<compile_context>
chip_gen: v7x
topology: tpu7x:2x2x1
jax: 0.10.0
libtpu: 0.0.40
codegen_flags: <defaults>
</compile_context>

<pallas_src>
import jax
import jax.numpy as jnp
from jax.experimental import pallas as pl
from jax.experimental.pallas import tpu as pltpu

# ----------------------------- configuration ---------------------------------
BS = 2             # batch size
C_IN = 4           # n_vars (channels)
CONTEXT = 32       # context_window
TARGET = 16        # target_window
PATCH_LEN = 8
STRIDE = 4
PATCH_NUM = (CONTEXT - PATCH_LEN) // STRIDE + 1       # 7   (padding_patch=None)
D_MODEL = 32
N_HEADS = 8        # pis is consumed 8-per-layer in the reference code -> n_heads = 8
D_K = D_MODEL // N_HEADS                              # 4
D_V = D_K
D_FF = 64
N_LAYERS = 2
NF = D_MODEL * PATCH_NUM                              # head_nf = 224
EPS_REVIN = 1e-5
EPS_BN = 1e-5
SCALE = float(D_K) ** -0.5                            # _ScaledDotProductAttention (lsa=False)

B_ITEMS = BS * C_IN                # 8  (== sublane tile) items stacked on sublanes
N_ROWS = PATCH_NUM * B_ITEMS       # 56 encoder rows; row = patch * B_ITEMS + item
NEG_MASK = -1e30                   # additive mask for cross-item attention entries

# ---------------- packed-slab row offsets (all multiples of 8) ----------------
# m32 slab (last dim = D_MODEL)
RWM_OFF = 0                                   # rev_w per item, cols >= PATCH_LEN zeroed
RBM_OFF = RWM_OFF + B_ITEMS                   # 8
WP_OFF = RBM_OFF + B_ITEMS                    # 16  (W_P padded to 32 rows)
SRCADD_OFF = WP_OFF + D_MODEL                 # 48  (b_P + W_pos per row)
BN_OFF = SRCADD_OFF + N_ROWS                  # 104 (per layer: bn1s, bn1b', bn2s, bn2b', pad)
BN_BLOCK = 8
W2_OFF = BN_OFF + N_LAYERS * BN_BLOCK         # 120
M32_ROWS = W2_OFF + N_LAYERS * D_FF           # 248

# m64 slab (last dim = D_FF): per layer w1 (32 rows) + b1 row + pad
M64_BLOCK = D_MODEL + 8                       # 40
M64_ROWS = N_LAYERS * M64_BLOCK               # 80

# head slab (last dim = TARGET)
WH_OFF = 0
DRB_OFF = PATCH_NUM * D_MODEL                 # 224  (rev_b - bh, per item, bcast to TARGET)
DRINV_OFF = DRB_OFF + B_ITEMS                 # 232  (1/(rev_w+eps^2), bcast to TARGET)
HEAD_ROWS = DRINV_OFF + B_ITEMS               # 240

# xz slab: rows 0..7 raw series z2 [8,32]; rows 8..63 raw patches padded to 32 cols
XZ_ROWS = B_ITEMS + N_ROWS                    # 64


# ----------------------------- small helpers ----------------------------------
def _gelu_tanh(x):
    # tanh-form GELU: single EUP tanh + a few VPU ops.
    c = 0.7978845608028654  # sqrt(2/pi)
    return 0.5 * x * (1.0 + jnp.tanh(c * (x + 0.044715 * x * x * x)))


def _vmem_full(shape):
    zeros = (0,) * len(shape)
    return pl.BlockSpec(tuple(shape), lambda *_: zeros)


# ----------------------------- fused forward kernel ---------------------------
def fused_forward_kernel(xz_ref, m32_ref, m64_ref, qkvo_ref, qkvc_ref,
                         pis_ref, mask_ref, head_ref, y_ref):
    f32 = jnp.float32

    # ---------------- RevIN 'norm' stats (per (batch, var) row) ----------------
    z = xz_ref[0:B_ITEMS, :]                               # [8, 32]
    mean = jnp.mean(z, axis=-1, keepdims=True)             # [8, 1]
    var = jnp.mean((z - mean) ** 2, axis=-1, keepdims=True)
    std = jnp.sqrt(var + EPS_REVIN)
    inv_std = 1.0 / std

    # masked (first PATCH_LEN cols) per-item affine; padding cols stay exactly 0
    rwm = m32_ref[RWM_OFF:RWM_OFF + B_ITEMS, :]            # [8, 32]
    rbm = m32_ref[RBM_OFF:RBM_OFF + B_ITEMS, :]
    a_item = rwm * inv_std                                 # [8, 32]
    c_item = rbm - mean * a_item

    # host-unfolded raw patches, (patch, item) row order; RevIN applied via a
    # broadcast over the free [7, 8, 32] sublane-split view (no relayout work)
    xp3 = xz_ref[B_ITEMS:XZ_ROWS, :].reshape(PATCH_NUM, B_ITEMS, D_MODEL)
    xp = (xp3 * a_item[None] + c_item[None]).reshape(N_ROWS, D_MODEL)   # [56, 32]

    # channel-wise init similarity (same-item block-diag entries match the ref)
    sim = jnp.einsum('nk,mk->nm', xp, xp, preferred_element_type=f32)   # [56, 56]
    sim_b = sim[None, :, :]

    # ---------------- patch embedding + positional encoding (folded) ----------
    wp = m32_ref[WP_OFF:WP_OFF + D_MODEL, :]               # [32, 32] (rows >= 8 zero)
    src_add = m32_ref[SRCADD_OFF:SRCADD_OFF + N_ROWS, :]   # [56, 32] = b_P + W_pos per row
    src = jnp.dot(xp, wp, preferred_element_type=f32) + src_add

    mask_b = mask_ref[...][None, :, :]                     # 0 same-item, -1e30 otherwise

    # ---------------- TST encoder (residual attention across layers) -----------
    prev = None
    for l in range(N_LAYERS):
        wq = qkvo_ref[l, 0]                                # [8, 4, 32] (pre-scaled by SCALE)
        wk = qkvo_ref[l, 1]
        wv = qkvo_ref[l, 2]
        wo = qkvo_ref[l, 3]
        qc = qkvc_ref[l, 0]                                # [8, 4, 56] = W*(pi*W_pos) + bias
        kc = qkvc_ref[l, 1]
        vc = qkvc_ref[l, 2]

        # per-head projections straight from the 2-D activation (no broadcasts)
        qh = jnp.einsum('hkd,nd->hkn', wq, src, preferred_element_type=f32) + qc
        kh = jnp.einsum('hkd,nd->hkn', wk, src, preferred_element_type=f32) + kc
        vh = jnp.einsum('hkd,nd->hkn', wv, src, preferred_element_type=f32) + vc

        # scores = SCALE*(q k^T + pis*init_sim) (+ prev)    [8, 56, 56]
        s = jnp.einsum('hkn,hkm->hnm', qh, kh, preferred_element_type=f32)
        s = s + pis_ref[l] * sim_b
        if prev is not None:
            s = s + prev
        prev = s                                           # residual attention carry (pre-mask)

        # masked softmax over keys (cross-item entries -> exactly 0 weight)
        att = s + mask_b
        m = jnp.max(att, axis=-1, keepdims=True)
        e = jnp.exp(att - m)
        a = e * pl.reciprocal(jnp.sum(e, axis=-1, keepdims=True), approx=True)

        # attention output + head-combine + out projection (bias folded into BN1 shift)
        oh = jnp.einsum('hnm,hvm->hnv', a, vh, preferred_element_type=f32)   # [8, 56, 4]
        o3 = jnp.einsum('hnv,hvd->hnd', oh, wo, preferred_element_type=f32)  # [8, 56, 32]
        o = jnp.sum(o3, axis=0)                                              # [56, 32]

        bnb = m32_ref[BN_OFF + l * BN_BLOCK:BN_OFF + (l + 1) * BN_BLOCK, :]  # [8, 32]
        bn1s = bnb[0:1, :]
        bn1b = bnb[1:2, :]
        bn2s = bnb[2:3, :]
        bn2b = bnb[3:4, :]

        x = (src + o) * bn1s + bn1b                        # residual + BatchNorm (folded, + bo)

        w1 = m64_ref[l * M64_BLOCK:l * M64_BLOCK + D_MODEL, :]                      # [32, 64]
        b1 = m64_ref[l * M64_BLOCK + D_MODEL:l * M64_BLOCK + D_MODEL + 1, :]        # [1, 64]
        h1 = _gelu_tanh(jnp.dot(x, w1, preferred_element_type=f32) + b1)
        w2 = m32_ref[W2_OFF + l * D_FF:W2_OFF + (l + 1) * D_FF, :]                  # [64, 32]
        h2 = jnp.dot(h1, w2, preferred_element_type=f32)

        src = (x + h2) * bn2s + bn2b                       # residual + BatchNorm (folded, + b2)

    # ---------------- Flatten_Head: one batched contraction + reduce ----------
    src3 = src.reshape(PATCH_NUM, B_ITEMS, D_MODEL)        # free sublane-only split
    wh3 = head_ref[WH_OFF:WH_OFF + PATCH_NUM * D_MODEL, :].reshape(PATCH_NUM, D_MODEL, TARGET)
    yp = jnp.einsum('pbd,pdt->pbt', src3, wh3, preferred_element_type=f32)   # [7, 8, 16]
    yh = jnp.sum(yp, axis=0)                                                 # [8, 16]

    # ---------------- RevIN 'denorm' (head bias folded into drb) ---------------
    drb = head_ref[DRB_OFF:DRB_OFF + B_ITEMS, :]           # [8, 16]
    drinv = head_ref[DRINV_OFF:DRINV_OFF + B_ITEMS, :]     # [8, 16]
    y_ref[...] = (yh - drb) * drinv * std + mean


# ----------------------------- wrapper (single pallas_call) -------------------
def patchtst_forward(z, prep):
    bs, nvars, L = z.shape
    z2 = z.reshape(bs * nvars, L)                          # row = b*nvars + var

    # host-side unfold into (patch, item) row order, padded to D_MODEL columns
    patches = jnp.stack(
        [z2[:, p * STRIDE:p * STRIDE + PATCH_LEN] for p in range(PATCH_NUM)],
        axis=0).reshape(N_ROWS, PATCH_LEN)
    xp_raw = jnp.pad(patches, ((0, 0), (0, D_MODEL - PATCH_LEN)))
    xz = jnp.concatenate([z2, xp_raw], axis=0)             # [64, 32]

    inputs = [xz, prep['m32'], prep['m64'], prep['qkvo'], prep['qkvc'],
              prep['pis2'], prep['mask'], prep['head']]

    y = pl.pallas_call(
        fused_forward_kernel,
        out_shape=jax.ShapeDtypeStruct((bs * nvars, TARGET), jnp.float32),
        grid=(1,),
        in_specs=[_vmem_full(a.shape) for a in inputs],
        out_specs=_vmem_full((bs * nvars, TARGET)),
        compiler_params=pltpu.CompilerParams(dimension_semantics=("arbitrary",)),
    )(*inputs)
    return y.reshape(bs, nvars, TARGET)


# ------------------- host-side constant folding / slab packing ----------------
def prepare_params(p):
    f32 = jnp.float32

    rev_w_item = jnp.tile(p['rev_w'].reshape(1, C_IN), (BS, 1)).reshape(B_ITEMS, 1)
    rev_b_item = jnp.tile(p['rev_b'].reshape(1, C_IN), (BS, 1)).reshape(B_ITEMS, 1)
    colmask = (jnp.arange(D_MODEL) < PATCH_LEN).astype(f32).reshape(1, D_MODEL)
    rwm = rev_w_item * colmask
    rbm = rev_b_item * colmask

    wp_pad = jnp.zeros((D_MODEL, D_MODEL), f32).at[:PATCH_LEN, :].set(p['wp'])

    wpos_rep = jnp.repeat(p['wpos'], B_ITEMS, axis=0)      # row p*8+b -> W_pos[p]
    src_add = wpos_rep + p['bp'].reshape(1, D_MODEL)

    def bn_fold(bn):
        g, b, rm, rv = bn
        sc = g / jnp.sqrt(rv + EPS_BN)
        sh = b - rm * sc
        return sc.reshape(1, D_MODEL), sh.reshape(1, D_MODEL)

    bn_rows, w2_rows, m64_rows, qkvo_list, qkvc_list = [], [], [], [], []
    for l, lp in enumerate(p['layers']):
        bn1s, bn1b = bn_fold(lp['bn1'])
        bn2s, bn2b = bn_fold(lp['bn2'])
        bn1b = bn1b + lp['bo'].reshape(1, D_MODEL) * bn1s      # fold attn-out bias
        bn2b = bn2b + lp['bf2'].reshape(1, D_MODEL) * bn2s     # fold FF second bias
        bn_rows.append(jnp.concatenate(
            [bn1s, bn1b, bn2s, bn2b, jnp.zeros((BN_BLOCK - 4, D_MODEL), f32)], axis=0))
        w2_rows.append(lp['w2'])
        m64_rows.append(jnp.concatenate(
            [lp['w1'], lp['bf1'].reshape(1, D_FF),
             jnp.zeros((M64_BLOCK - D_MODEL - 1, D_FF), f32)], axis=0))

        # per-head split weights in 'hkd' orientation; SCALE folded into wq/bq
        wq = (SCALE * lp['wq']).T.reshape(N_HEADS, D_K, D_MODEL)
        wk = lp['wk'].T.reshape(N_HEADS, D_K, D_MODEL)
        wv = lp['wv'].T.reshape(N_HEADS, D_V, D_MODEL)
        wo = lp['wo'].reshape(N_HEADS, D_V, D_MODEL)
        qkvo_list.append(jnp.stack([wq, wk, wv, wo], axis=0))

        # fold pi[l,i]*W_pos through the projections + biases -> [8, 4, 56] constants
        pi = p['pi'][l * 3:(l + 1) * 3]
        bq = (SCALE * lp['bq']).reshape(N_HEADS, D_K, 1)
        bk = lp['bk'].reshape(N_HEADS, D_K, 1)
        bv = lp['bv'].reshape(N_HEADS, D_V, 1)
        qc = jnp.einsum('hkd,nd->hkn', wq, pi[0] * wpos_rep) + bq
        kc = jnp.einsum('hkd,nd->hkn', wk, pi[1] * wpos_rep) + bk
        vc = jnp.einsum('hkd,nd->hkn', wv, pi[2] * wpos_rep) + bv
        qkvc_list.append(jnp.stack([qc, kc, vc], axis=0))

    m32 = jnp.concatenate([rwm, rbm, wp_pad, src_add] + bn_rows + w2_rows, axis=0)
    assert m32.shape == (M32_ROWS, D_MODEL)
    m64 = jnp.concatenate(m64_rows, axis=0)
    assert m64.shape == (M64_ROWS, D_FF)
    qkvo = jnp.stack(qkvo_list, axis=0)                    # [L, 4, 8, 4, 32]
    qkvc = jnp.stack(qkvc_list, axis=0)                    # [L, 3, 8, 4, 56]
    pis2 = (SCALE * p['pis']).reshape(N_LAYERS, N_HEADS, 1, 1)

    item = jnp.arange(N_ROWS) % B_ITEMS
    mask = jnp.where(item[:, None] == item[None, :], 0.0, NEG_MASK).astype(f32)

    # head weight permuted from PyTorch flatten order (d*P + p) to (p*D + d)
    wh = (p['wh'].reshape(D_MODEL, PATCH_NUM, TARGET)
          .transpose(1, 0, 2).reshape(PATCH_NUM * D_MODEL, TARGET))
    drb = (jnp.broadcast_to(rev_b_item, (B_ITEMS, TARGET))
           - jnp.broadcast_to(p['bh'].reshape(1, TARGET), (B_ITEMS, TARGET)))
    drinv = jnp.broadcast_to(1.0 / (rev_w_item + EPS_REVIN * EPS_REVIN), (B_ITEMS, TARGET))
    head = jnp.concatenate([wh, drb, drinv], axis=0)
    assert head.shape == (HEAD_ROWS, TARGET)

    return {'m32': m32, 'm64': m64, 'qkvo': qkvo, 'qkvc': qkvc,
            'pis2': pis2, 'mask': mask, 'head': head}


# ----------------------------- deterministic params ---------------------------
def init_params(key):
    keys = jax.random.split(key, 128)
    it = iter(keys)

    def nrm(shape, scale):
        return (scale * jax.random.normal(next(it), shape)).astype(jnp.float32)

    def uni(shape, lo, hi):
        return jax.random.uniform(next(it), shape, minval=lo, maxval=hi).astype(jnp.float32)

    p = {}
    p['rev_w'] = (1.0 + 0.1 * jax.random.normal(next(it), (C_IN,))).astype(jnp.float32)
    p['rev_b'] = nrm((C_IN,), 0.05)
    p['wp'] = nrm((PATCH_LEN, D_MODEL), PATCH_LEN ** -0.5)
    p['bp'] = nrm((D_MODEL,), 0.02)
    p['wpos'] = uni((PATCH_NUM, D_MODEL), -0.02, 0.02)       # positional_encoding('zeros')
    p['pi'] = nrm((N_LAYERS * 3,), 0.1)
    p['pis'] = nrm((N_LAYERS * N_HEADS,), 0.1)

    layers = []
    for _ in range(N_LAYERS):
        lp = {}
        for name in ('wq', 'wk', 'wv', 'wo'):
            lp[name] = nrm((D_MODEL, D_MODEL), D_MODEL ** -0.5)
        for name in ('bq', 'bk', 'bv', 'bo'):
            lp[name] = nrm((1, D_MODEL), 0.02)
        for bn in ('bn1', 'bn2'):
            g = (1.0 + 0.1 * jax.random.normal(next(it), (D_MODEL,))).astype(jnp.float32)
            b = nrm((D_MODEL,), 0.05)
            rm = nrm((D_MODEL,), 0.05)
            rv = (1.0 + uni((D_MODEL,), 0.0, 0.1)).astype(jnp.float32)
            lp[bn] = jnp.stack([g, b, rm, rv], axis=0)
        lp['w1'] = nrm((D_MODEL, D_FF), D_MODEL ** -0.5)
        lp['bf1'] = nrm((1, D_FF), 0.02)
        lp['w2'] = nrm((D_FF, D_MODEL), D_FF ** -0.5)
        lp['bf2'] = nrm((1, D_MODEL), 0.02)
        layers.append(lp)
    p['layers'] = layers

    p['wh'] = nrm((NF, TARGET), NF ** -0.5)
    p['bh'] = nrm((1, TARGET), 0.02)
    return p


# -------------------- pure-JAX reference (mirrors the PyTorch module) ---------
def reference_forward(z, p):
    bs, nv, L = z.shape
    mean = jnp.mean(z, axis=-1, keepdims=True)
    std = jnp.sqrt(jnp.var(z, axis=-1, keepdims=True) + EPS_REVIN)
    zn = (z - mean) / std
    zn = zn * p['rev_w'].reshape(1, nv, 1) + p['rev_b'].reshape(1, nv, 1)

    patches = jnp.stack([zn[..., i * STRIDE:i * STRIDE + PATCH_LEN]
                         for i in range(PATCH_NUM)], axis=2)              # [bs,nv,P,plen]
    x = patches.reshape(bs * nv, PATCH_NUM, PATCH_LEN)
    sim = jnp.einsum('bpl,bql->bpq', x, x)
    src = jnp.einsum('bpl,ld->bpd', x, p['wp']) + p['bp'] + p['wpos'][None]

    scores_prev = None
    for l, lp in enumerate(p['layers']):
        pi = p['pi'][l * 3:(l + 1) * 3]
        pis = p['pis'][l * N_HEADS:(l + 1) * N_HEADS]
        pe = p['wpos'][None]
        Q = src + pi[0] * pe
        K = src + pi[1] * pe
        V = src + pi[2] * pe
        q = (Q @ lp['wq'] + lp['bq']).reshape(bs * nv, PATCH_NUM, N_HEADS, D_K).transpose(0, 2, 1, 3)
        k = (K @ lp['wk'] + lp['bk']).reshape(bs * nv, PATCH_NUM, N_HEADS, D_K).transpose(0, 2, 1, 3)
        v = (V @ lp['wv'] + lp['bv']).reshape(bs * nv, PATCH_NUM, N_HEADS, D_V).transpose(0, 2, 1, 3)
        s = jnp.einsum('bhpk,bhqk->bhpq', q, k)
        s = (s + pis.reshape(1, N_HEADS, 1, 1) * sim[:, None]) * SCALE
        if scores_prev is not None:
            s = s + scores_prev
        scores_prev = s
        a = jax.nn.softmax(s, axis=-1)
        o = jnp.einsum('bhpq,bhqv->bhpv', a, v)
        o = o.transpose(0, 2, 1, 3).reshape(bs * nv, PATCH_NUM, N_HEADS * D_V)
        o = o @ lp['wo'] + lp['bo']
        x1 = src + o
        g, b, rm, rv = lp['bn1']
        x1 = (x1 - rm) / jnp.sqrt(rv + EPS_BN) * g + b
        h = _gelu_tanh(x1 @ lp['w1'] + lp['bf1'])
        h = h @ lp['w2'] + lp['bf2']
        y1 = x1 + h
        g2, b2, rm2, rv2 = lp['bn2']
        src = (y1 - rm2) / jnp.sqrt(rv2 + EPS_BN) * g2 + b2

    zf = src.transpose(0, 2, 1).reshape(bs * nv, NF)       # flatten order (d_model, patch)
    yh = (zf @ p['wh'] + p['bh']).reshape(bs, nv, TARGET)
    rw = p['rev_w'].reshape(1, nv, 1)
    rb = p['rev_b'].reshape(1, nv, 1)
    yh = (yh - rb) / (rw + EPS_REVIN * EPS_REVIN)
    yh = yh * std + mean
    return yh


# ----------------------------------- main -------------------------------------
if __name__ == "__main__":
    key = jax.random.PRNGKey(0)
    pkey, xkey = jax.random.split(key)
    params = init_params(pkey)
    prep = prepare_params(params)

    z = jax.random.normal(xkey, (BS, C_IN, CONTEXT), dtype=jnp.float32)

    y = jax.jit(patchtst_forward)(z, prep)
    y = jax.block_until_ready(y)

    assert y.shape == (BS, C_IN, TARGET), y.shape
    assert bool(jnp.all(jnp.isfinite(y)))

    # sanity-check the fused kernel against a pure-JAX re-implementation
    y_ref = reference_forward(z, params)
    assert bool(jnp.allclose(y, y_ref, rtol=5e-3, atol=5e-3)), float(jnp.max(jnp.abs(y - y_ref)))

    print("KERNEL_OK")
</pallas_src>

<mosaic_0001>
module attributes {stable_mosaic.version = 11 : i64} {
  func.func @fused_forward_kernel(%arg0: i32, %arg1: memref<64x32xf32, #tpu.memory_space<vmem>>, %arg2: memref<248x32xf32, #tpu.memory_space<vmem>>, %arg3: memref<80x64xf32, #tpu.memory_space<vmem>>, %arg4: memref<2x4x8x4x32xf32, #tpu.memory_space<vmem>>, %arg5: memref<2x3x8x4x56xf32, #tpu.memory_space<vmem>>, %arg6: memref<2x8x1x1xf32, #tpu.memory_space<vmem>>, %arg7: memref<56x56xf32, #tpu.memory_space<vmem>>, %arg8: memref<240x16xf32, #tpu.memory_space<vmem>>, %arg9: memref<8x16xf32, #tpu.memory_space<vmem>>) attributes {dimension_semantics = [#tpu.dimension_semantics<arbitrary>], iteration_bounds = array<i64: 1>, scalar_prefetch = 0 : i64, scratch_operands = 0 : i64, tpu.core_type = #tpu.core_type<tc>, window_params = [{pipeline_mode = #tpu.pipeline_mode<synchronous>, transform_indices = @transform_0, window_bounds = array<i64: 64, 32>}, {pipeline_mode = #tpu.pipeline_mode<synchronous>, transform_indices = @transform_1, window_bounds = array<i64: 248, 32>}, {pipeline_mode = #tpu.pipeline_mode<synchronous>, transform_indices = @transform_2, window_bounds = array<i64: 80, 64>}, {pipeline_mode = #tpu.pipeline_mode<synchronous>, transform_indices = @transform_3, window_bounds = array<i64: 2, 4, 8, 4, 32>}, {pipeline_mode = #tpu.pipeline_mode<synchronous>, transform_indices = @transform_4, window_bounds = array<i64: 2, 3, 8, 4, 56>}, {pipeline_mode = #tpu.pipeline_mode<synchronous>, transform_indices = @transform_5, window_bounds = array<i64: 2, 8, 1, 1>}, {pipeline_mode = #tpu.pipeline_mode<synchronous>, transform_indices = @transform_6, window_bounds = array<i64: 56, 56>}, {pipeline_mode = #tpu.pipeline_mode<synchronous>, transform_indices = @transform_7, window_bounds = array<i64: 240, 16>}, {pipeline_mode = #tpu.pipeline_mode<synchronous>, transform_indices = @transform_8, window_bounds = array<i64: 8, 16>}]} {
    %c0 = arith.constant 0 : index
    %c0_0 = arith.constant 0 : index
    %0 = vector.load %arg1[%c0, %c0_0] : memref<64x32xf32, #tpu.memory_space<vmem>>, vector<8x32xf32>
    %cst = arith.constant dense<0.000000e+00> : vector<8xf32>
    %1 = vector.multi_reduction <add>, %0, %cst [1] : vector<8x32xf32> to vector<8xf32>
    %2 = vector.shape_cast %1 : vector<8xf32> to vector<8x1xf32>
    %cst_1 = arith.constant 3.200000e+01 : f32
    %3 = vector.broadcast %cst_1 : f32 to vector<8x1xf32>
    %4 = arith.divf %2, %3 : vector<8x1xf32>
    %5 = vector.broadcast %4 : vector<8x1xf32> to vector<8x32xf32>
    %6 = arith.subf %0, %5 : vector<8x32xf32>
    %7 = arith.mulf %6, %6 : vector<8x32xf32>
    %cst_2 = arith.constant dense<0.000000e+00> : vector<8xf32>
    %8 = vector.multi_reduction <add>, %7, %cst_2 [1] : vector<8x32xf32> to vector<8xf32>
    %9 = vector.shape_cast %8 : vector<8xf32> to vector<8x1xf32>
    %cst_3 = arith.constant 3.200000e+01 : f32
    %10 = vector.broadcast %cst_3 : f32 to vector<8x1xf32>
    %11 = arith.divf %9, %10 : vector<8x1xf32>
    %cst_4 = arith.constant 9.99999974E-6 : f32
    %12 = vector.broadcast %cst_4 : f32 to vector<8x1xf32>
    %13 = arith.addf %11, %12 : vector<8x1xf32>
    %14 = math.sqrt %13 : vector<8x1xf32>
    %cst_5 = arith.constant 1.000000e+00 : f32
    %15 = vector.broadcast %cst_5 : f32 to vector<8x1xf32>
    %16 = arith.divf %15, %14 : vector<8x1xf32>
    %c0_6 = arith.constant 0 : index
    %c0_7 = arith.constant 0 : index
    %17 = vector.load %arg2[%c0_6, %c0_7] : memref<248x32xf32, #tpu.memory_space<vmem>>, vector<8x32xf32>
    %c8 = arith.constant 8 : index
    %c0_8 = arith.constant 0 : index
    %18 = vector.load %arg2[%c8, %c0_8] : memref<248x32xf32, #tpu.memory_space<vmem>>, vector<8x32xf32>
    %19 = vector.broadcast %16 : vector<8x1xf32> to vector<8x32xf32>
    %20 = arith.mulf %17, %19 : vector<8x32xf32>
    %21 = vector.broadcast %4 : vector<8x1xf32> to vector<8x32xf32>
    %22 = arith.mulf %21, %20 : vector<8x32xf32>
    %23 = arith.subf %18, %22 : vector<8x32xf32>
    %c8_9 = arith.constant 8 : index
    %c0_10 = arith.constant 0 : index
    %24 = vector.load %arg1[%c8_9, %c0_10] : memref<64x32xf32, #tpu.memory_space<vmem>>, vector<56x32xf32>
    %25 = vector.shape_cast %24 : vector<56x32xf32> to vector<7x8x32xf32>
    %26 = vector.shape_cast %20 : vector<8x32xf32> to vector<1x8x32xf32>
    %27 = vector.broadcast %26 : vector<1x8x32xf32> to vector<7x8x32xf32>
    %28 = arith.mulf %25, %27 : vector<7x8x32xf32>
    %29 = vector.shape_cast %23 : vector<8x32xf32> to vector<1x8x32xf32>
    %30 = vector.broadcast %29 : vector<1x8x32xf32> to vector<7x8x32xf32>
    %31 = arith.addf %28, %30 : vector<7x8x32xf32>
    %32 = vector.shape_cast %31 : vector<7x8x32xf32> to vector<56x32xf32>
    "tpu.trace_start"() <{level = 10 : i32, message = "nk,mk->nm"}> : () -> ()
    %cst_11 = arith.constant dense<0.000000e+00> : vector<56x56xf32>
    %33 = tpu.matmul %32, %32, %cst_11 {dimension_numbers = #tpu.dot_dimension_numbers<[1], [1], [0], [0], [0, 0, 1, 0], [], []>} : vector<56x32xf32>, vector<56x32xf32>, vector<56x56xf32> -> vector<56x56xf32>
    "tpu.trace_stop"() : () -> ()
    %34 = vector.shape_cast %33 : vector<56x56xf32> to vector<1x56x56xf32>
    %c16 = arith.constant 16 : index
    %c0_12 = arith.constant 0 : index
    %35 = vector.load %arg2[%c16, %c0_12] : memref<248x32xf32, #tpu.memory_space<vmem>>, vector<32x32xf32>
    %c48 = arith.constant 48 : index
    %c0_13 = arith.constant 0 : index
    %36 = vector.load %arg2[%c48, %c0_13] : memref<248x32xf32, #tpu.memory_space<vmem>>, vector<56x32xf32>
    %cst_14 = arith.constant dense<0.000000e+00> : vector<56x32xf32>
    %37 = tpu.matmul %32, %35, %cst_14 {dimension_numbers = #tpu.dot_dimension_numbers<[1], [0], [0], [1], [0, 0, 1, 1], [], []>} : vector<56x32xf32>, vector<32x32xf32>, vector<56x32xf32> -> vector<56x32xf32>
    %38 = arith.addf %37, %36 : vector<56x32xf32>
    %c0_15 = arith.constant 0 : index
    %c0_16 = arith.constant 0 : index
    %39 = vector.load %arg7[%c0_15, %c0_16] : memref<56x56xf32, #tpu.memory_space<vmem>>, vector<56x56xf32>
    %40 = vector.shape_cast %39 : vector<56x56xf32> to vector<1x56x56xf32>
    %c0_17 = arith.constant 0 : index
    %c0_18 = arith.constant 0 : index
    %c0_19 = arith.constant 0 : index
    %c0_20 = arith.constant 0 : index
    %c0_21 = arith.constant 0 : index
    %41 = vector.load %arg4[%c0_17, %c0_18, %c0_19, %c0_20, %c0_21] : memref<2x4x8x4x32xf32, #tpu.memory_space<vmem>>, vector<1x1x8x4x32xf32>
    %42 = vector.shape_cast %41 : vector<1x1x8x4x32xf32> to vector<8x4x32xf32>
    %c0_22 = arith.constant 0 : index
    %c1 = arith.constant 1 : index
    %c0_23 = arith.constant 0 : index
    %c0_24 = arith.constant 0 : index
    %c0_25 = arith.constant 0 : index
    %43 = vector.load %arg4[%c0_22, %c1, %c0_23, %c0_24, %c0_25] : memref<2x4x8x4x32xf32, #tpu.memory_space<vmem>>, vector<1x1x8x4x32xf32>
    %44 = vector.shape_cast %43 : vector<1x1x8x4x32xf32> to vector<8x4x32xf32>
    %c0_26 = arith.constant 0 : index
    %c2 = arith.constant 2 : index
    %c0_27 = arith.constant 0 : index
    %c0_28 = arith.constant 0 : index
    %c0_29 = arith.constant 0 : index
    %45 = vector.load %arg4[%c0_26, %c2, %c0_27, %c0_28, %c0_29] : memref<2x4x8x4x32xf32, #tpu.memory_space<vmem>>, vector<1x1x8x4x32xf32>
    %46 = vector.shape_cast %45 : vector<1x1x8x4x32xf32> to vector<8x4x32xf32>
    %c0_30 = arith.constant 0 : index
    %c3 = arith.constant 3 : index
    %c0_31 = arith.constant 0 : index
    %c0_32 = arith.constant 0 : index
    %c0_33 = arith.constant 0 : index
    %47 = vector.load %arg4[%c0_30, %c3, %c0_31, %c0_32, %c0_33] : memref<2x4x8x4x32xf32, #tpu.memory_space<vmem>>, vector<1x1x8x4x32xf32>
    %48 = vector.shape_cast %47 : vector<1x1x8x4x32xf32> to vector<8x4x32xf32>
    %c0_34 = arith.constant 0 : index
    %c0_35 = arith.constant 0 : index
    %c0_36 = arith.constant 0 : index
    %c0_37 = arith.constant 0 : index
    %c0_38 = arith.constant 0 : index
    %49 = vector.load %arg5[%c0_34, %c0_35, %c0_36, %c0_37, %c0_38] : memref<2x3x8x4x56xf32, #tpu.memory_space<vmem>>, vector<1x1x8x4x56xf32>
    %50 = vector.shape_cast %49 : vector<1x1x8x4x56xf32> to vector<8x4x56xf32>
    %c0_39 = arith.constant 0 : index
    %c1_40 = arith.constant 1 : index
    %c0_41 = arith.constant 0 : index
    %c0_42 = arith.constant 0 : index
    %c0_43 = arith.constant 0 : index
    %51 = vector.load %arg5[%c0_39, %c1_40, %c0_41, %c0_42, %c0_43] : memref<2x3x8x4x56xf32, #tpu.memory_space<vmem>>, vector<1x1x8x4x56xf32>
    %52 = vector.shape_cast %51 : vector<1x1x8x4x56xf32> to vector<8x4x56xf32>
    %c0_44 = arith.constant 0 : index
    %c2_45 = arith.constant 2 : index
    %c0_46 = arith.constant 0 : index
    %c0_47 = arith.constant 0 : index
    %c0_48 = arith.constant 0 : index
    %53 = vector.load %arg5[%c0_44, %c2_45, %c0_46, %c0_47, %c0_48] : memref<2x3x8x4x56xf32, #tpu.memory_space<vmem>>, vector<1x1x8x4x56xf32>
    %54 = vector.shape_cast %53 : vector<1x1x8x4x56xf32> to vector<8x4x56xf32>
    "tpu.trace_start"() <{level = 10 : i32, message = "hkd,nd->hkn"}> : () -> ()
    %cst_49 = arith.constant dense<0.000000e+00> : vector<8x4x56xf32>
    %55 = tpu.matmul %42, %38, %cst_49 {dimension_numbers = #tpu.dot_dimension_numbers<[2], [1], [0, 1], [0], [0, 0, 0, 1, 1, 0], [], []>} : vector<8x4x32xf32>, vector<56x32xf32>, vector<8x4x56xf32> -> vector<8x4x56xf32>
    "tpu.trace_stop"() : () -> ()
    %56 = arith.addf %55, %50 : vector<8x4x56xf32>
    "tpu.trace_start"() <{level = 10 : i32, message = "hkd,nd->hkn"}> : () -> ()
    %cst_50 = arith.constant dense<0.000000e+00> : vector<8x4x56xf32>
    %57 = tpu.matmul %44, %38, %cst_50 {dimension_numbers = #tpu.dot_dimension_numbers<[2], [1], [0, 1], [0], [0, 0, 0, 1, 1, 0], [], []>} : vector<8x4x32xf32>, vector<56x32xf32>, vector<8x4x56xf32> -> vector<8x4x56xf32>
    "tpu.trace_stop"() : () -> ()
    %58 = arith.addf %57, %52 : vector<8x4x56xf32>
    "tpu.trace_start"() <{level = 10 : i32, message = "hkd,nd->hkn"}> : () -> ()
    %cst_51 = arith.constant dense<0.000000e+00> : vector<8x4x56xf32>
    %59 = tpu.matmul %46, %38, %cst_51 {dimension_numbers = #tpu.dot_dimension_numbers<[2], [1], [0, 1], [0], [0, 0, 0, 1, 1, 0], [], []>} : vector<8x4x32xf32>, vector<56x32xf32>, vector<8x4x56xf32> -> vector<8x4x56xf32>
    "tpu.trace_stop"() : () -> ()
    %60 = arith.addf %59, %54 : vector<8x4x56xf32>
    "tpu.trace_start"() <{level = 10 : i32, message = "hkn,hkm->hnm"}> : () -> ()
    %cst_52 = arith.constant dense<0.000000e+00> : vector<8x56x56xf32>
    %61 = tpu.matmul %56, %58, %cst_52 {dimension_numbers = #tpu.dot_dimension_numbers<[1], [1], [2], [2], [0, 0, 0, 2, 1, 2], [0], [0]>} : vector<8x4x56xf32>, vector<8x4x56xf32>, vector<8x56x56xf32> -> vector<8x56x56xf32>
    "tpu.trace_stop"() : () -> ()
    %c0_53 = arith.constant 0 : index
    %c0_54 = arith.constant 0 : index
    %c0_55 = arith.constant 0 : index
    %c0_56 = arith.constant 0 : index
    %62 = vector.load %arg6[%c0_53, %c0_54, %c0_55, %c0_56] : memref<2x8x1x1xf32, #tpu.memory_space<vmem>>, vector<1x8x1x1xf32>
    %63 = vector.shape_cast %62 : vector<1x8x1x1xf32> to vector<8x1x1xf32>
    %64 = vector.broadcast %63 : vector<8x1x1xf32> to vector<8x56x56xf32>
    %65 = vector.broadcast %34 : vector<1x56x56xf32> to vector<8x56x56xf32>
    %66 = arith.mulf %64, %65 : vector<8x56x56xf32>
    %67 = arith.addf %61, %66 : vector<8x56x56xf32>
    %68 = vector.broadcast %40 : vector<1x56x56xf32> to vector<8x56x56xf32>
    %69 = arith.addf %67, %68 : vector<8x56x56xf32>
    %cst_57 = arith.constant dense<0xFF800000> : vector<8x56xf32>
    %70 = vector.multi_reduction <maximumf>, %69, %cst_57 [2] : vector<8x56x56xf32> to vector<8x56xf32>
    %71 = vector.shape_cast %70 : vector<8x56xf32> to vector<8x56x1xf32>
    %72 = vector.broadcast %71 : vector<8x56x1xf32> to vector<8x56x56xf32>
    %73 = arith.subf %69, %72 : vector<8x56x56xf32>
    %74 = math.exp %73 : vector<8x56x56xf32>
    %cst_58 = arith.constant dense<0.000000e+00> : vector<8x56xf32>
    %75 = vector.multi_reduction <add>, %74, %cst_58 [2] : vector<8x56x56xf32> to vector<8x56xf32>
    %76 = vector.shape_cast %75 : vector<8x56xf32> to vector<8x56x1xf32>
    %77 = tpu.reciprocal %76 {approx = true} : vector<8x56x1xf32> -> vector<8x56x1xf32>
    %78 = vector.broadcast %77 : vector<8x56x1xf32> to vector<8x56x56xf32>
    %79 = arith.mulf %74, %78 : vector<8x56x56xf32>
    "tpu.trace_start"() <{level = 10 : i32, message = "hnm,hvm->hnv"}> : () -> ()
    %cst_59 = arith.constant dense<0.000000e+00> : vector<8x56x4xf32>
    %80 = tpu.matmul %79, %60, %cst_59 {dimension_numbers = #tpu.dot_dimension_numbers<[2], [2], [1], [1], [0, 0, 0, 1, 1, 1], [0], [0]>} : vector<8x56x56xf32>, vector<8x4x56xf32>, vector<8x56x4xf32> -> vector<8x56x4xf32>
    "tpu.trace_stop"() : () -> ()
    "tpu.trace_start"() <{level = 10 : i32, message = "hnv,hvd->hnd"}> : () -> ()
    %cst_60 = arith.constant dense<0.000000e+00> : vector<8x56x32xf32>
    %81 = tpu.matmul %80, %48, %cst_60 {dimension_numbers = #tpu.dot_dimension_numbers<[2], [1], [1], [2], [0, 0, 0, 1, 1, 2], [0], [0]>} : vector<8x56x4xf32>, vector<8x4x32xf32>, vector<8x56x32xf32> -> vector<8x56x32xf32>
    "tpu.trace_stop"() : () -> ()
    %cst_61 = arith.constant dense<0.000000e+00> : vector<56x32xf32>
    %82 = vector.multi_reduction <add>, %81, %cst_61 [0] : vector<8x56x32xf32> to vector<56x32xf32>
    %c104 = arith.constant 104 : index
    %c0_62 = arith.constant 0 : index
    %83 = vector.load %arg2[%c104, %c0_62] : memref<248x32xf32, #tpu.memory_space<vmem>>, vector<8x32xf32>
    %84 = vector.extract_strided_slice %83 {offsets = [0, 0], sizes = [1, 32], strides = [1, 1]} : vector<8x32xf32> to vector<1x32xf32>
    %85 = vector.extract_strided_slice %83 {offsets = [1, 0], sizes = [1, 32], strides = [1, 1]} : vector<8x32xf32> to vector<1x32xf32>
    %86 = vector.extract_strided_slice %83 {offsets = [2, 0], sizes = [1, 32], strides = [1, 1]} : vector<8x32xf32> to vector<1x32xf32>
    %87 = vector.extract_strided_slice %83 {offsets = [3, 0], sizes = [1, 32], strides = [1, 1]} : vector<8x32xf32> to vector<1x32xf32>
    %88 = arith.addf %38, %82 : vector<56x32xf32>
    %89 = vector.broadcast %84 : vector<1x32xf32> to vector<56x32xf32>
    %90 = arith.mulf %88, %89 : vector<56x32xf32>
    %91 = vector.broadcast %85 : vector<1x32xf32> to vector<56x32xf32>
    %92 = arith.addf %90, %91 : vector<56x32xf32>
    %c0_63 = arith.constant 0 : index
    %c0_64 = arith.constant 0 : index
    %93 = vector.load %arg3[%c0_63, %c0_64] : memref<80x64xf32, #tpu.memory_space<vmem>>, vector<32x64xf32>
    %c32 = arith.constant 32 : index
    %c0_65 = arith.constant 0 : index
    %94 = vector.load %arg3[%c32, %c0_65] : memref<80x64xf32, #tpu.memory_space<vmem>>, vector<1x64xf32>
    %cst_66 = arith.constant dense<0.000000e+00> : vector<56x64xf32>
    %95 = tpu.matmul %92, %93, %cst_66 {dimension_numbers = #tpu.dot_dimension_numbers<[1], [0], [0], [1], [0, 0, 1, 1], [], []>} : vector<56x32xf32>, vector<32x64xf32>, vector<56x64xf32> -> vector<56x64xf32>
    %96 = vector.broadcast %94 : vector<1x64xf32> to vector<56x64xf32>
    %97 = arith.addf %95, %96 : vector<56x64xf32>
    %cst_67 = arith.constant 5.000000e-01 : f32
    %98 = vector.broadcast %cst_67 : f32 to vector<56x64xf32>
    %99 = arith.mulf %98, %97 : vector<56x64xf32>
    %cst_68 = arith.constant 4.471500e-02 : f32
    %100 = vector.broadcast %cst_68 : f32 to vector<56x64xf32>
    %101 = arith.mulf %100, %97 : vector<56x64xf32>
    %102 = arith.mulf %101, %97 : vector<56x64xf32>
    %103 = arith.mulf %102, %97 : vector<56x64xf32>
    %104 = arith.addf %97, %103 : vector<56x64xf32>
    %cst_69 = arith.constant 0.797884583 : f32
    %105 = vector.broadcast %cst_69 : f32 to vector<56x64xf32>
    %106 = arith.mulf %105, %104 : vector<56x64xf32>
    %107 = math.tanh %106 : vector<56x64xf32>
    %cst_70 = arith.constant 1.000000e+00 : f32
    %108 = vector.broadcast %cst_70 : f32 to vector<56x64xf32>
    %109 = arith.addf %108, %107 : vector<56x64xf32>
    %110 = arith.mulf %99, %109 : vector<56x64xf32>
    %c120 = arith.constant 120 : index
    %c0_71 = arith.constant 0 : index
    %111 = vector.load %arg2[%c120, %c0_71] : memref<248x32xf32, #tpu.memory_space<vmem>>, vector<64x32xf32>
    %cst_72 = arith.constant dense<0.000000e+00> : vector<56x32xf32>
    %112 = tpu.matmul %110, %111, %cst_72 {dimension_numbers = #tpu.dot_dimension_numbers<[1], [0], [0], [1], [0, 0, 1, 1], [], []>} : vector<56x64xf32>, vector<64x32xf32>, vector<56x32xf32> -> vector<56x32xf32>
    %113 = arith.addf %92, %112 : vector<56x32xf32>
    %114 = vector.broadcast %86 : vector<1x32xf32> to vector<56x32xf32>
    %115 = arith.mulf %113, %114 : vector<56x32xf32>
    %116 = vector.broadcast %87 : vector<1x32xf32> to vector<56x32xf32>
    %117 = arith.addf %115, %116 : vector<56x32xf32>
    %c1_73 = arith.constant 1 : index
    %c0_74 = arith.constant 0 : index
    %c0_75 = arith.constant 0 : index
    %c0_76 = arith.constant 0 : index
    %c0_77 = arith.constant 0 : index
    %118 = vector.load %arg4[%c1_73, %c0_74, %c0_75, %c0_76, %c0_77] : memref<2x4x8x4x32xf32, #tpu.memory_space<vmem>>, vector<1x1x8x4x32xf32>
    %119 = vector.shape_cast %118 : vector<1x1x8x4x32xf32> to vector<8x4x32xf32>
    %c1_78 = arith.constant 1 : index
    %c1_79 = arith.constant 1 : index
    %c0_80 = arith.constant 0 : index
    %c0_81 = arith.constant 0 : index
    %c0_82 = arith.constant 0 : index
    %120 = vector.load %arg4[%c1_78, %c1_79, %c0_80, %c0_81, %c0_82] : memref<2x4x8x4x32xf32, #tpu.memory_space<vmem>>, vector<1x1x8x4x32xf32>
    %121 = vector.shape_cast %120 : vector<1x1x8x4x32xf32> to vector<8x4x32xf32>
    %c1_83 = arith.constant 1 : index
    %c2_84 = arith.constant 2 : index
    %c0_85 = arith.constant 0 : index
    %c0_86 = arith.constant 0 : index
    %c0_87 = arith.constant 0 : index
    %122 = vector.load %arg4[%c1_83, %c2_84, %c0_85, %c0_86, %c0_87] : memref<2x4x8x4x32xf32, #tpu.memory_space<vmem>>, vector<1x1x8x4x32xf32>
    %123 = vector.shape_cast %122 : vector<1x1x8x4x32xf32> to vector<8x4x32xf32>
    %c1_88 = arith.constant 1 : index
    %c3_89 = arith.constant 3 : index
    %c0_90 = arith.constant 0 : index
    %c0_91 = arith.constant 0 : index
    %c0_92 = arith.constant 0 : index
    %124 = vector.load %arg4[%c1_88, %c3_89, %c0_90, %c0_91, %c0_92] : memref<2x4x8x4x32xf32, #tpu.memory_space<vmem>>, vector<1x1x8x4x32xf32>
    %125 = vector.shape_cast %124 : vector<1x1x8x4x32xf32> to vector<8x4x32xf32>
    %c1_93 = arith.constant 1 : index
    %c0_94 = arith.constant 0 : index
    %c0_95 = arith.constant 0 : index
    %c0_96 = arith.constant 0 : index
    %c0_97 = arith.constant 0 : index
    %126 = vector.load %arg5[%c1_93, %c0_94, %c0_95, %c0_96, %c0_97] : memref<2x3x8x4x56xf32, #tpu.memory_space<vmem>>, vector<1x1x8x4x56xf32>
    %127 = vector.shape_cast %126 : vector<1x1x8x4x56xf32> to vector<8x4x56xf32>
    %c1_98 = arith.constant 1 : index
    %c1_99 = arith.constant 1 : index
    %c0_100 = arith.constant 0 : index
    %c0_101 = arith.constant 0 : index
    %c0_102 = arith.constant 0 : index
    %128 = vector.load %arg5[%c1_98, %c1_99, %c0_100, %c0_101, %c0_102] : memref<2x3x8x4x56xf32, #tpu.memory_space<vmem>>, vector<1x1x8x4x56xf32>
    %129 = vector.shape_cast %128 : vector<1x1x8x4x56xf32> to vector<8x4x56xf32>
    %c1_103 = arith.constant 1 : index
    %c2_104 = arith.constant 2 : index
    %c0_105 = arith.constant 0 : index
    %c0_106 = arith.constant 0 : index
    %c0_107 = arith.constant 0 : index
    %130 = vector.load %arg5[%c1_103, %c2_104, %c0_105, %c0_106, %c0_107] : memref<2x3x8x4x56xf32, #tpu.memory_space<vmem>>, vector<1x1x8x4x56xf32>
    %131 = vector.shape_cast %130 : vector<1x1x8x4x56xf32> to vector<8x4x56xf32>
    "tpu.trace_start"() <{level = 10 : i32, message = "hkd,nd->hkn"}> : () -> ()
    %cst_108 = arith.constant dense<0.000000e+00> : vector<8x4x56xf32>
    %132 = tpu.matmul %119, %117, %cst_108 {dimension_numbers = #tpu.dot_dimension_numbers<[2], [1], [0, 1], [0], [0, 0, 0, 1, 1, 0], [], []>} : vector<8x4x32xf32>, vector<56x32xf32>, vector<8x4x56xf32> -> vector<8x4x56xf32>
    "tpu.trace_stop"() : () -> ()
    %133 = arith.addf %132, %127 : vector<8x4x56xf32>
    "tpu.trace_start"() <{level = 10 : i32, message = "hkd,nd->hkn"}> : () -> ()
    %cst_109 = arith.constant dense<0.000000e+00> : vector<8x4x56xf32>
    %134 = tpu.matmul %121, %117, %cst_109 {dimension_numbers = #tpu.dot_dimension_numbers<[2], [1], [0, 1], [0], [0, 0, 0, 1, 1, 0], [], []>} : vector<8x4x32xf32>, vector<56x32xf32>, vector<8x4x56xf32> -> vector<8x4x56xf32>
    "tpu.trace_stop"() : () -> ()
    %135 = arith.addf %134, %129 : vector<8x4x56xf32>
    "tpu.trace_start"() <{level = 10 : i32, message = "hkd,nd->hkn"}> : () -> ()
    %cst_110 = arith.constant dense<0.000000e+00> : vector<8x4x56xf32>
    %136 = tpu.matmul %123, %117, %cst_110 {dimension_numbers = #tpu.dot_dimension_numbers<[2], [1], [0, 1], [0], [0, 0, 0, 1, 1, 0], [], []>} : vector<8x4x32xf32>, vector<56x32xf32>, vector<8x4x56xf32> -> vector<8x4x56xf32>
    "tpu.trace_stop"() : () -> ()
    %137 = arith.addf %136, %131 : vector<8x4x56xf32>
    "tpu.trace_start"() <{level = 10 : i32, message = "hkn,hkm->hnm"}> : () -> ()
    %cst_111 = arith.constant dense<0.000000e+00> : vector<8x56x56xf32>
    %138 = tpu.matmul %133, %135, %cst_111 {dimension_numbers = #tpu.dot_dimension_numbers<[1], [1], [2], [2], [0, 0, 0, 2, 1, 2], [0], [0]>} : vector<8x4x56xf32>, vector<8x4x56xf32>, vector<8x56x56xf32> -> vector<8x56x56xf32>
    "tpu.trace_stop"() : () -> ()
    %c1_112 = arith.constant 1 : index
    %c0_113 = arith.constant 0 : index
    %c0_114 = arith.constant 0 : index
    %c0_115 = arith.constant 0 : index
    %139 = vector.load %arg6[%c1_112, %c0_113, %c0_114, %c0_115] : memref<2x8x1x1xf32, #tpu.memory_space<vmem>>, vector<1x8x1x1xf32>
    %140 = vector.shape_cast %139 : vector<1x8x1x1xf32> to vector<8x1x1xf32>
    %141 = vector.broadcast %140 : vector<8x1x1xf32> to vector<8x56x56xf32>
    %142 = vector.broadcast %34 : vector<1x56x56xf32> to vector<8x56x56xf32>
    %143 = arith.mulf %141, %142 : vector<8x56x56xf32>
    %144 = arith.addf %138, %143 : vector<8x56x56xf32>
    %145 = arith.addf %144, %67 : vector<8x56x56xf32>
    %146 = vector.broadcast %40 : vector<1x56x56xf32> to vector<8x56x56xf32>
    %147 = arith.addf %145, %146 : vector<8x56x56xf32>
    %cst_116 = arith.constant dense<0xFF800000> : vector<8x56xf32>
    %148 = vector.multi_reduction <maximumf>, %147, %cst_116 [2] : vector<8x56x56xf32> to vector<8x56xf32>
    %149 = vector.shape_cast %148 : vector<8x56xf32> to vector<8x56x1xf32>
    %150 = vector.broadcast %149 : vector<8x56x1xf32> to vector<8x56x56xf32>
    %151 = arith.subf %147, %150 : vector<8x56x56xf32>
    %152 = math.exp %151 : vector<8x56x56xf32>
    %cst_117 = arith.constant dense<0.000000e+00> : vector<8x56xf32>
    %153 = vector.multi_reduction <add>, %152, %cst_117 [2] : vector<8x56x56xf32> to vector<8x56xf32>
    %154 = vector.shape_cast %153 : vector<8x56xf32> to vector<8x56x1xf32>
    %155 = tpu.reciprocal %154 {approx = true} : vector<8x56x1xf32> -> vector<8x56x1xf32>
    %156 = vector.broadcast %155 : vector<8x56x1xf32> to vector<8x56x56xf32>
    %157 = arith.mulf %152, %156 : vector<8x56x56xf32>
    "tpu.trace_start"() <{level = 10 : i32, message = "hnm,hvm->hnv"}> : () -> ()
    %cst_118 = arith.constant dense<0.000000e+00> : vector<8x56x4xf32>
    %158 = tpu.matmul %157, %137, %cst_118 {dimension_numbers = #tpu.dot_dimension_numbers<[2], [2], [1], [1], [0, 0, 0, 1, 1, 1], [0], [0]>} : vector<8x56x56xf32>, vector<8x4x56xf32>, vector<8x56x4xf32> -> vector<8x56x4xf32>
    "tpu.trace_stop"() : () -> ()
    "tpu.trace_start"() <{level = 10 : i32, message = "hnv,hvd->hnd"}> : () -> ()
    %cst_119 = arith.constant dense<0.000000e+00> : vector<8x56x32xf32>
    %159 = tpu.matmul %158, %125, %cst_119 {dimension_numbers = #tpu.dot_dimension_numbers<[2], [1], [1], [2], [0, 0, 0, 1, 1, 2], [0], [0]>} : vector<8x56x4xf32>, vector<8x4x32xf32>, vector<8x56x32xf32> -> vector<8x56x32xf32>
    "tpu.trace_stop"() : () -> ()
    %cst_120 = arith.constant dense<0.000000e+00> : vector<56x32xf32>
    %160 = vector.multi_reduction <add>, %159, %cst_120 [0] : vector<8x56x32xf32> to vector<56x32xf32>
    %c112 = arith.constant 112 : index
    %c0_121 = arith.constant 0 : index
    %161 = vector.load %arg2[%c112, %c0_121] : memref<248x32xf32, #tpu.memory_space<vmem>>, vector<8x32xf32>
    %162 = vector.extract_strided_slice %161 {offsets = [0, 0], sizes = [1, 32], strides = [1, 1]} : vector<8x32xf32> to vector<1x32xf32>
    %163 = vector.extract_strided_slice %161 {offsets = [1, 0], sizes = [1, 32], strides = [1, 1]} : vector<8x32xf32> to vector<1x32xf32>
    %164 = vector.extract_strided_slice %161 {offsets = [2, 0], sizes = [1, 32], strides = [1, 1]} : vector<8x32xf32> to vector<1x32xf32>
    %165 = vector.extract_strided_slice %161 {offsets = [3, 0], sizes = [1, 32], strides = [1, 1]} : vector<8x32xf32> to vector<1x32xf32>
    %166 = arith.addf %117, %160 : vector<56x32xf32>
    %167 = vector.broadcast %162 : vector<1x32xf32> to vector<56x32xf32>
    %168 = arith.mulf %166, %167 : vector<56x32xf32>
    %169 = vector.broadcast %163 : vector<1x32xf32> to vector<56x32xf32>
    %170 = arith.addf %168, %169 : vector<56x32xf32>
    %c40 = arith.constant 40 : index
    %c0_122 = arith.constant 0 : index
    %171 = vector.load %arg3[%c40, %c0_122] : memref<80x64xf32, #tpu.memory_space<vmem>>, vector<32x64xf32>
    %c72 = arith.constant 72 : index
    %c0_123 = arith.constant 0 : index
    %172 = vector.load %arg3[%c72, %c0_123] : memref<80x64xf32, #tpu.memory_space<vmem>>, vector<1x64xf32>
    %cst_124 = arith.constant dense<0.000000e+00> : vector<56x64xf32>
    %173 = tpu.matmul %170, %171, %cst_124 {dimension_numbers = #tpu.dot_dimension_numbers<[1], [0], [0], [1], [0, 0, 1, 1], [], []>} : vector<56x32xf32>, vector<32x64xf32>, vector<56x64xf32> -> vector<56x64xf32>
    %174 = vector.broadcast %172 : vector<1x64xf32> to vector<56x64xf32>
    %175 = arith.addf %173, %174 : vector<56x64xf32>
    %cst_125 = arith.constant 5.000000e-01 : f32
    %176 = vector.broadcast %cst_125 : f32 to vector<56x64xf32>
    %177 = arith.mulf %176, %175 : vector<56x64xf32>
    %cst_126 = arith.constant 4.471500e-02 : f32
    %178 = vector.broadcast %cst_126 : f32 to vector<56x64xf32>
    %179 = arith.mulf %178, %175 : vector<56x64xf32>
    %180 = arith.mulf %179, %175 : vector<56x64xf32>
    %181 = arith.mulf %180, %175 : vector<56x64xf32>
    %182 = arith.addf %175, %181 : vector<56x64xf32>
    %cst_127 = arith.constant 0.797884583 : f32
    %183 = vector.broadcast %cst_127 : f32 to vector<56x64xf32>
    %184 = arith.mulf %183, %182 : vector<56x64xf32>
    %185 = math.tanh %184 : vector<56x64xf32>
    %cst_128 = arith.constant 1.000000e+00 : f32
    %186 = vector.broadcast %cst_128 : f32 to vector<56x64xf32>
    %187 = arith.addf %186, %185 : vector<56x64xf32>
    %188 = arith.mulf %177, %187 : vector<56x64xf32>
    %c184 = arith.constant 184 : index
    %c0_129 = arith.constant 0 : index
    %189 = vector.load %arg2[%c184, %c0_129] : memref<248x32xf32, #tpu.memory_space<vmem>>, vector<64x32xf32>
    %cst_130 = arith.constant dense<0.000000e+00> : vector<56x32xf32>
    %190 = tpu.matmul %188, %189, %cst_130 {dimension_numbers = #tpu.dot_dimension_numbers<[1], [0], [0], [1], [0, 0, 1, 1], [], []>} : vector<56x64xf32>, vector<64x32xf32>, vector<56x32xf32> -> vector<56x32xf32>
    %191 = arith.addf %170, %190 : vector<56x32xf32>
    %192 = vector.broadcast %164 : vector<1x32xf32> to vector<56x32xf32>
    %193 = arith.mulf %191, %192 : vector<56x32xf32>
    %194 = vector.broadcast %165 : vector<1x32xf32> to vector<56x32xf32>
    %195 = arith.addf %193, %194 : vector<56x32xf32>
    %196 = vector.shape_cast %195 : vector<56x32xf32> to vector<7x8x32xf32>
    %c0_131 = arith.constant 0 : index
    %c0_132 = arith.constant 0 : index
    %197 = vector.load %arg8[%c0_131, %c0_132] : memref<240x16xf32, #tpu.memory_space<vmem>>, vector<224x16xf32>
    %198 = vector.shape_cast %197 : vector<224x16xf32> to vector<7x32x16xf32>
    "tpu.trace_start"() <{level = 10 : i32, message = "pbd,pdt->pbt"}> : () -> ()
    %cst_133 = arith.constant dense<0.000000e+00> : vector<7x8x16xf32>
    %199 = tpu.matmul %196, %198, %cst_133 {dimension_numbers = #tpu.dot_dimension_numbers<[2], [1], [1], [2], [0, 0, 0, 1, 1, 2], [0], [0]>} : vector<7x8x32xf32>, vector<7x32x16xf32>, vector<7x8x16xf32> -> vector<7x8x16xf32>
    "tpu.trace_stop"() : () -> ()
    %cst_134 = arith.constant dense<0.000000e+00> : vector<8x16xf32>
    %200 = vector.multi_reduction <add>, %199, %cst_134 [0] : vector<7x8x16xf32> to vector<8x16xf32>
    %c224 = arith.constant 224 : index
    %c0_135 = arith.constant 0 : index
    %201 = vector.load %arg8[%c224, %c0_135] : memref<240x16xf32, #tpu.memory_space<vmem>>, vector<8x16xf32>
    %c232 = arith.constant 232 : index
    %c0_136 = arith.constant 0 : index
    %202 = vector.load %arg8[%c232, %c0_136] : memref<240x16xf32, #tpu.memory_space<vmem>>, vector<8x16xf32>
    %203 = arith.subf %200, %201 : vector<8x16xf32>
    %204 = arith.mulf %203, %202 : vector<8x16xf32>
    %205 = vector.broadcast %14 : vector<8x1xf32> to vector<8x16xf32>
    %206 = arith.mulf %204, %205 : vector<8x16xf32>
    %207 = vector.broadcast %4 : vector<8x1xf32> to vector<8x16xf32>
    %208 = arith.addf %206, %207 : vector<8x16xf32>
    %c0_137 = arith.constant 0 : index
    %c0_138 = arith.constant 0 : index
    %209 = vector.load %arg9[%c0_137, %c0_138] : memref<8x16xf32, #tpu.memory_space<vmem>>, vector<8x16xf32>
    tpu.vector_store %arg9[%c0_137, %c0_138], %208 {strides = array<i32>} : memref<8x16xf32, #tpu.memory_space<vmem>>, vector<8x16xf32>,
    return
  }
  func.func @transform_0(%arg0: i32) -> (i32, i32) {
    %c0_i32 = arith.constant 0 : i32
    %c0_i32_0 = arith.constant 0 : i32
    %c0_i32_1 = arith.constant 0 : i32
    return %c0_i32, %c0_i32_0 : i32, i32
  }
  func.func @transform_1(%arg0: i32) -> (i32, i32) {
    %c0_i32 = arith.constant 0 : i32
    %c0_i32_0 = arith.constant 0 : i32
    %c0_i32_1 = arith.constant 0 : i32
    return %c0_i32, %c0_i32_0 : i32, i32
  }
  func.func @transform_2(%arg0: i32) -> (i32, i32) {
    %c0_i32 = arith.constant 0 : i32
    %c0_i32_0 = arith.constant 0 : i32
    %c0_i32_1 = arith.constant 0 : i32
    return %c0_i32, %c0_i32_0 : i32, i32
  }
  func.func @transform_3(%arg0: i32) -> (i32, i32, i32, i32, i32) {
    %c0_i32 = arith.constant 0 : i32
    %c0_i32_0 = arith.constant 0 : i32
    %c0_i32_1 = arith.constant 0 : i32
    %c0_i32_2 = arith.constant 0 : i32
    %c0_i32_3 = arith.constant 0 : i32
    %c0_i32_4 = arith.constant 0 : i32
    return %c0_i32, %c0_i32_0, %c0_i32_1, %c0_i32_2, %c0_i32_3 : i32, i32, i32, i32, i32
  }
  func.func @transform_4(%arg0: i32) -> (i32, i32, i32, i32, i32) {
    %c0_i32 = arith.constant 0 : i32
    %c0_i32_0 = arith.constant 0 : i32
    %c0_i32_1 = arith.constant 0 : i32
    %c0_i32_2 = arith.constant 0 : i32
    %c0_i32_3 = arith.constant 0 : i32
    %c0_i32_4 = arith.constant 0 : i32
    return %c0_i32, %c0_i32_0, %c0_i32_1, %c0_i32_2, %c0_i32_3 : i32, i32, i32, i32, i32
  }
  func.func @transform_5(%arg0: i32) -> (i32, i32, i32, i32) {
    %c0_i32 = arith.constant 0 : i32
    %c0_i32_0 = arith.constant 0 : i32
    %c0_i32_1 = arith.constant 0 : i32
    %c0_i32_2 = arith.constant 0 : i32
    %c0_i32_3 = arith.constant 0 : i32
    return %c0_i32, %c0_i32_0, %c0_i32_1, %c0_i32_2 : i32, i32, i32, i32
  }
  func.func @transform_6(%arg0: i32) -> (i32, i32) {
    %c0_i32 = arith.constant 0 : i32
    %c0_i32_0 = arith.constant 0 : i32
    %c0_i32_1 = arith.constant 0 : i32
    return %c0_i32, %c0_i32_0 : i32, i32
  }
  func.func @transform_7(%arg0: i32) -> (i32, i32) {
    %c0_i32 = arith.constant 0 : i32
    %c0_i32_0 = arith.constant 0 : i32
    %c0_i32_1 = arith.constant 0 : i32
    return %c0_i32, %c0_i32_0 : i32, i32
  }
  func.func @transform_8(%arg0: i32) -> (i32, i32) {
    %c0_i32 = arith.constant 0 : i32
    %c0_i32_0 = arith.constant 0 : i32
    %c0_i32_1 = arith.constant 0 : i32
    return %c0_i32, %c0_i32_0 : i32, i32
  }
}

</mosaic_0001>

<bundles_post_ra>
// kernel: patchtst_forward.1
= control target key start
LH: loop header
LB: loop body
LE: loop exit
PB: predicated region body
PF: predicated region fallthrough
CT: control target
= control target key end

     0   :  { %vm31_vm0 = vcmask 261120   ;;  %s18557_s0 = inlined_call_operand.vmem [shape: f32[64,32], index: 0, kind: input, shape index: {}]   ;;  %s18558_s1 = inlined_call_operand.vmem [shape: f32[248,32], index: 1, kind: input, shape index: {}]   ;;  %s18559_s2 = inlined_call_operand.vmem [shape: f32[80,64], index: 2, kind: input, shape index: {}]   ;;  %s18560_s3 = inlined_call_operand.vmem [shape: f32[2,4,8,4,32], index: 3, kind: input, shape index: {}]   ;;  %s18561_s4 = inlined_call_operand.vmem [shape: f32[2,3,8,4,56], index: 4, kind: input, shape index: {}]   ;;  %s18562_s5 = inlined_call_operand.vmem [shape: f32[2,8,1,1], index: 5, kind: input, shape index: {}]   ;;  %s18563_s6 = inlined_call_operand.vmem [shape: f32[56,56], index: 6, kind: input, shape index: {}]   ;;  %s18564_s7 = inlined_call_operand.vmem [shape: f32[240,16], index: 7, kind: input, shape index: {}]   ;;  %s18565_s8 = inlined_call_operand.hbm [shape: f32[8,16], index: 8, kind: output, shape index: {}]  }
   0x1   :  { %v30_v0 = vld [vmem:[%s18557_s0] sm:$0xff] }
   0x2   :  { %v32_v1 = vsel %vm31_vm0, %v30_v0, 0.0 }
   0x3   :  { %33 = vadd.xlane.f32.xlu0 %v32_v1 }
   0x4   :  { %13 = vsyncpa [#allocation3], 0  ;;  %v200_v7 = vld [vmem:[%s18558_s1 + $0x10] sm:$0xff]  ;;  %v201_v8 = vld [vmem:[%s18558_s1 + $0x18] sm:$0xff]  ;;  %v18566_v10 = vmov 0.0|0.0   ;;  %vm14379_vm1 = vmmov 0  }
   0x5   :  { %v13621_v9 = vpack.c.bf16 %v201_v8, %v200_v7  ;;  %13620 = vmatprep.subr.bf16.mxu1 %v18566_v10  ;;  %v202_v11 = vld [vmem:[%s18558_s1 + $0x20] sm:$0xff]  ;;  %v203_v12 = vld [vmem:[%s18558_s1 + $0x28] sm:$0xff]  ;;  %13608 = vmatprep.subr.bf16.mxu0 %v18566_v10  ;;  %v18568_v14 = vmov 0.0   ;;  %v59_v28 = vld [vmem:[%s18557_s0 + $0x10] sm:$0xff]  ;;  %v18697_v35 = vmov 0  ;;  %vm981_vm5 = vcmask 1043456  }
   0x6   :  { %v13624_v13 = vpack.c.bf16 %v203_v12, %v202_v11  ;;  %12154 = vmatprep.mubr.msk.f32.mxu1 %vm14379_vm1, %v18568_v14  ;;  %12125 = vmatprep.mubr.msk.f32.mxu0 %vm14379_vm1, %v18568_v14  ;;  %v53_v23 = vld [vmem:[%s18558_s1] sm:$0xff]  ;;  %v54_v26 = vld [vmem:[%s18558_s1 + $0x8] sm:$0xff]  ;;  %vm14473_vm4 = vmpackc.low %vm31_vm0, %vm31_vm0  ;;  %vm959_vm6 = vcmask 31744   ;;  %vm2225_vm7 = vcmask 457728   ;;  %vm5154_vm8 = vcmask 523264   ;;  %s14382_s9 = smov [#allocation2]  }
   0x7   :  { %13622 = vmatpush3.bf16.msra.mxu1 %v13621_v9  ;;  %v58_v27 = vld [vmem:[%s18557_s0 + $0x8] sm:$0xff]  ;;  %v18698_v35 = vsel %vm14473_vm4, 4294967295, %v18697_v35  ;;  %v60_v36 = vld [vmem:[%s18557_s0 + $0x18] sm:$0xff]  ;;  %v61_v37 = vld [vmem:[%s18557_s0 + $0x20] sm:$0xff]  ;;  %vm10886_vm9 = vcmask 130048   ;;  %s10913_s10 = sshll.u32 %s14382_s9, 4  ;;  %s10914_s10 = int_to_ptr.vmem [resolvable:$true] %s10913_s10 }
   0x8   :  { %13623 = vmatprep.subr.bf16.mxu1 %v18566_v10  ;;  %18699 = vst [vmem:[#allocation7_spill] sm:$0xff] %v18698_v35  ;;  %v62_v43 = vld [vmem:[%s18557_s0 + $0x28] sm:$0xff]  ;;  %v63_v44 = vld [vmem:[%s18557_s0 + $0x30] sm:$0xff]  ;;  %v64_v51 = vld [vmem:[%s18557_s0 + $0x38] sm:$0xff]  ;;  %p14359_p1 = scmp.lt.s32.totalorder %s10914_s10, %s10914_s10 }
   0x9   :  { %v13819_v54 = vld [vmem:[%s18560_s3] sm:$0xff]   ;;  %v204_v58 = vld [vmem:[%s18558_s1 + $0x30] sm:$0xff]  ;;  %v205_v59 = vld [vmem:[%s18558_s1 + $0x38] sm:$0xff] }
   0xa   :  { %v13823_v55 = vld [vmem:[%s18560_s3 + $0x20] sm:$0xff]  }
   0xb   :  { %13625 = vmatpush3.bf16.msra.mxu1 %v13624_v13 }
  0x90   :  { %v34_v2 = vpop.xlane.xlu0 %33 }
  0x91   :  { %v14432_v3 = vmul.f32 0.03125, %v34_v2 }
  0x93   :  { %18695 = vst [vmem:[#allocation5_spill] sm:$0xff] %v14432_v3  ;;  %v37_v4 = vsub.f32 %v30_v0, %v14432_v3 }
  0x95   :  { %v38_v5 = vmul.f32 %v37_v4, %v37_v4  ;;  %v206_v4 = vld [vmem:[%s18558_s1 + $0x40] sm:$0xff] }
  0x97   :  { %v39_v6 = vsel %vm31_vm0, %v38_v5, 0.0  ;;  %v207_v5 = vld [vmem:[%s18558_s1 + $0x48] sm:$0xff] }
  0x98   :  { %40 = vadd.xlane.f32.xlu0 %v39_v6 }
 0x125   :  { %v41_v15 = vpop.xlane.xlu0 %40 }
 0x126   :  { %v42_v16 = vmul.f32 0.03125, %v41_v15  ;;  %v208_v15 = vld [vmem:[%s18558_s1 + $0x50] sm:$0xff] }
 0x128   :  { %v43_v17 = vadd.f32 1e-05, %v42_v16  ;;  %v209_v16 = vld [vmem:[%s18558_s1 + $0x58] sm:$0xff] }
 0x12a   :  { %13867 = vrsqrt.f32 %v43_v17  ;;  %vm46_vm2 = vcmp.eq.f32.partialorder %v43_v17, inf  ;;  %v49_v20 = vand.u32 2147483648, %v43_v17  ;;  %vm48_vm3 = vcmp.eq.f32.partialorder %v43_v17, 0.0 }
 0x134   :  { %v13868_v18 = vpop.eup %13867 }
 0x135   :  { %v45_v19 = vmul.f32 %v13868_v18, %v43_v17 }
 0x137   :  { %v47_v21 = vsel %vm46_vm2, %v43_v17, %v45_v19 }
 0x138   :  { %v14455_v22 = vsel %vm48_vm3, %v49_v20, %v47_v21  ;;  %v210_v21 = vld [vmem:[%s18558_s1 + $0x60] sm:$0xff] }
 0x139   :  { %18696 = vst [vmem:[#allocation6_spill] sm:$0xff] %v14455_v22  ;;  %13869 = vrcp.f32 %v14455_v22 }
 0x143   :  { %v13870_v24 = vpop.eup %13869 }
 0x144   :  { %v55_v25 = vmul.f32 %v13870_v24, %v53_v23 }
 0x146   :  { %v56_v29 = vmul.f32 %v55_v25, %v14432_v3  ;;  %v65_v31 = vmul.f32 %v58_v27, %v55_v25  ;;  %v66_v32 = vmul.f32 %v59_v28, %v55_v25  ;;  %v67_v39 = vmul.f32 %v60_v36, %v55_v25 }
 0x147   :  { %v68_v40 = vmul.f32 %v61_v37, %v55_v25  ;;  %v69_v46 = vmul.f32 %v62_v43, %v55_v25  ;;  %v70_v47 = vmul.f32 %v63_v44, %v55_v25  ;;  %v71_v52 = vmul.f32 %v64_v51, %v55_v25  ;;  %v13822_v37 = vld [vmem:[%s18560_s3 + $0x18] sm:$0xff]  }
 0x148   :  { %v57_v30 = vsub.f32 %v54_v26, %v56_v29 }
 0x14a   :  { %v72_v33 = vadd.f32 %v65_v31, %v57_v30  ;;  %v73_v34 = vadd.f32 %v66_v32, %v57_v30  ;;  %v74_v41 = vadd.f32 %v67_v39, %v57_v30  ;;  %v75_v42 = vadd.f32 %v68_v40, %v57_v30  ;;  %v13824_v31 = vld [vmem:[%s18560_s3 + $0x28] sm:$0xff]  }
 0x14b   :  { %v76_v48 = vadd.f32 %v69_v46, %v57_v30  ;;  %v77_v49 = vadd.f32 %v70_v47, %v57_v30  ;;  %v78_v53 = vadd.f32 %v71_v52, %v57_v30  ;;  %v13820_v30 = vld [vmem:[%s18560_s3 + $0x8] sm:$0xff]  }
 0x14c   :  { %12155 = vmatmul.mubr.msk.f32.vlgmr.msra.gmra.mrb[0].mxu1 %vm31_vm0, %v72_v33  ;;  %v13609_v38 = vpack.c.bf16 %v73_v34, %v72_v33  ;;  %v13613_v45 = vpack.c.bf16 %v75_v42, %v74_v41 }
 0x14d   :  { %12157 = vmatprep.mubr.msk.f32.mxu1 %vm14379_vm1, %v18568_v14  ;;  %v13617_v50 = vpack.c.bf16 %v77_v49, %v76_v48 }
 0x14e   :  { %13611 = vmatpush3.bf16.xpose.msk.msra.mxu0 %vm14473_vm4, %v13609_v38  ;;  %v13826_v38 = vld [vmem:[%s18560_s3 + $0x38] sm:$0xff]  }
 0x14f   :  { %13612 = vmatprep.subr.bf16.mxu0 %v18566_v10 }
 0x150   :  { %12158 = vmatmul.mubr.msk.f32.gmra.mrb[2].mxu1 %vm31_vm0, %v73_v34 }
 0x151   :  { %12160 = vmatprep.mubr.msk.f32.mxu1 %vm14379_vm1, %v18568_v14 }
 0x154   :  { %12161 = vmatmul.mubr.msk.f32.gmra.mrb[4].mxu1 %vm31_vm0, %v74_v41 }
 0x155   :  { %12163 = vmatprep.mubr.msk.f32.mxu1 %vm14379_vm1, %v18568_v14 }
 0x156   :  { %13615 = vmatpush3.bf16.xpose.msk.msra.mxu0 %vm14473_vm4, %v13613_v45 }
 0x157   :  { %13616 = vmatprep.subr.bf16.mxu0 %v18566_v10  ;;  %v15092_v10 = vld [vmem:[%s18563_s6 + $0x28] sm:$0xff] }
 0x158   :  { %12164 = vmatmul.mubr.msk.f32.gmra.mrb[6].mxu1 %vm31_vm0, %v75_v42 }
 0x159   :  { %12166 = vmatprep.mubr.msk.f32.mxu1 %vm14379_vm1, %v18568_v14 }
 0x15c   :  { %12167 = vmatmul.mubr.msk.f32.gmra.mrb[8].mxu1 %vm31_vm0, %v76_v48 }
 0x15d   :  { %12169 = vmatprep.mubr.msk.f32.mxu1 %vm14379_vm1, %v18568_v14 }
 0x15e   :  { %13619 = vmatpush3.bf16.xpose.msk.msra.mxu0 %vm14473_vm4, %v13617_v50  ;;  %v13832_v50 = vld [vmem:[%s18561_s4 + $0x20] sm:$0xff]  }
 0x15f   :  { %12123 = vmatprep.subr.mxu0 %v18568_v14 }
 0x160   :  { %12170 = vmatmul.mubr.msk.f32.gmra.mrb[10].mxu1 %vm31_vm0, %v77_v49 }
 0x161   :  { %12172 = vmatprep.mubr.msk.f32.mxu1 %vm14379_vm1, %v18568_v14 }
 0x164   :  { %12173 = vmatmul.mubr.msk.f32.gmra.mrb[12].mxu1 %vm31_vm0, %v78_v53 }
 0x165   :  { %12189 = vmatprep.mubr.msk.f32.mxu1 %vm31_vm0, %v13819_v54 }
 0x166   :  { %12124 = vmatpush3.xpose.msk.msra.mxu0 %vm31_vm0, %v78_v53 }
 0x169   :  { %12126 = vmatmul.mubr.msk.f32.vlgmr.msra.gmra.mrb[0].mxu0 %vm31_vm0, %v72_v33  ;;  %v13821_v33 = vld [vmem:[%s18560_s3 + $0x10] sm:$0xff]  }
 0x16a   :  { %12128 = vmatprep.mubr.msk.f32.mxu0 %vm14379_vm1, %v18568_v14 }
 0x16d   :  { %12129 = vmatmul.mubr.msk.f32.gmra.mrb[2].mxu0 %vm31_vm0, %v73_v34  ;;  %v13825_v34 = vld [vmem:[%s18560_s3 + $0x30] sm:$0xff]  }
 0x16e   :  { %12131 = vmatprep.mubr.msk.f32.mxu0 %vm14379_vm1, %v18568_v14 }
 0x171   :  { %12132 = vmatmul.mubr.msk.f32.gmra.mrb[4].mxu0 %vm31_vm0, %v74_v41 }
 0x172   :  { %12134 = vmatprep.mubr.msk.f32.mxu0 %vm14379_vm1, %v18568_v14 }
 0x175   :  { %12135 = vmatmul.mubr.msk.f32.gmra.mrb[6].mxu0 %vm31_vm0, %v75_v42 }
 0x176   :  { %12137 = vmatprep.mubr.msk.f32.mxu0 %vm14379_vm1, %v18568_v14 }
 0x179   :  { %12138 = vmatmul.mubr.msk.f32.gmra.mrb[8].mxu0 %vm31_vm0, %v76_v48  ;;  %v13827_v48 = vld [vmem:[%s18561_s4 + $0x8] sm:$0xff]  }
 0x17a   :  { %12140 = vmatprep.mubr.msk.f32.mxu0 %vm14379_vm1, %v18568_v14 }
 0x17d   :  { %12141 = vmatmul.mubr.msk.f32.gmra.mrb[10].mxu0 %vm31_vm0, %v77_v49  ;;  %v13828_v49 = vld [vmem:[%s18561_s4] sm:$0xff]  }
 0x17e   :  { %12143 = vmatprep.mubr.msk.f32.mxu0 %vm14379_vm1, %v18568_v14 }
 0x181   :  { %12144 = vmatmul.mubr.msk.f32.gmra.mrb[12].mxu0 %vm31_vm0, %v78_v53 }
 0x182   :  { %12209 = vmatprep.mubr.msk.f32.mxu0 %vm31_vm0, %v13823_v55 }
 0x21f   :  { %v277_v56 = vpop.f32.mrb[0].mxu1 }
 0x220   :  { %v12156_v57 = vpop.f32.mrb[1].mxu1  ;;  %v14554_v61 = vadd.f32 %v277_v56, %v204_v58 }
 0x222   :  { %18700 = vst [vmem:[#allocation8_spill] sm:$0xff] %v14554_v61 }
 0x223   :  { %v282_v60 = vpop.f32.mrb[2].mxu1 }
 0x224   :  { %v14556_v62 = vadd.f32 %v282_v60, %v205_v59  ;;  %v12159_v63 = vpop.f32.mrb[3].mxu1  ;;  %v13829_v60 = vld [vmem:[%s18561_s4 + $0x10] sm:$0xff]  }
 0x226   :  { %18701 = vst [vmem:[#allocation9_spill] sm:$0xff] %v14556_v62  ;;  %v13626_v0 = vpack.c.bf16 %v14556_v62, %v14554_v61 }
 0x227   :  { %v287_v1 = vpop.f32.mrb[4].mxu1 }
 0x228   :  { %v12162_v2 = vpop.f32.mrb[5].mxu1  ;;  %13628 = vmatprep.subr.msk.bf16.mxu1 %vm14473_vm4, %v13626_v0  ;;  %13646 = vmatprep.subr.msk.bf16.mxu0 %vm14473_vm4, %v13626_v0  ;;  %v14574_v7 = vadd.f32 %v287_v1, %v206_v4  ;;  %v13834_v1 = vld [vmem:[%s18560_s3 + $0x48] sm:$0xff]   ;;  %v13835_v4 = vld [vmem:[%s18560_s3 + $0x50] sm:$0xff]  }
 0x229   :  { %13631 = vmatpush3.bf16.xpose.msk.msra.mxu1 %vm14473_vm4, %v13626_v0  ;;  %13649 = vmatpush3.bf16.xpose.msk.msra.mxu0 %vm14473_vm4, %v13626_v0 }
 0x22a   :  { %18702 = vst [vmem:[#allocation10_spill] sm:$0xff] %v14574_v7 }
 0x22b   :  { %v292_v6 = vpop.f32.mrb[6].mxu1 }
 0x22c   :  { %v14576_v8 = vadd.f32 %v292_v6, %v207_v5  ;;  %v12165_v9 = vpop.f32.mrb[7].mxu1  ;;  %v13836_v5 = vld [vmem:[%s18560_s3 + $0x58] sm:$0xff]  }
 0x22d   :  { %v13830_v9 = vld [vmem:[%s18561_s4 + $0x18] sm:$0xff]  }
 0x22e   :  { %18703 = vst [vmem:[#allocation11_spill] sm:$0xff] %v14576_v8  ;;  %v13632_v11 = vpack.c.bf16 %v14576_v8, %v14574_v7 }
 0x22f   :  { %v297_v12 = vpop.f32.mrb[8].mxu1 }
 0x230   :  { %v12168_v13 = vpop.f32.mrb[9].mxu1  ;;  %13634 = vmatprep.subr.msk.bf16.mxu1 %vm14473_vm4, %v13632_v11  ;;  %13652 = vmatprep.subr.msk.bf16.mxu0 %vm14473_vm4, %v13632_v11  ;;  %v14594_v18 = vadd.f32 %v297_v12, %v208_v15 }
 0x231   :  { %13637 = vmatpush3.bf16.xpose.msk.msra.mxu1 %vm14473_vm4, %v13632_v11  ;;  %13655 = vmatpush3.bf16.xpose.msk.msra.mxu0 %vm14473_vm4, %v13632_v11 }
 0x232   :  { %18704 = vst [vmem:[#allocation12_spill] sm:$0xff] %v14594_v18 }
 0x233   :  { %v302_v17 = vpop.f32.mrb[10].mxu1 }
 0x234   :  { %v14596_v19 = vadd.f32 %v302_v17, %v209_v16  ;;  %v12171_v20 = vpop.f32.mrb[11].mxu1  ;;  %v14381_v17 = vmov 0  }
 0x236   :  { %18705 = vst [vmem:[#allocation13_spill] sm:$0xff] %v14596_v19  ;;  %v13638_v23 = vpack.c.bf16 %v14596_v19, %v14594_v18 }
 0x237   :  { %v307_v24 = vpop.f32.mrb[12].mxu1 }
 0x238   :  { %v14603_v25 = vadd.f32 %v307_v24, %v210_v21  ;;  %v12174_v26 = vpop.f32.mrb[13].mxu1  ;;  %13640 = vmatprep.subr.msk.bf16.mxu1 %vm14473_vm4, %v13638_v23  ;;  %13658 = vmatprep.subr.msk.bf16.mxu0 %vm14473_vm4, %v13638_v23  ;;  %v11015_v21 = vld [vmem:[%s18562_s5] ss:$0 sm:$0xff]  ;;  %v11021_v24 = vld [vmem:[%s18562_s5 + $0x6] ss:$0 sm:$0xff] }
 0x239   :  { %13643 = vmatpush3.bf16.xpose.msk.msra.mxu1 %vm14473_vm4, %v13638_v23  ;;  %13661 = vmatpush3.bf16.xpose.msk.msra.mxu0 %vm14473_vm4, %v13638_v23  ;;  %v13831_v26 = vld [vmem:[%s18561_s4 + $0x28] sm:$0xff]  }
 0x23a   :  { %18706 = vst [vmem:[#allocation14_spill] sm:$0xff] %v14603_v25  ;;  %12187 = vmatprep.subr.msk.mxu1 %vm31_vm0, %v14603_v25  ;;  %12207 = vmatprep.subr.msk.mxu0 %vm31_vm0, %v14603_v25 }
 0x23c   :  { %v14617_v27 = vpop.f32.mrb[0].mxu0 }
 0x23d   :  { %18707 = vst [vmem:[#allocation15_spill] sm:$0xff] %v14617_v27  ;;  %v12127_v28 = vpop.f32.mrb[1].mxu0 }
 0x240   :  { %v14619_v29 = vpop.f32.mrb[2].mxu0 }
 0x241   :  { %18708 = vst [vmem:[#allocation16_spill] sm:$0xff] %v14619_v29  ;;  %v12130_v32 = vpop.f32.mrb[3].mxu0  ;;  %12188 = vmatpush3.xpose.msk.msra.mxu1 %vm31_vm0, %v14603_v25  ;;  %12208 = vmatpush3.xpose.msk.msra.mxu0 %vm31_vm0, %v14603_v25 }
 0x242   :  { %13664 = vmatprep.subr.msk.bf16.mxu1 %vm14473_vm4, %v13626_v0  ;;  %12235 = vmatprep.subr.mxu0 %v18568_v14 }
 0x244   :  { %v14640_v36 = vpop.f32.mrb[4].mxu0  ;;  %12190 = vmatmul.mubr.msk.f32.vlgmr.msra.gmra.mrb[14].mxu1 %vm31_vm0, %v13820_v30  ;;  %12210 = vmatmul.mubr.msk.f32.vlgmr.msra.gmra.mrb[14].mxu0 %vm31_vm0, %v13824_v31 }
 0x245   :  { %18709 = vst [vmem:[#allocation17_spill] sm:$0xff] %v14640_v36  ;;  %v12133_v39 = vpop.f32.mrb[5].mxu0  ;;  %13667 = vmatpush3.bf16.xpose.msk.msra.mxu1 %vm14473_vm4, %v13626_v0  ;;  %12192 = vmatprep.mubr.msk.f32.mxu1 %vm31_vm0, %v13821_v33  ;;  %v13833_v0 = vld [vmem:[%s18560_s3 + $0x40] sm:$0xff]  }
 0x246   :  { %13670 = vmatprep.subr.msk.bf16.mxu1 %vm14473_vm4, %v13632_v11  ;;  %12212 = vmatprep.mubr.msk.f32.mxu0 %vm31_vm0, %v13825_v34 }
 0x248   :  { %v14656_v40 = vpop.f32.mrb[6].mxu0  ;;  %12193 = vmatmul.mubr.msk.f32.gmra.mrb[16].mxu1 %vm31_vm0, %v13822_v37  ;;  %12213 = vmatmul.mubr.msk.f32.gmra.mrb[16].mxu0 %vm31_vm0, %v13826_v38 }
 0x249   :  { %18710 = vst [vmem:[#allocation18_spill] sm:$0xff] %v14656_v40  ;;  %v12136_v41 = vpop.f32.mrb[7].mxu0  ;;  %12237 = vmatprep.mubr.msk.f32.mxu0 %vm14379_vm1, %v18568_v14  ;;  %12229 = vmatprep.mubr.msk.f32.mxu1 %vm31_vm0, %v13833_v0  ;;  %v11022_v0 = vld [vmem:[%s18562_s5 + $0x7] ss:$0 sm:$0xff] }
 0x24c   :  { %v14662_v42 = vpop.f32.mrb[8].mxu0 }
 0x24d   :  { %18711 = vst [vmem:[#allocation19_spill] sm:$0xff] %v14662_v42  ;;  %v12139_v43 = vpop.f32.mrb[9].mxu0  ;;  %13673 = vmatpush3.bf16.xpose.msk.msra.mxu1 %vm14473_vm4, %v13632_v11 }
 0x24e   :  { %13676 = vmatprep.subr.msk.bf16.mxu1 %vm14473_vm4, %v13638_v23 }
 0x250   :  { %v14668_v44 = vpop.f32.mrb[10].mxu0 }
 0x251   :  { %18712 = vst [vmem:[#allocation20_spill] sm:$0xff] %v14668_v44  ;;  %v12142_v45 = vpop.f32.mrb[11].mxu0 }
 0x254   :  { %v14670_v46 = vpop.f32.mrb[12].mxu0 }
 0x255   :  { %18713 = vst [vmem:[#allocation21_spill] sm:$0xff] %v14670_v46  ;;  %v12145_v47 = vpop.f32.mrb[13].mxu0  ;;  %13679 = vmatpush3.bf16.xpose.msk.msra.mxu1 %vm14473_vm4, %v13638_v23  ;;  %v11020_v23 = vld [vmem:[%s18562_s5 + $0x5] ss:$0 sm:$0xff] }
 0x256   :  { %12227 = vmatprep.subr.msk.mxu1 %vm31_vm0, %v14603_v25 }
 0x25d   :  { %12228 = vmatpush3.xpose.msk.msra.mxu1 %vm31_vm0, %v14603_v25 }
 0x25e   :  { %12258 = vmatprep.subr.mxu1 %v18568_v14 }
 0x260   :  { %12230 = vmatmul.mubr.msk.f32.vlgmr.msra.gmra.mrb[18].mxu1 %vm31_vm0, %v13834_v1 }
 0x261   :  { %12232 = vmatprep.mubr.msk.f32.mxu1 %vm31_vm0, %v13835_v4 }
 0x264   :  { %12233 = vmatmul.mubr.msk.f32.gmra.mrb[20].mxu1 %vm31_vm0, %v13836_v5 }
 0x265   :  { %12260 = vmatprep.mubr.msk.f32.mxu1 %vm14379_vm1, %v18568_v14 }
 0x317   :  { %v12191_v51 = vpop.f32.mrb[14].mxu1  ;;  %v12211_v52 = vpop.f32.mrb[14].mxu0 }
 0x318   :  { %v502_v53 = vpop.f32.mrb[15].mxu1  ;;  %v508_v54 = vadd.f32 %v13827_v48, %v12191_v51  ;;  %v635_v55 = vpop.f32.mrb[15].mxu0  ;;  %v641_v28 = vadd.f32 %v13831_v26, %v12211_v52  ;;  %v11016_v48 = vld [vmem:[%s18562_s5 + $0x1] ss:$0 sm:$0xff]  ;;  %v13838_v51 = vld [vmem:[%s18561_s4 + $0x30] sm:$0xff]  }
 0x319   :  { %v503_v56 = vadd.f32 %v13828_v49, %v502_v53  ;;  %v636_v57 = vadd.f32 %v13832_v50, %v635_v55  ;;  %v11017_v52 = vld [vmem:[%s18562_s5 + $0x2] ss:$0 sm:$0xff] }
 0x31a   :  { %1239 = vxpose.xlu0.b32.start.end [1/1] (short) (narrow) %v508_v54, 56  ;;  %v526_v12 = vcombine.high %v508_v54, %v508_v54  ;;  %v659_v53 = vcombine.high %v641_v28, %v641_v28 }
 0x31b   :  { %927 = vxpose.xlu1.b32.start.end [1/1] (short) (narrow) %v503_v56, 56  ;;  %v12194_v58 = vpop.f32.mrb[16].mxu1  ;;  %12236 = vmatpush3.msk.msra.mxu0 %vm981_vm5, %v636_v57  ;;  %v658_v63 = vcombine.high %v636_v57, %v636_v57  ;;  %v525_v6 = vcombine.high %v503_v56, %v503_v56  ;;  %v14716_v13 = vpop.f32.mrb[16].mxu0  ;;  %v11018_v57 = vld [vmem:[%s18562_s5 + $0x3] ss:$0 sm:$0xff] }
 0x31c   :  { %v512_v59 = vpop.f32.mrb[17].mxu1  ;;  %12281 = vmatprep.subr.mxu0 %v18568_v14  ;;  %v518_v11 = vadd.f32 %v13830_v9, %v12194_v58  ;;  %v645_v15 = vpop.f32.mrb[17].mxu0  ;;  %v13837_v9 = vld [vmem:[%s18561_s4 + $0x38] sm:$0xff]  }
 0x31d   :  { %v513_v2 = vadd.f32 %v13829_v60, %v512_v59  ;;  %12259 = vmatpush3.msk.msra.mxu1 %vm981_vm5, %v658_v63  ;;  %v646_v55 = vadd.f32 %v13838_v51, %v645_v15  ;;  %v11019_v60 = vld [vmem:[%s18562_s5 + $0x4] ss:$0 sm:$0xff]  ;;  %v651_v15 = vadd.f32 %v13837_v9, %v14716_v13 }
 0x31e   :  { %12304 = vmatprep.subr.mxu1 %v18568_v14  ;;  %v528_v20 = vcombine.high %v518_v11, %v518_v11 }
 0x31f   :  { %v527_v16 = vcombine.high %v513_v2, %v513_v2 }
 0x333   :  { %1549 = vxpose.xlu0.b32.start.end [1/1] (short) (narrow) %v513_v2, 56 }
 0x334   :  { %1084 = vxpose.xlu1.b32.start.end [1/1] (short) (narrow) %v525_v6, 56 }
 0x34c   :  { %1859 = vxpose.xlu0.b32.start.end [1/1] (short) (narrow) %v518_v11, 56 }
 0x34d   :  { %1394 = vxpose.xlu1.b32.start.end [1/1] (short) (narrow) %v526_v12, 56 }
 0x366   :  { %1704 = vxpose.xlu1.b32.start.end [1/1] (short) (narrow) %v527_v16, 56  ;;  %v660_v16 = vcombine.high %v646_v55, %v646_v55 }
 0x375   :  { %13817 = vset.pattern.permute.xlu0 %v14381_v17 }
 0x37f   :  { %2014 = vxpose.xlu1.b32.start.end [1/1] (short) (narrow) %v528_v20, 56 }
 0x38d   :  { %840 = vperm.xlu0 %13817, %v11015_v21  }
 0x391   :  { %860 = vperm.xlu0 %13817, %v11020_v23  }
 0x395   :  { %864 = vperm.xlu0 %13817, %v11021_v24  }
 0x39a   :  { %v1255_v30 = vpop.trf.xlu0 }
 0x39b   :  { %v943_v31 = vpop.trf.xlu1 }
 0x39c   :  { %12238 = vmatmul.mubr.msk.f32.vlgmr.msra.gmra.mrb[18].mxu0 %vm959_vm6, %v943_v31 }
 0x39d   :  { %12240 = vmatprep.mubr.msk.f32.mxu0 %vm14379_vm1, %v18568_v14  ;;  %12282 = vmatpush3.msk.msra.mxu0 %vm981_vm5, %v641_v28 }
 0x39e   :  { %13818 = vset.pattern.permute.xlu1 %v14381_v17  ;;  %v1256_v32 = vpop.trf.xlu0  ;;  %12327 = vmatprep.subr.mxu0 %v18568_v14 }
 0x39f   :  { %v944_v33 = vpop.trf.xlu1 }
 0x3a0   :  { %12241 = vmatmul.mubr.msk.f32.gmra.mrb[20].mxu0 %vm959_vm6, %v944_v33 }
 0x3a1   :  { %12243 = vmatprep.mubr.msk.f32.mxu0 %vm14379_vm1, %v18568_v14 }
 0x3a2   :  { %v1257_v34 = vpop.trf.xlu0 }
 0x3a3   :  { %v945_v37 = vpop.trf.xlu1 }
 0x3a4   :  { %12244 = vmatmul.mubr.msk.f32.gmra.mrb[22].mxu0 %vm959_vm6, %v945_v37 }
 0x3a5   :  { %12246 = vmatprep.mubr.msk.f32.mxu0 %vm14379_vm1, %v18568_v14 }
 0x3a6   :  { %v1258_v38 = vpop.trf.xlu0 }
 0x3a7   :  { %v946_v39 = vpop.trf.xlu1 }
 0x3a8   :  { %12247 = vmatmul.mubr.msk.f32.gmra.mrb[24].mxu0 %vm959_vm6, %v946_v39 }
 0x3a9   :  { %12249 = vmatprep.mubr.msk.f32.mxu0 %vm14379_vm1, %v18568_v14 }
 0x3aa   :  { %v1259_v41 = vpop.trf.xlu0 }
 0x3ab   :  { %v947_v43 = vpop.trf.xlu1 }
 0x3ac   :  { %12250 = vmatmul.mubr.msk.f32.gmra.mrb[26].mxu0 %vm959_vm6, %v947_v43 }
 0x3ad   :  { %12252 = vmatprep.mubr.msk.f32.mxu0 %vm14379_vm1, %v18568_v14 }
 0x3ae   :  { %v1260_v45 = vpop.trf.xlu0 }
 0x3af   :  { %v948_v47 = vpop.trf.xlu1 }
 0x3b0   :  { %12253 = vmatmul.mubr.msk.f32.gmra.mrb[28].mxu0 %vm959_vm6, %v948_v47 }
 0x3b1   :  { %12255 = vmatprep.mubr.msk.f32.mxu0 %vm14379_vm1, %v18568_v14 }
 0x3b2   :  { %v1261_v49 = vpop.trf.xlu0 }
 0x3b3   :  { %v949_v50 = vpop.trf.xlu1 }
 0x3b4   :  { %12256 = vmatmul.mubr.msk.f32.gmra.mrb[30].mxu0 %vm959_vm6, %v949_v50  ;;  %v14902_v50 = vpop.f32.mrb[18].mxu1 }
 0x3b5   :  { %844 = vperm.xlu1 %13818, %v11016_v48   ;;  %12283 = vmatprep.mubr.msk.f32.mxu0 %vm14379_vm1, %v18568_v14  ;;  %18714 = vst [vmem:[#allocation22_spill] sm:$0xff] %v14902_v50 }
 0x3b6   :  { %v1565_v56 = vpop.trf.xlu0 }
 0x3b7   :  { %v1100_v54 = vpop.trf.xlu1 }
 0x3b8   :  { %12261 = vmatmul.mubr.msk.f32.vlgmr.msra.gmra.mrb[22].mxu1 %vm959_vm6, %v1100_v54  ;;  %12284 = vmatmul.mubr.msk.f32.vlgmr.msra.gmra.mrb[32].mxu0 %vm959_vm6, %v1255_v30 }
 0x3b9   :  { %12305 = vmatpush3.msk.msra.mxu1 %vm981_vm5, %v659_v53  ;;  %848 = vperm.xlu1 %13818, %v11017_v52   ;;  %v764_v52 = vpop.f32.mrb[19].mxu1 }
 0x3ba   :  { %12263 = vmatprep.mubr.msk.f32.mxu1 %vm14379_vm1, %v18568_v14  ;;  %12286 = vmatprep.mubr.msk.f32.mxu0 %vm14379_vm1, %v18568_v14  ;;  %v1566_v59 = vpop.trf.xlu0 }
 0x3bb   :  { %v1101_v58 = vpop.trf.xlu1  ;;  %12328 = vmatpush3.msk.msra.mxu0 %vm981_vm5, %v646_v55  ;;  %12350 = vmatprep.subr.mxu1 %v18568_v14  ;;  %v14910_v55 = vpop.f32.mrb[20].mxu1 }
 0x3bc   :  { %12264 = vmatmul.mubr.msk.f32.gmra.mrb[24].mxu1 %vm959_vm6, %v1101_v58  ;;  %12287 = vmatmul.mubr.msk.f32.gmra.mrb[34].mxu0 %vm959_vm6, %v1256_v32  ;;  %18715 = vst [vmem:[#allocation23_spill] sm:$0xff] %v14910_v55 }
 0x3bd   :  { %852 = vperm.xlu1 %13818, %v11018_v57   ;;  %12266 = vmatprep.mubr.msk.f32.mxu1 %vm14379_vm1, %v18568_v14  ;;  %v14913_v57 = vpop.f32.mrb[21].mxu1 }
 0x3be   :  { %12289 = vmatprep.mubr.msk.f32.mxu0 %vm14379_vm1, %v18568_v14  ;;  %12373 = vmatprep.subr.mxu0 %v18568_v14  ;;  %v1567_v2 = vpop.trf.xlu0  ;;  %18716 = vst [vmem:[#allocation24_spill] sm:$0xff] %v14913_v57 }
 0x3bf   :  { %v1102_v63 = vpop.trf.xlu1 }
 0x3c0   :  { %12267 = vmatmul.mubr.msk.f32.gmra.mrb[26].mxu1 %vm959_vm6, %v1102_v63  ;;  %12290 = vmatmul.mubr.msk.f32.gmra.mrb[36].mxu0 %vm959_vm6, %v1257_v34  ;;  %v661_v34 = vcombine.high %v651_v15, %v651_v15 }
 0x3c1   :  { %856 = vperm.xlu1 %13818, %v11019_v60   ;;  %12269 = vmatprep.mubr.msk.f32.mxu1 %vm14379_vm1, %v18568_v14 }
 0x3c2   :  { %12292 = vmatprep.mubr.msk.f32.mxu0 %vm14379_vm1, %v18568_v14  ;;  %v1568_v5 = vpop.trf.xlu0 }
 0x3c3   :  { %v1103_v1 = vpop.trf.xlu1 }
 0x3c4   :  { %12270 = vmatmul.mubr.msk.f32.gmra.mrb[28].mxu1 %vm959_vm6, %v1103_v1  ;;  %12293 = vmatmul.mubr.msk.f32.gmra.mrb[38].mxu0 %vm959_vm6, %v1258_v38 }
 0x3c5   :  { %868 = vperm.xlu1 %13818, %v11022_v0   ;;  %12272 = vmatprep.mubr.msk.f32.mxu1 %vm14379_vm1, %v18568_v14 }
 0x3c6   :  { %12295 = vmatprep.mubr.msk.f32.mxu0 %vm14379_vm1, %v18568_v14  ;;  %v1569_v12 = vpop.trf.xlu0 }
 0x3c7   :  { %v1104_v4 = vpop.trf.xlu1 }
 0x3c8   :  { %12273 = vmatmul.mubr.msk.f32.gmra.mrb[30].mxu1 %vm959_vm6, %v1104_v4  ;;  %12296 = vmatmul.mubr.msk.f32.gmra.mrb[40].mxu0 %vm959_vm6, %v1259_v41 }
 0x3c9   :  { %12275 = vmatprep.mubr.msk.f32.mxu1 %vm14379_vm1, %v18568_v14  ;;  %12298 = vmatprep.mubr.msk.f32.mxu0 %vm14379_vm1, %v18568_v14 }
 0x3ca   :  { %v1570_v20 = vpop.trf.xlu0 }
 0x3cb   :  { %v1105_v6 = vpop.trf.xlu1 }
 0x3cc   :  { %12276 = vmatmul.mubr.msk.f32.gmra.mrb[32].mxu1 %vm959_vm6, %v1105_v6  ;;  %12299 = vmatmul.mubr.msk.f32.gmra.mrb[42].mxu0 %vm959_vm6, %v1260_v45 }
 0x3cd   :  { %12278 = vmatprep.mubr.msk.f32.mxu1 %vm14379_vm1, %v18568_v14  ;;  %12301 = vmatprep.mubr.msk.f32.mxu0 %vm14379_vm1, %v18568_v14 }
 0x3ce   :  { %v1571_v23 = vpop.trf.xlu0 }
 0x3cf   :  { %v1106_v11 = vpop.trf.xlu1 }
 0x3d0   :  { %12279 = vmatmul.mubr.msk.f32.gmra.mrb[34].mxu1 %vm959_vm6, %v1106_v11  ;;  %12302 = vmatmul.mubr.msk.f32.gmra.mrb[44].mxu0 %vm959_vm6, %v1261_v49  ;;  %v13840_v49 = vld [vmem:[%s18561_s4 + $0x40] sm:$0xff]  }
 0x3d1   :  { %12306 = vmatprep.mubr.msk.f32.mxu1 %vm14379_vm1, %v18568_v14  ;;  %12329 = vmatprep.mubr.msk.f32.mxu0 %vm14379_vm1, %v18568_v14  ;;  %v765_v53 = vadd.f32 %v13840_v49, %v764_v52  ;;  %v14949_v11 = vld [vmem:[%s18563_s6] sm:$0xff] }
 0x3d2   :  { %v1875_v26 = vpop.trf.xlu0 }
 0x3d3   :  { %v1410_v17 = vpop.trf.xlu1  ;;  %v787_v58 = vcombine.high %v765_v53, %v765_v53 }
 0x3d4   :  { %12307 = vmatmul.mubr.msk.f32.vlgmr.msra.gmra.mrb[36].mxu1 %vm959_vm6, %v1410_v17  ;;  %12330 = vmatmul.mubr.msk.f32.vlgmr.msra.gmra.mrb[46].mxu0 %vm959_vm6, %v1565_v56 }
 0x3d5   :  { %12309 = vmatprep.mubr.msk.f32.mxu1 %vm14379_vm1, %v18568_v14  ;;  %12332 = vmatprep.mubr.msk.f32.mxu0 %vm14379_vm1, %v18568_v14 }
 0x3d6   :  { %12351 = vmatpush3.msk.msra.mxu1 %vm981_vm5, %v660_v16  ;;  %12374 = vmatpush3.msk.msra.mxu0 %vm981_vm5, %v651_v15  ;;  %v1876_v31 = vpop.trf.xlu0 }
 0x3d7   :  { %v1411_v21 = vpop.trf.xlu1  ;;  %12396 = vmatprep.subr.mxu1 %v18568_v14  ;;  %12419 = vmatprep.subr.mxu0 %v18568_v14 }
 0x3d8   :  { %12310 = vmatmul.mubr.msk.f32.gmra.mrb[38].mxu1 %vm959_vm6, %v1411_v21  ;;  %12333 = vmatmul.mubr.msk.f32.gmra.mrb[48].mxu0 %vm959_vm6, %v1566_v59 }
 0x3d9   :  { %12312 = vmatprep.mubr.msk.f32.mxu1 %vm14379_vm1, %v18568_v14  ;;  %12335 = vmatprep.mubr.msk.f32.mxu0 %vm14379_vm1, %v18568_v14 }
 0x3da   :  { %v1877_v33 = vpop.trf.xlu0 }
 0x3db   :  { %v1412_v13 = vpop.trf.xlu1 }
 0x3dc   :  { %12313 = vmatmul.mubr.msk.f32.gmra.mrb[40].mxu1 %vm959_vm6, %v1412_v13  ;;  %12336 = vmatmul.mubr.msk.f32.gmra.mrb[50].mxu0 %vm959_vm6, %v1567_v2 }
 0x3dd   :  { %12315 = vmatprep.mubr.msk.f32.mxu1 %vm14379_vm1, %v18568_v14  ;;  %12338 = vmatprep.mubr.msk.f32.mxu0 %vm14379_vm1, %v18568_v14 }
 0x3de   :  { %v1878_v39 = vpop.trf.xlu0 }
 0x3df   :  { %v1413_v24 = vpop.trf.xlu1 }
 0x3e0   :  { %12316 = vmatmul.mubr.msk.f32.gmra.mrb[42].mxu1 %vm959_vm6, %v1413_v24  ;;  %12339 = vmatmul.mubr.msk.f32.gmra.mrb[52].mxu0 %vm959_vm6, %v1568_v5 }
 0x3e1   :  { %12318 = vmatprep.mubr.msk.f32.mxu1 %vm14379_vm1, %v18568_v14  ;;  %12341 = vmatprep.mubr.msk.f32.mxu0 %vm14379_vm1, %v18568_v14 }
 0x3e2   :  { %v1879_v43 = vpop.trf.xlu0 }
 0x3e3   :  { %v1414_v28 = vpop.trf.xlu1 }
 0x3e4   :  { %12319 = vmatmul.mubr.msk.f32.gmra.mrb[44].mxu1 %vm959_vm6, %v1414_v28  ;;  %12342 = vmatmul.mubr.msk.f32.gmra.mrb[54].mxu0 %vm959_vm6, %v1569_v12 }
 0x3e5   :  { %12321 = vmatprep.mubr.msk.f32.mxu1 %vm14379_vm1, %v18568_v14  ;;  %12344 = vmatprep.mubr.msk.f32.mxu0 %vm14379_vm1, %v18568_v14 }
 0x3e6   :  { %v1880_v48 = vpop.trf.xlu0 }
 0x3e7   :  { %v1415_v30 = vpop.trf.xlu1 }
 0x3e8   :  { %12322 = vmatmul.mubr.msk.f32.gmra.mrb[46].mxu1 %vm959_vm6, %v1415_v30  ;;  %12345 = vmatmul.mubr.msk.f32.gmra.mrb[56].mxu0 %vm959_vm6, %v1570_v20 }
 0x3e9   :  { %12324 = vmatprep.mubr.msk.f32.mxu1 %vm14379_vm1, %v18568_v14  ;;  %12347 = vmatprep.mubr.msk.f32.mxu0 %vm14379_vm1, %v18568_v14 }
 0x3ea   :  { %v1881_v54 = vpop.trf.xlu0 }
 0x3eb   :  { %v1416_v32 = vpop.trf.xlu1 }
 0x3ec   :  { %12325 = vmatmul.mubr.msk.f32.gmra.mrb[48].mxu1 %vm959_vm6, %v1416_v32  ;;  %12348 = vmatmul.mubr.msk.f32.gmra.mrb[58].mxu0 %vm959_vm6, %v1571_v23 }
 0x3ed   :  { %12352 = vmatprep.mubr.msk.f32.mxu1 %vm14379_vm1, %v18568_v14  ;;  %12375 = vmatprep.mubr.msk.f32.mxu0 %vm14379_vm1, %v18568_v14 }
 0x3ef   :  { %v1720_v37 = vpop.trf.xlu1 }
 0x3f0   :  { %12353 = vmatmul.mubr.msk.f32.vlgmr.msra.gmra.mrb[50].mxu1 %vm959_vm6, %v1720_v37  ;;  %12376 = vmatmul.mubr.msk.f32.vlgmr.msra.gmra.mrb[60].mxu0 %vm959_vm6, %v1875_v26 }
 0x3f1   :  { %12355 = vmatprep.mubr.msk.f32.mxu1 %vm14379_vm1, %v18568_v14  ;;  %12378 = vmatprep.mubr.msk.f32.mxu0 %vm14379_vm1, %v18568_v14 }
 0x3f2   :  { %12397 = vmatpush3.msk.msra.mxu1 %vm981_vm5, %v661_v34  ;;  %12420 = vmatpush3.xpose.msk.msra.mxu0 %vm2225_vm7, %v765_v53 }
 0x3f3   :  { %v1721_v38 = vpop.trf.xlu1  ;;  %12442 = vmatprep.subr.mxu1 %v18568_v14  ;;  %12465 = vmatprep.subr.mxu0 %v18568_v14 }
 0x3f4   :  { %12356 = vmatmul.mubr.msk.f32.gmra.mrb[52].mxu1 %vm959_vm6, %v1721_v38  ;;  %12379 = vmatmul.mubr.msk.f32.gmra.mrb[62].mxu0 %vm959_vm6, %v1876_v31 }
 0x3f5   :  { %12358 = vmatprep.mubr.msk.f32.mxu1 %vm14379_vm1, %v18568_v14  ;;  %12381 = vmatprep.mubr.msk.f32.mxu0 %vm14379_vm1, %v18568_v14 }
 0x3f7   :  { %v1722_v41 = vpop.trf.xlu1 }
 0x3f8   :  { %12359 = vmatmul.mubr.msk.f32.gmra.mrb[54].mxu1 %vm959_vm6, %v1722_v41  ;;  %12382 = vmatmul.mubr.msk.f32.gmra.mrb[64].mxu0 %vm959_vm6, %v1877_v33 }
 0x3f9   :  { %12361 = vmatprep.mubr.msk.f32.mxu1 %vm14379_vm1, %v18568_v14  ;;  %12384 = vmatprep.mubr.msk.f32.mxu0 %vm14379_vm1, %v18568_v14 }
 0x3fb   :  { %v1723_v45 = vpop.trf.xlu1 }
 0x3fc   :  { %12362 = vmatmul.mubr.msk.f32.gmra.mrb[56].mxu1 %vm959_vm6, %v1723_v45  ;;  %12385 = vmatmul.mubr.msk.f32.gmra.mrb[66].mxu0 %vm959_vm6, %v1878_v39 }
 0x3fd   :  { %12364 = vmatprep.mubr.msk.f32.mxu1 %vm14379_vm1, %v18568_v14  ;;  %12387 = vmatprep.mubr.msk.f32.mxu0 %vm14379_vm1, %v18568_v14 }
 0x3ff   :  { %v1724_v47 = vpop.trf.xlu1 }
 0x400   :  { %12365 = vmatmul.mubr.msk.f32.gmra.mrb[58].mxu1 %vm959_vm6, %v1724_v47  ;;  %12388 = vmatmul.mubr.msk.f32.gmra.mrb[68].mxu0 %vm959_vm6, %v1879_v43 }
 0x401   :  { %12367 = vmatprep.mubr.msk.f32.mxu1 %vm14379_vm1, %v18568_v14  ;;  %12390 = vmatprep.mubr.msk.f32.mxu0 %vm14379_vm1, %v18568_v14 }
 0x403   :  { %v1725_v51 = vpop.trf.xlu1 }
 0x404   :  { %12368 = vmatmul.mubr.msk.f32.gmra.mrb[60].mxu1 %vm959_vm6, %v1725_v51  ;;  %12391 = vmatmul.mubr.msk.f32.gmra.mrb[70].mxu0 %vm959_vm6, %v1880_v48 }
 0x405   :  { %12370 = vmatprep.mubr.msk.f32.mxu1 %vm14379_vm1, %v18568_v14  ;;  %12393 = vmatprep.mubr.msk.f32.mxu0 %vm14379_vm1, %v18568_v14 }
 0x407   :  { %v1726_v56 = vpop.trf.xlu1 }
 0x408   :  { %12371 = vmatmul.mubr.msk.f32.gmra.mrb[62].mxu1 %vm959_vm6, %v1726_v56  ;;  %12394 = vmatmul.mubr.msk.f32.gmra.mrb[72].mxu0 %vm959_vm6, %v1881_v54 }
 0x409   :  { %12398 = vmatprep.mubr.msk.f32.mxu1 %vm14379_vm1, %v18568_v14  ;;  %12421 = vmatprep.mubr.msk.f32.mxu0 %vm14379_vm1, %v18568_v14 }
 0x40b   :  { %v2030_v59 = vpop.trf.xlu1 }
 0x40c   :  { %12399 = vmatmul.mubr.msk.f32.vlgmr.msra.gmra.mrb[64].mxu1 %vm959_vm6, %v2030_v59  ;;  %v841_v5 = vpop.permute.xlu0 %840 }
 0x40d   :  { %12401 = vmatprep.mubr.msk.f32.mxu1 %vm14379_vm1, %v18568_v14  ;;  %12443 = vmatpush3.xpose.msk.msra.mxu1 %vm2225_vm7, %v787_v58  ;;  %v871_v6 = vmul.f32 %v841_v5, %v14617_v27  ;;  %v872_v16 = vmul.f32 %v841_v5, %v14619_v29  ;;  %v873_v24 = vmul.f32 %v841_v5, %v14640_v36 }
 0x40e   :  { %12488 = vmatprep.subr.mxu1 %v18568_v14  ;;  %v874_v31 = vmul.f32 %v841_v5, %v14656_v40  ;;  %v875_v37 = vmul.f32 %v841_v5, %v14662_v42  ;;  %v876_v45 = vmul.f32 %v841_v5, %v14668_v44  ;;  %v877_v51 = vmul.f32 %v841_v5, %v14670_v46  ;;  %v14992_v5 = vld [vmem:[%s18563_s6 + $0x8] sm:$0xff] }
 0x40f   :  { %v2031_v60 = vpop.trf.xlu1 }
 0x410   :  { %12402 = vmatmul.mubr.msk.f32.gmra.mrb[66].mxu1 %vm959_vm6, %v2031_v60 }
 0x411   :  { %12404 = vmatprep.mubr.msk.f32.mxu1 %vm14379_vm1, %v18568_v14 }
 0x413   :  { %v2032_v63 = vpop.trf.xlu1 }
 0x414   :  { %12405 = vmatmul.mubr.msk.f32.gmra.mrb[68].mxu1 %vm959_vm6, %v2032_v63 }
 0x415   :  { %12407 = vmatprep.mubr.msk.f32.mxu1 %vm14379_vm1, %v18568_v14 }
 0x417   :  { %v2033_v0 = vpop.trf.xlu1 }
 0x418   :  { %12408 = vmatmul.mubr.msk.f32.gmra.mrb[70].mxu1 %vm959_vm6, %v2033_v0 }
 0x419   :  { %12410 = vmatprep.mubr.msk.f32.mxu1 %vm14379_vm1, %v18568_v14 }
 0x41b   :  { %v2034_v1 = vpop.trf.xlu1 }
 0x41c   :  { %12411 = vmatmul.mubr.msk.f32.gmra.mrb[72].mxu1 %vm959_vm6, %v2034_v1 }
 0x41d   :  { %12413 = vmatprep.mubr.msk.f32.mxu1 %vm14379_vm1, %v18568_v14 }
 0x41f   :  { %v2035_v2 = vpop.trf.xlu1 }
 0x420   :  { %12414 = vmatmul.mubr.msk.f32.gmra.mrb[74].mxu1 %vm959_vm6, %v2035_v2 }
 0x421   :  { %12416 = vmatprep.mubr.msk.f32.mxu1 %vm14379_vm1, %v18568_v14 }
 0x423   :  { %v2036_v4 = vpop.trf.xlu1 }
 0x424   :  { %12417 = vmatmul.mubr.msk.f32.gmra.mrb[76].mxu1 %vm959_vm6, %v2036_v4 }
 0x425   :  { %12444 = vmatprep.mubr.msk.f32.mxu1 %vm14379_vm1, %v18568_v14 }
 0x434   :  { %v14971_v43 = vpop.permute.xlu1 %844 }
 0x435   :  { %v878_v58 = vmul.f32 %v14971_v43, %v14617_v27 }
 0x438   :  { %v14977_v52 = vpop.permute.xlu1 %848 }
 0x439   :  { %v885_v59 = vmul.f32 %v14977_v52, %v14617_v27 }
 0x46f   :  { %v1050_v9 = vpop.f32.mrb[18].mxu0 }
 0x470   :  { %v14951_v12 = vadd.f32 %v1050_v9, %v871_v6  ;;  %v12239_v15 = vpop.f32.mrb[19].mxu0  ;;  %v879_v6 = vmul.f32 %v14971_v43, %v14619_v29  ;;  %v886_v9 = vmul.f32 %v14977_v52, %v14619_v29 }
 0x472   :  { %18717 = vst [vmem:[#allocation25_spill] sm:$0xff] %v14951_v12  ;;  %v14956_v17 = vadd.f32 %v14951_v12, %v14949_v11 }
 0x473   :  { %v1055_v20 = vpop.f32.mrb[20].mxu0 }
 0x474   :  { %v14958_v21 = vadd.f32 %v1055_v20, %v872_v16  ;;  %v12242_v13 = vpop.f32.mrb[21].mxu0  ;;  %v2226_v23 = vsel %vm2225_vm7, %v14956_v17, -inf }
 0x475   :  { %2227 = vmax.xlane.f32.xlu1 %v2226_v23 }
 0x476   :  { %18718 = vst [vmem:[#allocation26_spill] sm:$0xff] %v14958_v21  ;;  %v15004_v13 = vadd.f32 %v14958_v21, %v14992_v5 }
 0x477   :  { %v1060_v26 = vpop.f32.mrb[22].mxu0 }
 0x478   :  { %v14963_v28 = vadd.f32 %v1060_v26, %v873_v24  ;;  %v12245_v30 = vpop.f32.mrb[23].mxu0 }
 0x47a   :  { %18719 = vst [vmem:[#allocation27_spill] sm:$0xff] %v14963_v28 }
 0x47b   :  { %v1065_v32 = vpop.f32.mrb[24].mxu0 }
 0x47c   :  { %v14966_v33 = vadd.f32 %v1065_v32, %v874_v31  ;;  %v12248_v34 = vpop.f32.mrb[25].mxu0  ;;  %v15015_v32 = vld [vmem:[%s18563_s6 + $0x10] sm:$0xff] }
 0x47d   :  { %v880_v34 = vmul.f32 %v14971_v43, %v14640_v36 }
 0x47e   :  { %18720 = vst [vmem:[#allocation28_spill] sm:$0xff] %v14966_v33 }
 0x47f   :  { %v1070_v38 = vpop.f32.mrb[26].mxu0 }
 0x480   :  { %v14969_v39 = vadd.f32 %v1070_v38, %v875_v37  ;;  %v12251_v41 = vpop.f32.mrb[27].mxu0  ;;  %v887_v37 = vmul.f32 %v14977_v52, %v14640_v36 }
 0x482   :  { %18721 = vst [vmem:[#allocation29_spill] sm:$0xff] %v14969_v39 }
 0x483   :  { %v1075_v47 = vpop.f32.mrb[28].mxu0 }
 0x484   :  { %v14974_v48 = vadd.f32 %v1075_v47, %v876_v45  ;;  %v12254_v49 = vpop.f32.mrb[29].mxu0  ;;  %v2229_v47 = vsel %vm2225_vm7, %v15004_v13, -inf }
 0x486   :  { %18722 = vst [vmem:[#allocation30_spill] sm:$0xff] %v14974_v48 }
 0x487   :  { %v1080_v53 = vpop.f32.mrb[30].mxu0 }
 0x488   :  { %v14979_v54 = vadd.f32 %v1080_v53, %v877_v51  ;;  %v12257_v56 = vpop.f32.mrb[31].mxu0 }
 0x48a   :  { %18723 = vst [vmem:[#allocation31_spill] sm:$0xff] %v14979_v54 }
 0x48b   :  { %v1205_v60 = vpop.f32.mrb[22].mxu1  ;;  %v1360_v63 = vpop.f32.mrb[32].mxu0 }
 0x48c   :  { %v14985_v0 = vadd.f32 %v1205_v60, %v878_v58  ;;  %v14987_v1 = vadd.f32 %v1360_v63, %v885_v59  ;;  %v12262_v2 = vpop.f32.mrb[23].mxu1  ;;  %v12285_v4 = vpop.f32.mrb[33].mxu0  ;;  %v15035_v59 = vadd.f32 %v14963_v28, %v15015_v32  ;;  %v15040_v60 = vld [vmem:[%s18563_s6 + $0x18] sm:$0xff]  ;;  %v881_v63 = vmul.f32 %v14971_v43, %v14656_v40 }
 0x48d   :  { %v888_v2 = vmul.f32 %v14977_v52, %v14656_v40 }
 0x48e   :  { %18724 = vst [vmem:[#allocation32_spill] sm:$0xff] %v14985_v0  ;;  %18725 = vst [vmem:[#allocation33_spill] sm:$0xff] %v14987_v1  ;;  %v15000_v15 = vadd.f32 %v14985_v0, %v14949_v11 }
 0x48f   :  { %v1210_v16 = vpop.f32.mrb[24].mxu1  ;;  %v1365_v20 = vpop.f32.mrb[34].mxu0 }
 0x490   :  { %v15006_v23 = vadd.f32 %v1210_v16, %v879_v6  ;;  %v15008_v24 = vadd.f32 %v1365_v20, %v886_v9  ;;  %v2247_v26 = vsel %vm2225_vm7, %v15000_v15, -inf  ;;  %v12265_v30 = vpop.f32.mrb[25].mxu1  ;;  %v12288_v31 = vpop.f32.mrb[35].mxu0  ;;  %v15052_v16 = vadd.f32 %v14966_v33, %v15040_v60 }
 0x491   :  { %2248 = vmax.xlane.f32.xlu0 %v2247_v26  ;;  %v2232_v30 = vsel %vm2225_vm7, %v15035_v59, -inf }
 0x492   :  { %18726 = vst [vmem:[#allocation34_spill] sm:$0xff] %v15006_v23  ;;  %18727 = vst [vmem:[#allocation35_spill] sm:$0xff] %v15008_v24  ;;  %v15023_v38 = vadd.f32 %v15006_v23, %v14992_v5  ;;  %v15179_v21 = vadd.f32 %v15008_v24, %v14992_v5 }
 0x493   :  { %v1215_v41 = vpop.f32.mrb[26].mxu1  ;;  %v1370_v45 = vpop.f32.mrb[36].mxu0 }
 0x494   :  { %v15027_v49 = vadd.f32 %v1215_v41, %v880_v34  ;;  %v15029_v51 = vadd.f32 %v1370_v45, %v887_v37  ;;  %v2250_v53 = vsel %vm2225_vm7, %v15023_v38, -inf  ;;  %v12268_v56 = vpop.f32.mrb[27].mxu1  ;;  %v12291_v58 = vpop.f32.mrb[37].mxu0  ;;  %v15065_v41 = vld [vmem:[%s18563_s6 + $0x20] sm:$0xff] }
 0x495   :  { %2230 = vmax.xlane.f32.xlu0 %v2229_v47  ;;  %2251 = vmax.xlane.f32.xlu1 %v2250_v53  ;;  %v15067_v45 = vpop.permute.xlu1 %852  ;;  %v882_v47 = vmul.f32 %v14971_v43, %v14662_v42  ;;  %v889_v53 = vmul.f32 %v14977_v52, %v14662_v42 }
 0x496   :  { %18728 = vst [vmem:[#allocation36_spill] sm:$0xff] %v15027_v49  ;;  %18729 = vst [vmem:[#allocation37_spill] sm:$0xff] %v15029_v51  ;;  %v15048_v4 = vadd.f32 %v15027_v49, %v15015_v32  ;;  %v896_v19 = vmul.f32 %v15067_v45, %v14662_v42  ;;  %v898_v61 = vmul.f32 %v15067_v45, %v14670_v46 }
 0x497   :  { %v1220_v6 = vpop.f32.mrb[28].mxu1  ;;  %v1375_v9 = vpop.f32.mrb[38].mxu0 }
 0x498   :  { %v15054_v20 = vadd.f32 %v1220_v6, %v881_v63  ;;  %v15056_v26 = vadd.f32 %v1375_v9, %v888_v2  ;;  %v2253_v31 = vsel %vm2225_vm7, %v15048_v4, -inf  ;;  %v12271_v34 = vpop.f32.mrb[29].mxu1  ;;  %v12294_v37 = vpop.f32.mrb[39].mxu0  ;;  %v2235_v2 = vsel %vm2225_vm7, %v15052_v16, -inf }
 0x499   :  { %2233 = vmax.xlane.f32.xlu0 %v2232_v30  ;;  %2254 = vmax.xlane.f32.xlu1 %v2253_v31  ;;  %v15087_v37 = vadd.f32 %v14969_v39, %v15065_v41 }
 0x49a   :  { %18730 = vst [vmem:[#allocation38_spill] sm:$0xff] %v15054_v20  ;;  %18731 = vst [vmem:[#allocation39_spill] sm:$0xff] %v15056_v26  ;;  %v15075_v56 = vadd.f32 %v15054_v20, %v15040_v60  ;;  %v15219_v25 = vadd.f32 %v15056_v26, %v15040_v60 }
 0x49b   :  { %v1225_v58 = vpop.f32.mrb[30].mxu1  ;;  %v1380_v63 = vpop.f32.mrb[40].mxu0 }
 0x49c   :  { %v15079_v6 = vadd.f32 %v1225_v58, %v882_v47  ;;  %v15081_v9 = vadd.f32 %v1380_v63, %v889_v53  ;;  %v2256_v30 = vsel %vm2225_vm7, %v15075_v56, -inf  ;;  %v12274_v31 = vpop.f32.mrb[31].mxu1  ;;  %v12297_v34 = vpop.f32.mrb[41].mxu0  ;;  %v883_v47 = vmul.f32 %v14971_v43, %v14668_v44 }
 0x49d   :  { %2236 = vmax.xlane.f32.xlu1 %v2235_v2  ;;  %2257 = vmax.xlane.f32.xlu0 %v2256_v30  ;;  %v890_v53 = vmul.f32 %v14977_v52, %v14668_v44  ;;  %v15104_v34 = vadd.f32 %v14974_v48, %v15092_v10  ;;  %v2238_v30 = vsel %vm2225_vm7, %v15087_v37, -inf  ;;  %v15119_v48 = vpop.permute.xlu1 %856 }
 0x49e   :  { %18732 = vst [vmem:[#allocation40_spill] sm:$0xff] %v15079_v6  ;;  %18733 = vst [vmem:[#allocation41_spill] sm:$0xff] %v15081_v9  ;;  %v15100_v58 = vadd.f32 %v15079_v6, %v15065_v41  ;;  %v15117_v6 = vld [vmem:[%s18563_s6 + $0x30] sm:$0xff] }
 0x49f   :  { %v1230_v63 = vpop.f32.mrb[32].mxu1  ;;  %v1385_v31 = vpop.f32.mrb[42].mxu0 }
 0x4a0   :  { %v15106_v14 = vadd.f32 %v1230_v63, %v883_v47  ;;  %v15108_v2 = vadd.f32 %v1385_v31, %v890_v53  ;;  %v2259_v3 = vsel %vm2225_vm7, %v15100_v58, -inf  ;;  %v12277_v22 = vpop.f32.mrb[33].mxu1  ;;  %v12300_v39 = vpop.f32.mrb[43].mxu0  ;;  %v884_v47 = vmul.f32 %v14971_v43, %v14670_v46 }
 0x4a1   :  { %2239 = vmax.xlane.f32.xlu1 %v2238_v30  ;;  %2260 = vmax.xlane.f32.xlu0 %v2259_v3  ;;  %v891_v53 = vmul.f32 %v14977_v52, %v14670_v46  ;;  %v2241_v3 = vsel %vm2225_vm7, %v15104_v34, -inf  ;;  %v15139_v52 = vadd.f32 %v14979_v54, %v15117_v6 }
 0x4a2   :  { %18734 = vst [vmem:[#allocation42_spill] sm:$0xff] %v15106_v14  ;;  %18735 = vst [vmem:[#allocation43_spill] sm:$0xff] %v15108_v2  ;;  %v15127_v63 = vadd.f32 %v15106_v14, %v15092_v10  ;;  %v892_v14 = vmul.f32 %v15067_v45, %v14617_v27  ;;  %v15261_v62 = vadd.f32 %v15108_v2, %v15092_v10 }
 0x4a3   :  { %v1235_v22 = vpop.f32.mrb[34].mxu1  ;;  %v1390_v39 = vpop.f32.mrb[44].mxu0 }
 0x4a4   :  { %v15131_v31 = vadd.f32 %v1235_v22, %v884_v47  ;;  %v15133_v30 = vadd.f32 %v1390_v39, %v891_v53  ;;  %v2262_v20 = vsel %vm2225_vm7, %v15127_v63, -inf  ;;  %v12280_v43 = vpop.f32.mrb[35].mxu1  ;;  %v12303_v33 = vpop.f32.mrb[45].mxu0  ;;  %v899_v47 = vmul.f32 %v15119_v48, %v14617_v27 }
 0x4a5   :  { %2242 = vmax.xlane.f32.xlu0 %v2241_v3  ;;  %2263 = vmax.xlane.f32.xlu1 %v2262_v20  ;;  %v15151_v33 = vadd.f32 %v14987_v1, %v14949_v11  ;;  %v2244_v20 = vsel %vm2225_vm7, %v15139_v52, -inf  ;;  %v900_v1 = vmul.f32 %v15119_v48, %v14619_v29 }
 0x4a6   :  { %18736 = vst [vmem:[#allocation44_spill] sm:$0xff] %v15131_v31  ;;  %18737 = vst [vmem:[#allocation45_spill] sm:$0xff] %v15133_v30  ;;  %v15147_v53 = vadd.f32 %v15131_v31, %v15117_v6  ;;  %v893_v31 = vmul.f32 %v15067_v45, %v14619_v29 }
 0x4a7   :  { %v1515_v22 = vpop.f32.mrb[36].mxu1  ;;  %v1670_v39 = vpop.f32.mrb[46].mxu0 }
 0x4a8   :  { %v15153_v43 = vadd.f32 %v1515_v22, %v892_v14  ;;  %v15155_v3 = vadd.f32 %v1670_v39, %v899_v47  ;;  %v2265_v54 = vsel %vm2225_vm7, %v15147_v53, -inf  ;;  %v12308_v49 = vpop.f32.mrb[37].mxu1  ;;  %v12331_v28 = vpop.f32.mrb[47].mxu0  ;;  %v2268_v39 = vsel %vm2225_vm7, %v15151_v33, -inf }
 0x4a9   :  { %2245 = vmax.xlane.f32.xlu0 %v2244_v20  ;;  %2266 = vmax.xlane.f32.xlu1 %v2265_v54 }
 0x4aa   :  { %18738 = vst [vmem:[#allocation46_spill] sm:$0xff] %v15153_v43  ;;  %18739 = vst [vmem:[#allocation47_spill] sm:$0xff] %v15155_v3  ;;  %v15167_v14 = vadd.f32 %v15153_v43, %v14949_v11  ;;  %v894_v43 = vmul.f32 %v15067_v45, %v14640_v36  ;;  %v15303_v57 = vadd.f32 %v15155_v3, %v14949_v11 }
 0x4ab   :  { %v1520_v47 = vpop.f32.mrb[38].mxu1  ;;  %v1675_v22 = vpop.f32.mrb[48].mxu0 }
 0x4ac   :  { %v15171_v23 = vadd.f32 %v1520_v47, %v893_v31  ;;  %v15173_v28 = vadd.f32 %v1675_v22, %v900_v1  ;;  %v2289_v54 = vsel %vm2225_vm7, %v15167_v14, -inf  ;;  %v12311_v49 = vpop.f32.mrb[39].mxu1  ;;  %v12334_v20 = vpop.f32.mrb[49].mxu0  ;;  %v901_v31 = vmul.f32 %v15119_v48, %v14640_v36 }
 0x4ad   :  { %2269 = vmax.xlane.f32.xlu0 %v2268_v39  ;;  %2290 = vmax.xlane.f32.xlu1 %v2289_v54  ;;  %v15191_v49 = vadd.f32 %v15029_v51, %v15015_v32  ;;  %v2271_v54 = vsel %vm2225_vm7, %v15179_v21, -inf  ;;  %v902_v51 = vmul.f32 %v15119_v48, %v14656_v40 }
 0x4ae   :  { %18740 = vst [vmem:[#allocation48_spill] sm:$0xff] %v15171_v23  ;;  %18741 = vst [vmem:[#allocation49_spill] sm:$0xff] %v15173_v28  ;;  %v15187_v1 = vadd.f32 %v15171_v23, %v14992_v5  ;;  %v895_v23 = vmul.f32 %v15067_v45, %v14656_v40 }
 0x4af   :  { %v1525_v47 = vpop.f32.mrb[40].mxu1  ;;  %v1680_v22 = vpop.f32.mrb[50].mxu0 }
 0x4b0   :  { %v15193_v20 = vadd.f32 %v1525_v47, %v894_v43  ;;  %v15195_v39 = vadd.f32 %v1680_v22, %v901_v31  ;;  %v2292_v24 = vsel %vm2225_vm7, %v15187_v1, -inf  ;;  %v12314_v0 = vpop.f32.mrb[41].mxu1  ;;  %v12337_v12 = vpop.f32.mrb[51].mxu0  ;;  %v2274_v22 = vsel %vm2225_vm7, %v15191_v49, -inf }
 0x4b1   :  { %2272 = vmax.xlane.f32.xlu0 %v2271_v54  ;;  %2293 = vmax.xlane.f32.xlu1 %v2292_v24 }
 0x4b2   :  { %18742 = vst [vmem:[#allocation50_spill] sm:$0xff] %v15193_v20  ;;  %18743 = vst [vmem:[#allocation51_spill] sm:$0xff] %v15195_v39  ;;  %v15207_v43 = vadd.f32 %v15193_v20, %v15015_v32  ;;  %v15221_v20 = vpop.permute.xlu0 %860 }
 0x4b3   :  { %v1530_v31 = vpop.f32.mrb[42].mxu1  ;;  %v1685_v47 = vpop.f32.mrb[52].mxu0 }
 0x4b4   :  { %v15211_v35 = vadd.f32 %v1530_v31, %v895_v23  ;;  %v15213_v12 = vadd.f32 %v1685_v47, %v902_v51  ;;  %v2295_v0 = vsel %vm2225_vm7, %v15207_v43, -inf  ;;  %v12317_v24 = vpop.f32.mrb[43].mxu1  ;;  %v12340_v54 = vpop.f32.mrb[53].mxu0  ;;  %v903_v23 = vmul.f32 %v15119_v48, %v14662_v42 }
 0x4b5   :  { %2275 = vmax.xlane.f32.xlu0 %v2274_v22  ;;  %2296 = vmax.xlane.f32.xlu1 %v2295_v0  ;;  %v15233_v24 = vadd.f32 %v15081_v9, %v15065_v41  ;;  %v2277_v54 = vsel %vm2225_vm7, %v15219_v25, -inf  ;;  %v904_v9 = vmul.f32 %v15119_v48, %v14668_v44 }
 0x4b6   :  { %18744 = vst [vmem:[#allocation52_spill] sm:$0xff] %v15211_v35  ;;  %18745 = vst [vmem:[#allocation53_spill] sm:$0xff] %v15213_v12  ;;  %v15229_v51 = vadd.f32 %v15211_v35, %v15040_v60  ;;  %v897_v35 = vmul.f32 %v15067_v45, %v14668_v44  ;;  %v2283_v45 = vsel %vm2225_vm7, %v15261_v62, -inf }
 0x4b7   :  { %v1535_v31 = vpop.f32.mrb[44].mxu1  ;;  %v1690_v47 = vpop.f32.mrb[54].mxu0 }
 0x4b8   :  { %v15235_v22 = vadd.f32 %v1535_v31, %v896_v19  ;;  %v15237_v0 = vadd.f32 %v1690_v47, %v903_v23  ;;  %v2298_v26 = vsel %vm2225_vm7, %v15229_v51, -inf  ;;  %v12320_v18 = vpop.f32.mrb[45].mxu1  ;;  %v12343_v8 = vpop.f32.mrb[55].mxu0  ;;  %v2280_v47 = vsel %vm2225_vm7, %v15233_v24, -inf }
 0x4b9   :  { %2278 = vmax.xlane.f32.xlu0 %v2277_v54  ;;  %2299 = vmax.xlane.f32.xlu1 %v2298_v26 }
 0x4ba   :  { %18746 = vst [vmem:[#allocation54_spill] sm:$0xff] %v15235_v22  ;;  %18747 = vst [vmem:[#allocation55_spill] sm:$0xff] %v15237_v0  ;;  %v15249_v19 = vadd.f32 %v15235_v22, %v15065_v41  ;;  %v15263_v22 = vpop.permute.xlu0 %864 }
 0x4bb   :  { %v1540_v23 = vpop.f32.mrb[46].mxu1  ;;  %v1695_v31 = vpop.f32.mrb[56].mxu0 }
 0x4bc   :  { %v15253_v7 = vadd.f32 %v1540_v23, %v897_v35  ;;  %v15255_v8 = vadd.f32 %v1695_v31, %v904_v9  ;;  %v2301_v18 = vsel %vm2225_vm7, %v15249_v19, -inf  ;;  %v12323_v26 = vpop.f32.mrb[47].mxu1  ;;  %v12346_v54 = vpop.f32.mrb[57].mxu0  ;;  %v905_v35 = vmul.f32 %v15119_v48, %v14670_v46 }
 0x4bd   :  { %2281 = vmax.xlane.f32.xlu0 %v2280_v47  ;;  %2302 = vmax.xlane.f32.xlu1 %v2301_v18  ;;  %v15275_v26 = vadd.f32 %v15133_v30, %v15117_v6  ;;  %v913_v30 = vmul.f32 %v15263_v22, %v14617_v27 }
 0x4be   :  { %18748 = vst [vmem:[#allocation56_spill] sm:$0xff] %v15253_v7  ;;  %18749 = vst [vmem:[#allocation57_spill] sm:$0xff] %v15255_v8  ;;  %v15271_v9 = vadd.f32 %v15253_v7, %v15092_v10  ;;  %v906_v7 = vmul.f32 %v15221_v20, %v14617_v27 }
 0x4bf   :  { %v1545_v23 = vpop.f32.mrb[48].mxu1  ;;  %v1700_v31 = vpop.f32.mrb[58].mxu0 }
 0x4c0   :  { %18750 = vst [vmem:[#allocation58_spill] sm:$0xff] %v15271_v9  ;;  %v15277_v47 = vadd.f32 %v1545_v23, %v898_v61  ;;  %v15279_v18 = vadd.f32 %v1700_v31, %v905_v35  ;;  %v2304_v48 = vsel %vm2225_vm7, %v15271_v9, -inf  ;;  %v12326_v54 = vpop.f32.mrb[49].mxu1  ;;  %v12349_v2 = vpop.f32.mrb[59].mxu0  ;;  %v2286_v31 = vsel %vm2225_vm7, %v15275_v26, -inf }
 0x4c1   :  { %2284 = vmax.xlane.f32.xlu0 %v2283_v45  ;;  %2305 = vmax.xlane.f32.xlu1 %v2304_v48  ;;  %v15343_v9 = vadd.f32 %v15195_v39, %v15015_v32 }
 0x4c2   :  { %18751 = vst [vmem:[#allocation59_spill] sm:$0xff] %v15277_v47  ;;  %18752 = vst [vmem:[#allocation60_spill] sm:$0xff] %v15279_v18  ;;  %v15291_v61 = vadd.f32 %v15277_v47, %v15117_v6  ;;  %v907_v47 = vmul.f32 %v15221_v20, %v14619_v29 }
 0x4c3   :  { %v1825_v35 = vpop.f32.mrb[50].mxu1  ;;  %v1980_v23 = vpop.f32.mrb[60].mxu0  ;;  %18763 = vst [vmem:[#allocation71_spill] sm:$0xff] %v15343_v9 }
 0x4c4   :  { %18753 = vst [vmem:[#allocation61_spill] sm:$0xff] %v15291_v61  ;;  %v15295_v55 = vadd.f32 %v1825_v35, %v906_v7  ;;  %v15297_v2 = vadd.f32 %v1980_v23, %v913_v30  ;;  %v2307_v45 = vsel %vm2225_vm7, %v15291_v61, -inf  ;;  %v12354_v48 = vpop.f32.mrb[51].mxu1  ;;  %v12377_v54 = vpop.f32.mrb[61].mxu0  ;;  %v914_v7 = vmul.f32 %v15263_v22, %v14619_v29 }
 0x4c5   :  { %2287 = vmax.xlane.f32.xlu0 %v2286_v31  ;;  %2308 = vmax.xlane.f32.xlu1 %v2307_v45  ;;  %v15315_v48 = vadd.f32 %v15173_v28, %v14992_v5  ;;  %v2310_v45 = vsel %vm2225_vm7, %v15303_v57, -inf  ;;  %v915_v28 = vmul.f32 %v15263_v22, %v14640_v36 }
 0x4c6   :  { %18754 = vst [vmem:[#allocation62_spill] sm:$0xff] %v15295_v55  ;;  %18755 = vst [vmem:[#allocation63_spill] sm:$0xff] %v15297_v2  ;;  %v15311_v30 = vadd.f32 %v15295_v55, %v14949_v11  ;;  %v908_v55 = vmul.f32 %v15221_v20, %v14640_v36 }
 0x4c7   :  { %v1830_v35 = vpop.f32.mrb[52].mxu1  ;;  %v1985_v23 = vpop.f32.mrb[62].mxu0  ;;  %18757 = vst [vmem:[#allocation65_spill] sm:$0xff] %v15315_v48 }
 0x4c8   :  { %18756 = vst [vmem:[#allocation64_spill] sm:$0xff] %v15311_v30  ;;  %v15317_v54 = vadd.f32 %v1830_v35, %v907_v47  ;;  %v15319_v31 = vadd.f32 %v1985_v23, %v914_v7  ;;  %v2331_v3 = vsel %vm2225_vm7, %v15311_v30, -inf  ;;  %v12357_v50 = vpop.f32.mrb[53].mxu1  ;;  %v12380_v61 = vpop.f32.mrb[63].mxu0  ;;  %v2313_v23 = vsel %vm2225_vm7, %v15315_v48, -inf }
 0x4c9   :  { %2311 = vmax.xlane.f32.xlu0 %v2310_v45  ;;  %2332 = vmax.xlane.f32.xlu1 %v2331_v3 }
 0x4ca   :  { %18758 = vst [vmem:[#allocation66_spill] sm:$0xff] %v15317_v54  ;;  %18759 = vst [vmem:[#allocation67_spill] sm:$0xff] %v15319_v31  ;;  %v15331_v47 = vadd.f32 %v15317_v54, %v14992_v5  ;;  %v909_v54 = vmul.f32 %v15221_v20, %v14656_v40 }
 0x4cb   :  { %v1835_v7 = vpop.f32.mrb[54].mxu1  ;;  %v1990_v35 = vpop.f32.mrb[64].mxu0 }
 0x4cc   :  { %18760 = vst [vmem:[#allocation68_spill] sm:$0xff] %v15331_v47  ;;  %v15335_v30 = vadd.f32 %v1835_v7, %v908_v55  ;;  %v15337_v50 = vadd.f32 %v1990_v35, %v915_v28  ;;  %v2334_v3 = vsel %vm2225_vm7, %v15331_v47, -inf  ;;  %v12360_v61 = vpop.f32.mrb[55].mxu1  ;;  %v12383_v45 = vpop.f32.mrb[65].mxu0  ;;  %v916_v55 = vmul.f32 %v15263_v22, %v14656_v40 }
 0x4cd   :  { %2314 = vmax.xlane.f32.xlu0 %v2313_v23  ;;  %2335 = vmax.xlane.f32.xlu1 %v2334_v3  ;;  %v15355_v61 = vadd.f32 %v15213_v12, %v15040_v60  ;;  %v2316_v3 = vsel %vm2225_vm7, %v15343_v9, -inf  ;;  %v917_v12 = vmul.f32 %v15263_v22, %v14662_v42  ;;  %v15383_v9 = vadd.f32 %v15237_v0, %v15065_v41 }
 0x4ce   :  { %18761 = vst [vmem:[#allocation69_spill] sm:$0xff] %v15335_v30  ;;  %18762 = vst [vmem:[#allocation70_spill] sm:$0xff] %v15337_v50  ;;  %v15351_v28 = vadd.f32 %v15335_v30, %v15015_v32  ;;  %v910_v30 = vmul.f32 %v15221_v20, %v14662_v42 }
 0x4cf   :  { %v1840_v7 = vpop.f32.mrb[56].mxu1  ;;  %v1995_v35 = vpop.f32.mrb[66].mxu0  ;;  %18765 = vst [vmem:[#allocation73_spill] sm:$0xff] %v15355_v61 }
 0x4d0   :  { %18764 = vst [vmem:[#allocation72_spill] sm:$0xff] %v15351_v28  ;;  %v15357_v45 = vadd.f32 %v1840_v7, %v909_v54  ;;  %v15359_v23 = vadd.f32 %v1995_v35, %v916_v55  ;;  %v2337_v39 = vsel %vm2225_vm7, %v15351_v28, -inf  ;;  %v12363_v47 = vpop.f32.mrb[57].mxu1  ;;  %v12386_v48 = vpop.f32.mrb[67].mxu0  ;;  %v2319_v35 = vsel %vm2225_vm7, %v15355_v61, -inf }
 0x4d1   :  { %2317 = vmax.xlane.f32.xlu0 %v2316_v3  ;;  %2338 = vmax.xlane.f32.xlu1 %v2337_v39 }
 0x4d2   :  { %18766 = vst [vmem:[#allocation74_spill] sm:$0xff] %v15357_v45  ;;  %18767 = vst [vmem:[#allocation75_spill] sm:$0xff] %v15359_v23  ;;  %v15371_v54 = vadd.f32 %v15357_v45, %v15040_v60  ;;  %v911_v45 = vmul.f32 %v15221_v20, %v14668_v44 }
 0x4d3   :  { %v1845_v55 = vpop.f32.mrb[58].mxu1  ;;  %v2000_v7 = vpop.f32.mrb[68].mxu0 }
 0x4d4   :  { %18768 = vst [vmem:[#allocation76_spill] sm:$0xff] %v15371_v54  ;;  %v15375_v28 = vadd.f32 %v1845_v55, %v910_v30  ;;  %v15377_v48 = vadd.f32 %v2000_v7, %v917_v12  ;;  %v2340_v39 = vsel %vm2225_vm7, %v15371_v54, -inf  ;;  %v12366_v47 = vpop.f32.mrb[59].mxu1  ;;  %v12389_v3 = vpop.f32.mrb[69].mxu0  ;;  %v918_v30 = vmul.f32 %v15263_v22, %v14668_v44 }
 0x4d5   :  { %2320 = vmax.xlane.f32.xlu0 %v2319_v35  ;;  %2341 = vmax.xlane.f32.xlu1 %v2340_v39  ;;  %v15395_v47 = vadd.f32 %v15255_v8, %v15092_v10  ;;  %v2322_v39 = vsel %vm2225_vm7, %v15383_v9, -inf  ;;  %v912_v8 = vmul.f32 %v15221_v20, %v14670_v46 }
 0x4d6   :  { %18769 = vst [vmem:[#allocation77_spill] sm:$0xff] %v15375_v28  ;;  %18770 = vst [vmem:[#allocation78_spill] sm:$0xff] %v15377_v48  ;;  %v15391_v12 = vadd.f32 %v15375_v28, %v15065_v41  ;;  %v15405_v28 = vpop.permute.xlu1 %868 }
 0x4d7   :  { %v1850_v55 = vpop.f32.mrb[60].mxu1  ;;  %v2005_v7 = vpop.f32.mrb[70].mxu0 }
 0x4d8   :  { %18771 = vst [vmem:[#allocation79_spill] sm:$0xff] %v15391_v12  ;;  %v15397_v3 = vadd.f32 %v1850_v55, %v911_v45  ;;  %v15399_v35 = vadd.f32 %v2005_v7, %v918_v30  ;;  %v2343_v0 = vsel %vm2225_vm7, %v15391_v12, -inf  ;;  %v12369_v54 = vpop.f32.mrb[61].mxu1  ;;  %v12392_v61 = vpop.f32.mrb[71].mxu0  ;;  %v919_v45 = vmul.f32 %v15263_v22, %v14670_v46 }
 0x4d9   :  { %2323 = vmax.xlane.f32.xlu0 %v2322_v39  ;;  %2344 = vmax.xlane.f32.xlu1 %v2343_v0  ;;  %v2325_v54 = vsel %vm2225_vm7, %v15395_v47, -inf  ;;  %v15425_v22 = vadd.f32 %v15279_v18, %v15117_v6 }
 0x4da   :  { %18772 = vst [vmem:[#allocation80_spill] sm:$0xff] %v15397_v3  ;;  %18773 = vst [vmem:[#allocation81_spill] sm:$0xff] %v15399_v35  ;;  %v15413_v30 = vadd.f32 %v15397_v3, %v15092_v10  ;;  %v920_v3 = vmul.f32 %v15405_v28, %v14617_v27 }
 0x4db   :  { %v1855_v55 = vpop.f32.mrb[62].mxu1  ;;  %v2010_v7 = vpop.f32.mrb[72].mxu0 }
 0x4dc   :  { %v15417_v61 = vadd.f32 %v1855_v55, %v912_v8  ;;  %v15419_v0 = vadd.f32 %v2010_v7, %v919_v45  ;;  %v2346_v39 = vsel %vm2225_vm7, %v15413_v30, -inf  ;;  %v12372_v20 = vpop.f32.mrb[63].mxu1  ;;  %v12395_v12 = vpop.f32.mrb[73].mxu0  ;;  %v15435_v55 = vadd.f32 %v15297_v2, %v14949_v11 }
 0x4dd   :  { %2326 = vmax.xlane.f32.xlu0 %v2325_v54  ;;  %2347 = vmax.xlane.f32.xlu1 %v2346_v39  ;;  %v2328_v20 = vsel %vm2225_vm7, %v15425_v22, -inf  ;;  %v921_v39 = vmul.f32 %v15405_v28, %v14619_v29 }
 0x4de   :  { %18774 = vst [vmem:[#allocation82_spill] sm:$0xff] %v15417_v61  ;;  %18775 = vst [vmem:[#allocation83_spill] sm:$0xff] %v15419_v0  ;;  %v15431_v8 = vadd.f32 %v15417_v61, %v15117_v6 }
 0x4df   :  { %v2135_v45 = vpop.f32.mrb[64].mxu1 }
 0x4e0   :  { %v15437_v7 = vadd.f32 %v2135_v45, %v920_v3  ;;  %v2349_v12 = vsel %vm2225_vm7, %v15431_v8, -inf  ;;  %v12400_v54 = vpop.f32.mrb[65].mxu1  ;;  %v2352_v3 = vsel %vm2225_vm7, %v15435_v55, -inf }
 0x4e1   :  { %2329 = vmax.xlane.f32.xlu0 %v2328_v20  ;;  %2350 = vmax.xlane.f32.xlu1 %v2349_v12  ;;  %v15457_v20 = vadd.f32 %v15319_v31, %v14992_v5  ;;  %v15461_v12 = vadd.f32 %v15419_v0, %v15117_v6 }
 0x4e2   :  { %18776 = vst [vmem:[#allocation84_spill] sm:$0xff] %v15437_v7  ;;  %v15447_v61 = vadd.f32 %v15437_v7, %v14949_v11  ;;  %v922_v11 = vmul.f32 %v15405_v28, %v14640_v36  ;;  %v15483_v36 = vadd.f32 %v15337_v50, %v15015_v32 }
 0x4e3   :  { %v2140_v2 = vpop.f32.mrb[66].mxu1 }
 0x4e4   :  { %v15451_v45 = vadd.f32 %v2140_v2, %v921_v39  ;;  %v2373_v18 = vsel %vm2225_vm7, %v15447_v61, -inf  ;;  %v12403_v27 = vpop.f32.mrb[67].mxu1  ;;  %v2355_v39 = vsel %vm2225_vm7, %v15457_v20, -inf }
 0x4e5   :  { %2353 = vmax.xlane.f32.xlu0 %v2352_v3  ;;  %2374 = vmax.xlane.f32.xlu1 %v2373_v18  ;;  %v2370_v27 = vsel %vm2225_vm7, %v15461_v12, -inf  ;;  %v923_v18 = vmul.f32 %v15405_v28, %v14656_v40 }
 0x4e6   :  { %18777 = vst [vmem:[#allocation85_spill] sm:$0xff] %v15451_v45  ;;  %v15473_v7 = vadd.f32 %v15451_v45, %v14992_v5  ;;  %v924_v5 = vmul.f32 %v15405_v28, %v14662_v42 }
 0x4e7   :  { %v2145_v54 = vpop.f32.mrb[68].mxu1 }
 0x4e8   :  { %v15465_v2 = vadd.f32 %v2145_v54, %v922_v11  ;;  %v12406_v31 = vpop.f32.mrb[69].mxu1  ;;  %v2376_v11 = vsel %vm2225_vm7, %v15473_v7, -inf }
 0x4e9   :  { %2356 = vmax.xlane.f32.xlu0 %v2355_v39  ;;  %2371 = vmax.xlane.f32.xlu1 %v2370_v27  ;;  %v2358_v27 = vsel %vm2225_vm7, %v15483_v36, -inf }
 0x4ea   :  { %18778 = vst [vmem:[#allocation86_spill] sm:$0xff] %v15465_v2 }
 0x4eb   :  { %v2150_v3 = vpop.f32.mrb[70].mxu1 }
 0x4ec   :  { %v15477_v0 = vadd.f32 %v2150_v3, %v923_v18  ;;  %v12409_v54 = vpop.f32.mrb[71].mxu1  ;;  %v15493_v3 = vadd.f32 %v15465_v2, %v15015_v32  ;;  %v926_v32 = vmul.f32 %v15405_v28, %v14670_v46 }
 0x4ed   :  { %2377 = vmax.xlane.f32.xlu0 %v2376_v11  ;;  %v925_v54 = vmul.f32 %v15405_v28, %v14668_v44 }
 0x4ee   :  { %18779 = vst [vmem:[#allocation87_spill] sm:$0xff] %v15477_v0  ;;  %v2379_v45 = vsel %vm2225_vm7, %v15493_v3, -inf }
 0x4ef   :  { %v2155_v31 = vpop.f32.mrb[72].mxu1 }
 0x4f0   :  { %v15487_v39 = vadd.f32 %v2155_v31, %v924_v5  ;;  %v12412_v18 = vpop.f32.mrb[73].mxu1  ;;  %v15503_v31 = vadd.f32 %v15359_v23, %v15040_v60 }
 0x4f1   :  { %2359 = vmax.xlane.f32.xlu0 %v2358_v27 }
 0x4f2   :  { %18780 = vst [vmem:[#allocation88_spill] sm:$0xff] %v15487_v39  ;;  %v2361_v2 = vsel %vm2225_vm7, %v15503_v31, -inf }
 0x4f3   :  { %v2160_v50 = vpop.f32.mrb[74].mxu1 }
 0x4f4   :  { %v15497_v11 = vadd.f32 %v2160_v50, %v925_v54  ;;  %v12415_v5 = vpop.f32.mrb[75].mxu1  ;;  %v15513_v50 = vadd.f32 %v15477_v0, %v15040_v60 }
 0x4f5   :  { %2380 = vmax.xlane.f32.xlu0 %v2379_v45  ;;  %v15519_v45 = vadd.f32 %v15377_v48, %v15065_v41 }
 0x4f6   :  { %18781 = vst [vmem:[#allocation89_spill] sm:$0xff] %v15497_v11  ;;  %v2382_v5 = vsel %vm2225_vm7, %v15513_v50, -inf }
 0x4f7   :  { %v2165_v18 = vpop.f32.mrb[76].mxu1  ;;  %v2364_v28 = vsel %vm2225_vm7, %v15519_v45, -inf }
 0x4f8   :  { %v15507_v27 = vadd.f32 %v2165_v18, %v926_v32  ;;  %v12418_v54 = vpop.f32.mrb[77].mxu1  ;;  %v15525_v32 = vadd.f32 %v15487_v39, %v15065_v41  ;;  %v15538_v41 = vadd.f32 %v15497_v11, %v15092_v10 }
 0x4f9   :  { %2362 = vmax.xlane.f32.xlu0 %v2361_v2  ;;  %v15532_v54 = vadd.f32 %v15399_v35, %v15092_v10 }
 0x4fa   :  { %18782 = vst [vmem:[#allocation90_spill] sm:$0xff] %v15507_v27  ;;  %v2385_v2 = vsel %vm2225_vm7, %v15525_v32, -inf }
 0x4fd   :  { %2383 = vmax.xlane.f32.xlu0 %v2382_v5  ;;  %v2367_v5 = vsel %vm2225_vm7, %v15532_v54, -inf }
 0x501   :  { %2365 = vmax.xlane.f32.xlu0 %v2364_v28 }
 0x502   :  { %v2228_v60 = vpop.xlane.xlu1 %2227 }
 0x503   :  { %v2394_v18 = vsub.f32 %v14956_v17, %v2228_v60  ;;  %v2388_v17 = vsel %vm2225_vm7, %v15538_v41, -inf }
 0x505   :  { %v2450_v48 = vmul.f32 1.442695, %v2394_v18  ;;  %2386 = vmax.xlane.f32.xlu0 %v2385_v2 }
 0x507   :  { %13871 = vpow2.f32 %v2450_v48 }
 0x509   :  { %2368 = vmax.xlane.f32.xlu0 %v2367_v5 }
 0x50d   :  { %2389 = vmax.xlane.f32.xlu0 %v2388_v17 }
 0x511   :  { %v15542_v28 = vpop.eup %13871 }
 0x512   :  { %v2562_v60 = vsel %vm2225_vm7, %v15542_v28, 0.0 }
 0x513   :  { %2563 = vadd.xlane.f32.xlu1 %v2562_v60 }
 0x51e   :  { %v2249_v18 = vpop.xlane.xlu0 %2248 }
 0x51f   :  { %v2401_v48 = vsub.f32 %v15000_v15, %v2249_v18 }
 0x521   :  { %v2464_v2 = vmul.f32 1.442695, %v2401_v48 }
 0x522   :  { %v2231_v35 = vpop.xlane.xlu0 %2230  ;;  %v2252_v39 = vpop.xlane.xlu1 %2251 }
 0x523   :  { %13873 = vpow2.f32 %v2464_v2  ;;  %v2395_v10 = vsub.f32 %v15004_v13, %v2231_v35  ;;  %v2402_v5 = vsub.f32 %v15023_v38, %v2252_v39 }
 0x525   :  { %v2452_v11 = vmul.f32 1.442695, %v2395_v10  ;;  %v2466_v0 = vmul.f32 1.442695, %v2402_v5 }
 0x526   :  { %v2234_v17 = vpop.xlane.xlu0 %2233  ;;  %v2255_v23 = vpop.xlane.xlu1 %2254 }
 0x527   :  { %13875 = vpow2.f32 %v2452_v11  ;;  %v2396_v46 = vsub.f32 %v15035_v59, %v2234_v17  ;;  %v2403_v44 = vsub.f32 %v15048_v4, %v2255_v23 }
 0x528   :  { %13877 = vpow2.f32 %v2466_v0 }
 0x529   :  { %v2454_v60 = vmul.f32 1.442695, %v2396_v46  ;;  %v2468_v2 = vmul.f32 1.442695, %v2403_v44 }
 0x52a   :  { %v2237_v15 = vpop.xlane.xlu1 %2236  ;;  %v2258_v18 = vpop.xlane.xlu0 %2257 }
 0x52b   :  { %13879 = vpow2.f32 %v2454_v60  ;;  %v2397_v13 = vsub.f32 %v15052_v16, %v2237_v15  ;;  %v2404_v59 = vsub.f32 %v15075_v56, %v2258_v18 }
 0x52c   :  { %13881 = vpow2.f32 %v2468_v2 }
 0x52d   :  { %v15551_v48 = vpop.eup %13873  ;;  %v2456_v46 = vmul.f32 1.442695, %v2397_v13  ;;  %v2470_v5 = vmul.f32 1.442695, %v2404_v59 }
 0x52e   :  { %v2240_v38 = vpop.xlane.xlu1 %2239  ;;  %v2261_v35 = vpop.xlane.xlu0 %2260  ;;  %v2583_v39 = vsel %vm2225_vm7, %v15551_v48, 0.0 }
 0x52f   :  { %2584 = vadd.xlane.f32.xlu1 %v2583_v39  ;;  %v2398_v10 = vsub.f32 %v15087_v37, %v2240_v38  ;;  %13883 = vpow2.f32 %v2456_v46  ;;  %v2405_v39 = vsub.f32 %v15100_v58, %v2261_v35 }
 0x531   :  { %v15556_v11 = vpop.eup %13875 }
 0x532   :  { %v2243_v4 = vpop.xlane.xlu0 %2242  ;;  %v2264_v23 = vpop.xlane.xlu1 %2263  ;;  %v2565_v0 = vsel %vm2225_vm7, %v15556_v11, 0.0 }
 0x533   :  { %v15561_v44 = vpop.eup %13877  ;;  %v2399_v16 = vsub.f32 %v15104_v34, %v2243_v4  ;;  %2566 = vadd.xlane.f32.xlu1 %v2565_v0  ;;  %v2458_v34 = vmul.f32 1.442695, %v2398_v10 }
 0x534   :  { %v2586_v56 = vsel %vm2225_vm7, %v15561_v44, 0.0 }
 0x535   :  { %v2460_v17 = vmul.f32 1.442695, %v2399_v16  ;;  %v15567_v18 = vpop.eup %13879 }
 0x536   :  { %v2246_v60 = vpop.xlane.xlu0 %2245  ;;  %v2267_v15 = vpop.xlane.xlu1 %2266  ;;  %v2568_v4 = vsel %vm2225_vm7, %v15567_v18, 0.0 }
 0x537   :  { %13885 = vpow2.f32 %v2460_v17  ;;  %v2400_v2 = vsub.f32 %v15139_v52, %v2246_v60  ;;  %v2407_v13 = vsub.f32 %v15147_v53, %v2267_v15  ;;  %2587 = vadd.xlane.f32.xlu1 %v2586_v56  ;;  %v15574_v0 = vpop.eup %13881  ;;  %v2472_v52 = vmul.f32 1.442695, %v2405_v39 }
 0x538   :  { %13887 = vpow2.f32 %v2470_v5  ;;  %v2406_v53 = vsub.f32 %v15127_v63, %v2264_v23  ;;  %v2589_v5 = vsel %vm2225_vm7, %v15574_v0, 0.0 }
 0x539   :  { %v2462_v37 = vmul.f32 1.442695, %v2400_v2  ;;  %v2476_v38 = vmul.f32 1.442695, %v2407_v13  ;;  %v15580_v17 = vpop.eup %13883 }
 0x53a   :  { %v2270_v46 = vpop.xlane.xlu0 %2269  ;;  %v2291_v59 = vpop.xlane.xlu1 %2290  ;;  %v2474_v15 = vmul.f32 1.442695, %v2406_v53  ;;  %v2571_v23 = vsel %vm2225_vm7, %v15580_v17, 0.0 }
 0x53b   :  { %13889 = vpow2.f32 %v2462_v37  ;;  %v2408_v16 = vsub.f32 %v15151_v33, %v2270_v46  ;;  %2569 = vadd.xlane.f32.xlu1 %v2568_v4 }
 0x53c   :  { %13891 = vpow2.f32 %v2458_v34 }
 0x53d   :  { %13893 = vpow2.f32 %v2476_v38  ;;  %v2478_v58 = vmul.f32 1.442695, %v2408_v16 }
 0x53e   :  { %v2273_v35 = vpop.xlane.xlu0 %2272  ;;  %v2294_v10 = vpop.xlane.xlu1 %2293  ;;  %13895 = vpow2.f32 %v2472_v52 }
 0x53f   :  { %v2409_v60 = vsub.f32 %v15179_v21, %v2273_v35  ;;  %2590 = vadd.xlane.f32.xlu1 %v2589_v5  ;;  %13897 = vpow2.f32 %v2478_v58  ;;  %v2415_v21 = vsub.f32 %v15167_v14, %v2291_v59  ;;  %v2416_v59 = vsub.f32 %v15187_v1, %v2294_v10 }
 0x540   :  { %13899 = vpow2.f32 %v2474_v15 }
 0x541   :  { %v15583_v33 = vpop.eup %13885  ;;  %v2480_v56 = vmul.f32 1.442695, %v2409_v60  ;;  %v2492_v14 = vmul.f32 1.442695, %v2415_v21  ;;  %v2494_v1 = vmul.f32 1.442695, %v2416_v59 }
 0x542   :  { %v2276_v2 = vpop.xlane.xlu0 %2275  ;;  %v2297_v63 = vpop.xlane.xlu1 %2296  ;;  %v2577_v13 = vsel %vm2225_vm7, %v15583_v33, 0.0 }
 0x543   :  { %v15589_v34 = vpop.eup %13887  ;;  %v2410_v39 = vsub.f32 %v15191_v49, %v2276_v2  ;;  %2572 = vadd.xlane.f32.xlu1 %v2571_v23  ;;  %2578 = vadd.xlane.f32.xlu0 %v2577_v13  ;;  %13901 = vpow2.f32 %v2480_v56  ;;  %v2417_v10 = vsub.f32 %v15207_v43, %v2297_v63 }
 0x544   :  { %v2592_v52 = vsel %vm2225_vm7, %v15589_v34, 0.0 }
 0x545   :  { %v15593_v37 = vpop.eup %13889  ;;  %v2482_v38 = vmul.f32 1.442695, %v2410_v39  ;;  %v2496_v43 = vmul.f32 1.442695, %v2417_v10 }
 0x546   :  { %v15595_v46 = vpop.eup %13891  ;;  %v2279_v4 = vpop.xlane.xlu0 %2278  ;;  %v2580_v53 = vsel %vm2225_vm7, %v15593_v37, 0.0 }
 0x547   :  { %v2300_v16 = vpop.xlane.xlu1 %2299  ;;  %v15601_v49 = vpop.eup %13893  ;;  %v2411_v58 = vsub.f32 %v15219_v25, %v2279_v4  ;;  %2593 = vadd.xlane.f32.xlu1 %v2592_v52  ;;  %2581 = vadd.xlane.f32.xlu0 %v2580_v53  ;;  %13903 = vpow2.f32 %v2482_v38  ;;  %v2574_v56 = vsel %vm2225_vm7, %v15595_v46, 0.0 }
 0x548   :  { %v15605_v5 = vpop.eup %13895  ;;  %v2601_v2 = vsel %vm2225_vm7, %v15601_v49, 0.0  ;;  %13905 = vpow2.f32 %v2492_v14  ;;  %v2418_v63 = vsub.f32 %v15229_v51, %v2300_v16 }
 0x549   :  { %v2484_v35 = vmul.f32 1.442695, %v2411_v58  ;;  %v15611_v23 = vpop.eup %13897  ;;  %v2595_v4 = vsel %vm2225_vm7, %v15605_v5, 0.0 }
 0x54a   :  { %v2282_v60 = vpop.xlane.xlu0 %2281  ;;  %v15615_v39 = vpop.eup %13899  ;;  %v2604_v52 = vsel %vm2225_vm7, %v15611_v23, 0.0  ;;  %v2498_v51 = vmul.f32 1.442695, %v2418_v63 }
 0x54b   :  { %v2303_v15 = vpop.xlane.xlu1 %2302  ;;  %v2412_v25 = vsub.f32 %v15233_v24, %v2282_v60  ;;  %2575 = vadd.xlane.f32.xlu1 %v2574_v56  ;;  %2602 = vadd.xlane.f32.xlu0 %v2601_v2  ;;  %13907 = vpow2.f32 %v2484_v35  ;;  %v2598_v35 = vsel %vm2225_vm7, %v15615_v39, 0.0  ;;  %v15631_v56 = vadd.f32 %v15507_v27, %v15117_v6 }
 0x54c   :  { %13909 = vpow2.f32 %v2494_v1  ;;  %v2419_v16 = vsub.f32 %v15249_v19, %v2303_v15  ;;  %v18783_v15 = vld [vmem:[#allocation58_spill] sm:$0xff] }
 0x54d   :  { %v2486_v13 = vmul.f32 1.442695, %v2412_v25  ;;  %v15621_v53 = vpop.eup %13901 }
 0x54e   :  { %v2285_v21 = vpop.xlane.xlu0 %2284  ;;  %v2607_v60 = vsel %vm2225_vm7, %v15621_v53, 0.0  ;;  %v2500_v19 = vmul.f32 1.442695, %v2419_v16 }
 0x54f   :  { %v2306_v38 = vpop.xlane.xlu1 %2305  ;;  %v2413_v24 = vsub.f32 %v15261_v62, %v2285_v21  ;;  %2596 = vadd.xlane.f32.xlu1 %v2595_v4  ;;  %2605 = vadd.xlane.f32.xlu0 %v2604_v52  ;;  %13911 = vpow2.f32 %v2486_v13  ;;  %v2391_v21 = vsel %vm2225_vm7, %v15631_v56, -inf }
 0x550   :  { %13913 = vpow2.f32 %v2496_v43  ;;  %v2420_v52 = vsub.f32 %v18783_v15, %v2306_v38 }
 0x551   :  { %v2488_v58 = vmul.f32 1.442695, %v2413_v24  ;;  %v15633_v62 = vpop.eup %13903 }
 0x552   :  { %v2288_v14 = vpop.xlane.xlu0 %2287  ;;  %v15637_v1 = vpop.eup %13905  ;;  %v2610_v6 = vsel %vm2225_vm7, %v15633_v62, 0.0  ;;  %v2502_v38 = vmul.f32 1.442695, %v2420_v52 }
 0x553   :  { %v2309_v59 = vpop.xlane.xlu1 %2308  ;;  %v2414_v2 = vsub.f32 %v15275_v26, %v2288_v14  ;;  %2599 = vadd.xlane.f32.xlu1 %v2598_v35  ;;  %2608 = vadd.xlane.f32.xlu0 %v2607_v60  ;;  %13915 = vpow2.f32 %v2488_v58  ;;  %v2625_v35 = vsel %vm2225_vm7, %v15637_v1, 0.0 }
 0x554   :  { %13917 = vpow2.f32 %v2498_v51  ;;  %v18785_v51 = vld [vmem:[#allocation61_spill] sm:$0xff] }
 0x555   :  { %v2490_v25 = vmul.f32 1.442695, %v2414_v2  ;;  %v15643_v4 = vpop.eup %13907  ;;  %v2421_v16 = vsub.f32 %v18785_v51, %v2309_v59 }
 0x556   :  { %v2312_v10 = vpop.xlane.xlu0 %2311  ;;  %v15647_v43 = vpop.eup %13909  ;;  %v2613_v14 = vsel %vm2225_vm7, %v15643_v4, 0.0 }
 0x557   :  { %v2333_v13 = vpop.xlane.xlu1 %2332  ;;  %v2422_v26 = vsub.f32 %v15303_v57, %v2312_v10  ;;  %2611 = vadd.xlane.f32.xlu0 %v2610_v6  ;;  %2392 = vmax.xlane.f32.xlu1 %v2391_v21  ;;  %13919 = vpow2.f32 %v2490_v25  ;;  %v18784_v57 = vld [vmem:[#allocation65_spill] sm:$0xff]  ;;  %v2628_v15 = vsel %vm2225_vm7, %v15647_v43, 0.0  ;;  %v2504_v59 = vmul.f32 1.442695, %v2421_v16 }
 0x558   :  { %13921 = vpow2.f32 %v2500_v19  ;;  %v18787_v19 = vld [vmem:[#allocation64_spill] sm:$0xff] }
 0x559   :  { %v2506_v24 = vmul.f32 1.442695, %v2422_v26  ;;  %v15653_v60 = vpop.eup %13911  ;;  %v2429_v52 = vsub.f32 %v18787_v19, %v2333_v13 }
 0x55a   :  { %v2315_v63 = vpop.xlane.xlu0 %2314  ;;  %v15657_v10 = vpop.eup %13913  ;;  %v2616_v26 = vsel %vm2225_vm7, %v15653_v60, 0.0 }
 0x55b   :  { %v2336_v58 = vpop.xlane.xlu1 %2335  ;;  %v2423_v2 = vsub.f32 %v18784_v57, %v2315_v63  ;;  %2614 = vadd.xlane.f32.xlu0 %v2613_v14  ;;  %2626 = vadd.xlane.f32.xlu1 %v2625_v35  ;;  %13923 = vpow2.f32 %v2506_v24  ;;  %v18786_v63 = vld [vmem:[#allocation71_spill] sm:$0xff]  ;;  %v2631_v42 = vsel %vm2225_vm7, %v15657_v10, 0.0  ;;  %v2520_v13 = vmul.f32 1.442695, %v2429_v52 }
 0x55c   :  { %13925 = vpow2.f32 %v2502_v38  ;;  %v18790_v38 = vld [vmem:[#allocation68_spill] sm:$0xff] }
 0x55d   :  { %v2508_v25 = vmul.f32 1.442695, %v2423_v2  ;;  %v15663_v27 = vpop.eup %13915  ;;  %v2430_v16 = vsub.f32 %v18790_v38, %v2336_v58  ;;  %v18792_v58 = vld [vmem:[#allocation72_spill] sm:$0xff] }
 0x55e   :  { %v2318_v6 = vpop.xlane.xlu0 %2317  ;;  %v15667_v35 = vpop.eup %13917  ;;  %v2619_v51 = vsel %vm2225_vm7, %v15663_v27, 0.0 }
 0x55f   :  { %v2339_v21 = vpop.xlane.xlu1 %2338  ;;  %v2424_v14 = vsub.f32 %v18786_v63, %v2318_v6  ;;  %2617 = vadd.xlane.f32.xlu0 %v2616_v26  ;;  %2629 = vadd.xlane.f32.xlu1 %v2628_v15  ;;  %13927 = vpow2.f32 %v2508_v25  ;;  %v18789_v6 = vld [vmem:[#allocation73_spill] sm:$0xff]  ;;  %v2634_v19 = vsel %vm2225_vm7, %v15667_v35, 0.0 }
 0x560   :  { %13929 = vpow2.f32 %v2504_v59  ;;  %v2431_v59 = vsub.f32 %v18792_v58, %v2339_v21 }
 0x561   :  { %v2510_v24 = vmul.f32 1.442695, %v2424_v14  ;;  %v15673_v40 = vpop.eup %13919 }
 0x562   :  { %v2321_v57 = vpop.xlane.xlu0 %2320  ;;  %18788 = vst [vmem:[#allocation58_spill] sm:$0xff] %v15673_v40  ;;  %v15677_v15 = vpop.eup %13921  ;;  %v2622_v14 = vsel %vm2225_vm7, %v15673_v40, 0.0  ;;  %v2524_v21 = vmul.f32 1.442695, %v2431_v59 }
 0x563   :  { %v2342_v2 = vpop.xlane.xlu1 %2341  ;;  %v2425_v26 = vsub.f32 %v18789_v6, %v2321_v57  ;;  %2620 = vadd.xlane.f32.xlu0 %v2619_v51  ;;  %2632 = vadd.xlane.f32.xlu1 %v2631_v42  ;;  %13931 = vpow2.f32 %v2510_v24  ;;  %v2522_v42 = vmul.f32 1.442695, %v2430_v16  ;;  %v2637_v38 = vsel %vm2225_vm7, %v15677_v15, 0.0 }
 0x564   :  { %13933 = vpow2.f32 %v2520_v13  ;;  %v18793_v13 = vld [vmem:[#allocation76_spill] sm:$0xff] }
 0x565   :  { %v2512_v25 = vmul.f32 1.442695, %v2425_v26  ;;  %v15683_v29 = vpop.eup %13923  ;;  %v2432_v16 = vsub.f32 %v18793_v13, %v2342_v2 }
 0x566   :  { %v2324_v63 = vpop.xlane.xlu0 %2323  ;;  %18791 = vst [vmem:[#allocation65_spill] sm:$0xff] %v15683_v29  ;;  %v15687_v51 = vpop.eup %13925  ;;  %v2646_v26 = vsel %vm2225_vm7, %v15683_v29, 0.0 }
 0x567   :  { %v2426_v57 = vsub.f32 %v15383_v9, %v2324_v63  ;;  %2623 = vadd.xlane.f32.xlu0 %v2622_v14  ;;  %2635 = vadd.xlane.f32.xlu1 %v2634_v19  ;;  %v2345_v52 = vpop.xlane.xlu1 %2344  ;;  %13935 = vpow2.f32 %v2512_v25  ;;  %v2640_v58 = vsel %vm2225_vm7, %v15687_v51, 0.0  ;;  %v2526_v2 = vmul.f32 1.442695, %v2432_v16 }
 0x568   :  { %13937 = vpow2.f32 %v2522_v42  ;;  %v18794_v42 = vld [vmem:[#allocation79_spill] sm:$0xff] }
 0x569   :  { %v2514_v24 = vmul.f32 1.442695, %v2426_v57  ;;  %v15693_v40 = vpop.eup %13927  ;;  %v2433_v59 = vsub.f32 %v18794_v42, %v2345_v52 }
 0x56a   :  { %v2327_v6 = vpop.xlane.xlu0 %2326  ;;  %v15697_v63 = vpop.eup %13929  ;;  %v2649_v57 = vsel %vm2225_vm7, %v15693_v40, 0.0 }
 0x56b   :  { %v2427_v9 = vsub.f32 %v15395_v47, %v2327_v6  ;;  %2647 = vadd.xlane.f32.xlu0 %v2646_v26  ;;  %2638 = vadd.xlane.f32.xlu1 %v2637_v38  ;;  %13939 = vpow2.f32 %v2514_v24  ;;  %v2348_v14 = vpop.xlane.xlu1 %2347 }
 0x56c   :  { %13941 = vpow2.f32 %v2524_v21  ;;  %v2528_v21 = vmul.f32 1.442695, %v2433_v59  ;;  %v2434_v52 = vsub.f32 %v15413_v30, %v2348_v14 }
 0x56d   :  { %v2516_v25 = vmul.f32 1.442695, %v2427_v9  ;;  %v15703_v29 = vpop.eup %13931  ;;  %v2643_v9 = vsel %vm2225_vm7, %v15697_v63, 0.0 }
 0x56e   :  { %v2330_v19 = vpop.xlane.xlu0 %2329  ;;  %v15707_v6 = vpop.eup %13933  ;;  %v2652_v38 = vsel %vm2225_vm7, %v15703_v29, 0.0  ;;  %v2530_v30 = vmul.f32 1.442695, %v2434_v52 }
 0x56f   :  { %v2428_v47 = vsub.f32 %v15425_v22, %v2330_v19  ;;  %2650 = vadd.xlane.f32.xlu0 %v2649_v57  ;;  %2641 = vadd.xlane.f32.xlu1 %v2640_v58  ;;  %13943 = vpow2.f32 %v2516_v25  ;;  %v2351_v16 = vpop.xlane.xlu1 %2350 }
 0x570   :  { %13945 = vpow2.f32 %v2526_v2  ;;  %v2435_v14 = vsub.f32 %v15431_v8, %v2351_v16 }
 0x571   :  { %v2518_v24 = vmul.f32 1.442695, %v2428_v47  ;;  %v15713_v13 = vpop.eup %13935  ;;  %v2667_v47 = vsel %vm2225_vm7, %v15707_v6, 0.0 }
 0x572   :  { %v2354_v26 = vpop.xlane.xlu0 %2353  ;;  %v15717_v19 = vpop.eup %13937  ;;  %v2655_v58 = vsel %vm2225_vm7, %v15713_v13, 0.0 }
 0x573   :  { %v2436_v22 = vsub.f32 %v15435_v55, %v2354_v26  ;;  %2653 = vadd.xlane.f32.xlu0 %v2652_v38  ;;  %2644 = vadd.xlane.f32.xlu1 %v2643_v9  ;;  %13947 = vpow2.f32 %v2518_v24  ;;  %v2375_v24 = vpop.xlane.xlu1 %2374  ;;  %v2670_v9 = vsel %vm2225_vm7, %v15717_v19, 0.0 }
 0x574   :  { %13949 = vpow2.f32 %v2528_v21  ;;  %v2443_v8 = vsub.f32 %v15447_v61, %v2375_v24 }
 0x575   :  { %v2534_v25 = vmul.f32 1.442695, %v2436_v22  ;;  %v15723_v42 = vpop.eup %13939 }
 0x576   :  { %v2357_v57 = vpop.xlane.xlu0 %2356  ;;  %v15727_v59 = vpop.eup %13941  ;;  %v2658_v38 = vsel %vm2225_vm7, %v15723_v42, 0.0 }
 0x577   :  { %v2437_v55 = vsub.f32 %v15457_v20, %v2357_v57  ;;  %2656 = vadd.xlane.f32.xlu0 %v2655_v58  ;;  %2668 = vadd.xlane.f32.xlu1 %v2667_v47  ;;  %13951 = vpow2.f32 %v2534_v25  ;;  %v2532_v20 = vmul.f32 1.442695, %v2435_v14  ;;  %v2673_v25 = vsel %vm2225_vm7, %v15727_v59, 0.0 }
 0x578   :  { %13953 = vpow2.f32 %v2530_v30  ;;  %v2548_v47 = vmul.f32 1.442695, %v2443_v8 }
 0x579   :  { %v2536_v2 = vmul.f32 1.442695, %v2437_v55  ;;  %v15733_v22 = vpop.eup %13943 }
 0x57a   :  { %v2378_v26 = vpop.xlane.xlu0 %2377  ;;  %v15736_v21 = vpop.eup %13945  ;;  %v2661_v16 = vsel %vm2225_vm7, %v15733_v22, 0.0 }
 0x57b   :  { %2659 = vadd.xlane.f32.xlu0 %v2658_v38  ;;  %2671 = vadd.xlane.f32.xlu1 %v2670_v9  ;;  %13955 = vpow2.f32 %v2536_v2  ;;  %v2444_v61 = vsub.f32 %v15473_v7, %v2378_v26  ;;  %v2676_v24 = vsel %vm2225_vm7, %v15736_v21, 0.0 }
 0x57c   :  { %13957 = vpow2.f32 %v2532_v20 }
 0x57d   :  { %v15742_v57 = vpop.eup %13947 }
 0x57e   :  { %v2360_v52 = vpop.xlane.xlu0 %2359  ;;  %v15746_v30 = vpop.eup %13949  ;;  %v2664_v2 = vsel %vm2225_vm7, %v15742_v57, 0.0 }
 0x57f   :  { %v2438_v58 = vsub.f32 %v15483_v36, %v2360_v52  ;;  %2662 = vadd.xlane.f32.xlu0 %v2661_v16  ;;  %2674 = vadd.xlane.f32.xlu1 %v2673_v25  ;;  %v2550_v36 = vmul.f32 1.442695, %v2444_v61  ;;  %v2679_v8 = vsel %vm2225_vm7, %v15746_v30, 0.0 }
 0x581   :  { %v2538_v55 = vmul.f32 1.442695, %v2438_v58  ;;  %v15752_v38 = vpop.eup %13951 }
 0x582   :  { %v2381_v14 = vpop.xlane.xlu0 %2380  ;;  %v15755_v7 = vpop.eup %13953  ;;  %v2688_v20 = vsel %vm2225_vm7, %v15752_v38, 0.0 }
 0x583   :  { %13959 = vpow2.f32 %v2538_v55  ;;  %2665 = vadd.xlane.f32.xlu0 %v2664_v2  ;;  %2677 = vadd.xlane.f32.xlu1 %v2676_v24  ;;  %v2445_v9 = vsub.f32 %v15493_v3, %v2381_v14  ;;  %v2682_v61 = vsel %vm2225_vm7, %v15755_v7, 0.0 }
 0x584   :  { %13961 = vpow2.f32 %v2548_v47 }
 0x585   :  { %v15761_v52 = vpop.eup %13955  ;;  %13963 = vpow2.f32 %v2550_v36  ;;  %v2552_v25 = vmul.f32 1.442695, %v2445_v9 }
 0x586   :  { %v2363_v26 = vpop.xlane.xlu0 %2362  ;;  %v2691_v3 = vsel %vm2225_vm7, %v15761_v52, 0.0  ;;  %v15768_v55 = vpop.eup %13957 }
 0x587   :  { %v2439_v16 = vsub.f32 %v15503_v31, %v2363_v26  ;;  %2689 = vadd.xlane.f32.xlu0 %v2688_v20  ;;  %2680 = vadd.xlane.f32.xlu1 %v2679_v8  ;;  %v2685_v9 = vsel %vm2225_vm7, %v15768_v55, 0.0  ;;  %v2372_v8 = vpop.xlane.xlu1 %2371 }
 0x589   :  { %v2540_v58 = vmul.f32 1.442695, %v2439_v16 }
 0x58a   :  { %v2384_v47 = vpop.xlane.xlu0 %2383 }
 0x58b   :  { %13965 = vpow2.f32 %v2540_v58  ;;  %v2446_v14 = vsub.f32 %v15513_v50, %v2384_v47  ;;  %2692 = vadd.xlane.f32.xlu0 %v2691_v3  ;;  %2683 = vadd.xlane.f32.xlu1 %v2682_v61  ;;  %v2442_v61 = vsub.f32 %v15461_v12, %v2372_v8 }
 0x58c   :  { %13967 = vpow2.f32 %v2552_v25 }
 0x58d   :  { %v15771_v31 = vpop.eup %13959  ;;  %v2554_v2 = vmul.f32 1.442695, %v2446_v14 }
 0x58e   :  { %v2366_v24 = vpop.xlane.xlu0 %2365  ;;  %v2694_v36 = vsel %vm2225_vm7, %v15771_v31, 0.0  ;;  %v15777_v26 = vpop.eup %13961 }
 0x58f   :  { %v2440_v20 = vsub.f32 %v15519_v45, %v2366_v24  ;;  %2695 = vadd.xlane.f32.xlu0 %v2694_v36  ;;  %2686 = vadd.xlane.f32.xlu1 %v2685_v9  ;;  %13969 = vpow2.f32 %v2554_v2  ;;  %v2709_v25 = vsel %vm2225_vm7, %v15777_v26, 0.0  ;;  %v15782_v58 = vpop.eup %13963 }
 0x590   :  { %v2712_v24 = vsel %vm2225_vm7, %v15782_v58, 0.0 }
 0x591   :  { %v2542_v50 = vmul.f32 1.442695, %v2440_v20 }
 0x592   :  { %v2387_v16 = vpop.xlane.xlu0 %2386 }
 0x593   :  { %13971 = vpow2.f32 %v2542_v50  ;;  %v2447_v47 = vsub.f32 %v15525_v32, %v2387_v16  ;;  %2710 = vadd.xlane.f32.xlu1 %v2709_v25  ;;  %v2546_v32 = vmul.f32 1.442695, %v2442_v61 }
 0x595   :  { %v15785_v3 = vpop.eup %13965  ;;  %v2556_v45 = vmul.f32 1.442695, %v2447_v47 }
 0x596   :  { %v2369_v14 = vpop.xlane.xlu0 %2368  ;;  %v2697_v2 = vsel %vm2225_vm7, %v15785_v3, 0.0  ;;  %v15792_v36 = vpop.eup %13967 }
 0x597   :  { %13973 = vpow2.f32 %v2556_v45  ;;  %v2441_v9 = vsub.f32 %v15532_v54, %v2369_v14  ;;  %2698 = vadd.xlane.f32.xlu0 %v2697_v2  ;;  %2713 = vadd.xlane.f32.xlu1 %v2712_v24  ;;  %v2715_v12 = vsel %vm2225_vm7, %v15792_v36, 0.0 }
 0x599   :  { %v2544_v20 = vmul.f32 1.442695, %v2441_v9  ;;  %v15797_v8 = vpop.eup %13969 }
 0x59a   :  { %v2390_v50 = vpop.xlane.xlu0 %2389  ;;  %v2718_v61 = vsel %vm2225_vm7, %v15797_v8, 0.0 }
 0x59b   :  { %13975 = vpow2.f32 %v2544_v20  ;;  %v2448_v16 = vsub.f32 %v15538_v41, %v2390_v50  ;;  %2716 = vadd.xlane.f32.xlu1 %v2715_v12  ;;  %v13839_v20 = vld [vmem:[%s18561_s4 + $0x48] sm:$0xff]  }
 0x59c   :  { %13977 = vpow2.f32 %v2546_v32 }
 0x59d   :  { %v15800_v25 = vpop.eup %13971  ;;  %v2558_v47 = vmul.f32 1.442695, %v2448_v16 }
 0x59e   :  { %v2700_v54 = vsel %vm2225_vm7, %v15800_v25, 0.0 }
 0x59f   :  { %13979 = vpow2.f32 %v2558_v47  ;;  %2701 = vadd.xlane.f32.xlu0 %v2700_v54  ;;  %2719 = vadd.xlane.f32.xlu1 %v2718_v61  ;;  %v18796_v54 = vld [vmem:[#allocation22_spill] sm:$0xff] }
 0x5a0   :  { %v2564_v45 = vpop.xlane.xlu1 %2563  ;;  %v770_v61 = vadd.f32 %v13839_v20, %v18796_v54 }
 0x5a1   :  { %v15806_v14 = vpop.eup %13973  ;;  %13981 = vrcp.f32 %v2564_v45  ;;  %v18797_v45 = vmov 0.0  }
 0x5a2   :  { %v2721_v41 = vsel %vm2225_vm7, %v15806_v14, 0.0  ;;  %v788_v20 = vcombine.high %v770_v61, %v770_v61 }
 0x5a3   :  { %2722 = vadd.xlane.f32.xlu1 %v2721_v41 }
 0x5a5   :  { %v15810_v2 = vpop.eup %13975 }
 0x5a6   :  { %v2703_v24 = vsel %vm2225_vm7, %v15810_v2, 0.0  ;;  %v15814_v9 = vpop.eup %13977 }
 0x5a7   :  { %2704 = vadd.xlane.f32.xlu0 %v2703_v24  ;;  %v2706_v50 = vsel %vm2225_vm7, %v15814_v9, 0.0 }
 0x5a9   :  { %v15816_v32 = vpop.eup %13979 }
 0x5aa   :  { %18795 = vst [vmem:[#allocation61_spill] sm:$0xff] %v15816_v32  ;;  %v2724_v12 = vsel %vm2225_vm7, %v15816_v32, 0.0 }
 0x5ab   :  { %v13982_v16 = vpop.eup %13981  ;;  %2707 = vadd.xlane.f32.xlu0 %v2706_v50  ;;  %2725 = vadd.xlane.f32.xlu1 %v2724_v12 }
 0x5ac   :  { %v2786_v47 = vmul.f32 %v13982_v16, %v15542_v28 }
 0x5ae   :  { %12422 = vmatmul.mubr.msk.f32.vlgmr.msra.gmra.mrb[74].mxu0 %vm2225_vm7, %v2786_v47 }
 0x5af   :  { %12466 = vmatpush3.xpose.msk.msra.mxu0 %vm2225_vm7, %v770_v61  ;;  %12424 = vmatprep.mubr.msk.f32.mxu0 %vm14379_vm1, %v18797_v45 }
 0x5b0   :  { %12511 = vmatprep.subr.mxu0 %v18797_v45 }
 0x5bc   :  { %v2585_v41 = vpop.xlane.xlu1 %2584 }
 0x5bd   :  { %13983 = vrcp.f32 %v2585_v41 }
 0x5c0   :  { %v2567_v24 = vpop.xlane.xlu1 %2566 }
 0x5c1   :  { %13985 = vrcp.f32 %v2567_v24 }
 0x5c4   :  { %v2588_v32 = vpop.xlane.xlu1 %2587 }
 0x5c5   :  { %13987 = vrcp.f32 %v2588_v32 }
 0x5c7   :  { %v13984_v50 = vpop.eup %13983 }
 0x5c8   :  { %v2793_v28 = vmul.f32 %v13984_v50, %v15551_v48  ;;  %v2570_v12 = vpop.xlane.xlu1 %2569 }
 0x5c9   :  { %13989 = vrcp.f32 %v2570_v12 }
 0x5ca   :  { %12445 = vmatmul.mubr.msk.f32.vlgmr.msra.gmra.mrb[78].mxu1 %vm2225_vm7, %v2793_v28 }
 0x5cb   :  { %v13986_v16 = vpop.eup %13985  ;;  %12489 = vmatpush3.xpose.msk.msra.mxu1 %vm2225_vm7, %v788_v20  ;;  %12447 = vmatprep.mubr.msk.f32.mxu1 %vm14379_vm1, %v18797_v45 }
 0x5cc   :  { %v2591_v47 = vpop.xlane.xlu1 %2590  ;;  %v2787_v54 = vmul.f32 %v13986_v16, %v15556_v11  ;;  %12534 = vmatprep.subr.mxu1 %v18797_v45 }
 0x5cd   :  { %13991 = vrcp.f32 %v2591_v47 }
 0x5ce   :  { %12425 = vmatmul.mubr.msk.f32.gmra.mrb[76].mxu0 %vm2225_vm7, %v2787_v54 }
 0x5cf   :  { %v13988_v48 = vpop.eup %13987  ;;  %12427 = vmatprep.mubr.msk.f32.mxu0 %vm14379_vm1, %v18797_v45 }
 0x5d0   :  { %v2573_v32 = vpop.xlane.xlu1 %2572  ;;  %v2579_v61 = vpop.xlane.xlu0 %2578  ;;  %v2794_v41 = vmul.f32 %v13988_v48, %v15561_v44 }
 0x5d1   :  { %13993 = vrcp.f32 %v2573_v32 }
 0x5d2   :  { %12448 = vmatmul.mubr.msk.f32.gmra.mrb[80].mxu1 %vm2225_vm7, %v2794_v41 }
 0x5d3   :  { %v13990_v24 = vpop.eup %13989  ;;  %12450 = vmatprep.mubr.msk.f32.mxu1 %vm14379_vm1, %v18797_v45 }
 0x5d4   :  { %v2594_v11 = vpop.xlane.xlu1 %2593  ;;  %v2582_v50 = vpop.xlane.xlu0 %2581  ;;  %v2788_v28 = vmul.f32 %v13990_v24, %v15567_v18 }
 0x5d5   :  { %13995 = vrcp.f32 %v2594_v11 }
 0x5d6   :  { %12428 = vmatmul.mubr.msk.f32.gmra.mrb[78].mxu0 %vm2225_vm7, %v2788_v28 }
 0x5d7   :  { %v13992_v12 = vpop.eup %13991  ;;  %12430 = vmatprep.mubr.msk.f32.mxu0 %vm14379_vm1, %v18797_v45 }
 0x5d8   :  { %v2576_v20 = vpop.xlane.xlu1 %2575  ;;  %v2603_v44 = vpop.xlane.xlu0 %2602  ;;  %v2795_v16 = vmul.f32 %v13992_v12, %v15574_v0 }
 0x5d9   :  { %13997 = vrcp.f32 %v2576_v20 }
 0x5da   :  { %12451 = vmatmul.mubr.msk.f32.gmra.mrb[82].mxu1 %vm2225_vm7, %v2795_v16  ;;  %13999 = vrcp.f32 %v2579_v61 }
 0x5db   :  { %v13994_v47 = vpop.eup %13993  ;;  %12453 = vmatprep.mubr.msk.f32.mxu1 %vm14379_vm1, %v18797_v45 }
 0x5dc   :  { %v2597_v18 = vpop.xlane.xlu1 %2596  ;;  %v2606_v54 = vpop.xlane.xlu0 %2605  ;;  %v2789_v48 = vmul.f32 %v13994_v47, %v15580_v17 }
 0x5dd   :  { %14001 = vrcp.f32 %v2597_v18 }
 0x5de   :  { %12431 = vmatmul.mubr.msk.f32.gmra.mrb[80].mxu0 %vm2225_vm7, %v2789_v48  ;;  %14003 = vrcp.f32 %v2582_v50 }
 0x5df   :  { %v13996_v32 = vpop.eup %13995  ;;  %12433 = vmatprep.mubr.msk.f32.mxu0 %vm14379_vm1, %v18797_v45 }
 0x5e0   :  { %v2600_v0 = vpop.xlane.xlu1 %2599  ;;  %v2609_v41 = vpop.xlane.xlu0 %2608  ;;  %v2796_v24 = vmul.f32 %v13996_v32, %v15589_v34 }
 0x5e1   :  { %14005 = vrcp.f32 %v2600_v0 }
 0x5e2   :  { %14007 = vrcp.f32 %v2603_v44  ;;  %12454 = vmatmul.mubr.msk.f32.gmra.mrb[84].mxu1 %vm2225_vm7, %v2796_v24 }
 0x5e3   :  { %v13998_v61 = vpop.eup %13997  ;;  %14009 = vrcp.f32 %v2606_v54  ;;  %12456 = vmatprep.mubr.msk.f32.mxu1 %vm14379_vm1, %v18797_v45 }
 0x5e4   :  { %v2612_v17 = vpop.xlane.xlu0 %2611  ;;  %v2393_v11 = vpop.xlane.xlu1 %2392  ;;  %v2790_v50 = vmul.f32 %v13998_v61, %v15595_v46  ;;  %14011 = vrcp.f32 %v2609_v41  ;;  %v13842_v41 = vld [vmem:[%s18561_s4 + $0x50] sm:$0xff]  }
 0x5e5   :  { %v14000_v28 = vpop.eup %13999  ;;  %v2449_v12 = vsub.f32 %v15631_v56, %v2393_v11  ;;  %v18798_v11 = vld [vmem:[#allocation24_spill] sm:$0xff] }
 0x5e6   :  { %12434 = vmatmul.mubr.msk.f32.gmra.mrb[82].mxu0 %vm2225_vm7, %v2790_v50  ;;  %v2791_v47 = vmul.f32 %v14000_v28, %v15583_v33  ;;  %v775_v50 = vadd.f32 %v13842_v41, %v18798_v11 }
 0x5e7   :  { %v14002_v20 = vpop.eup %14001  ;;  %v2560_v34 = vmul.f32 1.442695, %v2449_v12  ;;  %12436 = vmatprep.mubr.msk.f32.mxu0 %vm14379_vm1, %v18797_v45 }
 0x5e8   :  { %v2615_v44 = vpop.xlane.xlu0 %2614  ;;  %v2627_v16 = vpop.xlane.xlu1 %2626  ;;  %v2797_v18 = vmul.f32 %v14002_v20, %v15605_v5 }
 0x5e9   :  { %v14004_v54 = vpop.eup %14003  ;;  %14013 = vpow2.f32 %v2560_v34 }
 0x5ea   :  { %14015 = vrcp.f32 %v2612_v17  ;;  %12437 = vmatmul.mubr.msk.f32.gmra.mrb[84].mxu0 %vm2225_vm7, %v2791_v47  ;;  %12457 = vmatmul.mubr.msk.f32.gmra.mrb[86].mxu1 %vm2225_vm7, %v2797_v18  ;;  %v2792_v5 = vmul.f32 %v14004_v54, %v15593_v37  ;;  %v789_v47 = vcombine.high %v775_v50, %v775_v50 }
 0x5eb   :  { %v14006_v46 = vpop.eup %14005  ;;  %14017 = vrcp.f32 %v2627_v16  ;;  %12439 = vmatprep.mubr.msk.f32.mxu0 %vm14379_vm1, %v18797_v45  ;;  %12459 = vmatprep.mubr.msk.f32.mxu1 %vm14379_vm1, %v18797_v45 }
 0x5ec   :  { %v14008_v56 = vpop.eup %14007  ;;  %v2618_v48 = vpop.xlane.xlu0 %2617  ;;  %v2798_v32 = vmul.f32 %v14006_v46, %v15615_v39 }
 0x5ed   :  { %v2630_v33 = vpop.xlane.xlu1 %2629  ;;  %v14010_v0 = vpop.eup %14009  ;;  %v2799_v61 = vmul.f32 %v14008_v56, %v15601_v49 }
 0x5ee   :  { %14019 = vrcp.f32 %v2630_v33  ;;  %12440 = vmatmul.mubr.msk.f32.gmra.mrb[86].mxu0 %vm2225_vm7, %v2792_v5  ;;  %12460 = vmatmul.mubr.msk.f32.gmra.mrb[88].mxu1 %vm2225_vm7, %v2798_v32  ;;  %v2800_v37 = vmul.f32 %v14010_v0, %v15611_v23  ;;  %v14012_v17 = vpop.eup %14011 }
 0x5ef   :  { %14021 = vrcp.f32 %v2615_v44  ;;  %12462 = vmatprep.mubr.msk.f32.mxu1 %vm14379_vm1, %v18797_v45  ;;  %12467 = vmatprep.mubr.msk.f32.mxu0 %vm14379_vm1, %v18797_v45  ;;  %v2801_v34 = vmul.f32 %v14012_v17, %v15621_v53 }
 0x5f0   :  { %v2621_v39 = vpop.xlane.xlu0 %2620 }
 0x5f1   :  { %v2633_v24 = vpop.xlane.xlu1 %2632 }
 0x5f2   :  { %14023 = vrcp.f32 %v2633_v24  ;;  %12463 = vmatmul.mubr.msk.f32.gmra.mrb[90].mxu1 %vm2225_vm7, %v2799_v61  ;;  %12468 = vmatmul.mubr.msk.f32.vlgmr.msra.gmra.mrb[88].mxu0 %vm2225_vm7, %v2800_v37 }
 0x5f3   :  { %v15891_v28 = vpop.eup %14013  ;;  %14025 = vrcp.f32 %v2618_v48  ;;  %12512 = vmatpush3.xpose.msk.msra.mxu0 %vm2225_vm7, %v775_v50  ;;  %12470 = vmatprep.mubr.msk.f32.mxu0 %vm14379_vm1, %v18797_v45 }
 0x5f4   :  { %v14016_v23 = vpop.eup %14015  ;;  %v2624_v12 = vpop.xlane.xlu0 %2623  ;;  %12490 = vmatprep.mubr.msk.f32.mxu1 %vm14379_vm1, %v18797_v45  ;;  %v2727_v49 = vsel %vm2225_vm7, %v15891_v28, 0.0  ;;  %12557 = vmatprep.subr.mxu0 %v18797_v45 }
 0x5f5   :  { %v2636_v20 = vpop.xlane.xlu1 %2635  ;;  %v14018_v44 = vpop.eup %14017  ;;  %2728 = vadd.xlane.f32.xlu1 %v2727_v49  ;;  %v2802_v53 = vmul.f32 %v14016_v23, %v15633_v62 }
 0x5f6   :  { %v2807_v16 = vmul.f32 %v14018_v44, %v15637_v1  ;;  %14027 = vrcp.f32 %v2636_v20  ;;  %12471 = vmatmul.mubr.msk.f32.gmra.mrb[90].mxu0 %vm2225_vm7, %v2801_v34  ;;  %v18799_v20 = vld [vmem:[#allocation58_spill] sm:$0xff]  ;;  %v13841_v34 = vld [vmem:[%s18561_s4 + $0x58] sm:$0xff]  }
 0x5f7   :  { %14029 = vrcp.f32 %v2621_v39  ;;  %12473 = vmatprep.mubr.msk.f32.mxu0 %vm14379_vm1, %v18797_v45 }
 0x5f8   :  { %v14020_v18 = vpop.eup %14019  ;;  %12491 = vmatmul.mubr.msk.f32.vlgmr.msra.gmra.mrb[92].mxu1 %vm2225_vm7, %v2807_v16  ;;  %v2648_v54 = vpop.xlane.xlu0 %2647  ;;  %v18800_v16 = vld [vmem:[#allocation65_spill] sm:$0xff] }
 0x5f9   :  { %v2639_v46 = vpop.xlane.xlu1 %2638  ;;  %v14022_v56 = vpop.eup %14021  ;;  %12535 = vmatpush3.xpose.msk.msra.mxu1 %vm2225_vm7, %v789_v47  ;;  %12493 = vmatprep.mubr.msk.f32.mxu1 %vm14379_vm1, %v18797_v45  ;;  %v2808_v1 = vmul.f32 %v14020_v18, %v15647_v43 }
 0x5fa   :  { %14031 = vrcp.f32 %v2639_v46  ;;  %12474 = vmatmul.mubr.msk.f32.gmra.mrb[92].mxu0 %vm2225_vm7, %v2802_v53  ;;  %12580 = vmatprep.subr.mxu1 %v18797_v45  ;;  %v2803_v5 = vmul.f32 %v14022_v56, %v15643_v4  ;;  %v18801_v53 = vld [vmem:[#allocation23_spill] sm:$0xff] }
 0x5fb   :  { %14033 = vrcp.f32 %v2624_v12  ;;  %12476 = vmatprep.mubr.msk.f32.mxu0 %vm14379_vm1, %v18797_v45  ;;  %v780_v56 = vadd.f32 %v13841_v34, %v18801_v53 }
 0x5fc   :  { %v14024_v48 = vpop.eup %14023  ;;  %12494 = vmatmul.mubr.msk.f32.gmra.mrb[94].mxu1 %vm2225_vm7, %v2808_v1  ;;  %v2651_v62 = vpop.xlane.xlu0 %2650 }
 0x5fd   :  { %v2642_v33 = vpop.xlane.xlu1 %2641  ;;  %v14026_v32 = vpop.eup %14025  ;;  %12496 = vmatprep.mubr.msk.f32.mxu1 %vm14379_vm1, %v18797_v45  ;;  %v2809_v43 = vmul.f32 %v14024_v48, %v15657_v10 }
 0x5fe   :  { %14035 = vrcp.f32 %v2642_v33  ;;  %12477 = vmatmul.mubr.msk.f32.gmra.mrb[94].mxu0 %vm2225_vm7, %v2803_v5  ;;  %v2804_v4 = vmul.f32 %v14026_v32, %v15653_v60  ;;  %v790_v32 = vcombine.high %v780_v56, %v780_v56 }
 0x5ff   :  { %14037 = vrcp.f32 %v2648_v54  ;;  %12479 = vmatprep.mubr.msk.f32.mxu0 %vm14379_vm1, %v18797_v45 }
 0x600   :  { %v14028_v0 = vpop.eup %14027  ;;  %12497 = vmatmul.mubr.msk.f32.gmra.mrb[96].mxu1 %vm2225_vm7, %v2809_v43  ;;  %v2654_v41 = vpop.xlane.xlu0 %2653 }
 0x601   :  { %v2645_v37 = vpop.xlane.xlu1 %2644  ;;  %v14030_v39 = vpop.eup %14029  ;;  %12499 = vmatprep.mubr.msk.f32.mxu1 %vm14379_vm1, %v18797_v45  ;;  %v2810_v10 = vmul.f32 %v14028_v0, %v15667_v35 }
 0x602   :  { %14039 = vrcp.f32 %v2645_v37  ;;  %12480 = vmatmul.mubr.msk.f32.gmra.mrb[96].mxu0 %vm2225_vm7, %v2804_v4  ;;  %v2805_v60 = vmul.f32 %v14030_v39, %v15663_v27 }
 0x603   :  { %14041 = vrcp.f32 %v2651_v62  ;;  %12482 = vmatprep.mubr.msk.f32.mxu0 %vm14379_vm1, %v18797_v45 }
 0x604   :  { %v14032_v24 = vpop.eup %14031  ;;  %12500 = vmatmul.mubr.msk.f32.gmra.mrb[98].mxu1 %vm2225_vm7, %v2810_v10  ;;  %v2657_v61 = vpop.xlane.xlu0 %2656 }
 0x605   :  { %v2669_v17 = vpop.xlane.xlu1 %2668  ;;  %v14034_v11 = vpop.eup %14033  ;;  %12502 = vmatprep.mubr.msk.f32.mxu1 %vm14379_vm1, %v18797_v45  ;;  %v2811_v35 = vmul.f32 %v14032_v24, %v15677_v15 }
 0x606   :  { %14043 = vrcp.f32 %v2669_v17  ;;  %12483 = vmatmul.mubr.msk.f32.gmra.mrb[98].mxu0 %vm2225_vm7, %v2805_v60  ;;  %v2806_v27 = vmul.f32 %v14034_v11, %v18799_v20 }
 0x607   :  { %14045 = vrcp.f32 %v2654_v41  ;;  %12485 = vmatprep.mubr.msk.f32.mxu0 %vm14379_vm1, %v18797_v45 }
 0x608   :  { %v14036_v50 = vpop.eup %14035  ;;  %12503 = vmatmul.mubr.msk.f32.gmra.mrb[100].mxu1 %vm2225_vm7, %v2811_v35  ;;  %v2660_v23 = vpop.xlane.xlu0 %2659 }
 0x609   :  { %v2672_v12 = vpop.xlane.xlu1 %2671  ;;  %v14038_v49 = vpop.eup %14037  ;;  %12505 = vmatprep.mubr.msk.f32.mxu1 %vm14379_vm1, %v18797_v45  ;;  %v2812_v15 = vmul.f32 %v14036_v50, %v15687_v51 }
 0x60a   :  { %14047 = vrcp.f32 %v2672_v12  ;;  %12486 = vmatmul.mubr.msk.f32.gmra.mrb[100].mxu0 %vm2225_vm7, %v2806_v27  ;;  %v2814_v47 = vmul.f32 %v14038_v49, %v18800_v16 }
 0x60b   :  { %14049 = vrcp.f32 %v2657_v61  ;;  %12513 = vmatprep.mubr.msk.f32.mxu0 %vm14379_vm1, %v18797_v45 }
 0x60c   :  { %v14040_v44 = vpop.eup %14039  ;;  %12506 = vmatmul.mubr.msk.f32.gmra.mrb[102].mxu1 %vm2225_vm7, %v2812_v15  ;;  %v2663_v18 = vpop.xlane.xlu0 %2662 }
 0x60d   :  { %v2675_v54 = vpop.xlane.xlu1 %2674  ;;  %v14042_v46 = vpop.eup %14041  ;;  %12508 = vmatprep.mubr.msk.f32.mxu1 %vm14379_vm1, %v18797_v45  ;;  %v2813_v51 = vmul.f32 %v14040_v44, %v15697_v63 }
 0x60e   :  { %14051 = vrcp.f32 %v2675_v54  ;;  %12514 = vmatmul.mubr.msk.f32.vlgmr.msra.gmra.mrb[102].mxu0 %vm2225_vm7, %v2814_v47  ;;  %v2815_v33 = vmul.f32 %v14042_v46, %v15693_v40 }
 0x60f   :  { %14053 = vrcp.f32 %v2660_v23  ;;  %12558 = vmatpush3.xpose.msk.msra.mxu0 %vm2225_vm7, %v780_v56  ;;  %12516 = vmatprep.mubr.msk.f32.mxu0 %vm14379_vm1, %v18797_v45 }
 0x610   :  { %v14044_v1 = vpop.eup %14043  ;;  %12509 = vmatmul.mubr.msk.f32.gmra.mrb[104].mxu1 %vm2225_vm7, %v2813_v51  ;;  %v2666_v48 = vpop.xlane.xlu0 %2665  ;;  %12603 = vmatprep.subr.mxu0 %v18797_v45 }
 0x611   :  { %v2678_v62 = vpop.xlane.xlu1 %2677  ;;  %v14046_v5 = vpop.eup %14045  ;;  %v2821_v63 = vmul.f32 %v14044_v1, %v15707_v6  ;;  %12536 = vmatprep.mubr.msk.f32.mxu1 %vm14379_vm1, %v18797_v45 }
 0x612   :  { %14055 = vrcp.f32 %v2678_v62  ;;  %12517 = vmatmul.mubr.msk.f32.gmra.mrb[104].mxu0 %vm2225_vm7, %v2815_v33  ;;  %v2816_v41 = vmul.f32 %v14046_v5, %v15703_v29 }
 0x613   :  { %14057 = vrcp.f32 %v2663_v18  ;;  %12519 = vmatprep.mubr.msk.f32.mxu0 %vm14379_vm1, %v18797_v45 }
 0x614   :  { %v14048_v43 = vpop.eup %14047  ;;  %12537 = vmatmul.mubr.msk.f32.vlgmr.msra.gmra.mrb[106].mxu1 %vm2225_vm7, %v2821_v63  ;;  %v2690_v40 = vpop.xlane.xlu0 %2689 }
 0x615   :  { %v2681_v0 = vpop.xlane.xlu1 %2680  ;;  %v14050_v37 = vpop.eup %14049  ;;  %12581 = vmatpush3.xpose.msk.msra.mxu1 %vm2225_vm7, %v790_v32  ;;  %12539 = vmatprep.mubr.msk.f32.mxu1 %vm14379_vm1, %v18797_v45  ;;  %v2822_v6 = vmul.f32 %v14048_v43, %v15717_v19 }
 0x616   :  { %14059 = vrcp.f32 %v2681_v0  ;;  %12520 = vmatmul.mubr.msk.f32.gmra.mrb[106].mxu0 %vm2225_vm7, %v2816_v41  ;;  %12626 = vmatprep.subr.mxu1 %v18797_v45  ;;  %v2817_v39 = vmul.f32 %v14050_v37, %v15713_v13  ;;  %v18802_v37 = vld [vmem:[#allocation61_spill] sm:$0xff] }
 0x617   :  { %14061 = vrcp.f32 %v2666_v48  ;;  %12522 = vmatprep.mubr.msk.f32.mxu0 %vm14379_vm1, %v18797_v45 }
 0x618   :  { %v14052_v4 = vpop.eup %14051  ;;  %12540 = vmatmul.mubr.msk.f32.gmra.mrb[108].mxu1 %vm2225_vm7, %v2822_v6  ;;  %v2693_v24 = vpop.xlane.xlu0 %2692 }
 0x619   :  { %v2684_v29 = vpop.xlane.xlu1 %2683  ;;  %v14054_v10 = vpop.eup %14053  ;;  %12542 = vmatprep.mubr.msk.f32.mxu1 %vm14379_vm1, %v18797_v45  ;;  %v2823_v19 = vmul.f32 %v14052_v4, %v15727_v59 }
 0x61a   :  { %14063 = vrcp.f32 %v2684_v29  ;;  %12523 = vmatmul.mubr.msk.f32.gmra.mrb[108].mxu0 %vm2225_vm7, %v2817_v39  ;;  %v2818_v13 = vmul.f32 %v14054_v10, %v15723_v42 }
 0x61b   :  { %14065 = vrcp.f32 %v2690_v40  ;;  %12525 = vmatprep.mubr.msk.f32.mxu0 %vm14379_vm1, %v18797_v45 }
 0x61c   :  { %v14056_v61 = vpop.eup %14055  ;;  %12543 = vmatmul.mubr.msk.f32.gmra.mrb[110].mxu1 %vm2225_vm7, %v2823_v19  ;;  %v2696_v35 = vpop.xlane.xlu0 %2695  ;;  %v10961_v19 = vld [vmem:[%s18560_s3 + $0x6c] sm:$0xf] }
 0x61d   :  { %v2687_v17 = vpop.xlane.xlu1 %2686  ;;  %v14058_v60 = vpop.eup %14057  ;;  %12545 = vmatprep.mubr.msk.f32.mxu1 %vm14379_vm1, %v18797_v45  ;;  %v2824_v59 = vmul.f32 %v14056_v61, %v15736_v21 }
 0x61e   :  { %14067 = vrcp.f32 %v2687_v17  ;;  %12526 = vmatmul.mubr.msk.f32.gmra.mrb[110].mxu0 %vm2225_vm7, %v2818_v13  ;;  %v2819_v42 = vmul.f32 %v14058_v60, %v15733_v22 }
 0x61f   :  { %14069 = vrcp.f32 %v2693_v24  ;;  %12528 = vmatprep.mubr.msk.f32.mxu0 %vm14379_vm1, %v18797_v45 }
 0x620   :  { %v14060_v11 = vpop.eup %14059  ;;  %12546 = vmatmul.mubr.msk.f32.gmra.mrb[112].mxu1 %vm2225_vm7, %v2824_v59 }
 0x621   :  { %v2711_v50 = vpop.xlane.xlu1 %2710  ;;  %v14062_v23 = vpop.eup %14061  ;;  %12548 = vmatprep.mubr.msk.f32.mxu1 %vm14379_vm1, %v18797_v45  ;;  %v2825_v21 = vmul.f32 %v14060_v11, %v15746_v30 }
 0x622   :  { %14071 = vrcp.f32 %v2711_v50  ;;  %12529 = vmatmul.mubr.msk.f32.gmra.mrb[112].mxu0 %vm2225_vm7, %v2819_v42  ;;  %v2820_v22 = vmul.f32 %v14062_v23, %v15742_v57  ;;  %v10958_v57 = vld [vmem:[%s18560_s3 + $0x60] sm:$0xf] }
 0x623   :  { %14073 = vrcp.f32 %v2696_v35  ;;  %12531 = vmatprep.mubr.msk.f32.mxu0 %vm14379_vm1, %v18797_v45 }
 0x624   :  { %v14064_v12 = vpop.eup %14063  ;;  %12549 = vmatmul.mubr.msk.f32.gmra.mrb[114].mxu1 %vm2225_vm7, %v2825_v21  ;;  %v2699_v20 = vpop.xlane.xlu0 %2698 }
 0x625   :  { %v2714_v27 = vpop.xlane.xlu1 %2713  ;;  %v14066_v49 = vpop.eup %14065  ;;  %12551 = vmatprep.mubr.msk.f32.mxu1 %vm14379_vm1, %v18797_v45  ;;  %v2826_v34 = vmul.f32 %v14064_v12, %v15755_v7 }
 0x626   :  { %14075 = vrcp.f32 %v2714_v27  ;;  %12532 = vmatmul.mubr.msk.f32.gmra.mrb[114].mxu0 %vm2225_vm7, %v2820_v22  ;;  %v2828_v15 = vmul.f32 %v14066_v49, %v15752_v38 }
 0x627   :  { %14077 = vrcp.f32 %v2699_v20  ;;  %12559 = vmatprep.mubr.msk.f32.mxu0 %vm14379_vm1, %v18797_v45 }
 0x628   :  { %v14068_v30 = vpop.eup %14067  ;;  %12552 = vmatmul.mubr.msk.f32.gmra.mrb[116].mxu1 %vm2225_vm7, %v2826_v34 }
 0x629   :  { %v2717_v44 = vpop.xlane.xlu1 %2716  ;;  %v14070_v16 = vpop.eup %14069  ;;  %12554 = vmatprep.mubr.msk.f32.mxu1 %vm14379_vm1, %v18797_v45  ;;  %v2827_v7 = vmul.f32 %v14068_v30, %v15768_v55  ;;  %v10959_v55 = vld [vmem:[%s18560_s3 + $0x64] sm:$0xf] }
 0x62a   :  { %14079 = vrcp.f32 %v2717_v44  ;;  %12560 = vmatmul.mubr.msk.f32.vlgmr.msra.gmra.mrb[116].mxu0 %vm2225_vm7, %v2828_v15  ;;  %v2829_v46 = vmul.f32 %v14070_v16, %v15761_v52 }
 0x62b   :  { %12562 = vmatprep.mubr.msk.f32.mxu0 %vm14379_vm1, %v18797_v45  ;;  %12604 = vmatpush3.msk.msra.mxu0 %vm981_vm5, %v10958_v57 }
 0x62c   :  { %v14072_v47 = vpop.eup %14071  ;;  %12555 = vmatmul.mubr.msk.f32.gmra.mrb[118].mxu1 %vm2225_vm7, %v2827_v7  ;;  %v2702_v18 = vpop.xlane.xlu0 %2701  ;;  %12649 = vmatprep.subr.mxu0 %v18797_v45 }
 0x62d   :  { %v2835_v38 = vmul.f32 %v14072_v47, %v15777_v26  ;;  %v2720_v54 = vpop.xlane.xlu1 %2719  ;;  %v14074_v53 = vpop.eup %14073  ;;  %14081 = vrcp.f32 %v2702_v18  ;;  %12582 = vmatprep.mubr.msk.f32.mxu1 %vm14379_vm1, %v18797_v45 }
 0x62e   :  { %14083 = vrcp.f32 %v2720_v54  ;;  %12563 = vmatmul.mubr.msk.f32.gmra.mrb[118].mxu0 %vm2225_vm7, %v2829_v46  ;;  %v2830_v56 = vmul.f32 %v14074_v53, %v15771_v31 }
 0x62f   :  { %12565 = vmatprep.mubr.msk.f32.mxu0 %vm14379_vm1, %v18797_v45 }
 0x630   :  { %v14076_v26 = vpop.eup %14075  ;;  %12583 = vmatmul.mubr.msk.f32.vlgmr.msra.gmra.mrb[120].mxu1 %vm2225_vm7, %v2835_v38  ;;  %v10962_v38 = vld [vmem:[%s18560_s3 + $0x70] sm:$0xf] }
 0x631   :  { %v2723_v52 = vpop.xlane.xlu1 %2722  ;;  %v14078_v51 = vpop.eup %14077  ;;  %12585 = vmatprep.mubr.msk.f32.mxu1 %vm14379_vm1, %v18797_v45  ;;  %v2836_v1 = vmul.f32 %v14076_v26, %v15782_v58  ;;  %12627 = vmatpush3.msk.msra.mxu1 %vm981_vm5, %v10959_v55  ;;  %v10963_v55 = vld [vmem:[%s18560_s3 + $0x74] sm:$0xf] }
 0x632   :  { %14085 = vrcp.f32 %v2723_v52  ;;  %12566 = vmatmul.mubr.msk.f32.gmra.mrb[120].mxu0 %vm2225_vm7, %v2830_v56  ;;  %12672 = vmatprep.subr.mxu1 %v18797_v45  ;;  %v2831_v62 = vmul.f32 %v14078_v51, %v15785_v3 }
 0x633   :  { %12568 = vmatprep.mubr.msk.f32.mxu0 %vm14379_vm1, %v18797_v45 }
 0x634   :  { %v14080_v48 = vpop.eup %14079  ;;  %12586 = vmatmul.mubr.msk.f32.gmra.mrb[122].mxu1 %vm2225_vm7, %v2836_v1  ;;  %v2705_v31 = vpop.xlane.xlu0 %2704 }
 0x635   :  { %v2837_v33 = vmul.f32 %v14080_v48, %v15792_v36  ;;  %14087 = vrcp.f32 %v2705_v31  ;;  %12588 = vmatprep.mubr.msk.f32.mxu1 %vm14379_vm1, %v18797_v45 }
 0x636   :  { %12569 = vmatmul.mubr.msk.f32.gmra.mrb[122].mxu0 %vm2225_vm7, %v2831_v62 }
 0x637   :  { %v14082_v58 = vpop.eup %14081  ;;  %12571 = vmatprep.mubr.msk.f32.mxu0 %vm14379_vm1, %v18797_v45 }
 0x638   :  { %v14084_v5 = vpop.eup %14083  ;;  %12589 = vmatmul.mubr.msk.f32.gmra.mrb[124].mxu1 %vm2225_vm7, %v2837_v33  ;;  %v2708_v63 = vpop.xlane.xlu0 %2707  ;;  %v2832_v43 = vmul.f32 %v14082_v58, %v15800_v25 }
 0x639   :  { %v2726_v32 = vpop.xlane.xlu1 %2725  ;;  %14089 = vrcp.f32 %v2708_v63  ;;  %12591 = vmatprep.mubr.msk.f32.mxu1 %vm14379_vm1, %v18797_v45  ;;  %v2838_v3 = vmul.f32 %v14084_v5, %v15797_v8 }
 0x63a   :  { %14091 = vrcp.f32 %v2726_v32  ;;  %12572 = vmatmul.mubr.msk.f32.gmra.mrb[124].mxu0 %vm2225_vm7, %v2832_v43 }
 0x63b   :  { %12574 = vmatprep.mubr.msk.f32.mxu0 %vm14379_vm1, %v18797_v45 }
 0x63c   :  { %v14086_v36 = vpop.eup %14085  ;;  %12592 = vmatmul.mubr.msk.f32.gmra.mrb[126].mxu1 %vm2225_vm7, %v2838_v3 }
 0x63d   :  { %v2839_v40 = vmul.f32 %v14086_v36, %v15806_v14  ;;  %12594 = vmatprep.mubr.msk.f32.mxu1 %vm14379_vm1, %v18797_v45 }
 0x63f   :  { %v14088_v25 = vpop.eup %14087 }
 0x640   :  { %12595 = vmatmul.mubr.msk.f32.gmra.mrb[128].mxu1 %vm2225_vm7, %v2839_v40  ;;  %v2833_v0 = vmul.f32 %v14088_v25, %v15810_v2  ;;  %v10960_v2 = vld [vmem:[%s18560_s3 + $0x68] sm:$0xf] }
 0x641   :  { %12597 = vmatprep.mubr.msk.f32.mxu1 %vm14379_vm1, %v18797_v45 }
 0x642   :  { %12575 = vmatmul.mubr.msk.f32.gmra.mrb[126].mxu0 %vm2225_vm7, %v2833_v0 }
 0x643   :  { %v14090_v8 = vpop.eup %14089  ;;  %12577 = vmatprep.mubr.msk.f32.mxu0 %vm14379_vm1, %v18797_v45 }
 0x644   :  { %v14092_v41 = vpop.eup %14091  ;;  %v2834_v14 = vmul.f32 %v14090_v8, %v15814_v9 }
 0x645   :  { %v2840_v6 = vmul.f32 %v14092_v41, %v18802_v37  ;;  %v10964_v37 = vld [vmem:[%s18560_s3 + $0x78] sm:$0xf] }
 0x646   :  { %12578 = vmatmul.mubr.msk.f32.gmra.mrb[128].mxu0 %vm2225_vm7, %v2834_v14 }
 0x647   :  { %12598 = vmatmul.mubr.msk.f32.gmra.mrb[130].mxu1 %vm2225_vm7, %v2840_v6  ;;  %12605 = vmatprep.mubr.msk.f32.mxu0 %vm14379_vm1, %v18797_v45 }
 0x648   :  { %12600 = vmatprep.mubr.msk.f32.mxu1 %vm14379_vm1, %v18797_v45 }
 0x681   :  { %v2931_v4 = vpop.f32.mrb[74].mxu0 }
 0x682   :  { %v12423_v29 = vpop.f32.mrb[75].mxu0  ;;  %12606 = vmatmul.mubr.msk.f32.vlgmr.msra.gmra.mrb[130].mxu0 %vm959_vm6, %v2931_v4  ;;  %v2729_v9 = vpop.xlane.xlu1 %2728 }
 0x683   :  { %14093 = vrcp.f32 %v2729_v9  ;;  %12608 = vmatprep.mubr.msk.f32.mxu0 %vm14379_vm1, %v18797_v45  ;;  %12650 = vmatpush3.msk.msra.mxu0 %vm981_vm5, %v10960_v2  ;;  %v18803_v9 = vmov 0.0|0.0  }
 0x684   :  { %12695 = vmatprep.subr.mxu0 %v18797_v45 }
 0x68d   :  { %v14094_v39 = vpop.eup %14093 }
 0x68e   :  { %v2841_v10 = vmul.f32 %v14094_v39, %v15891_v28 }
 0x690   :  { %12601 = vmatmul.mubr.msk.f32.gmra.mrb[132].mxu1 %vm2225_vm7, %v2841_v10 }
 0x691   :  { %12628 = vmatprep.mubr.msk.f32.mxu1 %vm14379_vm1, %v18797_v45 }
 0x69d   :  { %v3054_v24 = vpop.f32.mrb[78].mxu1 }
 0x69e   :  { %v12446_v61 = vpop.f32.mrb[79].mxu1  ;;  %12629 = vmatmul.mubr.msk.f32.vlgmr.msra.gmra.mrb[134].mxu1 %vm959_vm6, %v3054_v24 }
 0x69f   :  { %12631 = vmatprep.mubr.msk.f32.mxu1 %vm14379_vm1, %v18797_v45  ;;  %12673 = vmatpush3.msk.msra.mxu1 %vm981_vm5, %v10961_v19  ;;  %v10965_v19 = vld [vmem:[%s18560_s3 + $0x7c] sm:$0xf] }
 0x6a0   :  { %12718 = vmatprep.subr.mxu1 %v18797_v45 }
 0x6a1   :  { %v2936_v28 = vpop.f32.mrb[76].mxu0 }
 0x6a2   :  { %v12426_v17 = vpop.f32.mrb[77].mxu0  ;;  %12609 = vmatmul.mubr.msk.f32.gmra.mrb[132].mxu0 %vm959_vm6, %v2936_v28 }
 0x6a3   :  { %12611 = vmatprep.mubr.msk.f32.mxu0 %vm14379_vm1, %v18797_v45 }
 0x6a5   :  { %v3059_v13 = vpop.f32.mrb[80].mxu1 }
 0x6a6   :  { %v12449_v60 = vpop.f32.mrb[81].mxu1  ;;  %12632 = vmatmul.mubr.msk.f32.gmra.mrb[136].mxu1 %vm959_vm6, %v3059_v13 }
 0x6a7   :  { %12634 = vmatprep.mubr.msk.f32.mxu1 %vm14379_vm1, %v18797_v45 }
 0x6a9   :  { %v2941_v59 = vpop.f32.mrb[78].mxu0 }
 0x6aa   :  { %v12429_v11 = vpop.f32.mrb[79].mxu0  ;;  %12612 = vmatmul.mubr.msk.f32.gmra.mrb[134].mxu0 %vm959_vm6, %v2941_v59 }
 0x6ab   :  { %12614 = vmatprep.mubr.msk.f32.mxu0 %vm14379_vm1, %v18797_v45 }
 0x6ad   :  { %v3064_v35 = vpop.f32.mrb[82].mxu1 }
 0x6ae   :  { %v12452_v50 = vpop.f32.mrb[83].mxu1  ;;  %12635 = vmatmul.mubr.msk.f32.gmra.mrb[138].mxu1 %vm959_vm6, %v3064_v35 }
 0x6af   :  { %12637 = vmatprep.mubr.msk.f32.mxu1 %vm14379_vm1, %v18797_v45 }
 0x6b1   :  { %v2946_v42 = vpop.f32.mrb[80].mxu0 }
 0x6b2   :  { %v12432_v23 = vpop.f32.mrb[81].mxu0  ;;  %12615 = vmatmul.mubr.msk.f32.gmra.mrb[136].mxu0 %vm959_vm6, %v2946_v42 }
 0x6b3   :  { %12617 = vmatprep.mubr.msk.f32.mxu0 %vm14379_vm1, %v18797_v45 }
 0x6b5   :  { %v3069_v21 = vpop.f32.mrb[84].mxu1 }
 0x6b6   :  { %v12455_v12 = vpop.f32.mrb[85].mxu1  ;;  %12638 = vmatmul.mubr.msk.f32.gmra.mrb[140].mxu1 %vm959_vm6, %v3069_v21 }
 0x6b7   :  { %12640 = vmatprep.mubr.msk.f32.mxu1 %vm14379_vm1, %v18797_v45 }
 0x6b9   :  { %v2951_v20 = vpop.f32.mrb[82].mxu0 }
 0x6ba   :  { %v12435_v27 = vpop.f32.mrb[83].mxu0  ;;  %12618 = vmatmul.mubr.msk.f32.gmra.mrb[138].mxu0 %vm959_vm6, %v2951_v20 }
 0x6bb   :  { %12620 = vmatprep.mubr.msk.f32.mxu0 %vm14379_vm1, %v18797_v45 }
 0x6bd   :  { %v2956_v22 = vpop.f32.mrb[84].mxu0  ;;  %v3074_v49 = vpop.f32.mrb[86].mxu1 }
 0x6be   :  { %v12438_v34 = vpop.f32.mrb[85].mxu0  ;;  %v12458_v30 = vpop.f32.mrb[87].mxu1  ;;  %12621 = vmatmul.mubr.msk.f32.gmra.mrb[140].mxu0 %vm959_vm6, %v2956_v22  ;;  %12641 = vmatmul.mubr.msk.f32.gmra.mrb[142].mxu1 %vm959_vm6, %v3074_v49 }
 0x6bf   :  { %12623 = vmatprep.mubr.msk.f32.mxu0 %vm14379_vm1, %v18797_v45  ;;  %12643 = vmatprep.mubr.msk.f32.mxu1 %vm14379_vm1, %v18797_v45 }
 0x6c1   :  { %v2961_v15 = vpop.f32.mrb[86].mxu0  ;;  %v3079_v44 = vpop.f32.mrb[88].mxu1 }
 0x6c2   :  { %v12441_v57 = vpop.f32.mrb[87].mxu0  ;;  %v12461_v16 = vpop.f32.mrb[89].mxu1  ;;  %12624 = vmatmul.mubr.msk.f32.gmra.mrb[142].mxu0 %vm959_vm6, %v2961_v15  ;;  %12644 = vmatmul.mubr.msk.f32.gmra.mrb[144].mxu1 %vm959_vm6, %v3079_v44 }
 0x6c3   :  { %12646 = vmatprep.mubr.msk.f32.mxu1 %vm14379_vm1, %v18797_v45  ;;  %12651 = vmatprep.mubr.msk.f32.mxu0 %vm14379_vm1, %v18797_v45 }
 0x6c5   :  { %v3084_v7 = vpop.f32.mrb[90].mxu1  ;;  %v3177_v47 = vpop.f32.mrb[88].mxu0 }
 0x6c6   :  { %v12464_v18 = vpop.f32.mrb[91].mxu1  ;;  %v12469_v54 = vpop.f32.mrb[89].mxu0  ;;  %12647 = vmatmul.mubr.msk.f32.gmra.mrb[146].mxu1 %vm959_vm6, %v3084_v7  ;;  %12652 = vmatmul.mubr.msk.f32.vlgmr.msra.gmra.mrb[144].mxu0 %vm959_vm6, %v3177_v47 }
 0x6c7   :  { %12654 = vmatprep.mubr.msk.f32.mxu0 %vm14379_vm1, %v18797_v45  ;;  %12674 = vmatprep.mubr.msk.f32.mxu1 %vm14379_vm1, %v18797_v45 }
 0x6c8   :  { %12696 = vmatpush3.msk.msra.mxu0 %vm981_vm5, %v10962_v38 }
 0x6c9   :  { %v3182_v46 = vpop.f32.mrb[90].mxu0  ;;  %12741 = vmatprep.subr.mxu0 %v18797_v45 }
 0x6ca   :  { %v12472_v53 = vpop.f32.mrb[91].mxu0  ;;  %12655 = vmatmul.mubr.msk.f32.gmra.mrb[146].mxu0 %vm959_vm6, %v3182_v46 }
 0x6cb   :  { %v3300_v26 = vpop.f32.mrb[92].mxu1  ;;  %12657 = vmatprep.mubr.msk.f32.mxu0 %vm14379_vm1, %v18797_v45 }
 0x6cc   :  { %v12492_v52 = vpop.f32.mrb[93].mxu1  ;;  %12675 = vmatmul.mubr.msk.f32.vlgmr.msra.gmra.mrb[148].mxu1 %vm959_vm6, %v3300_v26 }
 0x6cd   :  { %v3187_v56 = vpop.f32.mrb[92].mxu0  ;;  %12677 = vmatprep.mubr.msk.f32.mxu1 %vm14379_vm1, %v18797_v45  ;;  %12719 = vmatpush3.msk.msra.mxu1 %vm981_vm5, %v10963_v55 }
 0x6ce   :  { %v12475_v51 = vpop.f32.mrb[93].mxu0  ;;  %12658 = vmatmul.mubr.msk.f32.gmra.mrb[148].mxu0 %vm959_vm6, %v3187_v56  ;;  %12764 = vmatprep.subr.mxu1 %v18797_v45 }
 0x6cf   :  { %v3305_v1 = vpop.f32.mrb[94].mxu1  ;;  %12660 = vmatprep.mubr.msk.f32.mxu0 %vm14379_vm1, %v18797_v45 }
 0x6d0   :  { %v12495_v48 = vpop.f32.mrb[95].mxu1  ;;  %12678 = vmatmul.mubr.msk.f32.gmra.mrb[150].mxu1 %vm959_vm6, %v3305_v1 }
 0x6d1   :  { %v3192_v31 = vpop.f32.mrb[94].mxu0  ;;  %12680 = vmatprep.mubr.msk.f32.mxu1 %vm14379_vm1, %v18797_v45 }
 0x6d2   :  { %v12478_v62 = vpop.f32.mrb[95].mxu0  ;;  %12661 = vmatmul.mubr.msk.f32.gmra.mrb[150].mxu0 %vm959_vm6, %v3192_v31 }
 0x6d3   :  { %v3310_v33 = vpop.f32.mrb[96].mxu1  ;;  %12663 = vmatprep.mubr.msk.f32.mxu0 %vm14379_vm1, %v18797_v45 }
 0x6d4   :  { %v12498_v58 = vpop.f32.mrb[97].mxu1  ;;  %12681 = vmatmul.mubr.msk.f32.gmra.mrb[152].mxu1 %vm959_vm6, %v3310_v33 }
 0x6d5   :  { %v3197_v5 = vpop.f32.mrb[96].mxu0  ;;  %12683 = vmatprep.mubr.msk.f32.mxu1 %vm14379_vm1, %v18797_v45 }
 0x6d6   :  { %v12481_v63 = vpop.f32.mrb[97].mxu0  ;;  %12664 = vmatmul.mubr.msk.f32.gmra.mrb[152].mxu0 %vm959_vm6, %v3197_v5 }
 0x6d7   :  { %v3315_v32 = vpop.f32.mrb[98].mxu1  ;;  %12666 = vmatprep.mubr.msk.f32.mxu0 %vm14379_vm1, %v18797_v45 }
 0x6d8   :  { %v12501_v43 = vpop.f32.mrb[99].mxu1  ;;  %12684 = vmatmul.mubr.msk.f32.gmra.mrb[154].mxu1 %vm959_vm6, %v3315_v32 }
 0x6d9   :  { %v3202_v3 = vpop.f32.mrb[98].mxu0  ;;  %12686 = vmatprep.mubr.msk.f32.mxu1 %vm14379_vm1, %v18797_v45 }
 0x6da   :  { %v12484_v36 = vpop.f32.mrb[99].mxu0  ;;  %12667 = vmatmul.mubr.msk.f32.gmra.mrb[154].mxu0 %vm959_vm6, %v3202_v3 }
 0x6db   :  { %v3320_v40 = vpop.f32.mrb[100].mxu1  ;;  %12669 = vmatprep.mubr.msk.f32.mxu0 %vm14379_vm1, %v18797_v45 }
 0x6dc   :  { %v12504_v25 = vpop.f32.mrb[101].mxu1  ;;  %12687 = vmatmul.mubr.msk.f32.gmra.mrb[156].mxu1 %vm959_vm6, %v3320_v40 }
 0x6dd   :  { %v3207_v0 = vpop.f32.mrb[100].mxu0  ;;  %12689 = vmatprep.mubr.msk.f32.mxu1 %vm14379_vm1, %v18797_v45 }
 0x6de   :  { %v12487_v8 = vpop.f32.mrb[101].mxu0  ;;  %12670 = vmatmul.mubr.msk.f32.gmra.mrb[156].mxu0 %vm959_vm6, %v3207_v0 }
 0x6df   :  { %v3325_v41 = vpop.f32.mrb[102].mxu1  ;;  %12697 = vmatprep.mubr.msk.f32.mxu0 %vm14379_vm1, %v18797_v45 }
 0x6e0   :  { %v12507_v14 = vpop.f32.mrb[103].mxu1  ;;  %12690 = vmatmul.mubr.msk.f32.gmra.mrb[158].mxu1 %vm959_vm6, %v3325_v41  ;;  %v4953_v41 = vld [vmem:[%s18559_s2] sm:$0xff] }
 0x6e1   :  { %v3423_v6 = vpop.f32.mrb[102].mxu0  ;;  %12692 = vmatprep.mubr.msk.f32.mxu1 %vm14379_vm1, %v18797_v45  ;;  %v4954_v14 = vld [vmem:[%s18559_s2 + $0x8] sm:$0xff] }
 0x6e2   :  { %v12515_v2 = vpop.f32.mrb[103].mxu0  ;;  %12698 = vmatmul.mubr.msk.f32.vlgmr.msra.gmra.mrb[158].mxu0 %vm959_vm6, %v3423_v6  ;;  %v4955_v6 = vld [vmem:[%s18559_s2 + $0x10] sm:$0xff] }
 0x6e3   :  { %v3330_v4 = vpop.f32.mrb[104].mxu1  ;;  %12700 = vmatprep.mubr.msk.f32.mxu0 %vm14379_vm1, %v18797_v45  ;;  %12742 = vmatpush3.msk.msra.mxu0 %vm981_vm5, %v10964_v37  ;;  %v13681_v37 = vpack.c.bf16 %v4954_v14, %v4953_v41  ;;  %v4956_v2 = vld [vmem:[%s18559_s2 + $0x18] sm:$0xff] }
 0x6e4   :  { %v12510_v29 = vpop.f32.mrb[105].mxu1  ;;  %12693 = vmatmul.mubr.msk.f32.gmra.mrb[160].mxu1 %vm959_vm6, %v3330_v4  ;;  %13680 = vmatprep.subr.bf16.mxu0 %v18803_v9  ;;  %v13684_v4 = vpack.c.bf16 %v4956_v2, %v4955_v6 }
 0x6e5   :  { %v3428_v39 = vpop.f32.mrb[104].mxu0  ;;  %12720 = vmatprep.mubr.msk.f32.mxu1 %vm14379_vm1, %v18797_v45 }
 0x6e6   :  { %v12518_v10 = vpop.f32.mrb[105].mxu0  ;;  %12701 = vmatmul.mubr.msk.f32.gmra.mrb[160].mxu0 %vm959_vm6, %v3428_v39 }
 0x6e7   :  { %v3546_v24 = vpop.f32.mrb[106].mxu1  ;;  %12703 = vmatprep.mubr.msk.f32.mxu0 %vm14379_vm1, %v18797_v45 }
 0x6e8   :  { %v12538_v61 = vpop.f32.mrb[107].mxu1  ;;  %12721 = vmatmul.mubr.msk.f32.vlgmr.msra.gmra.mrb[162].mxu1 %vm959_vm6, %v3546_v24 }
 0x6e9   :  { %v3433_v28 = vpop.f32.mrb[106].mxu0  ;;  %12723 = vmatprep.mubr.msk.f32.mxu1 %vm14379_vm1, %v18797_v45  ;;  %12765 = vmatpush3.msk.msra.mxu1 %vm981_vm5, %v10965_v19 }
 0x6ea   :  { %v12521_v17 = vpop.f32.mrb[107].mxu0  ;;  %12704 = vmatmul.mubr.msk.f32.gmra.mrb[162].mxu0 %vm959_vm6, %v3433_v28  ;;  %13686 = vmatprep.subr.bf16.mxu1 %v18803_v9 }
 0x6eb   :  { %v3551_v13 = vpop.f32.mrb[108].mxu1  ;;  %12706 = vmatprep.mubr.msk.f32.mxu0 %vm14379_vm1, %v18797_v45 }
 0x6ec   :  { %v12541_v60 = vpop.f32.mrb[109].mxu1  ;;  %12724 = vmatmul.mubr.msk.f32.gmra.mrb[164].mxu1 %vm959_vm6, %v3551_v13 }
 0x6ed   :  { %v3438_v59 = vpop.f32.mrb[108].mxu0  ;;  %12726 = vmatprep.mubr.msk.f32.mxu1 %vm14379_vm1, %v18797_v45 }
 0x6ee   :  { %v12524_v11 = vpop.f32.mrb[109].mxu0  ;;  %12707 = vmatmul.mubr.msk.f32.gmra.mrb[164].mxu0 %vm959_vm6, %v3438_v59 }
 0x6ef   :  { %v3556_v35 = vpop.f32.mrb[110].mxu1  ;;  %12709 = vmatprep.mubr.msk.f32.mxu0 %vm14379_vm1, %v18797_v45 }
 0x6f0   :  { %v12544_v50 = vpop.f32.mrb[111].mxu1  ;;  %12727 = vmatmul.mubr.msk.f32.gmra.mrb[166].mxu1 %vm959_vm6, %v3556_v35 }
 0x6f1   :  { %v3443_v42 = vpop.f32.mrb[110].mxu0  ;;  %12729 = vmatprep.mubr.msk.f32.mxu1 %vm14379_vm1, %v18797_v45 }
 0x6f2   :  { %v12527_v23 = vpop.f32.mrb[111].mxu0  ;;  %12710 = vmatmul.mubr.msk.f32.gmra.mrb[166].mxu0 %vm959_vm6, %v3443_v42 }
 0x6f3   :  { %v3561_v21 = vpop.f32.mrb[112].mxu1  ;;  %12712 = vmatprep.mubr.msk.f32.mxu0 %vm14379_vm1, %v18797_v45 }
 0x6f4   :  { %v12547_v12 = vpop.f32.mrb[113].mxu1  ;;  %12730 = vmatmul.mubr.msk.f32.gmra.mrb[168].mxu1 %vm959_vm6, %v3561_v21 }
 0x6f5   :  { %v3448_v20 = vpop.f32.mrb[112].mxu0  ;;  %12732 = vmatprep.mubr.msk.f32.mxu1 %vm14379_vm1, %v18797_v45 }
 0x6f6   :  { %v12530_v27 = vpop.f32.mrb[113].mxu0  ;;  %12713 = vmatmul.mubr.msk.f32.gmra.mrb[168].mxu0 %vm959_vm6, %v3448_v20 }
 0x6f7   :  { %v3566_v22 = vpop.f32.mrb[114].mxu1  ;;  %12715 = vmatprep.mubr.msk.f32.mxu0 %vm14379_vm1, %v18797_v45 }
 0x6f8   :  { %v12550_v49 = vpop.f32.mrb[115].mxu1  ;;  %12733 = vmatmul.mubr.msk.f32.gmra.mrb[170].mxu1 %vm959_vm6, %v3566_v22 }
 0x6f9   :  { %v3453_v34 = vpop.f32.mrb[114].mxu0  ;;  %12735 = vmatprep.mubr.msk.f32.mxu1 %vm14379_vm1, %v18797_v45 }
 0x6fa   :  { %v12533_v30 = vpop.f32.mrb[115].mxu0  ;;  %12716 = vmatmul.mubr.msk.f32.gmra.mrb[170].mxu0 %vm959_vm6, %v3453_v34 }
 0x6fb   :  { %v3571_v15 = vpop.f32.mrb[116].mxu1  ;;  %12743 = vmatprep.mubr.msk.f32.mxu0 %vm14379_vm1, %v18797_v45 }
 0x6fc   :  { %v12553_v44 = vpop.f32.mrb[117].mxu1  ;;  %12736 = vmatmul.mubr.msk.f32.gmra.mrb[172].mxu1 %vm959_vm6, %v3571_v15 }
 0x6fd   :  { %v3669_v57 = vpop.f32.mrb[116].mxu0  ;;  %12738 = vmatprep.mubr.msk.f32.mxu1 %vm14379_vm1, %v18797_v45 }
 0x6fe   :  { %v12561_v16 = vpop.f32.mrb[117].mxu0  ;;  %12744 = vmatmul.mubr.msk.f32.vlgmr.msra.gmra.mrb[172].mxu0 %vm959_vm6, %v3669_v57 }
 0x6ff   :  { %v3576_v7 = vpop.f32.mrb[118].mxu1  ;;  %12746 = vmatprep.mubr.msk.f32.mxu0 %vm14379_vm1, %v18797_v45  ;;  %13682 = vmatpush3.bf16.msra.mxu0 %v13681_v37 }
 0x700   :  { %v12556_v47 = vpop.f32.mrb[119].mxu1  ;;  %12739 = vmatmul.mubr.msk.f32.gmra.mrb[174].mxu1 %vm959_vm6, %v3576_v7  ;;  %13683 = vmatprep.subr.bf16.mxu0 %v18803_v9 }
 0x701   :  { %v3674_v38 = vpop.f32.mrb[118].mxu0  ;;  %12766 = vmatprep.mubr.msk.f32.mxu1 %vm14379_vm1, %v18797_v45 }
 0x702   :  { %v12564_v18 = vpop.f32.mrb[119].mxu0  ;;  %12747 = vmatmul.mubr.msk.f32.gmra.mrb[174].mxu0 %vm959_vm6, %v3674_v38 }
 0x703   :  { %v3792_v54 = vpop.f32.mrb[120].mxu1  ;;  %12749 = vmatprep.mubr.msk.f32.mxu0 %vm14379_vm1, %v18797_v45  ;;  %13685 = vmatpush3.bf16.msra.mxu0 %v13684_v4 }
 0x704   :  { %v12584_v46 = vpop.f32.mrb[121].mxu1  ;;  %12767 = vmatmul.mubr.msk.f32.vlgmr.msra.gmra.mrb[176].mxu1 %vm959_vm6, %v3792_v54 }
 0x705   :  { %v3679_v53 = vpop.f32.mrb[120].mxu0  ;;  %12769 = vmatprep.mubr.msk.f32.mxu1 %vm14379_vm1, %v18797_v45 }
 0x706   :  { %v12567_v55 = vpop.f32.mrb[121].mxu0  ;;  %12750 = vmatmul.mubr.msk.f32.gmra.mrb[176].mxu0 %vm959_vm6, %v3679_v53 }
 0x707   :  { %v3797_v26 = vpop.f32.mrb[122].mxu1  ;;  %12752 = vmatprep.mubr.msk.f32.mxu0 %vm14379_vm1, %v18797_v45 }
 0x708   :  { %v12587_v52 = vpop.f32.mrb[123].mxu1  ;;  %12770 = vmatmul.mubr.msk.f32.gmra.mrb[178].mxu1 %vm959_vm6, %v3797_v26 }
 0x709   :  { %v3684_v56 = vpop.f32.mrb[122].mxu0  ;;  %12772 = vmatprep.mubr.msk.f32.mxu1 %vm14379_vm1, %v18797_v45 }
 0x70a   :  { %v12570_v51 = vpop.f32.mrb[123].mxu0  ;;  %12753 = vmatmul.mubr.msk.f32.gmra.mrb[178].mxu0 %vm959_vm6, %v3684_v56 }
 0x70b   :  { %v3802_v1 = vpop.f32.mrb[124].mxu1  ;;  %12755 = vmatprep.mubr.msk.f32.mxu0 %vm14379_vm1, %v18797_v45 }
 0x70c   :  { %v12590_v48 = vpop.f32.mrb[125].mxu1  ;;  %12773 = vmatmul.mubr.msk.f32.gmra.mrb[180].mxu1 %vm959_vm6, %v3802_v1 }
 0x70d   :  { %v3689_v31 = vpop.f32.mrb[124].mxu0  ;;  %12775 = vmatprep.mubr.msk.f32.mxu1 %vm14379_vm1, %v18797_v45 }
 0x70e   :  { %v12573_v62 = vpop.f32.mrb[125].mxu0  ;;  %12756 = vmatmul.mubr.msk.f32.gmra.mrb[180].mxu0 %vm959_vm6, %v3689_v31 }
 0x70f   :  { %v3807_v33 = vpop.f32.mrb[126].mxu1  ;;  %12758 = vmatprep.mubr.msk.f32.mxu0 %vm14379_vm1, %v18797_v45 }
 0x710   :  { %v12593_v58 = vpop.f32.mrb[127].mxu1  ;;  %12776 = vmatmul.mubr.msk.f32.gmra.mrb[182].mxu1 %vm959_vm6, %v3807_v33 }
 0x711   :  { %12778 = vmatprep.mubr.msk.f32.mxu1 %vm14379_vm1, %v18797_v45 }
 0x713   :  { %v3812_v5 = vpop.f32.mrb[128].mxu1 }
 0x714   :  { %v12596_v63 = vpop.f32.mrb[129].mxu1  ;;  %12779 = vmatmul.mubr.msk.f32.gmra.mrb[184].mxu1 %vm959_vm6, %v3812_v5 }
 0x715   :  { %v3694_v32 = vpop.f32.mrb[126].mxu0  ;;  %12781 = vmatprep.mubr.msk.f32.mxu1 %vm14379_vm1, %v18797_v45 }
 0x716   :  { %v12576_v43 = vpop.f32.mrb[127].mxu0  ;;  %12759 = vmatmul.mubr.msk.f32.gmra.mrb[182].mxu0 %vm959_vm6, %v3694_v32 }
 0x717   :  { %12761 = vmatprep.mubr.msk.f32.mxu0 %vm14379_vm1, %v18797_v45 }
 0x719   :  { %v3699_v3 = vpop.f32.mrb[128].mxu0 }
 0x71a   :  { %v3817_v36 = vpop.f32.mrb[130].mxu1  ;;  %v12579_v40 = vpop.f32.mrb[129].mxu0  ;;  %12762 = vmatmul.mubr.msk.f32.gmra.mrb[184].mxu0 %vm959_vm6, %v3699_v3 }
 0x71b   :  { %v12599_v25 = vpop.f32.mrb[131].mxu1  ;;  %12782 = vmatmul.mubr.msk.f32.gmra.mrb[186].mxu1 %vm959_vm6, %v3817_v36  ;;  %12795 = vmatprep.mubr.msk.f32.mxu0 %vm14379_vm1, %v18797_v45 }
 0x71c   :  { %12784 = vmatprep.mubr.msk.f32.mxu1 %vm14379_vm1, %v18797_v45 }
 0x755   :  { %v3916_v0 = vpop.f32.mrb[130].mxu0 }
 0x756   :  { %v12607_v8 = vpop.f32.mrb[131].mxu0  ;;  %v4818_v19 = vsel %vm31_vm0, %v3916_v0, 0.0 }
 0x763   :  { %v3822_v29 = vpop.f32.mrb[132].mxu1 }
 0x764   :  { %v12602_v39 = vpop.f32.mrb[133].mxu1  ;;  %12785 = vmatmul.mubr.msk.f32.gmra.mrb[188].mxu1 %vm959_vm6, %v3822_v29 }
 0x765   :  { %12832 = vmatprep.mubr.msk.f32.mxu1 %vm14379_vm1, %v18797_v45 }
 0x771   :  { %v4040_v10 = vpop.f32.mrb[134].mxu1 }
 0x772   :  { %v4819_v24 = vsel %vm31_vm0, %v4040_v10, 0.0  ;;  %v12630_v61 = vpop.f32.mrb[135].mxu1 }
 0x773   :  { %v4820_v28 = vadd.f32 %v4819_v24, %v4818_v19 }
 0x775   :  { %v3921_v17 = vpop.f32.mrb[132].mxu0 }
 0x776   :  { %v12610_v13 = vpop.f32.mrb[133].mxu0  ;;  %v4833_v59 = vsel %vm31_vm0, %v3921_v17, 0.0 }
 0x779   :  { %v4045_v60 = vpop.f32.mrb[136].mxu1 }
 0x77a   :  { %v4834_v11 = vsel %vm31_vm0, %v4045_v60, 0.0  ;;  %v12633_v35 = vpop.f32.mrb[137].mxu1 }
 0x77b   :  { %v4835_v50 = vadd.f32 %v4834_v11, %v4833_v59 }
 0x77d   :  { %v3926_v42 = vpop.f32.mrb[134].mxu0 }
 0x77e   :  { %v12613_v23 = vpop.f32.mrb[135].mxu0  ;;  %v4848_v12 = vsel %vm31_vm0, %v3926_v42, 0.0 }
 0x781   :  { %v4050_v21 = vpop.f32.mrb[138].mxu1 }
 0x782   :  { %v4849_v20 = vsel %vm31_vm0, %v4050_v21, 0.0  ;;  %v12636_v27 = vpop.f32.mrb[139].mxu1 }
 0x783   :  { %v4850_v22 = vadd.f32 %v4849_v20, %v4848_v12 }
 0x785   :  { %v3931_v49 = vpop.f32.mrb[136].mxu0 }
 0x786   :  { %v12616_v34 = vpop.f32.mrb[137].mxu0  ;;  %v4863_v15 = vsel %vm31_vm0, %v3931_v49, 0.0 }
 0x789   :  { %v4055_v30 = vpop.f32.mrb[140].mxu1 }
 0x78a   :  { %v4864_v44 = vsel %vm31_vm0, %v4055_v30, 0.0  ;;  %v12639_v57 = vpop.f32.mrb[141].mxu1 }
 0x78b   :  { %v4865_v16 = vadd.f32 %v4864_v44, %v4863_v15 }
 0x78d   :  { %v3936_v7 = vpop.f32.mrb[138].mxu0 }
 0x78e   :  { %v12619_v47 = vpop.f32.mrb[139].mxu0  ;;  %v4878_v54 = vsel %vm31_vm0, %v3936_v7, 0.0 }
 0x791   :  { %v3941_v38 = vpop.f32.mrb[140].mxu0  ;;  %v4060_v18 = vpop.f32.mrb[142].mxu1 }
 0x792   :  { %v4879_v46 = vsel %vm31_vm0, %v4060_v18, 0.0  ;;  %v12622_v53 = vpop.f32.mrb[141].mxu0  ;;  %v12642_v55 = vpop.f32.mrb[143].mxu1  ;;  %v4893_v51 = vsel %vm31_vm0, %v3941_v38, 0.0 }
 0x793   :  { %v4880_v26 = vadd.f32 %v4879_v46, %v4878_v54 }
 0x795   :  { %v3946_v52 = vpop.f32.mrb[142].mxu0  ;;  %v4065_v56 = vpop.f32.mrb[144].mxu1 }
 0x796   :  { %v4894_v1 = vsel %vm31_vm0, %v4065_v56, 0.0  ;;  %v12625_v48 = vpop.f32.mrb[143].mxu0  ;;  %v12645_v31 = vpop.f32.mrb[145].mxu1  ;;  %v4908_v5 = vsel %vm31_vm0, %v3946_v52, 0.0 }
 0x797   :  { %v4895_v62 = vadd.f32 %v4894_v1, %v4893_v51 }
 0x799   :  { %v4070_v33 = vpop.f32.mrb[146].mxu1  ;;  %v4164_v58 = vpop.f32.mrb[144].mxu0 }
 0x79a   :  { %v4909_v63 = vsel %vm31_vm0, %v4070_v33, 0.0  ;;  %v4821_v32 = vsel %vm31_vm0, %v4164_v58, 0.0  ;;  %v12648_v43 = vpop.f32.mrb[147].mxu1  ;;  %v12653_v3 = vpop.f32.mrb[145].mxu0 }
 0x79b   :  { %v4910_v36 = vadd.f32 %v4909_v63, %v4908_v5  ;;  %v4822_v40 = vadd.f32 %v4821_v32, %v4820_v28 }
 0x79d   :  { %v4169_v25 = vpop.f32.mrb[146].mxu0 }
 0x79e   :  { %v4836_v0 = vsel %vm31_vm0, %v4169_v25, 0.0  ;;  %v12656_v8 = vpop.f32.mrb[147].mxu0 }
 0x79f   :  { %v4837_v41 = vadd.f32 %v4836_v0, %v4835_v50  ;;  %v4288_v14 = vpop.f32.mrb[148].mxu1 }
 0x7a0   :  { %v4823_v37 = vsel %vm31_vm0, %v4288_v14, 0.0  ;;  %v12676_v6 = vpop.f32.mrb[149].mxu1 }
 0x7a1   :  { %v4824_v2 = vadd.f32 %v4823_v37, %v4822_v40  ;;  %v4174_v4 = vpop.f32.mrb[148].mxu0 }
 0x7a2   :  { %v4851_v29 = vsel %vm31_vm0, %v4174_v4, 0.0  ;;  %v12659_v39 = vpop.f32.mrb[149].mxu0 }
 0x7a3   :  { %v4852_v10 = vadd.f32 %v4851_v29, %v4850_v22  ;;  %v4293_v19 = vpop.f32.mrb[150].mxu1 }
 0x7a4   :  { %v4838_v24 = vsel %vm31_vm0, %v4293_v19, 0.0  ;;  %v12679_v61 = vpop.f32.mrb[151].mxu1 }
 0x7a5   :  { %v4839_v28 = vadd.f32 %v4838_v24, %v4837_v41  ;;  %v4179_v17 = vpop.f32.mrb[150].mxu0 }
 0x7a6   :  { %v4866_v13 = vsel %vm31_vm0, %v4179_v17, 0.0  ;;  %v12662_v60 = vpop.f32.mrb[151].mxu0 }
 0x7a7   :  { %v4867_v59 = vadd.f32 %v4866_v13, %v4865_v16  ;;  %v4298_v11 = vpop.f32.mrb[152].mxu1 }
 0x7a8   :  { %v4853_v35 = vsel %vm31_vm0, %v4298_v11, 0.0  ;;  %v12682_v50 = vpop.f32.mrb[153].mxu1 }
 0x7a9   :  { %v4854_v42 = vadd.f32 %v4853_v35, %v4852_v10  ;;  %v4184_v23 = vpop.f32.mrb[152].mxu0 }
 0x7aa   :  { %v4881_v21 = vsel %vm31_vm0, %v4184_v23, 0.0  ;;  %v12665_v12 = vpop.f32.mrb[153].mxu0 }
 0x7ab   :  { %v4882_v20 = vadd.f32 %v4881_v21, %v4880_v26  ;;  %v4303_v27 = vpop.f32.mrb[154].mxu1 }
 0x7ac   :  { %v4868_v22 = vsel %vm31_vm0, %v4303_v27, 0.0  ;;  %v12685_v49 = vpop.f32.mrb[155].mxu1 }
 0x7ad   :  { %v4869_v34 = vadd.f32 %v4868_v22, %v4867_v59  ;;  %v4189_v30 = vpop.f32.mrb[154].mxu0 }
 0x7ae   :  { %v4896_v15 = vsel %vm31_vm0, %v4189_v30, 0.0  ;;  %v12668_v44 = vpop.f32.mrb[155].mxu0 }
 0x7af   :  { %v4897_v57 = vadd.f32 %v4896_v15, %v4895_v62  ;;  %v4308_v16 = vpop.f32.mrb[156].mxu1 }
 0x7b0   :  { %v4883_v7 = vsel %vm31_vm0, %v4308_v16, 0.0  ;;  %v12688_v47 = vpop.f32.mrb[157].mxu1 }
 0x7b1   :  { %v4884_v38 = vadd.f32 %v4883_v7, %v4882_v20  ;;  %v4194_v18 = vpop.f32.mrb[156].mxu0 }
 0x7b2   :  { %v4911_v54 = vsel %vm31_vm0, %v4194_v18, 0.0  ;;  %v12671_v46 = vpop.f32.mrb[157].mxu0 }
 0x7b3   :  { %v4912_v53 = vadd.f32 %v4911_v54, %v4910_v36  ;;  %v4313_v55 = vpop.f32.mrb[158].mxu1 }
 0x7b4   :  { %v4898_v26 = vsel %vm31_vm0, %v4313_v55, 0.0  ;;  %v12691_v52 = vpop.f32.mrb[159].mxu1 }
 0x7b5   :  { %v4899_v56 = vadd.f32 %v4898_v26, %v4897_v57  ;;  %v4412_v51 = vpop.f32.mrb[158].mxu0  ;;  %v4931_v57 = vlaneseq }
 0x7b6   :  { %v4825_v1 = vsel %vm31_vm0, %v4412_v51, 0.0  ;;  %v12699_v48 = vpop.f32.mrb[159].mxu0 }
 0x7b7   :  { %v4318_v31 = vpop.f32.mrb[160].mxu1  ;;  %v4826_v62 = vadd.f32 %v4825_v1, %v4824_v2  ;;  %v16339_v55 = vshrl.u32 %v4931_v57, 7 }
 0x7b8   :  { %v4913_v33 = vsel %vm31_vm0, %v4318_v31, 0.0  ;;  %v12694_v58 = vpop.f32.mrb[161].mxu1 }
 0x7b9   :  { %v4914_v5 = vadd.f32 %v4913_v33, %v4912_v53  ;;  %v4417_v63 = vpop.f32.mrb[160].mxu0  ;;  %18804 = vst [vmem:[#allocation71_spill] sm:$0xff] %v16339_v55  ;;  %v18667_v33 = vsub.s32 0, %v16339_v55 }
 0x7ba   :  { %v4840_v32 = vsel %vm31_vm0, %v4417_v63, 0.0  ;;  %v12702_v43 = vpop.f32.mrb[161].mxu0 }
 0x7bb   :  { %v4841_v3 = vadd.f32 %v4840_v32, %v4839_v28  ;;  %v4536_v36 = vpop.f32.mrb[162].mxu1 }
 0x7bc   :  { %v4827_v40 = vsel %vm31_vm0, %v4536_v36, 0.0  ;;  %v12722_v25 = vpop.f32.mrb[163].mxu1 }
 0x7bd   :  { %v4828_v0 = vadd.f32 %v4827_v40, %v4826_v62  ;;  %v4422_v8 = vpop.f32.mrb[162].mxu0 }
 0x7be   :  { %v4855_v41 = vsel %vm31_vm0, %v4422_v8, 0.0  ;;  %v12705_v14 = vpop.f32.mrb[163].mxu0 }
 0x7bf   :  { %v4856_v37 = vadd.f32 %v4855_v41, %v4854_v42  ;;  %v4541_v6 = vpop.f32.mrb[164].mxu1 }
 0x7c0   :  { %v4842_v2 = vsel %vm31_vm0, %v4541_v6, 0.0  ;;  %v12725_v4 = vpop.f32.mrb[165].mxu1 }
 0x7c1   :  { %v4843_v29 = vadd.f32 %v4842_v2, %v4841_v3  ;;  %v4427_v39 = vpop.f32.mrb[164].mxu0  ;;  %v18666_v3 = vsub.s32 1, %v16339_v55 }
 0x7c2   :  { %v4870_v10 = vsel %vm31_vm0, %v4427_v39, 0.0  ;;  %v12708_v19 = vpop.f32.mrb[165].mxu0 }
 0x7c3   :  { %v4871_v24 = vadd.f32 %v4870_v10, %v4869_v34  ;;  %v4546_v61 = vpop.f32.mrb[166].mxu1 }
 0x7c4   :  { %v4857_v28 = vsel %vm31_vm0, %v4546_v61, 0.0  ;;  %v12728_v17 = vpop.f32.mrb[167].mxu1 }
 0x7c5   :  { %v4858_v13 = vadd.f32 %v4857_v28, %v4856_v37  ;;  %v4432_v60 = vpop.f32.mrb[166].mxu0  ;;  %v18805_v37 = vld [vmem:[#allocation8_spill] sm:$0xff] }
 0x7c6   :  { %v4885_v59 = vsel %vm31_vm0, %v4432_v60, 0.0  ;;  %v12711_v11 = vpop.f32.mrb[167].mxu0 }
 0x7c7   :  { %v4886_v35 = vadd.f32 %v4885_v59, %v4884_v38  ;;  %v4551_v50 = vpop.f32.mrb[168].mxu1  ;;  %v18806_v59 = vld [vmem:[#allocation9_spill] sm:$0xff] }
 0x7c8   :  { %v4872_v42 = vsel %vm31_vm0, %v4551_v50, 0.0  ;;  %v12731_v23 = vpop.f32.mrb[169].mxu1 }
 0x7c9   :  { %v4873_v21 = vadd.f32 %v4872_v42, %v4871_v24  ;;  %v4437_v12 = vpop.f32.mrb[168].mxu0 }
 0x7ca   :  { %v4900_v20 = vsel %vm31_vm0, %v4437_v12, 0.0  ;;  %v12714_v27 = vpop.f32.mrb[169].mxu0 }
 0x7cb   :  { %v4901_v22 = vadd.f32 %v4900_v20, %v4899_v56  ;;  %v4556_v49 = vpop.f32.mrb[170].mxu1 }
 0x7cc   :  { %v4887_v34 = vsel %vm31_vm0, %v4556_v49, 0.0  ;;  %v12734_v30 = vpop.f32.mrb[171].mxu1  ;;  %v18807_v49 = vld [vmem:[#allocation10_spill] sm:$0xff] }
 0x7cd   :  { %v4888_v15 = vadd.f32 %v4887_v34, %v4886_v35  ;;  %v4442_v44 = vpop.f32.mrb[170].mxu0 }
 0x7ce   :  { %v4915_v16 = vsel %vm31_vm0, %v4442_v44, 0.0  ;;  %v12717_v7 = vpop.f32.mrb[171].mxu0 }
 0x7cf   :  { %v4916_v47 = vadd.f32 %v4915_v16, %v4914_v5  ;;  %v4561_v38 = vpop.f32.mrb[172].mxu1  ;;  %v16350_v5 = vld [vmem:[%s18558_s1 + $0x68] sm:$0xff] }
 0x7d0   :  { %v4902_v18 = vsel %vm31_vm0, %v4561_v38, 0.0  ;;  %v12737_v54 = vpop.f32.mrb[173].mxu1  ;;  %v16364_v2 = vrot.slane %v16350_v5, %v18666_v3  ;;  %v18808_v38 = vld [vmem:[#allocation11_spill] sm:$0xff] }
 0x7d1   :  { %v16337_v46 = vadd.f32 %v4902_v18, %v4901_v22  ;;  %v4660_v53 = vpop.f32.mrb[172].mxu0 }
 0x7d2   :  { %v4829_v26 = vsel %vm31_vm0, %v4660_v53, 0.0  ;;  %v12745_v52 = vpop.f32.mrb[173].mxu0 }
 0x7d3   :  { %v4566_v56 = vpop.f32.mrb[174].mxu1  ;;  %v4830_v51 = vadd.f32 %v4829_v26, %v4828_v0  ;;  %v16357_v0 = vrot.slane %v16350_v5, %v18667_v33 }
 0x7d4   :  { %v4917_v1 = vsel %vm31_vm0, %v4566_v56, 0.0  ;;  %v12740_v48 = vpop.f32.mrb[175].mxu1 }
 0x7d5   :  { %v16343_v31 = vadd.f32 %v4917_v1, %v4916_v47  ;;  %v4665_v62 = vpop.f32.mrb[174].mxu0 }
 0x7d6   :  { %v4844_v58 = vsel %vm31_vm0, %v4665_v62, 0.0  ;;  %v12748_v63 = vpop.f32.mrb[175].mxu0  ;;  %v18809_v62 = vld [vmem:[#allocation12_spill] sm:$0xff] }
 0x7d7   :  { %v4845_v32 = vadd.f32 %v4844_v58, %v4843_v29  ;;  %v4784_v43 = vpop.f32.mrb[176].mxu1 }
 0x7d8   :  { %v4831_v36 = vsel %vm31_vm0, %v4784_v43, 0.0  ;;  %v12768_v40 = vpop.f32.mrb[177].mxu1 }
 0x7d9   :  { %v4832_v25 = vadd.f32 %v4831_v36, %v4830_v51  ;;  %v4670_v8 = vpop.f32.mrb[176].mxu0 }
 0x7da   :  { %v4859_v41 = vsel %vm31_vm0, %v4670_v8, 0.0  ;;  %v12751_v14 = vpop.f32.mrb[177].mxu0 }
 0x7db   :  { %v4924_v6 = vadd.f32 %v4832_v25, %v18805_v37  ;;  %v4860_v4 = vadd.f32 %v4859_v41, %v4858_v13  ;;  %v4789_v29 = vpop.f32.mrb[178].mxu1 }
 0x7dc   :  { %v4846_v39 = vsel %vm31_vm0, %v4789_v29, 0.0  ;;  %v12771_v10 = vpop.f32.mrb[179].mxu1 }
 0x7dd   :  { %v4935_v19 = vmul.f32 %v16357_v0, %v4924_v6  ;;  %v4847_v24 = vadd.f32 %v4846_v39, %v4845_v32  ;;  %v4675_v61 = vpop.f32.mrb[178].mxu0 }
 0x7de   :  { %v4874_v28 = vsel %vm31_vm0, %v4675_v61, 0.0  ;;  %v12754_v17 = vpop.f32.mrb[179].mxu0 }
 0x7df   :  { %v16370_v60 = vadd.f32 %v16364_v2, %v4935_v19  ;;  %v4925_v11 = vadd.f32 %v4847_v24, %v18806_v59  ;;  %v4875_v35 = vadd.f32 %v4874_v28, %v4873_v21  ;;  %v4794_v50 = vpop.f32.mrb[180].mxu1  ;;  %v18811_v28 = vld [vmem:[#allocation14_spill] sm:$0xff] }
 0x7e0   :  { %v4861_v13 = vsel %vm31_vm0, %v4794_v50, 0.0  ;;  %v12774_v42 = vpop.f32.mrb[181].mxu1  ;;  %v5147_v50 = vld [vmem:[%s18558_s1 + $0x80] sm:$0xff] }
 0x7e1   :  { %v4936_v23 = vmul.f32 %v16357_v0, %v4925_v11  ;;  %v4862_v12 = vadd.f32 %v4861_v13, %v4860_v4  ;;  %12796 = vmatmul.mubr.msk.f32.vlgmr.msra.gmra.mrb[186].mxu0 %vm31_vm0, %v16370_v60  ;;  %v4680_v20 = vpop.f32.mrb[180].mxu0  ;;  %v18810_v4 = vld [vmem:[#allocation13_spill] sm:$0xff] }
 0x7e2   :  { %v4889_v27 = vsel %vm31_vm0, %v4680_v20, 0.0  ;;  %v12757_v22 = vpop.f32.mrb[181].mxu0  ;;  %12798 = vmatprep.mubr.msk.f32.mxu0 %vm14379_vm1, %v18797_v45 }
 0x7e3   :  { %v4926_v34 = vadd.f32 %v4862_v12, %v18807_v49  ;;  %v4890_v21 = vadd.f32 %v4889_v27, %v4888_v15  ;;  %v4799_v30 = vpop.f32.mrb[182].mxu1  ;;  %v16382_v44 = vadd.f32 %v16364_v2, %v4936_v23  ;;  %v5150_v23 = vld [vmem:[%s18558_s1 + $0x98] sm:$0xff]  ;;  %v5151_v12 = vld [vmem:[%s18558_s1 + $0xa0] sm:$0xff]  ;;  %v5152_v27 = vld [vmem:[%s18558_s1 + $0xa8] sm:$0xff] }
 0x7e4   :  { %v4876_v57 = vsel %vm31_vm0, %v4799_v30, 0.0  ;;  %v12777_v16 = vpop.f32.mrb[183].mxu1  ;;  %v13693_v20 = vpack.c.bf16 %v5151_v12, %v5150_v23  ;;  %v5153_v22 = vld [vmem:[%s18558_s1 + $0xb0] sm:$0xff] }
 0x7e5   :  { %v4937_v7 = vmul.f32 %v16357_v0, %v4926_v34  ;;  %v4877_v47 = vadd.f32 %v4876_v57, %v4875_v35  ;;  %12799 = vmatmul.mubr.msk.f32.gmra.mrb[188].mxu0 %vm31_vm0, %v16382_v44  ;;  %v5146_v35 = vld [vmem:[%s18558_s1 + $0x78] sm:$0xff]  ;;  %v13696_v49 = vpack.c.bf16 %v5153_v22, %v5152_v27  ;;  %v16468_v34 = vld [vmem:[%s18559_s2 + $0x20] ss:$0 sm:$0xff] }
 0x7e6   :  { %12801 = vmatprep.mubr.msk.f32.mxu0 %vm14379_vm1, %v18797_v45  ;;  %v13687_v13 = vpack.c.bf16 %v5147_v50, %v5146_v35 }
 0x7e7   :  { %v4927_v18 = vadd.f32 %v4877_v47, %v18808_v38  ;;  %v4804_v54 = vpop.f32.mrb[184].mxu1  ;;  %v16392_v15 = vadd.f32 %v16364_v2, %v4937_v7 }
 0x7e8   :  { %v4891_v53 = vsel %vm31_vm0, %v4804_v54, 0.0  ;;  %v12780_v26 = vpop.f32.mrb[185].mxu1  ;;  %13688 = vmatpush3.bf16.msra.mxu1 %v13687_v13 }
 0x7e9   :  { %v4938_v52 = vmul.f32 %v16357_v0, %v4927_v18  ;;  %v4892_v56 = vadd.f32 %v4891_v53, %v4890_v21  ;;  %12802 = vmatmul.mubr.msk.f32.gmra.mrb[190].mxu0 %vm31_vm0, %v16392_v15  ;;  %v4685_v51 = vpop.f32.mrb[182].mxu0  ;;  %13689 = vmatprep.subr.bf16.mxu1 %v18803_v9 }
 0x7ea   :  { %v4904_v1 = vsel %vm31_vm0, %v4685_v51, 0.0  ;;  %v12760_v48 = vpop.f32.mrb[183].mxu0  ;;  %12804 = vmatprep.mubr.msk.f32.mxu0 %vm14379_vm1, %v18797_v45 }
 0x7eb   :  { %v4928_v58 = vadd.f32 %v4892_v56, %v18809_v62  ;;  %v4905_v63 = vadd.f32 %v4904_v1, %v16337_v46  ;;  %v16404_v32 = vadd.f32 %v16364_v2, %v4938_v52 }
 0x7ed   :  { %v4939_v43 = vmul.f32 %v16357_v0, %v4928_v58  ;;  %12805 = vmatmul.mubr.msk.f32.gmra.mrb[192].mxu0 %vm31_vm0, %v16404_v32  ;;  %v4690_v36 = vpop.f32.mrb[184].mxu0 }
 0x7ee   :  { %v4919_v40 = vsel %vm31_vm0, %v4690_v36, 0.0  ;;  %v4809_v25 = vpop.f32.mrb[186].mxu1  ;;  %v12763_v8 = vpop.f32.mrb[185].mxu0  ;;  %12807 = vmatprep.mubr.msk.f32.mxu0 %vm14379_vm1, %v18797_v45 }
 0x7ef   :  { %v4920_v41 = vadd.f32 %v4919_v40, %v16343_v31  ;;  %v4906_v46 = vsel %vm31_vm0, %v4809_v25, 0.0  ;;  %v12783_v14 = vpop.f32.mrb[187].mxu1  ;;  %v16415_v37 = vadd.f32 %v16364_v2, %v4939_v43 }
 0x7f0   :  { %v4907_v6 = vadd.f32 %v4906_v46, %v4905_v63 }
 0x7f1   :  { %12808 = vmatmul.mubr.msk.f32.gmra.mrb[194].mxu0 %vm31_vm0, %v16415_v37 }
 0x7f2   :  { %v4929_v29 = vadd.f32 %v4907_v6, %v18810_v4  ;;  %12810 = vmatprep.mubr.msk.f32.mxu0 %vm14379_vm1, %v18797_v45 }
 0x7f4   :  { %v4940_v39 = vmul.f32 %v16357_v0, %v4929_v29 }
 0x7f6   :  { %v16424_v10 = vadd.f32 %v16364_v2, %v4940_v39 }
 0x7f8   :  { %12811 = vmatmul.mubr.msk.f32.gmra.mrb[196].mxu0 %vm31_vm0, %v16424_v10 }
 0x7f9   :  { %12813 = vmatprep.mubr.msk.f32.mxu0 %vm14379_vm1, %v18797_v45 }
 0x837   :  { %v4814_v31 = vpop.f32.mrb[188].mxu1 }
 0x838   :  { %v4921_v19 = vsel %vm31_vm0, %v4814_v31, 0.0  ;;  %v12786_v24 = vpop.f32.mrb[189].mxu1 }
 0x839   :  { %v4922_v61 = vadd.f32 %v4921_v19, %v4920_v41 }
 0x83b   :  { %v4930_v17 = vadd.f32 %v4922_v61, %v18811_v28 }
 0x83d   :  { %v4941_v59 = vmul.f32 %v16357_v0, %v4930_v17  ;;  %v5148_v0 = vld [vmem:[%s18558_s1 + $0x88] sm:$0xff] }
 0x83f   :  { %v16434_v11 = vadd.f32 %v16364_v2, %v4941_v59  ;;  %v5149_v2 = vld [vmem:[%s18558_s1 + $0x90] sm:$0xff] }
 0x840   :  { %v13690_v42 = vpack.c.bf16 %v5149_v2, %v5148_v0 }
 0x841   :  { %12814 = vmatmul.mubr.msk.f32.gmra.mrb[198].mxu0 %vm31_vm0, %v16434_v11 }
 0x842   :  { %13691 = vmatpush3.bf16.msra.mxu1 %v13690_v42 }
 0x843   :  { %13692 = vmatprep.subr.bf16.mxu1 %v18803_v9 }
 0x846   :  { %13694 = vmatpush3.bf16.msra.mxu1 %v13693_v20 }
 0x847   :  { %13695 = vmatprep.subr.bf16.mxu1 %v18803_v9 }
 0x84a   :  { %13697 = vmatpush3.bf16.msra.mxu1 %v13696_v49 }
 0x8b4   :  { %v5049_v21 = vpop.f32.mrb[186].mxu0 }
 0x8b5   :  { %v5050_v30 = vadd.f32 %v16468_v34, %v5049_v21  ;;  %v12797_v57 = vpop.f32.mrb[187].mxu0 }
 0x8b7   :  { %v5090_v16 = vmul.f32 0.044715, %v5050_v30  ;;  %v5083_v13 = vmul.f32 0.5, %v5050_v30 }
 0x8b8   :  { %v5054_v7 = vpop.f32.mrb[188].mxu0 }
 0x8b9   :  { %v5097_v47 = vmul.f32 %v5090_v16, %v5050_v30  ;;  %v5055_v38 = vadd.f32 %v16468_v34, %v5054_v7  ;;  %v12800_v18 = vpop.f32.mrb[189].mxu0 }
 0x8bb   :  { %v5104_v54 = vmul.f32 %v5097_v47, %v5050_v30  ;;  %v5091_v53 = vmul.f32 0.044715, %v5055_v38  ;;  %v5084_v21 = vmul.f32 0.5, %v5055_v38 }
 0x8bc   :  { %v5059_v26 = vpop.f32.mrb[190].mxu0 }
 0x8bd   :  { %v5111_v52 = vadd.f32 %v5104_v54, %v5050_v30  ;;  %v5098_v56 = vmul.f32 %v5091_v53, %v5055_v38  ;;  %v5060_v51 = vadd.f32 %v16468_v34, %v5059_v26  ;;  %v12803_v1 = vpop.f32.mrb[191].mxu0 }
 0x8bf   :  { %v5118_v48 = vmul.f32 0.7978846, %v5111_v52  ;;  %v5105_v62 = vmul.f32 %v5098_v56, %v5055_v38  ;;  %v5092_v58 = vmul.f32 0.044715, %v5060_v51  ;;  %v5085_v18 = vmul.f32 0.5, %v5060_v51 }
 0x8c0   :  { %v5064_v63 = vpop.f32.mrb[192].mxu0 }
 0x8c1   :  { %14095 = vtanh.f32 %v5118_v48  ;;  %v5112_v43 = vadd.f32 %v5105_v62, %v5055_v38  ;;  %v5099_v36 = vmul.f32 %v5092_v58, %v5060_v51  ;;  %v5065_v40 = vadd.f32 %v16468_v34, %v5064_v63  ;;  %v12806_v25 = vpop.f32.mrb[193].mxu0 }
 0x8c3   :  { %v5106_v8 = vmul.f32 %v5099_v36, %v5060_v51  ;;  %v5093_v41 = vmul.f32 0.044715, %v5065_v40  ;;  %v5119_v46 = vmul.f32 0.7978846, %v5112_v43  ;;  %v5086_v38 = vmul.f32 0.5, %v5065_v40 }
 0x8c4   :  { %v5069_v14 = vpop.f32.mrb[194].mxu0 }
 0x8c5   :  { %v5113_v6 = vadd.f32 %v5106_v8, %v5060_v51  ;;  %v5100_v4 = vmul.f32 %v5093_v41, %v5065_v40  ;;  %v5070_v29 = vadd.f32 %v16468_v34, %v5069_v14  ;;  %v12809_v39 = vpop.f32.mrb[195].mxu0  ;;  %14097 = vtanh.f32 %v5119_v46 }
 0x8c7   :  { %v5107_v31 = vmul.f32 %v5100_v4, %v5065_v40  ;;  %v5094_v19 = vmul.f32 0.044715, %v5070_v29  ;;  %v5120_v24 = vmul.f32 0.7978846, %v5113_v6  ;;  %v5087_v51 = vmul.f32 0.5, %v5070_v29 }
 0x8c9   :  { %v5114_v61 = vadd.f32 %v5107_v31, %v5065_v40  ;;  %v5101_v28 = vmul.f32 %v5094_v19, %v5070_v29  ;;  %14099 = vtanh.f32 %v5120_v24 }
 0x8cb   :  { %v14096_v17 = vpop.eup %14095  ;;  %v5108_v59 = vmul.f32 %v5101_v28, %v5070_v29  ;;  %v5074_v35 = vpop.f32.mrb[196].mxu0  ;;  %v5121_v50 = vmul.f32 0.7978846, %v5114_v61  ;;  %v13843_v61 = vld [vmem:[%s18560_s3 + $0x80] sm:$0xff]  }
 0x8cc   :  { %v5132_v0 = vadd.f32 1.0, %v14096_v17  ;;  %v5075_v2 = vadd.f32 %v16468_v34, %v5074_v35  ;;  %v12812_v42 = vpop.f32.mrb[197].mxu0  ;;  %12867 = vmatprep.mubr.msk.f32.mxu0 %vm31_vm0, %v13843_v61  ;;  %v18664_v35 = vsub.s32 3, %v16339_v55 }
 0x8cd   :  { %v5115_v23 = vadd.f32 %v5108_v59, %v5070_v29  ;;  %14101 = vtanh.f32 %v5121_v50 }
 0x8ce   :  { %v5139_v12 = vmul.f32 %v5132_v0, %v5083_v13  ;;  %v5095_v20 = vmul.f32 0.044715, %v5075_v2  ;;  %v5088_v43 = vmul.f32 0.5, %v5075_v2  ;;  %v13847_v0 = vld [vmem:[%s18560_s3 + $0xa0] sm:$0xff]   ;;  %v5297_v42 = vrot.slane %v16350_v5, %v18664_v35 }
 0x8cf   :  { %v14098_v27 = vpop.eup %14097  ;;  %v5122_v22 = vmul.f32 0.7978846, %v5115_v23 }
 0x8d0   :  { %v5102_v49 = vmul.f32 %v5095_v20, %v5075_v2  ;;  %12833 = vmatmul.mubr.msk.f32.vlgmr.msra.gmra.mrb[190].mxu1 %vm5154_vm8, %v5139_v12  ;;  %v5133_v57 = vadd.f32 1.0, %v14098_v27 }
 0x8d1   :  { %12835 = vmatprep.mubr.msk.f32.mxu1 %vm14379_vm1, %v18797_v45  ;;  %14103 = vtanh.f32 %v5122_v22 }
 0x8d2   :  { %v5109_v30 = vmul.f32 %v5102_v49, %v5075_v2  ;;  %v5140_v16 = vmul.f32 %v5133_v57, %v5084_v21 }
 0x8d3   :  { %v14100_v7 = vpop.eup %14099 }
 0x8d4   :  { %v5116_v47 = vadd.f32 %v5109_v30, %v5075_v2  ;;  %12836 = vmatmul.mubr.msk.f32.gmra.mrb[192].mxu1 %vm5154_vm8, %v5140_v16  ;;  %v5134_v54 = vadd.f32 1.0, %v14100_v7 }
 0x8d5   :  { %12838 = vmatprep.mubr.msk.f32.mxu1 %vm14379_vm1, %v18797_v45 }
 0x8d6   :  { %v5141_v53 = vmul.f32 %v5134_v54, %v5085_v18  ;;  %v5123_v26 = vmul.f32 0.7978846, %v5116_v47 }
 0x8d7   :  { %v14102_v52 = vpop.eup %14101 }
 0x8d8   :  { %12839 = vmatmul.mubr.msk.f32.gmra.mrb[194].mxu1 %vm5154_vm8, %v5141_v53  ;;  %v5135_v56 = vadd.f32 1.0, %v14102_v52  ;;  %14105 = vtanh.f32 %v5123_v26 }
 0x8d9   :  { %12841 = vmatprep.mubr.msk.f32.mxu1 %vm14379_vm1, %v18797_v45 }
 0x8da   :  { %v5142_v1 = vmul.f32 %v5135_v56, %v5086_v38 }
 0x8db   :  { %v14104_v48 = vpop.eup %14103 }
 0x8dc   :  { %12842 = vmatmul.mubr.msk.f32.gmra.mrb[196].mxu1 %vm5154_vm8, %v5142_v1  ;;  %v5136_v62 = vadd.f32 1.0, %v14104_v48 }
 0x8dd   :  { %12844 = vmatprep.mubr.msk.f32.mxu1 %vm14379_vm1, %v18797_v45 }
 0x8de   :  { %v5143_v58 = vmul.f32 %v5136_v62, %v5087_v51 }
 0x8e0   :  { %12845 = vmatmul.mubr.msk.f32.gmra.mrb[198].mxu1 %vm5154_vm8, %v5143_v58 }
 0x8e1   :  { %12847 = vmatprep.mubr.msk.f32.mxu1 %vm14379_vm1, %v18797_v45 }
 0x8e2   :  { %v14106_v63 = vpop.eup %14105 }
 0x8e3   :  { %v5137_v36 = vadd.f32 1.0, %v14106_v63 }
 0x8e5   :  { %v5144_v40 = vmul.f32 %v5137_v36, %v5088_v43 }
 0x8e7   :  { %12848 = vmatmul.mubr.msk.f32.gmra.mrb[200].mxu1 %vm5154_vm8, %v5144_v40  ;;  %v13844_v40 = vld [vmem:[%s18560_s3 + $0x88] sm:$0xff]  }
 0x8e8   :  { %12850 = vmatprep.mubr.msk.f32.mxu1 %vm14379_vm1, %v18797_v45 }
 0x914   :  { %v5079_v25 = vpop.f32.mrb[198].mxu0 }
 0x915   :  { %v5080_v8 = vadd.f32 %v16468_v34, %v5079_v25  ;;  %v12815_v41 = vpop.f32.mrb[199].mxu0  ;;  %v18665_v34 = vsub.s32 2, %v16339_v55  ;;  %v13848_v25 = vld [vmem:[%s18560_s3 + $0xa8] sm:$0xff]  }
 0x916   :  { %v13846_v41 = vld [vmem:[%s18560_s3 + $0x98] sm:$0xff]  }
 0x917   :  { %v5096_v46 = vmul.f32 0.044715, %v5080_v8  ;;  %v5089_v31 = vmul.f32 0.5, %v5080_v8  ;;  %v5286_v59 = vrot.slane %v16350_v5, %v18665_v34 }
 0x919   :  { %v5103_v14 = vmul.f32 %v5096_v46, %v5080_v8  ;;  %v13850_v46 = vld [vmem:[%s18560_s3 + $0xb8] sm:$0xff]  }
 0x91b   :  { %v5110_v6 = vmul.f32 %v5103_v14, %v5080_v8  ;;  %v13857_v14 = vld [vmem:[%s18560_s3 + $0xc0] sm:$0xff]  }
 0x91d   :  { %v5117_v4 = vadd.f32 %v5110_v6, %v5080_v8  ;;  %v13849_v8 = vld [vmem:[%s18560_s3 + $0xb0] sm:$0xff]   ;;  %v13858_v6 = vld [vmem:[%s18560_s3 + $0xc8] sm:$0xff]  }
 0x91f   :  { %v5124_v29 = vmul.f32 0.7978846, %v5117_v4  ;;  %v13859_v4 = vld [vmem:[%s18560_s3 + $0xd0] sm:$0xff]  }
 0x921   :  { %14107 = vtanh.f32 %v5124_v29  ;;  %v13860_v29 = vld [vmem:[%s18560_s3 + $0xd8] sm:$0xff]  }
 0x92b   :  { %v14108_v39 = vpop.eup %14107 }
 0x92c   :  { %v5138_v19 = vadd.f32 1.0, %v14108_v39  ;;  %v13852_v39 = vld [vmem:[%s18561_s4 + $0x60] sm:$0xff]  }
 0x92e   :  { %v5145_v24 = vmul.f32 %v5138_v19, %v5089_v31  ;;  %v13856_v31 = vld [vmem:[%s18561_s4 + $0x80] sm:$0xff]  }
 0x930   :  { %12851 = vmatmul.mubr.msk.f32.gmra.mrb[202].mxu1 %vm5154_vm8, %v5145_v24 }
 0x931   :  { %12887 = vmatprep.mubr.msk.f32.mxu1 %vm31_vm0, %v13847_v0 }
 0x9a3   :  { %v5242_v28 = vpop.f32.mrb[190].mxu1 }
 0x9a4   :  { %v5276_v17 = vadd.f32 %v5242_v28, %v16370_v60  ;;  %v12834_v50 = vpop.f32.mrb[191].mxu1 }
 0x9a6   :  { %v5287_v2 = vmul.f32 %v5286_v59, %v5276_v17 }
 0x9a7   :  { %v5247_v13 = vpop.f32.mrb[192].mxu1 }
 0x9a8   :  { %v5277_v23 = vadd.f32 %v5247_v13, %v16382_v44  ;;  %v12837_v60 = vpop.f32.mrb[193].mxu1  ;;  %v16514_v27 = vadd.f32 %v5297_v42, %v5287_v2 }
 0x9aa   :  { %v5288_v12 = vmul.f32 %v5286_v59, %v5277_v23  ;;  %18812 = vst [vmem:[#allocation64_spill] sm:$0xff] %v16514_v27 }
 0x9ab   :  { %v5252_v20 = vpop.f32.mrb[194].mxu1 }
 0x9ac   :  { %v16516_v22 = vadd.f32 %v5297_v42, %v5288_v12  ;;  %v5278_v49 = vadd.f32 %v5252_v20, %v16392_v15  ;;  %v12840_v21 = vpop.f32.mrb[195].mxu1  ;;  %v13854_v12 = vld [vmem:[%s18561_s4 + $0x70] sm:$0xff]  }
 0x9ae   :  { %18813 = vst [vmem:[#allocation73_spill] sm:$0xff] %v16516_v22  ;;  %v13698_v57 = vpack.c.bf16 %v16516_v22, %v16514_v27  ;;  %v5289_v16 = vmul.f32 %v5286_v59, %v5278_v49 }
 0x9af   :  { %v5257_v30 = vpop.f32.mrb[196].mxu1 }
 0x9b0   :  { %v5279_v5 = vadd.f32 %v5257_v30, %v16404_v32  ;;  %v12843_v44 = vpop.f32.mrb[197].mxu1  ;;  %13700 = vmatprep.subr.msk.bf16.mxu0 %vm14473_vm4, %v13698_v57  ;;  %13718 = vmatprep.subr.msk.bf16.mxu1 %vm14473_vm4, %v13698_v57  ;;  %v16530_v18 = vadd.f32 %v5297_v42, %v5289_v16  ;;  %v13853_v30 = vld [vmem:[%s18561_s4 + $0x78] sm:$0xff]  }
 0x9b1   :  { %13703 = vmatpush3.bf16.xpose.msk.msra.mxu0 %vm14473_vm4, %v13698_v57  ;;  %13721 = vmatpush3.bf16.xpose.msk.msra.mxu1 %vm14473_vm4, %v13698_v57  ;;  %v13855_v44 = vld [vmem:[%s18561_s4 + $0x88] sm:$0xff]  }
 0x9b2   :  { %v5290_v15 = vmul.f32 %v5286_v59, %v5279_v5  ;;  %18815 = vst [vmem:[#allocation68_spill] sm:$0xff] %v16530_v18 }
 0x9b3   :  { %v5262_v47 = vpop.f32.mrb[198].mxu1 }
 0x9b4   :  { %v16532_v54 = vadd.f32 %v5297_v42, %v5290_v15  ;;  %v12846_v32 = vpop.f32.mrb[199].mxu1  ;;  %v5280_v26 = vadd.f32 %v5262_v47, %v16415_v37  ;;  %v11328_v47 = vld [vmem:[%s18562_s5 + $0x9] ss:$0 sm:$0xff] }
 0x9b6   :  { %18816 = vst [vmem:[#allocation72_spill] sm:$0xff] %v16532_v54  ;;  %v13704_v53 = vpack.c.bf16 %v16532_v54, %v16530_v18  ;;  %v5291_v38 = vmul.f32 %v5286_v59, %v5280_v26 }
 0x9b8   :  { %13706 = vmatprep.subr.msk.bf16.mxu0 %vm14473_vm4, %v13704_v53  ;;  %13724 = vmatprep.subr.msk.bf16.mxu1 %vm14473_vm4, %v13704_v53  ;;  %v16546_v51 = vadd.f32 %v5297_v42, %v5291_v38 }
 0x9b9   :  { %13709 = vmatpush3.bf16.xpose.msk.msra.mxu0 %vm14473_vm4, %v13704_v53  ;;  %13727 = vmatpush3.bf16.xpose.msk.msra.mxu1 %vm14473_vm4, %v13704_v53 }
 0x9ba   :  { %v5267_v52 = vpop.f32.mrb[200].mxu1  ;;  %18817 = vst [vmem:[#allocation76_spill] sm:$0xff] %v16546_v51 }
 0x9bb   :  { %v5281_v56 = vadd.f32 %v5267_v52, %v16424_v10  ;;  %v12849_v1 = vpop.f32.mrb[201].mxu1  ;;  %v11329_v52 = vld [vmem:[%s18562_s5 + $0xa] ss:$0 sm:$0xff] }
 0x9bc   :  { %v11331_v1 = vld [vmem:[%s18562_s5 + $0xc] ss:$0 sm:$0xff] }
 0x9bd   :  { %v5292_v48 = vmul.f32 %v5286_v59, %v5281_v56 }
 0x9bf   :  { %v16548_v37 = vadd.f32 %v5297_v42, %v5292_v48  ;;  %v11327_v48 = vld [vmem:[%s18562_s5 + $0x8] ss:$0 sm:$0xff] }
 0x9c1   :  { %18818 = vst [vmem:[#allocation79_spill] sm:$0xff] %v16548_v37  ;;  %v13710_v62 = vpack.c.bf16 %v16548_v37, %v16546_v51 }
 0x9c3   :  { %13712 = vmatprep.subr.msk.bf16.mxu0 %vm14473_vm4, %v13710_v62  ;;  %13730 = vmatprep.subr.msk.bf16.mxu1 %vm14473_vm4, %v13710_v62 }
 0x9c4   :  { %13715 = vmatpush3.bf16.xpose.msk.msra.mxu0 %vm14473_vm4, %v13710_v62  ;;  %13733 = vmatpush3.bf16.xpose.msk.msra.mxu1 %vm14473_vm4, %v13710_v62 }
 0xa03   :  { %v5272_v10 = vpop.f32.mrb[202].mxu1 }
 0xa04   :  { %v5282_v58 = vadd.f32 %v5272_v10, %v16434_v11  ;;  %v12852_v63 = vpop.f32.mrb[203].mxu1  ;;  %v13845_v11 = vld [vmem:[%s18560_s3 + $0x90] sm:$0xff]  }
 0xa05   :  { %v11330_v63 = vld [vmem:[%s18562_s5 + $0xb] ss:$0 sm:$0xff] }
 0xa06   :  { %v5293_v43 = vmul.f32 %v5286_v59, %v5282_v58  ;;  %v11333_v58 = vld [vmem:[%s18562_s5 + $0xe] ss:$0 sm:$0xff] }
 0xa08   :  { %v16561_v36 = vadd.f32 %v5297_v42, %v5293_v43  ;;  %v13851_v42 = vld [vmem:[%s18561_s4 + $0x68] sm:$0xff]  }
 0xa0a   :  { %18819 = vst [vmem:[#allocation22_spill] sm:$0xff] %v16561_v36  ;;  %12865 = vmatprep.subr.msk.mxu0 %vm31_vm0, %v16561_v36  ;;  %12885 = vmatprep.subr.msk.mxu1 %vm31_vm0, %v16561_v36 }
 0xa0b   :  { %12866 = vmatpush3.xpose.msk.msra.mxu0 %vm31_vm0, %v16561_v36  ;;  %12886 = vmatpush3.xpose.msk.msra.mxu1 %vm31_vm0, %v16561_v36 }
 0xa0c   :  { %13736 = vmatprep.subr.msk.bf16.mxu0 %vm14473_vm4, %v13698_v57  ;;  %12913 = vmatprep.subr.mxu1 %v18797_v45 }
 0xa0e   :  { %12868 = vmatmul.mubr.msk.f32.vlgmr.msra.gmra.mrb[200].mxu0 %vm31_vm0, %v13844_v40  ;;  %12888 = vmatmul.mubr.msk.f32.vlgmr.msra.gmra.mrb[204].mxu1 %vm31_vm0, %v13848_v25  ;;  %v11332_v25 = vld [vmem:[%s18562_s5 + $0xd] ss:$0 sm:$0xff] }
 0xa0f   :  { %13739 = vmatpush3.bf16.xpose.msk.msra.mxu0 %vm14473_vm4, %v13698_v57  ;;  %12870 = vmatprep.mubr.msk.f32.mxu0 %vm31_vm0, %v13845_v11 }
 0xa10   :  { %13742 = vmatprep.subr.msk.bf16.mxu0 %vm14473_vm4, %v13704_v53  ;;  %12890 = vmatprep.mubr.msk.f32.mxu1 %vm31_vm0, %v13849_v8 }
 0xa12   :  { %12871 = vmatmul.mubr.msk.f32.gmra.mrb[202].mxu0 %vm31_vm0, %v13846_v41  ;;  %12891 = vmatmul.mubr.msk.f32.gmra.mrb[206].mxu1 %vm31_vm0, %v13850_v46  ;;  %v13862_v41 = vld [vmem:[%s18561_s4 + $0x90] sm:$0xff]   ;;  %v11334_v46 = vld [vmem:[%s18562_s5 + $0xf] ss:$0 sm:$0xff] }
 0xa13   :  { %12915 = vmatprep.mubr.msk.f32.mxu1 %vm14379_vm1, %v18797_v45  ;;  %12907 = vmatprep.mubr.msk.f32.mxu0 %vm31_vm0, %v13857_v14 }
 0xa17   :  { %13745 = vmatpush3.bf16.xpose.msk.msra.mxu0 %vm14473_vm4, %v13704_v53 }
 0xa18   :  { %13748 = vmatprep.subr.msk.bf16.mxu0 %vm14473_vm4, %v13710_v62 }
 0xa1f   :  { %13751 = vmatpush3.bf16.xpose.msk.msra.mxu0 %vm14473_vm4, %v13710_v62 }
 0xa20   :  { %12905 = vmatprep.subr.msk.mxu0 %vm31_vm0, %v16561_v36 }
 0xa27   :  { %12906 = vmatpush3.xpose.msk.msra.mxu0 %vm31_vm0, %v16561_v36 }
 0xa28   :  { %12936 = vmatprep.subr.mxu0 %v18797_v45 }
 0xa2a   :  { %12908 = vmatmul.mubr.msk.f32.vlgmr.msra.gmra.mrb[204].mxu0 %vm31_vm0, %v13858_v6 }
 0xa2b   :  { %12910 = vmatprep.mubr.msk.f32.mxu0 %vm31_vm0, %v13859_v4 }
 0xa2e   :  { %12911 = vmatmul.mubr.msk.f32.gmra.mrb[206].mxu0 %vm31_vm0, %v13860_v29 }
 0xa2f   :  { %12938 = vmatprep.mubr.msk.f32.mxu0 %vm14379_vm1, %v18797_v45 }
 0xae1   :  { %v12869_v19 = vpop.f32.mrb[200].mxu0  ;;  %v12889_v24 = vpop.f32.mrb[204].mxu1 }
 0xae2   :  { %v5491_v61 = vpop.f32.mrb[201].mxu0  ;;  %v5624_v28 = vpop.f32.mrb[205].mxu1  ;;  %v5497_v23 = vadd.f32 %v13851_v42, %v12869_v19  ;;  %v5630_v7 = vadd.f32 %v13855_v44, %v12889_v24 }
 0xae3   :  { %v5492_v17 = vadd.f32 %v13852_v39, %v5491_v61  ;;  %v5625_v59 = vadd.f32 %v13856_v31, %v5624_v28 }
 0xae4   :  { %v5515_v60 = vcombine.high %v5497_v23, %v5497_v23  ;;  %v5648_v32 = vcombine.high %v5630_v7, %v5630_v7 }
 0xae5   :  { %v5514_v50 = vcombine.high %v5492_v17, %v5492_v17  ;;  %5917 = vxpose.xlu0.b32.start.end [1/1] (short) (narrow) %v5492_v17, 56  ;;  %v12872_v13 = vpop.f32.mrb[202].mxu0  ;;  %v5647_v0 = vcombine.high %v5625_v59, %v5625_v59  ;;  %12914 = vmatpush3.msk.msra.mxu1 %vm981_vm5, %v5625_v59  ;;  %v16649_v21 = vpop.f32.mrb[206].mxu1 }
 0xae6   :  { %v5501_v2 = vpop.f32.mrb[203].mxu0  ;;  %12959 = vmatprep.subr.mxu1 %v18797_v45  ;;  %v16651_v57 = vpop.f32.mrb[207].mxu1  ;;  %v5507_v16 = vadd.f32 %v13853_v30, %v12872_v13 }
 0xae7   :  { %6072 = vxpose.xlu1.b32.start.end [1/1] (short) (narrow) %v5514_v50, 56  ;;  %12937 = vmatpush3.msk.msra.mxu0 %vm981_vm5, %v5647_v0  ;;  %v5502_v20 = vadd.f32 %v13854_v12, %v5501_v2  ;;  %v5635_v4 = vadd.f32 %v13862_v41, %v16651_v57  ;;  %v13861_v12 = vld [vmem:[%s18561_s4 + $0x98] sm:$0xff]  }
 0xae8   :  { %12982 = vmatprep.subr.mxu0 %v18797_v45  ;;  %v5517_v5 = vcombine.high %v5507_v16, %v5507_v16  ;;  %v5640_v57 = vadd.f32 %v13861_v12, %v16649_v21 }
 0xae9   :  { %v5516_v49 = vcombine.high %v5502_v20, %v5502_v20  ;;  %v5649_v31 = vcombine.high %v5635_v4, %v5635_v4 }
 0xafd   :  { %v16747_v28 = vpop.f32.mrb[204].mxu0 }
 0xafe   :  { %6227 = vxpose.xlu0.b32.start.end [1/1] (short) (narrow) %v5497_v23, 56  ;;  %18820 = vst [vmem:[#allocation24_spill] sm:$0xff] %v16747_v28  ;;  %v16751_v59 = vpop.f32.mrb[205].mxu0 }
 0xb00   :  { %6382 = vxpose.xlu1.b32.start.end [1/1] (short) (narrow) %v5515_v60, 56 }
 0xb01   :  { %v16757_v13 = vpop.f32.mrb[206].mxu0 }
 0xb02   :  { %18821 = vst [vmem:[#allocation58_spill] sm:$0xff] %v16757_v13 }
 0xb17   :  { %6537 = vxpose.xlu0.b32.start.end [1/1] (short) (narrow) %v5502_v20, 56 }
 0xb19   :  { %6692 = vxpose.xlu1.b32.start.end [1/1] (short) (narrow) %v5516_v49, 56 }
 0xb30   :  { %6847 = vxpose.xlu0.b32.start.end [1/1] (short) (narrow) %v5507_v16, 56  ;;  %v5650_v16 = vcombine.high %v5640_v57, %v5640_v57 }
 0xb32   :  { %7002 = vxpose.xlu1.b32.start.end [1/1] (short) (narrow) %v5517_v5, 56 }
 0xb65   :  { %v5933_v15 = vpop.trf.xlu0 }
 0xb66   :  { %12916 = vmatmul.mubr.msk.f32.vlgmr.msra.gmra.mrb[208].mxu1 %vm959_vm6, %v5933_v15 }
 0xb67   :  { %12960 = vmatpush3.msk.msra.mxu1 %vm981_vm5, %v5630_v7  ;;  %v6088_v53 = vpop.trf.xlu1  ;;  %12918 = vmatprep.mubr.msk.f32.mxu1 %vm14379_vm1, %v18797_v45 }
 0xb68   :  { %5834 = vperm.xlu1 %13818, %v11328_v47   ;;  %12939 = vmatmul.mubr.msk.f32.vlgmr.msra.gmra.mrb[208].mxu0 %vm959_vm6, %v6088_v53 }
 0xb69   :  { %12983 = vmatpush3.msk.msra.mxu0 %vm981_vm5, %v5648_v32  ;;  %v5934_v26 = vpop.trf.xlu0  ;;  %12941 = vmatprep.mubr.msk.f32.mxu0 %vm14379_vm1, %v18797_v45 }
 0xb6a   :  { %12919 = vmatmul.mubr.msk.f32.gmra.mrb[210].mxu1 %vm959_vm6, %v5934_v26  ;;  %13005 = vmatprep.subr.mxu1 %v18797_v45 }
 0xb6b   :  { %v6089_v38 = vpop.trf.xlu1  ;;  %12921 = vmatprep.mubr.msk.f32.mxu1 %vm14379_vm1, %v18797_v45  ;;  %13028 = vmatprep.subr.mxu0 %v18797_v45 }
 0xb6c   :  { %5838 = vperm.xlu1 %13818, %v11329_v52   ;;  %12942 = vmatmul.mubr.msk.f32.gmra.mrb[210].mxu0 %vm959_vm6, %v6089_v38 }
 0xb6d   :  { %v5935_v56 = vpop.trf.xlu0  ;;  %12944 = vmatprep.mubr.msk.f32.mxu0 %vm14379_vm1, %v18797_v45 }
 0xb6e   :  { %12922 = vmatmul.mubr.msk.f32.gmra.mrb[212].mxu1 %vm959_vm6, %v5935_v56  ;;  %v13864_v56 = vld [vmem:[%s18561_s4 + $0xa0] sm:$0xff]  }
 0xb6f   :  { %v6090_v62 = vpop.trf.xlu1  ;;  %12924 = vmatprep.mubr.msk.f32.mxu1 %vm14379_vm1, %v18797_v45 }
 0xb70   :  { %5846 = vperm.xlu1 %13818, %v11331_v1   ;;  %12945 = vmatmul.mubr.msk.f32.gmra.mrb[212].mxu0 %vm959_vm6, %v6090_v62  ;;  %v5754_v62 = vadd.f32 %v13864_v56, %v16751_v59 }
 0xb71   :  { %5830 = vperm.xlu0 %13817, %v11327_v48   ;;  %v5936_v10 = vpop.trf.xlu0  ;;  %12947 = vmatprep.mubr.msk.f32.mxu0 %vm14379_vm1, %v18797_v45 }
 0xb72   :  { %12925 = vmatmul.mubr.msk.f32.gmra.mrb[214].mxu1 %vm959_vm6, %v5936_v10 }
 0xb73   :  { %v6091_v43 = vpop.trf.xlu1  ;;  %12927 = vmatprep.mubr.msk.f32.mxu1 %vm14379_vm1, %v18797_v45 }
 0xb74   :  { %5854 = vperm.xlu1 %13818, %v11333_v58   ;;  %12948 = vmatmul.mubr.msk.f32.gmra.mrb[214].mxu0 %vm959_vm6, %v6091_v43  ;;  %v16840_v43 = vpop.f32.mrb[207].mxu0 }
 0xb75   :  { %5842 = vperm.xlu0 %13817, %v11330_v63   ;;  %v5937_v40 = vpop.trf.xlu0  ;;  %12950 = vmatprep.mubr.msk.f32.mxu0 %vm14379_vm1, %v18797_v45  ;;  %v5776_v63 = vcombine.high %v5754_v62, %v5754_v62  ;;  %18822 = vst [vmem:[#allocation65_spill] sm:$0xff] %v16840_v43 }
 0xb76   :  { %12928 = vmatmul.mubr.msk.f32.gmra.mrb[216].mxu1 %vm959_vm6, %v5937_v40 }
 0xb77   :  { %v6092_v11 = vpop.trf.xlu1  ;;  %12930 = vmatprep.mubr.msk.f32.mxu1 %vm14379_vm1, %v18797_v45 }
 0xb78   :  { %12951 = vmatmul.mubr.msk.f32.gmra.mrb[216].mxu0 %vm959_vm6, %v6092_v11 }
 0xb79   :  { %5850 = vperm.xlu0 %13817, %v11332_v25   ;;  %v5938_v8 = vpop.trf.xlu0  ;;  %12953 = vmatprep.mubr.msk.f32.mxu0 %vm14379_vm1, %v18797_v45 }
 0xb7a   :  { %12931 = vmatmul.mubr.msk.f32.gmra.mrb[218].mxu1 %vm959_vm6, %v5938_v8 }
 0xb7b   :  { %v6093_v14 = vpop.trf.xlu1  ;;  %12933 = vmatprep.mubr.msk.f32.mxu1 %vm14379_vm1, %v18797_v45 }
 0xb7c   :  { %12954 = vmatmul.mubr.msk.f32.gmra.mrb[218].mxu0 %vm959_vm6, %v6093_v14 }
 0xb7d   :  { %5858 = vperm.xlu0 %13817, %v11334_v46   ;;  %v5939_v6 = vpop.trf.xlu0  ;;  %12956 = vmatprep.mubr.msk.f32.mxu0 %vm14379_vm1, %v18797_v45 }
 0xb7e   :  { %12934 = vmatmul.mubr.msk.f32.gmra.mrb[220].mxu1 %vm959_vm6, %v5939_v6 }
 0xb7f   :  { %v6094_v29 = vpop.trf.xlu1  ;;  %12961 = vmatprep.mubr.msk.f32.mxu1 %vm14379_vm1, %v18797_v45 }
 0xb80   :  { %12957 = vmatmul.mubr.msk.f32.gmra.mrb[220].mxu0 %vm959_vm6, %v6094_v29 }
 0xb81   :  { %v6243_v39 = vpop.trf.xlu0  ;;  %12984 = vmatprep.mubr.msk.f32.mxu0 %vm14379_vm1, %v18797_v45 }
 0xb82   :  { %12962 = vmatmul.mubr.msk.f32.vlgmr.msra.gmra.mrb[222].mxu1 %vm959_vm6, %v6243_v39 }
 0xb83   :  { %v6398_v19 = vpop.trf.xlu1  ;;  %12964 = vmatprep.mubr.msk.f32.mxu1 %vm14379_vm1, %v18797_v45  ;;  %13006 = vmatpush3.msk.msra.mxu1 %vm981_vm5, %v5635_v4 }
 0xb84   :  { %12985 = vmatmul.mubr.msk.f32.vlgmr.msra.gmra.mrb[222].mxu0 %vm959_vm6, %v6398_v19  ;;  %13051 = vmatprep.subr.mxu1 %v18797_v45 }
 0xb85   :  { %v6244_v24 = vpop.trf.xlu0  ;;  %12987 = vmatprep.mubr.msk.f32.mxu0 %vm14379_vm1, %v18797_v45  ;;  %13029 = vmatpush3.msk.msra.mxu0 %vm981_vm5, %v5649_v31 }
 0xb86   :  { %12965 = vmatmul.mubr.msk.f32.gmra.mrb[224].mxu1 %vm959_vm6, %v6244_v24  ;;  %13074 = vmatprep.subr.mxu0 %v18797_v45 }
 0xb87   :  { %v6399_v61 = vpop.trf.xlu1  ;;  %12967 = vmatprep.mubr.msk.f32.mxu1 %vm14379_vm1, %v18797_v45 }
 0xb88   :  { %12988 = vmatmul.mubr.msk.f32.gmra.mrb[224].mxu0 %vm959_vm6, %v6399_v61 }
 0xb89   :  { %v6245_v17 = vpop.trf.xlu0  ;;  %12990 = vmatprep.mubr.msk.f32.mxu0 %vm14379_vm1, %v18797_v45 }
 0xb8a   :  { %12968 = vmatmul.mubr.msk.f32.gmra.mrb[226].mxu1 %vm959_vm6, %v6245_v17  ;;  %v18823_v17 = vld [vmem:[#allocation15_spill] sm:$0xff] }
 0xb8b   :  { %v6400_v50 = vpop.trf.xlu1  ;;  %12970 = vmatprep.mubr.msk.f32.mxu1 %vm14379_vm1, %v18797_v45 }
 0xb8c   :  { %12991 = vmatmul.mubr.msk.f32.gmra.mrb[226].mxu0 %vm959_vm6, %v6400_v50 }
 0xb8d   :  { %v6246_v0 = vpop.trf.xlu0  ;;  %12993 = vmatprep.mubr.msk.f32.mxu0 %vm14379_vm1, %v18797_v45 }
 0xb8e   :  { %12971 = vmatmul.mubr.msk.f32.gmra.mrb[228].mxu1 %vm959_vm6, %v6246_v0 }
 0xb8f   :  { %v6401_v2 = vpop.trf.xlu1  ;;  %12973 = vmatprep.mubr.msk.f32.mxu1 %vm14379_vm1, %v18797_v45 }
 0xb90   :  { %12994 = vmatmul.mubr.msk.f32.gmra.mrb[228].mxu0 %vm959_vm6, %v6401_v2 }
 0xb91   :  { %v6247_v42 = vpop.trf.xlu0  ;;  %12996 = vmatprep.mubr.msk.f32.mxu0 %vm14379_vm1, %v18797_v45 }
 0xb92   :  { %12974 = vmatmul.mubr.msk.f32.gmra.mrb[230].mxu1 %vm959_vm6, %v6247_v42 }
 0xb93   :  { %v6402_v23 = vpop.trf.xlu1  ;;  %12976 = vmatprep.mubr.msk.f32.mxu1 %vm14379_vm1, %v18797_v45 }
 0xb94   :  { %12997 = vmatmul.mubr.msk.f32.gmra.mrb[230].mxu0 %vm959_vm6, %v6402_v23 }
 0xb95   :  { %v6248_v60 = vpop.trf.xlu0  ;;  %12999 = vmatprep.mubr.msk.f32.mxu0 %vm14379_vm1, %v18797_v45 }
 0xb96   :  { %12977 = vmatmul.mubr.msk.f32.gmra.mrb[232].mxu1 %vm959_vm6, %v6248_v60  ;;  %v18824_v60 = vld [vmem:[#allocation25_spill] sm:$0xff] }
 0xb97   :  { %v6403_v20 = vpop.trf.xlu1  ;;  %12979 = vmatprep.mubr.msk.f32.mxu1 %vm14379_vm1, %v18797_v45 }
 0xb98   :  { %13000 = vmatmul.mubr.msk.f32.gmra.mrb[232].mxu0 %vm959_vm6, %v6403_v20 }
 0xb99   :  { %v6249_v49 = vpop.trf.xlu0  ;;  %13002 = vmatprep.mubr.msk.f32.mxu0 %vm14379_vm1, %v18797_v45 }
 0xb9a   :  { %12980 = vmatmul.mubr.msk.f32.gmra.mrb[234].mxu1 %vm959_vm6, %v6249_v49  ;;  %v18825_v49 = vld [vmem:[#allocation16_spill] sm:$0xff] }
 0xb9b   :  { %v6404_v30 = vpop.trf.xlu1  ;;  %13007 = vmatprep.mubr.msk.f32.mxu1 %vm14379_vm1, %v18797_v45 }
 0xb9c   :  { %13003 = vmatmul.mubr.msk.f32.gmra.mrb[234].mxu0 %vm959_vm6, %v6404_v30 }
 0xb9d   :  { %v6553_v5 = vpop.trf.xlu0  ;;  %13030 = vmatprep.mubr.msk.f32.mxu0 %vm14379_vm1, %v18797_v45 }
 0xb9e   :  { %13008 = vmatmul.mubr.msk.f32.vlgmr.msra.gmra.mrb[236].mxu1 %vm959_vm6, %v6553_v5  ;;  %v18826_v5 = vld [vmem:[#allocation32_spill] sm:$0xff] }
 0xb9f   :  { %v6708_v44 = vpop.trf.xlu1  ;;  %13010 = vmatprep.mubr.msk.f32.mxu1 %vm14379_vm1, %v18797_v45  ;;  %13052 = vmatpush3.msk.msra.mxu1 %vm981_vm5, %v5640_v57 }
 0xba0   :  { %13031 = vmatmul.mubr.msk.f32.vlgmr.msra.gmra.mrb[236].mxu0 %vm959_vm6, %v6708_v44  ;;  %13097 = vmatprep.subr.mxu1 %v18797_v45 }
 0xba1   :  { %v6554_v21 = vpop.trf.xlu0  ;;  %13033 = vmatprep.mubr.msk.f32.mxu0 %vm14379_vm1, %v18797_v45  ;;  %13075 = vmatpush3.msk.msra.mxu0 %vm981_vm5, %v5650_v16 }
 0xba2   :  { %13011 = vmatmul.mubr.msk.f32.gmra.mrb[238].mxu1 %vm959_vm6, %v6554_v21  ;;  %13120 = vmatprep.subr.mxu0 %v18797_v45 }
 0xba3   :  { %v6709_v7 = vpop.trf.xlu1  ;;  %13013 = vmatprep.mubr.msk.f32.mxu1 %vm14379_vm1, %v18797_v45 }
 0xba4   :  { %13034 = vmatmul.mubr.msk.f32.gmra.mrb[238].mxu0 %vm959_vm6, %v6709_v7 }
 0xba5   :  { %v6555_v15 = vpop.trf.xlu0  ;;  %13036 = vmatprep.mubr.msk.f32.mxu0 %vm14379_vm1, %v18797_v45 }
 0xba6   :  { %13014 = vmatmul.mubr.msk.f32.gmra.mrb[240].mxu1 %vm959_vm6, %v6555_v15 }
 0xba7   :  { %v6710_v47 = vpop.trf.xlu1  ;;  %13016 = vmatprep.mubr.msk.f32.mxu1 %vm14379_vm1, %v18797_v45 }
 0xba8   :  { %13037 = vmatmul.mubr.msk.f32.gmra.mrb[240].mxu0 %vm959_vm6, %v6710_v47  ;;  %v16904_v47 = vld [vmem:[%s18563_s6] sm:$0xff] }
 0xba9   :  { %v6556_v32 = vpop.trf.xlu0  ;;  %13039 = vmatprep.mubr.msk.f32.mxu0 %vm14379_vm1, %v18797_v45 }
 0xbaa   :  { %13017 = vmatmul.mubr.msk.f32.gmra.mrb[242].mxu1 %vm959_vm6, %v6556_v32 }
 0xbab   :  { %v6711_v53 = vpop.trf.xlu1  ;;  %13019 = vmatprep.mubr.msk.f32.mxu1 %vm14379_vm1, %v18797_v45 }
 0xbac   :  { %13040 = vmatmul.mubr.msk.f32.gmra.mrb[242].mxu0 %vm959_vm6, %v6711_v53 }
 0xbad   :  { %v6557_v26 = vpop.trf.xlu0  ;;  %13042 = vmatprep.mubr.msk.f32.mxu0 %vm14379_vm1, %v18797_v45 }
 0xbae   :  { %13020 = vmatmul.mubr.msk.f32.gmra.mrb[244].mxu1 %vm959_vm6, %v6557_v26  ;;  %v18827_v26 = vld [vmem:[#allocation17_spill] sm:$0xff] }
 0xbaf   :  { %v6712_v52 = vpop.trf.xlu1  ;;  %13022 = vmatprep.mubr.msk.f32.mxu1 %vm14379_vm1, %v18797_v45 }
 0xbb0   :  { %13043 = vmatmul.mubr.msk.f32.gmra.mrb[244].mxu0 %vm959_vm6, %v6712_v52 }
 0xbb1   :  { %v6558_v38 = vpop.trf.xlu0  ;;  %13045 = vmatprep.mubr.msk.f32.mxu0 %vm14379_vm1, %v18797_v45 }
 0xbb2   :  { %13023 = vmatmul.mubr.msk.f32.gmra.mrb[246].mxu1 %vm959_vm6, %v6558_v38  ;;  %v18828_v38 = vld [vmem:[#allocation26_spill] sm:$0xff] }
 0xbb3   :  { %v6713_v1 = vpop.trf.xlu1  ;;  %13025 = vmatprep.mubr.msk.f32.mxu1 %vm14379_vm1, %v18797_v45 }
 0xbb4   :  { %13046 = vmatmul.mubr.msk.f32.gmra.mrb[246].mxu0 %vm959_vm6, %v6713_v1 }
 0xbb5   :  { %v6559_v48 = vpop.trf.xlu0  ;;  %13048 = vmatprep.mubr.msk.f32.mxu0 %vm14379_vm1, %v18797_v45 }
 0xbb6   :  { %13026 = vmatmul.mubr.msk.f32.gmra.mrb[248].mxu1 %vm959_vm6, %v6559_v48 }
 0xbb7   :  { %v6714_v10 = vpop.trf.xlu1  ;;  %13053 = vmatprep.mubr.msk.f32.mxu1 %vm14379_vm1, %v18797_v45 }
 0xbb8   :  { %13049 = vmatmul.mubr.msk.f32.gmra.mrb[248].mxu0 %vm959_vm6, %v6714_v10 }
 0xbb9   :  { %v6863_v58 = vpop.trf.xlu0  ;;  %13076 = vmatprep.mubr.msk.f32.mxu0 %vm14379_vm1, %v18797_v45 }
 0xbba   :  { %13054 = vmatmul.mubr.msk.f32.vlgmr.msra.gmra.mrb[250].mxu1 %vm959_vm6, %v6863_v58 }
 0xbbb   :  { %v7018_v40 = vpop.trf.xlu1  ;;  %13056 = vmatprep.mubr.msk.f32.mxu1 %vm14379_vm1, %v18797_v45  ;;  %13098 = vmatpush3.xpose.msk.msra.mxu1 %vm2225_vm7, %v5754_v62 }
 0xbbc   :  { %13077 = vmatmul.mubr.msk.f32.vlgmr.msra.gmra.mrb[250].mxu0 %vm959_vm6, %v7018_v40  ;;  %13143 = vmatprep.subr.mxu1 %v18797_v45  ;;  %v18829_v40 = vld [vmem:[#allocation34_spill] sm:$0xff] }
 0xbbd   :  { %v6864_v25 = vpop.trf.xlu0  ;;  %13079 = vmatprep.mubr.msk.f32.mxu0 %vm14379_vm1, %v18797_v45  ;;  %13121 = vmatpush3.xpose.msk.msra.mxu0 %vm2225_vm7, %v5776_v63 }
 0xbbe   :  { %13057 = vmatmul.mubr.msk.f32.gmra.mrb[252].mxu1 %vm959_vm6, %v6864_v25  ;;  %13166 = vmatprep.subr.mxu0 %v18797_v45 }
 0xbbf   :  { %v7019_v11 = vpop.trf.xlu1  ;;  %13059 = vmatprep.mubr.msk.f32.mxu1 %vm14379_vm1, %v18797_v45 }
 0xbc0   :  { %13080 = vmatmul.mubr.msk.f32.gmra.mrb[252].mxu0 %vm959_vm6, %v7019_v11 }
 0xbc1   :  { %v6865_v8 = vpop.trf.xlu0  ;;  %13082 = vmatprep.mubr.msk.f32.mxu0 %vm14379_vm1, %v18797_v45 }
 0xbc2   :  { %13060 = vmatmul.mubr.msk.f32.gmra.mrb[254].mxu1 %vm959_vm6, %v6865_v8 }
 0xbc3   :  { %v7020_v41 = vpop.trf.xlu1  ;;  %13062 = vmatprep.mubr.msk.f32.mxu1 %vm14379_vm1, %v18797_v45 }
 0xbc4   :  { %13083 = vmatmul.mubr.msk.f32.gmra.mrb[254].mxu0 %vm959_vm6, %v7020_v41 }
 0xbc5   :  { %v6866_v46 = vpop.trf.xlu0  ;;  %13085 = vmatprep.mubr.msk.f32.mxu0 %vm14379_vm1, %v18797_v45 }
 0xbc6   :  { %13063 = vmatmul.mubr.msk.f32.gmra.mrb[0].mxu1 %vm959_vm6, %v6866_v46  ;;  %v16925_v46 = vld [vmem:[%s18563_s6 + $0x8] sm:$0xff] }
 0xbc7   :  { %v7021_v14 = vpop.trf.xlu1  ;;  %13065 = vmatprep.mubr.msk.f32.mxu1 %vm14379_vm1, %v18797_v45 }
 0xbc8   :  { %13086 = vmatmul.mubr.msk.f32.gmra.mrb[0].mxu0 %vm959_vm6, %v7021_v14 }
 0xbc9   :  { %v6867_v6 = vpop.trf.xlu0  ;;  %13088 = vmatprep.mubr.msk.f32.mxu0 %vm14379_vm1, %v18797_v45 }
 0xbca   :  { %13066 = vmatmul.mubr.msk.f32.gmra.mrb[2].mxu1 %vm959_vm6, %v6867_v6 }
 0xbcb   :  { %v7022_v4 = vpop.trf.xlu1  ;;  %13068 = vmatprep.mubr.msk.f32.mxu1 %vm14379_vm1, %v18797_v45 }
 0xbcc   :  { %13089 = vmatmul.mubr.msk.f32.gmra.mrb[2].mxu0 %vm959_vm6, %v7022_v4  ;;  %v18830_v4 = vld [vmem:[#allocation27_spill] sm:$0xff] }
 0xbcd   :  { %v6868_v29 = vpop.trf.xlu0  ;;  %13091 = vmatprep.mubr.msk.f32.mxu0 %vm14379_vm1, %v18797_v45 }
 0xbce   :  { %13069 = vmatmul.mubr.msk.f32.gmra.mrb[4].mxu1 %vm959_vm6, %v6868_v29 }
 0xbcf   :  { %v7023_v39 = vpop.trf.xlu1  ;;  %13071 = vmatprep.mubr.msk.f32.mxu1 %vm14379_vm1, %v18797_v45 }
 0xbd0   :  { %13092 = vmatmul.mubr.msk.f32.gmra.mrb[4].mxu0 %vm959_vm6, %v7023_v39 }
 0xbd1   :  { %v6869_v31 = vpop.trf.xlu0  ;;  %13094 = vmatprep.mubr.msk.f32.mxu0 %vm14379_vm1, %v18797_v45 }
 0xbd2   :  { %13072 = vmatmul.mubr.msk.f32.gmra.mrb[6].mxu1 %vm959_vm6, %v6869_v31  ;;  %v18831_v31 = vld [vmem:[#allocation18_spill] sm:$0xff] }
 0xbd3   :  { %v7024_v19 = vpop.trf.xlu1  ;;  %13099 = vmatprep.mubr.msk.f32.mxu1 %vm14379_vm1, %v18797_v45 }
 0xbd4   :  { %13095 = vmatmul.mubr.msk.f32.gmra.mrb[6].mxu0 %vm959_vm6, %v7024_v19 }
 0xbd5   :  { %13122 = vmatprep.mubr.msk.f32.mxu0 %vm14379_vm1, %v18797_v45 }
 0xbe7   :  { %v16889_v61 = vpop.permute.xlu1 %5834 }
 0xbe8   :  { %v5868_v2 = vmul.f32 %v16889_v61, %v18823_v17  ;;  %v5869_v7 = vmul.f32 %v16889_v61, %v18825_v49  ;;  %v5870_v63 = vmul.f32 %v16889_v61, %v18827_v26 }
 0xbf0   :  { %v16887_v24 = vpop.permute.xlu0 %5830 }
 0xbf1   :  { %v5861_v59 = vmul.f32 %v16887_v24, %v18823_v17  ;;  %v5862_v57 = vmul.f32 %v16887_v24, %v18825_v49  ;;  %v5863_v52 = vmul.f32 %v16887_v24, %v18827_v26  ;;  %v5864_v19 = vmul.f32 %v16887_v24, %v18831_v31 }
 0xc39   :  { %v6038_v50 = vpop.f32.mrb[208].mxu1 }
 0xc3a   :  { %v6039_v0 = vadd.f32 %v6038_v50, %v5861_v59  ;;  %v12917_v42 = vpop.f32.mrb[209].mxu1 }
 0xc3b   :  { %v6193_v23 = vpop.f32.mrb[208].mxu0  ;;  %v5871_v42 = vmul.f32 %v16889_v61, %v18831_v31 }
 0xc3c   :  { %v7157_v12 = vadd.f32 %v6039_v0, %v18824_v60  ;;  %v6194_v20 = vadd.f32 %v6193_v23, %v5868_v2  ;;  %v12940_v30 = vpop.f32.mrb[209].mxu0  ;;  %v18832_v23 = vld [vmem:[#allocation36_spill] sm:$0xff] }
 0xc3d   :  { %v6043_v16 = vpop.f32.mrb[210].mxu1  ;;  %v16946_v30 = vld [vmem:[%s18563_s6 + $0x10] sm:$0xff] }
 0xc3e   :  { %v7164_v44 = vadd.f32 %v6194_v20, %v18826_v5  ;;  %v6044_v21 = vadd.f32 %v6043_v16, %v5862_v57  ;;  %v12920_v15 = vpop.f32.mrb[211].mxu1  ;;  %v16907_v32 = vadd.f32 %v16904_v47, %v7157_v12 }
 0xc3f   :  { %v6198_v53 = vpop.f32.mrb[210].mxu0  ;;  %v18834_v15 = vld [vmem:[#allocation19_spill] sm:$0xff] }
 0xc40   :  { %v7158_v56 = vadd.f32 %v6044_v21, %v18828_v38  ;;  %v6199_v1 = vadd.f32 %v6198_v53, %v5869_v7  ;;  %v7269_v48 = vsel %vm2225_vm7, %v16907_v32, -inf  ;;  %v12943_v62 = vpop.f32.mrb[211].mxu0  ;;  %v16915_v10 = vadd.f32 %v16904_v47, %v7164_v44  ;;  %v18833_v44 = vld [vmem:[#allocation28_spill] sm:$0xff] }
 0xc41   :  { %7270 = vmax.xlane.f32.xlu1 %v7269_v48  ;;  %v6048_v58 = vpop.f32.mrb[212].mxu1  ;;  %v5865_v53 = vmul.f32 %v16887_v24, %v18834_v15  ;;  %v18835_v48 = vld [vmem:[#allocation38_spill] sm:$0xff] }
 0xc42   :  { %v7165_v25 = vadd.f32 %v6199_v1, %v18829_v40  ;;  %v6049_v11 = vadd.f32 %v6048_v58, %v5863_v52  ;;  %v7290_v8 = vsel %vm2225_vm7, %v16915_v10, -inf  ;;  %v12923_v41 = vpop.f32.mrb[213].mxu1  ;;  %v16928_v14 = vadd.f32 %v16925_v46, %v7158_v56 }
 0xc43   :  { %7291 = vmax.xlane.f32.xlu0 %v7290_v8  ;;  %v6203_v6 = vpop.f32.mrb[212].mxu0  ;;  %v5872_v56 = vmul.f32 %v16889_v61, %v18834_v15  ;;  %v18836_v41 = vld [vmem:[#allocation29_spill] sm:$0xff] }
 0xc44   :  { %v7159_v29 = vadd.f32 %v6049_v11, %v18830_v4  ;;  %v6204_v39 = vadd.f32 %v6203_v6, %v5870_v63  ;;  %v12946_v59 = vpop.f32.mrb[213].mxu0  ;;  %v16934_v50 = vadd.f32 %v16925_v46, %v7165_v25  ;;  %v7272_v2 = vsel %vm2225_vm7, %v16928_v14, -inf  ;;  %v16965_v25 = vld [vmem:[%s18563_s6 + $0x18] sm:$0xff] }
 0xc45   :  { %v6053_v0 = vpop.f32.mrb[214].mxu1 }
 0xc46   :  { %v7166_v60 = vadd.f32 %v6204_v39, %v18832_v23  ;;  %v6054_v12 = vadd.f32 %v6053_v0, %v5864_v19  ;;  %v7293_v20 = vsel %vm2225_vm7, %v16934_v50, -inf  ;;  %v12926_v57 = vpop.f32.mrb[215].mxu1  ;;  %v16949_v16 = vadd.f32 %v16946_v30, %v7159_v29  ;;  %v18837_v29 = vld [vmem:[#allocation20_spill] sm:$0xff] }
 0xc47   :  { %7273 = vmax.xlane.f32.xlu0 %v7272_v2  ;;  %7294 = vmax.xlane.f32.xlu1 %v7293_v20  ;;  %v6208_v5 = vpop.f32.mrb[214].mxu0  ;;  %v5866_v39 = vmul.f32 %v16887_v24, %v18837_v29  ;;  %v18838_v23 = vld [vmem:[#allocation40_spill] sm:$0xff] }
 0xc48   :  { %v7160_v21 = vadd.f32 %v6054_v12, %v18833_v44  ;;  %v6209_v7 = vadd.f32 %v6208_v5, %v5871_v42  ;;  %v12949_v52 = vpop.f32.mrb[215].mxu0  ;;  %v16957_v1 = vadd.f32 %v16946_v30, %v7166_v60  ;;  %v7275_v63 = vsel %vm2225_vm7, %v16949_v16, -inf  ;;  %v16983_v57 = vld [vmem:[%s18563_s6 + $0x20] sm:$0xff] }
 0xc49   :  { %v6058_v38 = vpop.f32.mrb[216].mxu1  ;;  %v5873_v42 = vmul.f32 %v16889_v61, %v18837_v29  ;;  %v16993_v52 = vpop.permute.xlu1 %5838 }
 0xc4a   :  { %v7167_v62 = vadd.f32 %v6209_v7, %v18835_v48  ;;  %v6059_v58 = vadd.f32 %v6058_v38, %v5865_v53  ;;  %v12929_v40 = vpop.f32.mrb[217].mxu1  ;;  %v16968_v11 = vadd.f32 %v16965_v25, %v7160_v21  ;;  %v7296_v2 = vsel %vm2225_vm7, %v16957_v1, -inf  ;;  %v18839_v7 = vld [vmem:[#allocation21_spill] sm:$0xff]  ;;  %v18840_v38 = vld [vmem:[#allocation30_spill] sm:$0xff] }
 0xc4b   :  { %7276 = vmax.xlane.f32.xlu0 %v7275_v63  ;;  %v6213_v8 = vpop.f32.mrb[216].mxu0  ;;  %v5867_v53 = vmul.f32 %v16887_v24, %v18839_v7  ;;  %v18841_v24 = vld [vmem:[#allocation42_spill] sm:$0xff] }
 0xc4c   :  { %v7161_v6 = vadd.f32 %v6059_v58, %v18836_v41  ;;  %v6214_v4 = vadd.f32 %v6213_v8, %v5872_v56  ;;  %v7278_v19 = vsel %vm2225_vm7, %v16968_v11, -inf  ;;  %v12952_v59 = vpop.f32.mrb[217].mxu0  ;;  %v16989_v44 = vadd.f32 %v16965_v25, %v7167_v62  ;;  %v17003_v41 = vpop.permute.xlu0 %5842 }
 0xc4d   :  { %v6063_v0 = vpop.f32.mrb[218].mxu1  ;;  %7279 = vmax.xlane.f32.xlu1 %v7278_v19  ;;  %v5874_v62 = vmul.f32 %v16889_v61, %v18839_v7  ;;  %v17011_v59 = vld [vmem:[%s18563_s6 + $0x28] sm:$0xff]  ;;  %v5875_v61 = vmul.f32 %v16993_v52, %v18823_v17 }
 0xc4e   :  { %v7168_v60 = vadd.f32 %v6214_v4, %v18838_v23  ;;  %v6064_v12 = vadd.f32 %v6063_v0, %v5866_v39  ;;  %v12932_v20 = vpop.f32.mrb[219].mxu1  ;;  %v16986_v5 = vadd.f32 %v16983_v57, %v7161_v6  ;;  %v7299_v39 = vsel %vm2225_vm7, %v16989_v44, -inf }
 0xc4f   :  { %7297 = vmax.xlane.f32.xlu0 %v7296_v2  ;;  %v6218_v21 = vpop.f32.mrb[218].mxu0 }
 0xc50   :  { %v7162_v56 = vadd.f32 %v6064_v12, %v18840_v38  ;;  %v6219_v48 = vadd.f32 %v6218_v21, %v5873_v42  ;;  %v7281_v58 = vsel %vm2225_vm7, %v16986_v5, -inf  ;;  %v12955_v63 = vpop.f32.mrb[219].mxu0  ;;  %v16999_v40 = vadd.f32 %v16983_v57, %v7168_v60  ;;  %v18842_v42 = vld [vmem:[#allocation31_spill] sm:$0xff] }
 0xc51   :  { %v6068_v8 = vpop.f32.mrb[220].mxu1  ;;  %7282 = vmax.xlane.f32.xlu1 %v7281_v58  ;;  %v5882_v38 = vmul.f32 %v17003_v41, %v18823_v17 }
 0xc52   :  { %v7169_v6 = vadd.f32 %v6219_v48, %v18841_v24  ;;  %v6069_v4 = vadd.f32 %v6068_v8, %v5867_v53  ;;  %v12935_v19 = vpop.f32.mrb[221].mxu1  ;;  %v17014_v0 = vadd.f32 %v17011_v59, %v7162_v56  ;;  %v7302_v12 = vsel %vm2225_vm7, %v16999_v40, -inf  ;;  %v18843_v56 = vld [vmem:[#allocation44_spill] sm:$0xff] }
 0xc53   :  { %7300 = vmax.xlane.f32.xlu0 %v7299_v39  ;;  %v6223_v2 = vpop.f32.mrb[220].mxu0  ;;  %v18844_v39 = vld [vmem:[#allocation33_spill] sm:$0xff] }
 0xc54   :  { %v7163_v23 = vadd.f32 %v6069_v4, %v18842_v42  ;;  %v6224_v60 = vadd.f32 %v6223_v2, %v5874_v62  ;;  %v12958_v20 = vpop.f32.mrb[221].mxu0  ;;  %v17022_v21 = vadd.f32 %v17011_v59, %v7169_v6  ;;  %v7284_v63 = vsel %vm2225_vm7, %v17014_v0, -inf  ;;  %v17032_v62 = vld [vmem:[%s18563_s6 + $0x30] sm:$0xff] }
 0xc55   :  { %v6348_v53 = vpop.f32.mrb[222].mxu1  ;;  %7303 = vmax.xlane.f32.xlu1 %v7302_v12  ;;  %v5876_v4 = vmul.f32 %v16993_v52, %v18825_v49  ;;  %v18845_v20 = vld [vmem:[#allocation46_spill] sm:$0xff] }
 0xc56   :  { %v7170_v48 = vadd.f32 %v6224_v60, %v18843_v56  ;;  %v6349_v58 = vadd.f32 %v6348_v53, %v5875_v61  ;;  %v12963_v8 = vpop.f32.mrb[223].mxu1  ;;  %v17035_v24 = vadd.f32 %v17032_v62, %v7163_v23  ;;  %v7305_v61 = vsel %vm2225_vm7, %v17022_v21, -inf }
 0xc57   :  { %7285 = vmax.xlane.f32.xlu0 %v7284_v63  ;;  %v6503_v6 = vpop.f32.mrb[222].mxu0  ;;  %v5883_v23 = vmul.f32 %v17003_v41, %v18825_v49 }
 0xc58   :  { %v7171_v19 = vadd.f32 %v6349_v58, %v18844_v39  ;;  %v6504_v2 = vadd.f32 %v6503_v6, %v5882_v38  ;;  %v12986_v42 = vpop.f32.mrb[223].mxu0  ;;  %v17043_v60 = vadd.f32 %v17032_v62, %v7170_v48  ;;  %v7287_v63 = vsel %vm2225_vm7, %v17035_v24, -inf  ;;  %v18846_v6 = vld [vmem:[#allocation35_spill] sm:$0xff] }
 0xc59   :  { %v6353_v12 = vpop.f32.mrb[224].mxu1  ;;  %7306 = vmax.xlane.f32.xlu1 %v7305_v61  ;;  %v5877_v48 = vmul.f32 %v16993_v52, %v18827_v26 }
 0xc5a   :  { %v7178_v53 = vadd.f32 %v6504_v2, %v18845_v20  ;;  %v6354_v56 = vadd.f32 %v6353_v12, %v5876_v4  ;;  %v12966_v58 = vpop.f32.mrb[225].mxu1  ;;  %v17051_v38 = vadd.f32 %v16904_v47, %v7171_v19  ;;  %v7308_v42 = vsel %vm2225_vm7, %v17043_v60, -inf  ;;  %v18847_v20 = vld [vmem:[#allocation48_spill] sm:$0xff] }
 0xc5b   :  { %7288 = vmax.xlane.f32.xlu0 %v7287_v63  ;;  %v6508_v8 = vpop.f32.mrb[224].mxu0  ;;  %v5884_v19 = vmul.f32 %v17003_v41, %v18827_v26 }
 0xc5c   :  { %v7172_v39 = vadd.f32 %v6354_v56, %v18846_v6  ;;  %v6509_v61 = vadd.f32 %v6508_v8, %v5883_v23  ;;  %v12989_v2 = vpop.f32.mrb[225].mxu0  ;;  %v17059_v4 = vadd.f32 %v16904_v47, %v7178_v53  ;;  %v7311_v35 = vsel %vm2225_vm7, %v17051_v38, -inf  ;;  %v18848_v6 = vld [vmem:[#allocation37_spill] sm:$0xff] }
 0xc5d   :  { %v6358_v12 = vpop.f32.mrb[226].mxu1  ;;  %7309 = vmax.xlane.f32.xlu1 %v7308_v42  ;;  %v5878_v53 = vmul.f32 %v16993_v52, %v18831_v31 }
 0xc5e   :  { %v7179_v63 = vadd.f32 %v6509_v61, %v18847_v20  ;;  %v6359_v58 = vadd.f32 %v6358_v12, %v5877_v48  ;;  %v12969_v56 = vpop.f32.mrb[227].mxu1  ;;  %v17067_v23 = vadd.f32 %v16925_v46, %v7172_v39  ;;  %v7332_v34 = vsel %vm2225_vm7, %v17059_v4, -inf }
 0xc5f   :  { %7312 = vmax.xlane.f32.xlu0 %v7311_v35  ;;  %v6513_v8 = vpop.f32.mrb[226].mxu0  ;;  %v5885_v39 = vmul.f32 %v17003_v41, %v18831_v31  ;;  %v18849_v35 = vld [vmem:[#allocation50_spill] sm:$0xff] }
 0xc60   :  { %v7173_v42 = vadd.f32 %v6359_v58, %v18848_v6  ;;  %v6514_v2 = vadd.f32 %v6513_v8, %v5884_v19  ;;  %v12992_v61 = vpop.f32.mrb[227].mxu0  ;;  %v17075_v48 = vadd.f32 %v16925_v46, %v7179_v63  ;;  %v7314_v3 = vsel %vm2225_vm7, %v17067_v23, -inf  ;;  %v18850_v6 = vld [vmem:[#allocation39_spill] sm:$0xff] }
 0xc61   :  { %v6363_v12 = vpop.f32.mrb[228].mxu1  ;;  %7333 = vmax.xlane.f32.xlu1 %v7332_v34  ;;  %v5879_v63 = vmul.f32 %v16993_v52, %v18834_v15 }
 0xc62   :  { %v7180_v20 = vadd.f32 %v6514_v2, %v18849_v35  ;;  %v6364_v56 = vadd.f32 %v6363_v12, %v5878_v53  ;;  %v12972_v58 = vpop.f32.mrb[229].mxu1  ;;  %v17083_v19 = vadd.f32 %v16946_v30, %v7173_v42  ;;  %v7335_v33 = vsel %vm2225_vm7, %v17075_v48, -inf }
 0xc63   :  { %7315 = vmax.xlane.f32.xlu0 %v7314_v3  ;;  %v6518_v8 = vpop.f32.mrb[228].mxu0  ;;  %v5886_v42 = vmul.f32 %v17003_v41, %v18834_v15  ;;  %v18851_v3 = vld [vmem:[#allocation52_spill] sm:$0xff] }
 0xc64   :  { %v7174_v34 = vadd.f32 %v6364_v56, %v18850_v6  ;;  %v6519_v61 = vadd.f32 %v6518_v8, %v5885_v39  ;;  %v12995_v2 = vpop.f32.mrb[229].mxu0  ;;  %v17091_v53 = vadd.f32 %v16946_v30, %v7180_v20  ;;  %v7317_v36 = vsel %vm2225_vm7, %v17083_v19, -inf  ;;  %v18852_v6 = vld [vmem:[#allocation41_spill] sm:$0xff] }
 0xc65   :  { %v6368_v12 = vpop.f32.mrb[230].mxu1  ;;  %7336 = vmax.xlane.f32.xlu1 %v7335_v33  ;;  %v5880_v20 = vmul.f32 %v16993_v52, %v18837_v29 }
 0xc66   :  { %v7181_v35 = vadd.f32 %v6519_v61, %v18851_v3  ;;  %v6369_v58 = vadd.f32 %v6368_v12, %v5879_v63  ;;  %v12975_v56 = vpop.f32.mrb[231].mxu1  ;;  %v17099_v39 = vadd.f32 %v16965_v25, %v7174_v34  ;;  %v7338_v37 = vsel %vm2225_vm7, %v17091_v53, -inf }
 0xc67   :  { %7318 = vmax.xlane.f32.xlu0 %v7317_v36  ;;  %v6523_v8 = vpop.f32.mrb[230].mxu0  ;;  %v5887_v34 = vmul.f32 %v17003_v41, %v18837_v29  ;;  %v18853_v36 = vld [vmem:[#allocation54_spill] sm:$0xff] }
 0xc68   :  { %v7175_v33 = vadd.f32 %v6369_v58, %v18852_v6  ;;  %v6524_v2 = vadd.f32 %v6523_v8, %v5886_v42  ;;  %v12998_v61 = vpop.f32.mrb[231].mxu0  ;;  %v17107_v63 = vadd.f32 %v16965_v25, %v7181_v35  ;;  %v7320_v51 = vsel %vm2225_vm7, %v17099_v39, -inf  ;;  %v17119_v6 = vpop.permute.xlu1 %5846 }
 0xc69   :  { %v6373_v12 = vpop.f32.mrb[232].mxu1  ;;  %7339 = vmax.xlane.f32.xlu1 %v7338_v37  ;;  %v5881_v35 = vmul.f32 %v16993_v52, %v18839_v7  ;;  %v18854_v37 = vld [vmem:[#allocation43_spill] sm:$0xff]  ;;  %v18855_v52 = vld [vmem:[#allocation56_spill] sm:$0xff] }
 0xc6a   :  { %v7182_v3 = vadd.f32 %v6524_v2, %v18853_v36  ;;  %v6374_v56 = vadd.f32 %v6373_v12, %v5880_v20  ;;  %v12978_v58 = vpop.f32.mrb[233].mxu1  ;;  %v17115_v42 = vadd.f32 %v16983_v57, %v7175_v33  ;;  %v7341_v20 = vsel %vm2225_vm7, %v17107_v63, -inf  ;;  %v17129_v33 = vpop.permute.xlu0 %5850 }
 0xc6b   :  { %7321 = vmax.xlane.f32.xlu0 %v7320_v51  ;;  %v6528_v8 = vpop.f32.mrb[232].mxu0  ;;  %v5888_v51 = vmul.f32 %v17003_v41, %v18839_v7 }
 0xc6c   :  { %v7176_v61 = vadd.f32 %v6374_v56, %v18854_v37  ;;  %v6529_v54 = vadd.f32 %v6528_v8, %v5887_v34  ;;  %v13001_v2 = vpop.f32.mrb[233].mxu0  ;;  %v17125_v12 = vadd.f32 %v16983_v57, %v7182_v3  ;;  %v7323_v34 = vsel %vm2225_vm7, %v17115_v42, -inf }
 0xc6d   :  { %v6378_v36 = vpop.f32.mrb[234].mxu1  ;;  %7342 = vmax.xlane.f32.xlu1 %v7341_v20  ;;  %v5889_v37 = vmul.f32 %v17119_v6, %v18823_v17  ;;  %v18856_v20 = vld [vmem:[#allocation45_spill] sm:$0xff] }
 0xc6e   :  { %v7183_v58 = vadd.f32 %v6529_v54, %v18855_v52  ;;  %v6379_v18 = vadd.f32 %v6378_v36, %v5881_v35  ;;  %v12981_v56 = vpop.f32.mrb[235].mxu1  ;;  %v17135_v8 = vadd.f32 %v17011_v59, %v7176_v61  ;;  %v7344_v22 = vsel %vm2225_vm7, %v17125_v12, -inf  ;;  %v18858_v52 = vld [vmem:[#allocation59_spill] sm:$0xff] }
 0xc6f   :  { %7324 = vmax.xlane.f32.xlu0 %v7323_v34  ;;  %v6533_v3 = vpop.f32.mrb[234].mxu0  ;;  %v5896_v61 = vmul.f32 %v17129_v33, %v18823_v17 }
 0xc70   :  { %v7177_v2 = vadd.f32 %v6379_v18, %v18856_v20  ;;  %v6534_v41 = vadd.f32 %v6533_v3, %v5888_v51  ;;  %v13004_v54 = vpop.f32.mrb[235].mxu0  ;;  %v17143_v35 = vadd.f32 %v17011_v59, %v7183_v58  ;;  %v7326_v27 = vsel %vm2225_vm7, %v17135_v8, -inf  ;;  %v18859_v20 = vld [vmem:[#allocation47_spill] sm:$0xff] }
 0xc71   :  { %v6658_v36 = vpop.f32.mrb[236].mxu1  ;;  %7345 = vmax.xlane.f32.xlu1 %v7344_v22  ;;  %v5890_v58 = vmul.f32 %v17119_v6, %v18825_v49 }
 0xc72   :  { %18857 = vst [vmem:[#allocation23_spill] sm:$0xff] %v17143_v35  ;;  %v7184_v34 = vadd.f32 %v6534_v41, %v18858_v52  ;;  %v6659_v56 = vadd.f32 %v6658_v36, %v5889_v37  ;;  %v13009_v18 = vpop.f32.mrb[237].mxu1  ;;  %v17151_v51 = vadd.f32 %v17032_v62, %v7177_v2  ;;  %v7347_v55 = vsel %vm2225_vm7, %v17143_v35, -inf }
 0xc73   :  { %7327 = vmax.xlane.f32.xlu0 %v7326_v27  ;;  %v6813_v3 = vpop.f32.mrb[236].mxu0  ;;  %v5897_v2 = vmul.f32 %v17129_v33, %v18825_v49  ;;  %v18861_v27 = vld [vmem:[#allocation62_spill] sm:$0xff] }
 0xc74   :  { %v7185_v22 = vadd.f32 %v6659_v56, %v18859_v20  ;;  %v6814_v54 = vadd.f32 %v6813_v3, %v5896_v61  ;;  %v13032_v41 = vpop.f32.mrb[237].mxu0  ;;  %v17159_v37 = vadd.f32 %v17032_v62, %v7184_v34  ;;  %v7329_v9 = vsel %vm2225_vm7, %v17151_v51, -inf  ;;  %v18862_v20 = vld [vmem:[#allocation49_spill] sm:$0xff] }
 0xc75   :  { %v6663_v36 = vpop.f32.mrb[238].mxu1  ;;  %7348 = vmax.xlane.f32.xlu1 %v7347_v55  ;;  %v5891_v34 = vmul.f32 %v17119_v6, %v18827_v26 }
 0xc76   :  { %18860 = vst [vmem:[#allocation61_spill] sm:$0xff] %v17159_v37  ;;  %v7192_v52 = vadd.f32 %v6814_v54, %v18861_v27  ;;  %v6664_v18 = vadd.f32 %v6663_v36, %v5890_v58  ;;  %v13012_v56 = vpop.f32.mrb[239].mxu1  ;;  %v17167_v61 = vadd.f32 %v16904_v47, %v7185_v22  ;;  %v7350_v13 = vsel %vm2225_vm7, %v17159_v37, -inf }
 0xc77   :  { %7330 = vmax.xlane.f32.xlu0 %v7329_v9  ;;  %v6818_v3 = vpop.f32.mrb[238].mxu0  ;;  %v5898_v22 = vmul.f32 %v17129_v33, %v18827_v26  ;;  %v18864_v9 = vld [vmem:[#allocation66_spill] sm:$0xff] }
 0xc78   :  { %v7186_v55 = vadd.f32 %v6664_v18, %v18862_v20  ;;  %v6819_v41 = vadd.f32 %v6818_v3, %v5897_v2  ;;  %v13035_v54 = vpop.f32.mrb[239].mxu0  ;;  %v17175_v58 = vadd.f32 %v16904_v47, %v7192_v52  ;;  %v7353_v43 = vsel %vm2225_vm7, %v17167_v61, -inf  ;;  %v18865_v20 = vld [vmem:[#allocation51_spill] sm:$0xff] }
 0xc79   :  { %v6668_v36 = vpop.f32.mrb[240].mxu1  ;;  %7351 = vmax.xlane.f32.xlu1 %v7350_v13  ;;  %v5892_v52 = vmul.f32 %v17119_v6, %v18831_v31 }
 0xc7a   :  { %18863 = vst [vmem:[#allocation8_spill] sm:$0xff] %v17175_v58  ;;  %v7193_v27 = vadd.f32 %v6819_v41, %v18864_v9  ;;  %v6669_v56 = vadd.f32 %v6668_v36, %v5891_v34  ;;  %v13015_v18 = vpop.f32.mrb[241].mxu1  ;;  %v17183_v2 = vadd.f32 %v16925_v46, %v7186_v55  ;;  %v7374_v45 = vsel %vm2225_vm7, %v17175_v58, -inf }
 0xc7b   :  { %7354 = vmax.xlane.f32.xlu0 %v7353_v43  ;;  %v6823_v3 = vpop.f32.mrb[240].mxu0  ;;  %v5899_v55 = vmul.f32 %v17129_v33, %v18831_v31  ;;  %v18867_v43 = vld [vmem:[#allocation69_spill] sm:$0xff] }
 0xc7c   :  { %v7187_v13 = vadd.f32 %v6669_v56, %v18865_v20  ;;  %v6824_v54 = vadd.f32 %v6823_v3, %v5898_v22  ;;  %v13038_v41 = vpop.f32.mrb[241].mxu0  ;;  %v17191_v34 = vadd.f32 %v16925_v46, %v7193_v27  ;;  %v7356_v28 = vsel %vm2225_vm7, %v17183_v2, -inf  ;;  %v18868_v20 = vld [vmem:[#allocation53_spill] sm:$0xff] }
 0xc7d   :  { %v6673_v36 = vpop.f32.mrb[242].mxu1  ;;  %7375 = vmax.xlane.f32.xlu1 %v7374_v45  ;;  %v5893_v27 = vmul.f32 %v17119_v6, %v18834_v15 }
 0xc7e   :  { %18866 = vst [vmem:[#allocation9_spill] sm:$0xff] %v17191_v34  ;;  %v7194_v9 = vadd.f32 %v6824_v54, %v18867_v43  ;;  %v6674_v18 = vadd.f32 %v6673_v36, %v5892_v52  ;;  %v13018_v56 = vpop.f32.mrb[243].mxu1  ;;  %v17199_v22 = vadd.f32 %v16946_v30, %v7187_v13  ;;  %v7377_v58 = vsel %vm2225_vm7, %v17191_v34, -inf }
 0xc7f   :  { %7357 = vmax.xlane.f32.xlu0 %v7356_v28  ;;  %v6828_v3 = vpop.f32.mrb[242].mxu0  ;;  %v5900_v13 = vmul.f32 %v17129_v33, %v18834_v15  ;;  %v18870_v28 = vld [vmem:[#allocation74_spill] sm:$0xff] }
 0xc80   :  { %v7188_v45 = vadd.f32 %v6674_v18, %v18868_v20  ;;  %v6829_v41 = vadd.f32 %v6828_v3, %v5899_v55  ;;  %v13041_v54 = vpop.f32.mrb[243].mxu0  ;;  %v17207_v52 = vadd.f32 %v16946_v30, %v7194_v9  ;;  %v7359_v37 = vsel %vm2225_vm7, %v17199_v22, -inf  ;;  %v18872_v20 = vld [vmem:[#allocation55_spill] sm:$0xff] }
 0xc81   :  { %v6678_v36 = vpop.f32.mrb[244].mxu1  ;;  %7378 = vmax.xlane.f32.xlu1 %v7377_v58  ;;  %v5894_v9 = vmul.f32 %v17119_v6, %v18837_v29 }
 0xc82   :  { %18869 = vst [vmem:[#allocation10_spill] sm:$0xff] %v17207_v52  ;;  %v7195_v43 = vadd.f32 %v6829_v41, %v18870_v28  ;;  %v6679_v56 = vadd.f32 %v6678_v36, %v5893_v27  ;;  %v13021_v18 = vpop.f32.mrb[245].mxu1  ;;  %v17215_v55 = vadd.f32 %v16965_v25, %v7188_v45  ;;  %v7380_v34 = vsel %vm2225_vm7, %v17207_v52, -inf }
 0xc83   :  { %7360 = vmax.xlane.f32.xlu0 %v7359_v37  ;;  %v6833_v3 = vpop.f32.mrb[244].mxu0  ;;  %v5901_v45 = vmul.f32 %v17129_v33, %v18837_v29  ;;  %v18874_v37 = vld [vmem:[#allocation77_spill] sm:$0xff] }
 0xc84   :  { %18871 = vst [vmem:[#allocation11_spill] sm:$0xff] %v17215_v55  ;;  %v7189_v58 = vadd.f32 %v6679_v56, %v18872_v20  ;;  %v6834_v54 = vadd.f32 %v6833_v3, %v5900_v13  ;;  %v13044_v41 = vpop.f32.mrb[245].mxu0  ;;  %v17223_v27 = vadd.f32 %v16965_v25, %v7195_v43  ;;  %v7362_v35 = vsel %vm2225_vm7, %v17215_v55, -inf  ;;  %v17235_v20 = vpop.permute.xlu1 %5854 }
 0xc85   :  { %v6683_v36 = vpop.f32.mrb[246].mxu1  ;;  %7381 = vmax.xlane.f32.xlu1 %v7380_v34  ;;  %v5895_v43 = vmul.f32 %v17119_v6, %v18839_v7  ;;  %v18876_v34 = vld [vmem:[#allocation57_spill] sm:$0xff]  ;;  %v18878_v6 = vld [vmem:[#allocation80_spill] sm:$0xff] }
 0xc86   :  { %18873 = vst [vmem:[#allocation12_spill] sm:$0xff] %v17223_v27  ;;  %v7196_v28 = vadd.f32 %v6834_v54, %v18874_v37  ;;  %v6684_v18 = vadd.f32 %v6683_v36, %v5894_v9  ;;  %v13024_v56 = vpop.f32.mrb[247].mxu1  ;;  %v17231_v13 = vadd.f32 %v16983_v57, %v7189_v58  ;;  %v7383_v9 = vsel %vm2225_vm7, %v17223_v27, -inf  ;;  %v17245_v58 = vpop.permute.xlu0 %5858 }
 0xc87   :  { %7363 = vmax.xlane.f32.xlu0 %v7362_v35  ;;  %v6838_v3 = vpop.f32.mrb[246].mxu0  ;;  %v5902_v35 = vmul.f32 %v17129_v33, %v18839_v7 }
 0xc88   :  { %18875 = vst [vmem:[#allocation13_spill] sm:$0xff] %v17231_v13  ;;  %v7190_v41 = vadd.f32 %v6684_v18, %v18876_v34  ;;  %v6839_v52 = vadd.f32 %v6838_v3, %v5901_v45  ;;  %v13047_v54 = vpop.f32.mrb[247].mxu0  ;;  %v17241_v36 = vadd.f32 %v16983_v57, %v7196_v28  ;;  %v7365_v45 = vsel %vm2225_vm7, %v17231_v13, -inf }
 0xc89   :  { %v6688_v37 = vpop.f32.mrb[248].mxu1  ;;  %7384 = vmax.xlane.f32.xlu1 %v7383_v9  ;;  %v5903_v34 = vmul.f32 %v17235_v20, %v18823_v17  ;;  %v18879_v9 = vld [vmem:[#allocation60_spill] sm:$0xff] }
 0xc8a   :  { %18877 = vst [vmem:[#allocation14_spill] sm:$0xff] %v17241_v36  ;;  %v7197_v56 = vadd.f32 %v6839_v52, %v18878_v6  ;;  %v6689_v55 = vadd.f32 %v6688_v37, %v5895_v43  ;;  %v13027_v18 = vpop.f32.mrb[249].mxu1  ;;  %v17251_v3 = vadd.f32 %v17011_v59, %v7190_v41  ;;  %v7386_v27 = vsel %vm2225_vm7, %v17241_v36, -inf  ;;  %v18881_v6 = vld [vmem:[#allocation82_spill] sm:$0xff] }
 0xc8b   :  { %7366 = vmax.xlane.f32.xlu0 %v7365_v45  ;;  %v6843_v28 = vpop.f32.mrb[248].mxu0  ;;  %v5910_v41 = vmul.f32 %v17245_v58, %v18823_v17 }
 0xc8c   :  { %v7191_v54 = vadd.f32 %v6689_v55, %v18879_v9  ;;  %v6844_v33 = vadd.f32 %v6843_v28, %v5902_v35  ;;  %v13050_v52 = vpop.f32.mrb[249].mxu0  ;;  %v17259_v43 = vadd.f32 %v17011_v59, %v7197_v56  ;;  %v7368_v13 = vsel %vm2225_vm7, %v17251_v3, -inf  ;;  %v18882_v9 = vld [vmem:[#allocation63_spill] sm:$0xff] }
 0xc8d   :  { %v6968_v37 = vpop.f32.mrb[250].mxu1  ;;  %7387 = vmax.xlane.f32.xlu1 %v7386_v27  ;;  %v5904_v56 = vmul.f32 %v17235_v20, %v18825_v49 }
 0xc8e   :  { %18880 = vst [vmem:[#allocation7_spill] sm:$0xff] %v17259_v43  ;;  %v7198_v45 = vadd.f32 %v6844_v33, %v18881_v6  ;;  %v6969_v18 = vadd.f32 %v6968_v37, %v5903_v34  ;;  %v13055_v55 = vpop.f32.mrb[251].mxu1  ;;  %v17267_v35 = vadd.f32 %v17032_v62, %v7191_v54  ;;  %v7389_v17 = vsel %vm2225_vm7, %v17259_v43, -inf }
 0xc8f   :  { %7369 = vmax.xlane.f32.xlu0 %v7368_v13  ;;  %v7123_v28 = vpop.f32.mrb[250].mxu0  ;;  %v5911_v54 = vmul.f32 %v17245_v58, %v18825_v49  ;;  %v18883_v13 = vld [vmem:[#allocation84_spill] sm:$0xff] }
 0xc90   :  { %v7199_v27 = vadd.f32 %v6969_v18, %v18882_v9  ;;  %v7124_v52 = vadd.f32 %v7123_v28, %v5910_v41  ;;  %v13078_v33 = vpop.f32.mrb[251].mxu0  ;;  %v17275_v34 = vadd.f32 %v17032_v62, %v7198_v45  ;;  %v7371_v36 = vsel %vm2225_vm7, %v17267_v35, -inf  ;;  %v18884_v9 = vld [vmem:[#allocation67_spill] sm:$0xff] }
 0xc91   :  { %v6973_v37 = vpop.f32.mrb[252].mxu1  ;;  %7390 = vmax.xlane.f32.xlu1 %v7389_v17  ;;  %v5905_v45 = vmul.f32 %v17235_v20, %v18827_v26 }
 0xc92   :  { %v7206_v6 = vadd.f32 %v7124_v52, %v18883_v13  ;;  %v6974_v55 = vadd.f32 %v6973_v37, %v5904_v56  ;;  %v13058_v18 = vpop.f32.mrb[253].mxu1  ;;  %v17283_v41 = vadd.f32 %v16904_v47, %v7199_v27  ;;  %v7392_v49 = vsel %vm2225_vm7, %v17275_v34, -inf }
 0xc93   :  { %7372 = vmax.xlane.f32.xlu0 %v7371_v36  ;;  %v7128_v28 = vpop.f32.mrb[252].mxu0  ;;  %v5912_v27 = vmul.f32 %v17245_v58, %v18827_v26  ;;  %v18885_v36 = vld [vmem:[#allocation85_spill] sm:$0xff] }
 0xc94   :  { %v7200_v17 = vadd.f32 %v6974_v55, %v18884_v9  ;;  %v7129_v33 = vadd.f32 %v7128_v28, %v5911_v54  ;;  %v13081_v52 = vpop.f32.mrb[253].mxu0  ;;  %v17291_v56 = vadd.f32 %v16904_v47, %v7206_v6  ;;  %v7395_v43 = vsel %vm2225_vm7, %v17283_v41, -inf }
 0xc95   :  { %v6978_v37 = vpop.f32.mrb[254].mxu1  ;;  %7393 = vmax.xlane.f32.xlu1 %v7392_v49  ;;  %v5906_v47 = vmul.f32 %v17235_v20, %v18831_v31 }
 0xc96   :  { %v7207_v13 = vadd.f32 %v7129_v33, %v18885_v36  ;;  %v6979_v18 = vadd.f32 %v6978_v37, %v5905_v45  ;;  %v13061_v55 = vpop.f32.mrb[255].mxu1  ;;  %v17299_v54 = vadd.f32 %v16925_v46, %v7200_v17  ;;  %v7416_v6 = vsel %vm2225_vm7, %v17291_v56, -inf  ;;  %v18886_v33 = vld [vmem:[#allocation70_spill] sm:$0xff] }
 0xc97   :  { %7396 = vmax.xlane.f32.xlu0 %v7395_v43  ;;  %v7133_v28 = vpop.f32.mrb[254].mxu0  ;;  %v5913_v45 = vmul.f32 %v17245_v58, %v18831_v31  ;;  %v5914_v31 = vmul.f32 %v17245_v58, %v18834_v15 }
 0xc98   :  { %v7134_v9 = vadd.f32 %v7133_v28, %v5912_v27  ;;  %v13084_v26 = vpop.f32.mrb[255].mxu0  ;;  %v7201_v52 = vadd.f32 %v6979_v18, %v18886_v33  ;;  %v7398_v43 = vsel %vm2225_vm7, %v17299_v54, -inf  ;;  %v17311_v27 = vadd.f32 %v16925_v46, %v7207_v13  ;;  %v18887_v18 = vld [vmem:[#allocation86_spill] sm:$0xff] }
 0xc99   :  { %v6983_v49 = vpop.f32.mrb[0].mxu1  ;;  %7417 = vmax.xlane.f32.xlu1 %v7416_v6  ;;  %v5907_v28 = vmul.f32 %v17235_v20, %v18834_v15  ;;  %v5915_v15 = vmul.f32 %v17245_v58, %v18837_v29 }
 0xc9a   :  { %v6984_v37 = vadd.f32 %v6983_v49, %v5906_v47  ;;  %v13064_v17 = vpop.f32.mrb[1].mxu1  ;;  %v7208_v47 = vadd.f32 %v7134_v9, %v18887_v18  ;;  %v7419_v33 = vsel %vm2225_vm7, %v17311_v27, -inf  ;;  %v17321_v46 = vadd.f32 %v16946_v30, %v7201_v52  ;;  %v18888_v9 = vld [vmem:[#allocation75_spill] sm:$0xff] }
 0xc9b   :  { %7399 = vmax.xlane.f32.xlu0 %v7398_v43  ;;  %v7138_v36 = vpop.f32.mrb[0].mxu0  ;;  %v5908_v43 = vmul.f32 %v17235_v20, %v18837_v29 }
 0xc9c   :  { %v7139_v55 = vadd.f32 %v7138_v36, %v5913_v45  ;;  %v13087_v6 = vpop.f32.mrb[1].mxu0  ;;  %v7401_v52 = vsel %vm2225_vm7, %v17321_v46, -inf }
 0xc9d   :  { %v6988_v26 = vpop.f32.mrb[2].mxu1 }
 0xc9e   :  { %v6989_v49 = vadd.f32 %v6988_v26, %v5907_v28  ;;  %v13067_v17 = vpop.f32.mrb[3].mxu1  ;;  %v7202_v28 = vadd.f32 %v6984_v37, %v18888_v9  ;;  %v5916_v37 = vmul.f32 %v17245_v58, %v18839_v7 }
 0xc9f   :  { %7420 = vmax.xlane.f32.xlu0 %v7419_v33  ;;  %v7143_v13 = vpop.f32.mrb[2].mxu0  ;;  %v17335_v33 = vadd.f32 %v16946_v30, %v7208_v47 }
 0xca0   :  { %v17323_v45 = vadd.f32 %v7143_v13, %v5914_v31  ;;  %v13090_v36 = vpop.f32.mrb[3].mxu0  ;;  %v5909_v13 = vmul.f32 %v17235_v20, %v18839_v7  ;;  %v17349_v47 = vadd.f32 %v16965_v25, %v7202_v28 }
 0xca1   :  { %v6993_v6 = vpop.f32.mrb[4].mxu1  ;;  %v7422_v30 = vsel %vm2225_vm7, %v17335_v33, -inf }
 0xca2   :  { %v17330_v26 = vadd.f32 %v6993_v6, %v5908_v43  ;;  %v13070_v18 = vpop.f32.mrb[5].mxu1  ;;  %v18889_v43 = vld [vmem:[#allocation87_spill] sm:$0xff] }
 0xca3   :  { %7402 = vmax.xlane.f32.xlu0 %v7401_v52  ;;  %v7148_v31 = vpop.f32.mrb[4].mxu0  ;;  %v7209_v6 = vadd.f32 %v7139_v55, %v18889_v43 }
 0xca4   :  { %v17337_v17 = vadd.f32 %v7148_v31, %v5915_v15  ;;  %v13093_v36 = vpop.f32.mrb[5].mxu0  ;;  %v7404_v31 = vsel %vm2225_vm7, %v17349_v47, -inf }
 0xca5   :  { %v6998_v29 = vpop.f32.mrb[6].mxu1  ;;  %v17356_v7 = vadd.f32 %v16965_v25, %v7209_v6 }
 0xca6   :  { %v17344_v9 = vadd.f32 %v6998_v29, %v5909_v13  ;;  %v13073_v15 = vpop.f32.mrb[7].mxu1 }
 0xca7   :  { %7423 = vmax.xlane.f32.xlu0 %v7422_v30  ;;  %v7153_v52 = vpop.f32.mrb[6].mxu0  ;;  %v7425_v58 = vsel %vm2225_vm7, %v17356_v7, -inf }
 0xca8   :  { %v17351_v18 = vadd.f32 %v7153_v52, %v5916_v37  ;;  %v13096_v20 = vpop.f32.mrb[7].mxu0 }
 0xcab   :  { %7405 = vmax.xlane.f32.xlu0 %v7404_v31 }
 0xcaf   :  { %7426 = vmax.xlane.f32.xlu0 %v7425_v58 }
 0xcce   :  { %v7271_v55 = vpop.xlane.xlu1 %7270 }
 0xccf   :  { %v7437_v28 = vsub.f32 %v16907_v32, %v7271_v55  ;;  %v18890_v32 = vld [vmem:[#allocation78_spill] sm:$0xff] }
 0xcd0   :  { %v7292_v13 = vpop.xlane.xlu0 %7291  ;;  %v7203_v58 = vadd.f32 %v6989_v49, %v18890_v32 }
 0xcd1   :  { %v7493_v36 = vmul.f32 1.442695, %v7437_v28  ;;  %v7444_v29 = vsub.f32 %v16915_v10, %v7292_v13 }
 0xcd3   :  { %14109 = vpow2.f32 %v7493_v36  ;;  %v7507_v37 = vmul.f32 1.442695, %v7444_v29 }
 0xcd4   :  { %v7274_v43 = vpop.xlane.xlu0 %7273  ;;  %v7295_v30 = vpop.xlane.xlu1 %7294 }
 0xcd5   :  { %14111 = vpow2.f32 %v7507_v37  ;;  %v7438_v25 = vsub.f32 %v16928_v14, %v7274_v43  ;;  %v7445_v6 = vsub.f32 %v16934_v50, %v7295_v30  ;;  %v17373_v37 = vadd.f32 %v16983_v57, %v7203_v58 }
 0xcd7   :  { %v7495_v15 = vmul.f32 1.442695, %v7438_v25  ;;  %v7509_v52 = vmul.f32 1.442695, %v7445_v6  ;;  %v7407_v6 = vsel %vm2225_vm7, %v17373_v37, -inf }
 0xcd8   :  { %v7277_v20 = vpop.xlane.xlu0 %7276 }
 0xcd9   :  { %14113 = vpow2.f32 %v7495_v15  ;;  %v7439_v31 = vsub.f32 %v16949_v16, %v7277_v20 }
 0xcda   :  { %v7280_v55 = vpop.xlane.xlu1 %7279  ;;  %14115 = vpow2.f32 %v7509_v52 }
 0xcdb   :  { %v7497_v10 = vmul.f32 1.442695, %v7439_v31  ;;  %v7440_v28 = vsub.f32 %v16968_v11, %v7280_v55  ;;  %v18891_v31 = vld [vmem:[#allocation88_spill] sm:$0xff] }
 0xcdc   :  { %v7298_v13 = vpop.xlane.xlu0 %7297  ;;  %v7210_v32 = vadd.f32 %v17323_v45, %v18891_v31 }
 0xcdd   :  { %v17367_v36 = vpop.eup %14109  ;;  %14117 = vpow2.f32 %v7497_v10  ;;  %v7446_v14 = vsub.f32 %v16957_v1, %v7298_v13  ;;  %v7499_v49 = vmul.f32 1.442695, %v7440_v28 }
 0xcde   :  { %v7283_v50 = vpop.xlane.xlu1 %7282  ;;  %v7605_v29 = vsel %vm2225_vm7, %v17367_v36, 0.0 }
 0xcdf   :  { %v17375_v16 = vpop.eup %14111  ;;  %v7511_v43 = vmul.f32 1.442695, %v7446_v14  ;;  %7606 = vadd.xlane.f32.xlu0 %v7605_v29  ;;  %v7441_v52 = vsub.f32 %v16986_v5, %v7283_v50  ;;  %v18892_v5 = vld [vmem:[#allocation81_spill] sm:$0xff] }
 0xce0   :  { %v7301_v30 = vpop.xlane.xlu0 %7300  ;;  %v7626_v11 = vsel %vm2225_vm7, %v17375_v16, 0.0  ;;  %v7204_v50 = vadd.f32 %v17330_v26, %v18892_v5  ;;  %v18893_v26 = vld [vmem:[#allocation89_spill] sm:$0xff] }
 0xce1   :  { %14119 = vpow2.f32 %v7511_v43  ;;  %v7447_v25 = vsub.f32 %v16989_v44, %v7301_v30  ;;  %7627 = vadd.xlane.f32.xlu1 %v7626_v11  ;;  %v7501_v13 = vmul.f32 1.442695, %v7441_v52  ;;  %v17401_v43 = vadd.f32 %v16983_v57, %v7210_v32 }
 0xce2   :  { %v7304_v1 = vpop.xlane.xlu1 %7303  ;;  %14121 = vpow2.f32 %v7499_v49 }
 0xce3   :  { %v17382_v15 = vpop.eup %14113  ;;  %v7513_v20 = vmul.f32 1.442695, %v7447_v25  ;;  %7408 = vmax.xlane.f32.xlu0 %v7407_v6  ;;  %v7448_v14 = vsub.f32 %v16999_v40, %v7304_v1  ;;  %v7211_v1 = vadd.f32 %v17337_v17, %v18893_v26  ;;  %v7428_v57 = vsel %vm2225_vm7, %v17401_v43, -inf }
 0xce4   :  { %v7286_v58 = vpop.xlane.xlu0 %7285  ;;  %v7608_v55 = vsel %vm2225_vm7, %v17382_v15, 0.0  ;;  %v17389_v44 = vpop.eup %14115 }
 0xce5   :  { %7609 = vadd.xlane.f32.xlu1 %v7608_v55  ;;  %14123 = vpow2.f32 %v7513_v20  ;;  %v7629_v45 = vsel %vm2225_vm7, %v17389_v44, 0.0  ;;  %v7515_v40 = vmul.f32 1.442695, %v7448_v14  ;;  %v7442_v25 = vsub.f32 %v17014_v0, %v7286_v58  ;;  %v18894_v58 = vld [vmem:[#allocation83_spill] sm:$0xff] }
 0xce6   :  { %v7307_v10 = vpop.xlane.xlu1 %7306  ;;  %14125 = vpow2.f32 %v7501_v13  ;;  %v17415_v20 = vadd.f32 %v17011_v59, %v7204_v50  ;;  %v7205_v55 = vadd.f32 %v17344_v9, %v18894_v58  ;;  %v17429_v50 = vadd.f32 %v17011_v59, %v7211_v1 }
 0xce7   :  { %v17391_v28 = vpop.eup %14117  ;;  %14127 = vpow2.f32 %v7515_v40  ;;  %v7503_v0 = vmul.f32 1.442695, %v7442_v25  ;;  %v7449_v17 = vsub.f32 %v17022_v21, %v7307_v10  ;;  %v18895_v25 = vld [vmem:[#allocation90_spill] sm:$0xff] }
 0xce8   :  { %v7289_v29 = vpop.xlane.xlu0 %7288  ;;  %v7611_v49 = vsel %vm2225_vm7, %v17391_v28, 0.0  ;;  %v7410_v5 = vsel %vm2225_vm7, %v17415_v20, -inf  ;;  %v7212_v26 = vadd.f32 %v17351_v18, %v18895_v25  ;;  %v7431_v1 = vsel %vm2225_vm7, %v17429_v50, -inf }
 0xce9   :  { %7630 = vadd.xlane.f32.xlu1 %v7629_v45  ;;  %7612 = vadd.xlane.f32.xlu0 %v7611_v49  ;;  %14129 = vpow2.f32 %v7503_v0  ;;  %v7517_v9 = vmul.f32 1.442695, %v7449_v17  ;;  %v7443_v10 = vsub.f32 %v17035_v24, %v7289_v29 }
 0xcea   :  { %v7310_v30 = vpop.xlane.xlu1 %7309 }
 0xceb   :  { %v17403_v11 = vpop.eup %14119  ;;  %v7505_v18 = vmul.f32 1.442695, %v7443_v10  ;;  %v7450_v29 = vsub.f32 %v17043_v60, %v7310_v30 }
 0xcec   :  { %v17408_v6 = vpop.xlane.xlu0 %7312  ;;  %v7632_v52 = vsel %vm2225_vm7, %v17403_v11, 0.0  ;;  %v17417_v31 = vpop.eup %14121 }
 0xced   :  { %7633 = vadd.xlane.f32.xlu1 %v7632_v52  ;;  %7429 = vmax.xlane.f32.xlu0 %v7428_v57  ;;  %v7614_v14 = vsel %vm2225_vm7, %v17417_v31, 0.0  ;;  %v7519_v60 = vmul.f32 1.442695, %v7450_v29  ;;  %v7451_v30 = vsub.f32 %v17051_v38, %v17408_v6 }
 0xcee   :  { %v17419_v32 = vpop.xlane.xlu1 %7333 }
 0xcef   :  { %v17431_v45 = vpop.eup %14123  ;;  %v7521_v38 = vmul.f32 1.442695, %v7451_v30  ;;  %v7458_v6 = vsub.f32 %v17059_v4, %v17419_v32 }
 0xcf0   :  { %v7316_v13 = vpop.xlane.xlu0 %7315  ;;  %v7635_v59 = vsel %vm2225_vm7, %v17431_v45, 0.0  ;;  %v17446_v57 = vpop.eup %14125 }
 0xcf1   :  { %v7452_v49 = vsub.f32 %v17067_v23, %v7316_v13  ;;  %7615 = vadd.xlane.f32.xlu1 %v7614_v14  ;;  %7411 = vmax.xlane.f32.xlu0 %v7410_v5  ;;  %v17444_v23 = vadd.f32 %v17032_v62, %v7205_v55  ;;  %v7617_v13 = vsel %vm2225_vm7, %v17446_v57, 0.0  ;;  %v17457_v14 = vadd.f32 %v17032_v62, %v7212_v26 }
 0xcf2   :  { %v17434_v21 = vpop.xlane.xlu1 %7336  ;;  %v7535_v4 = vmul.f32 1.442695, %v7458_v6 }
 0xcf3   :  { %v7523_v40 = vmul.f32 1.442695, %v7452_v49  ;;  %v7413_v55 = vsel %vm2225_vm7, %v17444_v23, -inf  ;;  %v7459_v32 = vsub.f32 %v17075_v48, %v17434_v21 }
 0xcf4   :  { %v7319_v52 = vpop.xlane.xlu0 %7318 }
 0xcf5   :  { %14131 = vpow2.f32 %v7523_v40  ;;  %v7453_v0 = vsub.f32 %v17083_v19, %v7319_v52  ;;  %7636 = vadd.xlane.f32.xlu1 %v7635_v59  ;;  %7432 = vmax.xlane.f32.xlu0 %v7431_v1  ;;  %v17459_v19 = vpop.eup %14127  ;;  %v7434_v40 = vsel %vm2225_vm7, %v17457_v14, -inf  ;;  %v7537_v48 = vmul.f32 1.442695, %v7459_v32 }
 0xcf6   :  { %v17449_v24 = vpop.xlane.xlu1 %7339  ;;  %14133 = vpow2.f32 %v7517_v9  ;;  %v7638_v62 = vsel %vm2225_vm7, %v17459_v19, 0.0  ;;  %v17470_v25 = vpop.eup %14129 }
 0xcf7   :  { %v7525_v17 = vmul.f32 1.442695, %v7453_v0  ;;  %v7620_v0 = vsel %vm2225_vm7, %v17470_v25, 0.0  ;;  %v7460_v21 = vsub.f32 %v17091_v53, %v17449_v24 }
 0xcf8   :  { %v7322_v58 = vpop.xlane.xlu0 %7321 }
 0xcf9   :  { %14135 = vpow2.f32 %v7525_v17  ;;  %v7454_v5 = vsub.f32 %v17099_v39, %v7322_v58  ;;  %7618 = vadd.xlane.f32.xlu1 %v7617_v13  ;;  %7414 = vmax.xlane.f32.xlu0 %v7413_v55  ;;  %v7539_v53 = vmul.f32 1.442695, %v7460_v21 }
 0xcfa   :  { %v17462_v49 = vpop.xlane.xlu1 %7342  ;;  %14137 = vpow2.f32 %v7505_v18 }
 0xcfb   :  { %v7527_v9 = vmul.f32 1.442695, %v7454_v5  ;;  %v7461_v24 = vsub.f32 %v17107_v63, %v17462_v49 }
 0xcfc   :  { %v7325_v10 = vpop.xlane.xlu0 %7324 }
 0xcfd   :  { %14139 = vpow2.f32 %v7527_v9  ;;  %v7455_v39 = vsub.f32 %v17115_v42, %v7325_v10  ;;  %7639 = vadd.xlane.f32.xlu1 %v7638_v62  ;;  %7435 = vmax.xlane.f32.xlu0 %v7434_v40 }
 0xcfe   :  { %v17473_v26 = vpop.xlane.xlu1 %7345  ;;  %14141 = vpow2.f32 %v7519_v60 }
 0xcff   :  { %v17475_v52 = vpop.eup %14131  ;;  %v7529_v59 = vmul.f32 1.442695, %v7455_v39  ;;  %v7462_v63 = vsub.f32 %v17125_v12, %v17473_v26  ;;  %v18896_v26 = vld [vmem:[#allocation23_spill] sm:$0xff] }
 0xd00   :  { %v7328_v1 = vpop.xlane.xlu0 %7327  ;;  %v7650_v18 = vsel %vm2225_vm7, %v17475_v52, 0.0  ;;  %v17483_v42 = vpop.eup %14133 }
 0xd01   :  { %14143 = vpow2.f32 %v7529_v59  ;;  %v7456_v29 = vsub.f32 %v17135_v8, %v7328_v1  ;;  %7621 = vadd.xlane.f32.xlu1 %v7620_v0  ;;  %7651 = vadd.xlane.f32.xlu0 %v7650_v18  ;;  %v7641_v5 = vsel %vm2225_vm7, %v17483_v42, 0.0  ;;  %v7543_v12 = vmul.f32 1.442695, %v7462_v63 }
 0xd02   :  { %v17486_v17 = vpop.xlane.xlu1 %7348  ;;  %14145 = vpow2.f32 %v7521_v38 }
 0xd03   :  { %v17488_v58 = vpop.eup %14135  ;;  %v7531_v13 = vmul.f32 1.442695, %v7456_v29 }
 0xd04   :  { %v7331_v55 = vpop.xlane.xlu0 %7330  ;;  %v7653_v60 = vsel %vm2225_vm7, %v17488_v58, 0.0  ;;  %v17496_v8 = vpop.eup %14137 }
 0xd05   :  { %14147 = vpow2.f32 %v7531_v13  ;;  %v7457_v30 = vsub.f32 %v17151_v51, %v7331_v55  ;;  %7642 = vadd.xlane.f32.xlu1 %v7641_v5  ;;  %7654 = vadd.xlane.f32.xlu0 %v7653_v60  ;;  %v7623_v39 = vsel %vm2225_vm7, %v17496_v8, 0.0  ;;  %v7541_v55 = vmul.f32 1.442695, %v7461_v24 }
 0xd06   :  { %v17499_v9 = vpop.xlane.xlu1 %7351  ;;  %14149 = vpow2.f32 %v7535_v4 }
 0xd07   :  { %v17501_v10 = vpop.eup %14139  ;;  %v7533_v62 = vmul.f32 1.442695, %v7457_v30 }
 0xd08   :  { %v7355_v40 = vpop.xlane.xlu0 %7354  ;;  %v7656_v38 = vsel %vm2225_vm7, %v17501_v10, 0.0  ;;  %v17509_v51 = vpop.eup %14141 }
 0xd09   :  { %14151 = vpow2.f32 %v7533_v62  ;;  %v7465_v6 = vsub.f32 %v17167_v61, %v7355_v40  ;;  %7624 = vadd.xlane.f32.xlu1 %v7623_v39  ;;  %7657 = vadd.xlane.f32.xlu0 %v7656_v38  ;;  %v7644_v29 = vsel %vm2225_vm7, %v17509_v51, 0.0  ;;  %v7463_v40 = vsub.f32 %v18896_v26, %v17486_v17 }
 0xd0a   :  { %v17512_v59 = vpop.xlane.xlu1 %7375  ;;  %14153 = vpow2.f32 %v7537_v48 }
 0xd0b   :  { %v17514_v1 = vpop.eup %14143  ;;  %v7549_v0 = vmul.f32 1.442695, %v7465_v6  ;;  %v7545_v17 = vmul.f32 1.442695, %v7463_v40 }
 0xd0c   :  { %v7358_v18 = vpop.xlane.xlu0 %7357  ;;  %v7659_v4 = vsel %vm2225_vm7, %v17514_v1, 0.0  ;;  %v17522_v61 = vpop.eup %14145 }
 0xd0d   :  { %14155 = vpow2.f32 %v7549_v0  ;;  %v7466_v32 = vsub.f32 %v17183_v2, %v7358_v18  ;;  %7645 = vadd.xlane.f32.xlu1 %v7644_v29  ;;  %7660 = vadd.xlane.f32.xlu0 %v7659_v4  ;;  %v7647_v30 = vsel %vm2225_vm7, %v17522_v61, 0.0  ;;  %v18898_v4 = vld [vmem:[#allocation61_spill] sm:$0xff] }
 0xd0e   :  { %14157 = vpow2.f32 %v7539_v53  ;;  %v17529_v5 = vpop.xlane.xlu1 %7378 }
 0xd0f   :  { %v17525_v13 = vpop.eup %14147  ;;  %v7551_v49 = vmul.f32 1.442695, %v7466_v32  ;;  %v7464_v32 = vsub.f32 %v18898_v4, %v17499_v9  ;;  %v18900_v9 = vld [vmem:[#allocation8_spill] sm:$0xff] }
 0xd10   :  { %v7361_v60 = vpop.xlane.xlu0 %7360  ;;  %v7662_v48 = vsel %vm2225_vm7, %v17525_v13, 0.0  ;;  %v17535_v2 = vpop.eup %14149  ;;  %v7472_v40 = vsub.f32 %v18900_v9, %v17512_v59 }
 0xd11   :  { %14159 = vpow2.f32 %v7551_v49  ;;  %v7467_v21 = vsub.f32 %v17199_v22, %v7361_v60  ;;  %7648 = vadd.xlane.f32.xlu1 %v7647_v30  ;;  %7663 = vadd.xlane.f32.xlu0 %v7662_v48  ;;  %v7668_v6 = vsel %vm2225_vm7, %v17535_v2, 0.0  ;;  %v18897_v22 = vld [vmem:[#allocation11_spill] sm:$0xff]  ;;  %v18899_v48 = vld [vmem:[#allocation13_spill] sm:$0xff]  ;;  %v7547_v26 = vmul.f32 1.442695, %v7464_v32 }
 0xd12   :  { %14161 = vpow2.f32 %v7541_v55  ;;  %v7382_v18 = vpop.xlane.xlu1 %7381  ;;  %v7563_v59 = vmul.f32 1.442695, %v7472_v40  ;;  %v18901_v32 = vld [vmem:[#allocation9_spill] sm:$0xff]  ;;  %v18902_v40 = vld [vmem:[#allocation10_spill] sm:$0xff] }
 0xd13   :  { %v17538_v62 = vpop.eup %14151  ;;  %v7553_v39 = vmul.f32 1.442695, %v7467_v21 }
 0xd14   :  { %v7364_v38 = vpop.xlane.xlu0 %7363  ;;  %v7665_v53 = vsel %vm2225_vm7, %v17538_v62, 0.0  ;;  %v17546_v24 = vpop.eup %14153 }
 0xd15   :  { %14163 = vpow2.f32 %v7553_v39  ;;  %v7468_v0 = vsub.f32 %v18897_v22, %v7364_v38  ;;  %7669 = vadd.xlane.f32.xlu1 %v7668_v6  ;;  %7666 = vadd.xlane.f32.xlu0 %v7665_v53  ;;  %v7671_v49 = vsel %vm2225_vm7, %v17546_v24, 0.0 }
 0xd16   :  { %14165 = vpow2.f32 %v7543_v12  ;;  %v7385_v38 = vpop.xlane.xlu1 %7384 }
 0xd17   :  { %v17549_v29 = vpop.eup %14155  ;;  %v7555_v55 = vmul.f32 1.442695, %v7468_v0 }
 0xd18   :  { %v7367_v63 = vpop.xlane.xlu0 %7366  ;;  %v7689_v60 = vsel %vm2225_vm7, %v17549_v29, 0.0  ;;  %v17557_v30 = vpop.eup %14157 }
 0xd19   :  { %14167 = vpow2.f32 %v7555_v55  ;;  %v7469_v21 = vsub.f32 %v18899_v48, %v7367_v63  ;;  %7672 = vadd.xlane.f32.xlu1 %v7671_v49  ;;  %7690 = vadd.xlane.f32.xlu0 %v7689_v60  ;;  %v7674_v53 = vsel %vm2225_vm7, %v17557_v30, 0.0  ;;  %v7473_v55 = vsub.f32 %v18901_v32, %v17529_v5 }
 0xd1a   :  { %14169 = vpow2.f32 %v7545_v17 }
 0xd1b   :  { %v17560_v12 = vpop.eup %14159  ;;  %v7557_v39 = vmul.f32 1.442695, %v7469_v21  ;;  %v7565_v5 = vmul.f32 1.442695, %v7473_v55 }
 0xd1c   :  { %v7370_v6 = vpop.xlane.xlu0 %7369  ;;  %v7692_v22 = vsel %vm2225_vm7, %v17560_v12, 0.0  ;;  %v17568_v0 = vpop.eup %14161 }
 0xd1d   :  { %14171 = vpow2.f32 %v7557_v39  ;;  %v7470_v4 = vsub.f32 %v17251_v3, %v7370_v6  ;;  %7675 = vadd.xlane.f32.xlu1 %v7674_v53  ;;  %7693 = vadd.xlane.f32.xlu0 %v7692_v22  ;;  %v7677_v60 = vsel %vm2225_vm7, %v17568_v0, 0.0  ;;  %v7474_v39 = vsub.f32 %v18902_v40, %v7382_v18  ;;  %v18904_v18 = vld [vmem:[#allocation12_spill] sm:$0xff] }
 0xd1e   :  { %14173 = vpow2.f32 %v7547_v26  ;;  %v7388_v26 = vpop.xlane.xlu1 %7387  ;;  %v7475_v55 = vsub.f32 %v18904_v18, %v7385_v38 }
 0xd1f   :  { %v17571_v17 = vpop.eup %14163  ;;  %v7559_v63 = vmul.f32 1.442695, %v7470_v4 }
 0xd20   :  { %v7373_v49 = vpop.xlane.xlu0 %7372  ;;  %v7695_v48 = vsel %vm2225_vm7, %v17571_v17, 0.0  ;;  %v17579_v21 = vpop.eup %14165  ;;  %v7569_v38 = vmul.f32 1.442695, %v7475_v55  ;;  %v18908_v55 = vld [vmem:[#allocation7_spill] sm:$0xff] }
 0xd21   :  { %14175 = vpow2.f32 %v7559_v63  ;;  %v7471_v3 = vsub.f32 %v17267_v35, %v7373_v49  ;;  %7678 = vadd.xlane.f32.xlu1 %v7677_v60  ;;  %7696 = vadd.xlane.f32.xlu0 %v7695_v48  ;;  %v7680_v22 = vsel %vm2225_vm7, %v17579_v21, 0.0 }
 0xd22   :  { %14177 = vpow2.f32 %v7563_v59  ;;  %v7567_v59 = vmul.f32 1.442695, %v7474_v39  ;;  %v7391_v60 = vpop.xlane.xlu1 %7390  ;;  %v18906_v39 = vld [vmem:[#allocation14_spill] sm:$0xff] }
 0xd23   :  { %v17582_v9 = vpop.eup %14167  ;;  %v7561_v6 = vmul.f32 1.442695, %v7471_v3 }
 0xd24   :  { %v7397_v53 = vpop.xlane.xlu0 %7396  ;;  %v7698_v4 = vsel %vm2225_vm7, %v17582_v9, 0.0  ;;  %v17589_v32 = vpop.eup %14169 }
 0xd25   :  { %14179 = vpow2.f32 %v7561_v6  ;;  %v7479_v35 = vsub.f32 %v17283_v41, %v7397_v53  ;;  %7681 = vadd.xlane.f32.xlu1 %v7680_v22  ;;  %7699 = vadd.xlane.f32.xlu0 %v7698_v4  ;;  %v7683_v3 = vsel %vm2225_vm7, %v17589_v32, 0.0  ;;  %v7476_v53 = vsub.f32 %v18906_v39, %v7388_v26 }
 0xd26   :  { %14181 = vpow2.f32 %v7565_v5  ;;  %v7477_v26 = vsub.f32 %v18908_v55, %v7391_v60 }
 0xd27   :  { %v17592_v63 = vpop.eup %14171  ;;  %v7577_v49 = vmul.f32 1.442695, %v7479_v35 }
 0xd28   :  { %18903 = vst [vmem:[#allocation15_spill] sm:$0xff] %v17592_v63  ;;  %v7400_v48 = vpop.xlane.xlu0 %7399  ;;  %v7701_v40 = vsel %vm2225_vm7, %v17592_v63, 0.0  ;;  %v17599_v6 = vpop.eup %14173 }
 0xd29   :  { %14183 = vpow2.f32 %v7577_v49  ;;  %v7480_v41 = vsub.f32 %v17299_v54, %v7400_v48  ;;  %7684 = vadd.xlane.f32.xlu1 %v7683_v3  ;;  %7702 = vadd.xlane.f32.xlu0 %v7701_v40  ;;  %v7686_v35 = vsel %vm2225_vm7, %v17599_v6, 0.0  ;;  %v7394_v54 = vpop.xlane.xlu1 %7393 }
 0xd2a   :  { %14185 = vpow2.f32 %v7567_v59  ;;  %v7571_v59 = vmul.f32 1.442695, %v7476_v53  ;;  %v7478_v53 = vsub.f32 %v17275_v34, %v7394_v54 }
 0xd2b   :  { %v17602_v5 = vpop.eup %14175  ;;  %v7579_v22 = vmul.f32 1.442695, %v7480_v41 }
 0xd2c   :  { %18905 = vst [vmem:[#allocation25_spill] sm:$0xff] %v17602_v5  ;;  %v7421_v4 = vpop.xlane.xlu0 %7420  ;;  %v7704_v18 = vsel %vm2225_vm7, %v17602_v5, 0.0  ;;  %v17609_v63 = vpop.eup %14177 }
 0xd2d   :  { %14187 = vpow2.f32 %v7579_v22  ;;  %7687 = vadd.xlane.f32.xlu1 %v7686_v35  ;;  %7705 = vadd.xlane.f32.xlu0 %v7704_v18  ;;  %v7710_v3 = vsel %vm2225_vm7, %v17609_v63, 0.0  ;;  %v7418_v35 = vpop.xlane.xlu1 %7417 }
 0xd2e   :  { %14189 = vpow2.f32 %v7569_v38  ;;  %v7573_v38 = vmul.f32 1.442695, %v7477_v26  ;;  %v7486_v34 = vsub.f32 %v17291_v56, %v7418_v35 }
 0xd2f   :  { %v17611_v49 = vpop.eup %14179  ;;  %14191 = vpow2.f32 %v7571_v59  ;;  %v7575_v59 = vmul.f32 1.442695, %v7478_v53 }
 0xd30   :  { %18907 = vst [vmem:[#allocation16_spill] sm:$0xff] %v17611_v49  ;;  %v7403_v48 = vpop.xlane.xlu0 %7402  ;;  %v7707_v40 = vsel %vm2225_vm7, %v17611_v49, 0.0  ;;  %v17618_v41 = vpop.eup %14181 }
 0xd31   :  { %v7481_v39 = vsub.f32 %v17321_v46, %v7403_v48  ;;  %7711 = vadd.xlane.f32.xlu1 %v7710_v3  ;;  %7708 = vadd.xlane.f32.xlu0 %v7707_v40  ;;  %v7713_v55 = vsel %vm2225_vm7, %v17618_v41, 0.0 }
 0xd33   :  { %v17621_v22 = vpop.eup %14183  ;;  %v7581_v60 = vmul.f32 1.442695, %v7481_v39  ;;  %v7487_v39 = vsub.f32 %v17311_v27, %v7421_v4 }
 0xd34   :  { %v7424_v18 = vpop.xlane.xlu0 %7423  ;;  %v7731_v49 = vsel %vm2225_vm7, %v17621_v22, 0.0  ;;  %v17628_v5 = vpop.eup %14185 }
 0xd35   :  { %14193 = vpow2.f32 %v7581_v60  ;;  %7714 = vadd.xlane.f32.xlu1 %v7713_v55  ;;  %7732 = vadd.xlane.f32.xlu0 %v7731_v49  ;;  %v7716_v26 = vsel %vm2225_vm7, %v17628_v5, 0.0  ;;  %v7591_v49 = vmul.f32 1.442695, %v7486_v34  ;;  %v7593_v35 = vmul.f32 1.442695, %v7487_v39 }
 0xd36   :  { %14195 = vpow2.f32 %v7573_v38 }
 0xd37   :  { %v17630_v46 = vpop.eup %14187  ;;  %14197 = vpow2.f32 %v7575_v59 }
 0xd38   :  { %v7406_v54 = vpop.xlane.xlu0 %7405  ;;  %v7734_v48 = vsel %vm2225_vm7, %v17630_v46, 0.0  ;;  %v17637_v3 = vpop.eup %14189 }
 0xd39   :  { %v7482_v40 = vsub.f32 %v17349_v47, %v7406_v54  ;;  %7717 = vadd.xlane.f32.xlu1 %v7716_v26  ;;  %7735 = vadd.xlane.f32.xlu0 %v7734_v48  ;;  %v7719_v56 = vsel %vm2225_vm7, %v17637_v3, 0.0  ;;  %v17643_v53 = vpop.eup %14191  ;;  %v7488_v47 = vsub.f32 %v17335_v33, %v7424_v18 }
 0xd3a   :  { %v7722_v59 = vsel %vm2225_vm7, %v17643_v53, 0.0 }
 0xd3b   :  { %v7583_v38 = vmul.f32 1.442695, %v7482_v40  ;;  %v7595_v34 = vmul.f32 1.442695, %v7488_v47 }
 0xd3c   :  { %v7427_v55 = vpop.xlane.xlu0 %7426 }
 0xd3d   :  { %14199 = vpow2.f32 %v7583_v38  ;;  %7720 = vadd.xlane.f32.xlu1 %v7719_v56  ;;  %v7489_v54 = vsub.f32 %v17356_v7, %v7427_v55 }
 0xd3e   :  { %14201 = vpow2.f32 %v7591_v49 }
 0xd3f   :  { %v17645_v60 = vpop.eup %14193  ;;  %14203 = vpow2.f32 %v7593_v35  ;;  %v7597_v18 = vmul.f32 1.442695, %v7489_v54 }
 0xd40   :  { %v7737_v27 = vsel %vm2225_vm7, %v17645_v60, 0.0  ;;  %v17652_v4 = vpop.eup %14195  ;;  %14205 = vpow2.f32 %v7595_v34 }
 0xd41   :  { %7723 = vadd.xlane.f32.xlu1 %v7722_v59  ;;  %7738 = vadd.xlane.f32.xlu0 %v7737_v27  ;;  %v7725_v26 = vsel %vm2225_vm7, %v17652_v4, 0.0  ;;  %v17657_v48 = vpop.eup %14197  ;;  %14207 = vpow2.f32 %v7597_v18 }
 0xd42   :  { %v7728_v40 = vsel %vm2225_vm7, %v17657_v48, 0.0 }
 0xd45   :  { %7726 = vadd.xlane.f32.xlu1 %v7725_v26 }
 0xd47   :  { %v17659_v33 = vpop.eup %14199 }
 0xd48   :  { %18909 = vst [vmem:[#allocation32_spill] sm:$0xff] %v17659_v33  ;;  %v7740_v49 = vsel %vm2225_vm7, %v17659_v33, 0.0  ;;  %v17665_v39 = vpop.eup %14201 }
 0xd49   :  { %7729 = vadd.xlane.f32.xlu1 %v7728_v40  ;;  %7741 = vadd.xlane.f32.xlu0 %v7740_v49  ;;  %v7752_v7 = vsel %vm2225_vm7, %v17665_v39, 0.0  ;;  %v17669_v38 = vpop.eup %14203  ;;  %v13863_v40 = vld [vmem:[%s18561_s4 + $0xa8] sm:$0xff]  }
 0xd4a   :  { %v7755_v56 = vsel %vm2225_vm7, %v17669_v38, 0.0  ;;  %v17673_v35 = vpop.eup %14205 }
 0xd4b   :  { %18910 = vst [vmem:[#allocation17_spill] sm:$0xff] %v17673_v35  ;;  %v7758_v47 = vsel %vm2225_vm7, %v17673_v35, 0.0  ;;  %v17677_v55 = vpop.eup %14207 }
 0xd4c   :  { %18911 = vst [vmem:[#allocation26_spill] sm:$0xff] %v17677_v55  ;;  %v7761_v59 = vsel %vm2225_vm7, %v17677_v55, 0.0  ;;  %v18912_v55 = vld [vmem:[#allocation24_spill] sm:$0xff] }
 0xd4d   :  { %7753 = vadd.xlane.f32.xlu1 %v7752_v7 }
 0xd51   :  { %7756 = vadd.xlane.f32.xlu1 %v7755_v56 }
 0xd55   :  { %7759 = vadd.xlane.f32.xlu1 %v7758_v47 }
 0xd59   :  { %7762 = vadd.xlane.f32.xlu1 %v7761_v59  ;;  %v5759_v59 = vadd.f32 %v13863_v40, %v18912_v55 }
 0xd5b   :  { %v5777_v33 = vcombine.high %v5759_v59, %v5759_v59 }
 0xd6c   :  { %v7607_v27 = vpop.xlane.xlu0 %7606 }
 0xd6d   :  { %14209 = vrcp.f32 %v7607_v27 }
 0xd6e   :  { %v7628_v34 = vpop.xlane.xlu1 %7627 }
 0xd6f   :  { %14211 = vrcp.f32 %v7628_v34 }
 0xd70   :  { %v7409_v54 = vpop.xlane.xlu0 %7408 }
 0xd71   :  { %v7483_v26 = vsub.f32 %v17373_v37, %v7409_v54 }
 0xd72   :  { %v7610_v18 = vpop.xlane.xlu1 %7609 }
 0xd73   :  { %v7585_v49 = vmul.f32 1.442695, %v7483_v26  ;;  %14213 = vrcp.f32 %v7610_v18  ;;  %v18913_v18 = vmov 0.0  }
 0xd75   :  { %14215 = vpow2.f32 %v7585_v49 }
 0xd76   :  { %v7631_v7 = vpop.xlane.xlu1 %7630  ;;  %v7613_v56 = vpop.xlane.xlu0 %7612 }
 0xd77   :  { %v14210_v47 = vpop.eup %14209  ;;  %14217 = vrcp.f32 %v7631_v7 }
 0xd78   :  { %v7829_v27 = vmul.f32 %v14210_v47, %v17367_v36  ;;  %14219 = vrcp.f32 %v7613_v56 }
 0xd79   :  { %v14212_v34 = vpop.eup %14211 }
 0xd7a   :  { %v7836_v37 = vmul.f32 %v14212_v34, %v17375_v16  ;;  %v7634_v54 = vpop.xlane.xlu1 %7633  ;;  %13100 = vmatmul.mubr.msk.f32.vlgmr.msra.gmra.mrb[8].mxu1 %vm2225_vm7, %v7829_v27  ;;  %v7430_v35 = vpop.xlane.xlu0 %7429 }
 0xd7b   :  { %14221 = vrcp.f32 %v7634_v54  ;;  %13144 = vmatpush3.xpose.msk.msra.mxu1 %vm2225_vm7, %v5759_v59  ;;  %v7490_v26 = vsub.f32 %v17401_v43, %v7430_v35  ;;  %13102 = vmatprep.mubr.msk.f32.mxu1 %vm14379_vm1, %v18913_v18 }
 0xd7c   :  { %13123 = vmatmul.mubr.msk.f32.vlgmr.msra.gmra.mrb[8].mxu0 %vm2225_vm7, %v7836_v37  ;;  %13189 = vmatprep.subr.mxu1 %v18913_v18 }
 0xd7d   :  { %v14214_v36 = vpop.eup %14213  ;;  %v7599_v55 = vmul.f32 1.442695, %v7490_v26  ;;  %13167 = vmatpush3.xpose.msk.msra.mxu0 %vm2225_vm7, %v5777_v33  ;;  %13125 = vmatprep.mubr.msk.f32.mxu0 %vm14379_vm1, %v18913_v18 }
 0xd7e   :  { %v7830_v16 = vmul.f32 %v14214_v36, %v17382_v15  ;;  %v7616_v40 = vpop.xlane.xlu1 %7615  ;;  %v7412_v49 = vpop.xlane.xlu0 %7411  ;;  %13212 = vmatprep.subr.mxu0 %v18913_v18 }
 0xd7f   :  { %v17700_v43 = vpop.eup %14215  ;;  %14223 = vpow2.f32 %v7599_v55  ;;  %v7484_v35 = vsub.f32 %v17415_v20, %v7412_v49 }
 0xd80   :  { %14225 = vrcp.f32 %v7616_v40  ;;  %13103 = vmatmul.mubr.msk.f32.gmra.mrb[10].mxu1 %vm2225_vm7, %v7830_v16  ;;  %v7743_v33 = vsel %vm2225_vm7, %v17700_v43, 0.0 }
 0xd81   :  { %v14218_v7 = vpop.eup %14217  ;;  %v7587_v56 = vmul.f32 1.442695, %v7484_v35  ;;  %7744 = vadd.xlane.f32.xlu0 %v7743_v33  ;;  %13105 = vmatprep.mubr.msk.f32.mxu1 %vm14379_vm1, %v18913_v18 }
 0xd82   :  { %v14220_v15 = vpop.eup %14219  ;;  %v7837_v47 = vmul.f32 %v14218_v7, %v17389_v44  ;;  %v7637_v59 = vpop.xlane.xlu1 %7636 }
 0xd83   :  { %v7433_v27 = vpop.xlane.xlu0 %7432  ;;  %v7831_v34 = vmul.f32 %v14220_v15, %v17391_v28  ;;  %14227 = vpow2.f32 %v7587_v56 }
 0xd84   :  { %v7491_v20 = vsub.f32 %v17429_v50, %v7433_v27  ;;  %14229 = vrcp.f32 %v7637_v59  ;;  %13126 = vmatmul.mubr.msk.f32.gmra.mrb[10].mxu0 %vm2225_vm7, %v7837_v47 }
 0xd85   :  { %v14222_v37 = vpop.eup %14221  ;;  %13106 = vmatmul.mubr.msk.f32.gmra.mrb[12].mxu1 %vm2225_vm7, %v7831_v34  ;;  %13128 = vmatprep.mubr.msk.f32.mxu0 %vm14379_vm1, %v18913_v18 }
 0xd86   :  { %v7601_v54 = vmul.f32 1.442695, %v7491_v20  ;;  %v7838_v26 = vmul.f32 %v14222_v37, %v17403_v11  ;;  %v7619_v44 = vpop.xlane.xlu1 %7618  ;;  %13108 = vmatprep.mubr.msk.f32.mxu1 %vm14379_vm1, %v18913_v18 }
 0xd87   :  { %v7415_v36 = vpop.xlane.xlu0 %7414 }
 0xd88   :  { %14231 = vpow2.f32 %v7601_v54  ;;  %v7485_v28 = vsub.f32 %v17444_v23, %v7415_v36  ;;  %13129 = vmatmul.mubr.msk.f32.gmra.mrb[12].mxu0 %vm2225_vm7, %v7838_v26 }
 0xd89   :  { %14233 = vrcp.f32 %v7619_v44  ;;  %v17720_v50 = vpop.eup %14223  ;;  %13131 = vmatprep.mubr.msk.f32.mxu0 %vm14379_vm1, %v18913_v18 }
 0xd8a   :  { %v7589_v55 = vmul.f32 1.442695, %v7485_v28  ;;  %v14226_v16 = vpop.eup %14225  ;;  %v7640_v40 = vpop.xlane.xlu1 %7639  ;;  %v7764_v49 = vsel %vm2225_vm7, %v17720_v50, 0.0 }
 0xd8b   :  { %v7436_v11 = vpop.xlane.xlu0 %7435  ;;  %v7832_v35 = vmul.f32 %v14226_v16, %v17417_v31  ;;  %7765 = vadd.xlane.f32.xlu1 %v7764_v49 }
 0xd8c   :  { %14235 = vpow2.f32 %v7589_v55  ;;  %v7492_v23 = vsub.f32 %v17457_v14, %v7436_v11 }
 0xd8d   :  { %14237 = vrcp.f32 %v7640_v40  ;;  %v17728_v33 = vpop.eup %14227  ;;  %13109 = vmatmul.mubr.msk.f32.gmra.mrb[14].mxu1 %vm2225_vm7, %v7832_v35 }
 0xd8e   :  { %v7603_v7 = vmul.f32 1.442695, %v7492_v23  ;;  %v14230_v56 = vpop.eup %14229  ;;  %v7622_v15 = vpop.xlane.xlu1 %7621  ;;  %v7746_v59 = vsel %vm2225_vm7, %v17728_v33, 0.0  ;;  %13111 = vmatprep.mubr.msk.f32.mxu1 %vm14379_vm1, %v18913_v18 }
 0xd8f   :  { %v7652_v47 = vpop.xlane.xlu0 %7651  ;;  %v7839_v31 = vmul.f32 %v14230_v56, %v17431_v45  ;;  %7747 = vadd.xlane.f32.xlu0 %v7746_v59 }
 0xd90   :  { %14239 = vpow2.f32 %v7603_v7 }
 0xd91   :  { %14241 = vrcp.f32 %v7622_v15  ;;  %13132 = vmatmul.mubr.msk.f32.gmra.mrb[14].mxu0 %vm2225_vm7, %v7839_v31 }
 0xd92   :  { %v17736_v14 = vpop.eup %14231  ;;  %v7643_v34 = vpop.xlane.xlu1 %7642  ;;  %13134 = vmatprep.mubr.msk.f32.mxu0 %vm14379_vm1, %v18913_v18 }
 0xd93   :  { %v14234_v27 = vpop.eup %14233  ;;  %v7655_v20 = vpop.xlane.xlu0 %7654  ;;  %v7767_v37 = vsel %vm2225_vm7, %v17736_v14, 0.0  ;;  %14243 = vrcp.f32 %v7643_v34 }
 0xd94   :  { %v7833_v54 = vmul.f32 %v14234_v27, %v17446_v57  ;;  %7768 = vadd.xlane.f32.xlu1 %v7767_v37 }
 0xd96   :  { %v17744_v45 = vpop.eup %14235  ;;  %13112 = vmatmul.mubr.msk.f32.gmra.mrb[16].mxu1 %vm2225_vm7, %v7833_v54  ;;  %v7625_v44 = vpop.xlane.xlu1 %7624 }
 0xd97   :  { %v14238_v26 = vpop.eup %14237  ;;  %v7658_v36 = vpop.xlane.xlu0 %7657  ;;  %v7749_v28 = vsel %vm2225_vm7, %v17744_v45, 0.0  ;;  %13114 = vmatprep.mubr.msk.f32.mxu1 %vm14379_vm1, %v18913_v18  ;;  %14245 = vrcp.f32 %v7625_v44  ;;  %v18914_v44 = vld [vmem:[#allocation65_spill] sm:$0xff] }
 0xd98   :  { %v7840_v55 = vmul.f32 %v14238_v26, %v17459_v19  ;;  %7750 = vadd.xlane.f32.xlu0 %v7749_v28 }
 0xd9a   :  { %v17752_v57 = vpop.eup %14239  ;;  %13135 = vmatmul.mubr.msk.f32.gmra.mrb[16].mxu0 %vm2225_vm7, %v7840_v55  ;;  %v7646_v40 = vpop.xlane.xlu1 %7645 }
 0xd9b   :  { %v14242_v16 = vpop.eup %14241  ;;  %v7661_v11 = vpop.xlane.xlu0 %7660  ;;  %v7770_v49 = vsel %vm2225_vm7, %v17752_v57, 0.0  ;;  %13137 = vmatprep.mubr.msk.f32.mxu0 %vm14379_vm1, %v18913_v18  ;;  %14247 = vrcp.f32 %v7646_v40 }
 0xd9c   :  { %v7834_v35 = vmul.f32 %v14242_v16, %v17470_v25  ;;  %7771 = vadd.xlane.f32.xlu1 %v7770_v49 }
 0xd9d   :  { %v14244_v19 = vpop.eup %14243 }
 0xd9e   :  { %13115 = vmatmul.mubr.msk.f32.gmra.mrb[18].mxu1 %vm2225_vm7, %v7834_v35  ;;  %v7841_v23 = vmul.f32 %v14244_v19, %v17483_v42  ;;  %v7649_v7 = vpop.xlane.xlu1 %7648 }
 0xd9f   :  { %v7664_v56 = vpop.xlane.xlu0 %7663  ;;  %13117 = vmatprep.mubr.msk.f32.mxu1 %vm14379_vm1, %v18913_v18  ;;  %14249 = vrcp.f32 %v7649_v7 }
 0xda0   :  { %13138 = vmatmul.mubr.msk.f32.gmra.mrb[18].mxu0 %vm2225_vm7, %v7841_v23  ;;  %14251 = vrcp.f32 %v7652_v47  ;;  %v13866_v47 = vld [vmem:[%s18561_s4 + $0xb0] sm:$0xff]  }
 0xda1   :  { %v14246_v15 = vpop.eup %14245  ;;  %13140 = vmatprep.mubr.msk.f32.mxu0 %vm14379_vm1, %v18913_v18 }
 0xda2   :  { %v7835_v25 = vmul.f32 %v14246_v15, %v17496_v8  ;;  %v7670_v59 = vpop.xlane.xlu1 %7669 }
 0xda3   :  { %v7667_v31 = vpop.xlane.xlu0 %7666  ;;  %14253 = vrcp.f32 %v7670_v59 }
 0xda4   :  { %13118 = vmatmul.mubr.msk.f32.gmra.mrb[20].mxu1 %vm2225_vm7, %v7835_v25  ;;  %14255 = vrcp.f32 %v7655_v20 }
 0xda5   :  { %v14248_v42 = vpop.eup %14247  ;;  %13145 = vmatprep.mubr.msk.f32.mxu1 %vm14379_vm1, %v18913_v18 }
 0xda6   :  { %v7842_v27 = vmul.f32 %v14248_v42, %v17509_v51  ;;  %v7673_v34 = vpop.xlane.xlu1 %7672  ;;  %v5764_v51 = vadd.f32 %v13866_v47, %v18914_v44 }
 0xda7   :  { %v7691_v37 = vpop.xlane.xlu0 %7690  ;;  %14257 = vrcp.f32 %v7673_v34 }
 0xda8   :  { %13141 = vmatmul.mubr.msk.f32.gmra.mrb[20].mxu0 %vm2225_vm7, %v7842_v27  ;;  %14259 = vrcp.f32 %v7658_v36  ;;  %v5778_v49 = vcombine.high %v5764_v51, %v5764_v51 }
 0xda9   :  { %v14250_v8 = vpop.eup %14249  ;;  %13168 = vmatprep.mubr.msk.f32.mxu0 %vm14379_vm1, %v18913_v18 }
 0xdaa   :  { %v7843_v20 = vmul.f32 %v14250_v8, %v17522_v61  ;;  %v7676_v54 = vpop.xlane.xlu1 %7675  ;;  %v14252_v26 = vpop.eup %14251 }
 0xdab   :  { %14261 = vrcp.f32 %v7676_v54  ;;  %v7694_v28 = vpop.xlane.xlu0 %7693  ;;  %v7844_v36 = vmul.f32 %v14252_v26, %v17475_v52  ;;  %v13865_v26 = vld [vmem:[%s18561_s4 + $0xb8] sm:$0xff]  }
 0xdac   :  { %13146 = vmatmul.mubr.msk.f32.vlgmr.msra.gmra.mrb[22].mxu1 %vm2225_vm7, %v7843_v20  ;;  %14263 = vrcp.f32 %v7661_v11 }
 0xdad   :  { %v14254_v55 = vpop.eup %14253  ;;  %13190 = vmatpush3.xpose.msk.msra.mxu1 %vm2225_vm7, %v5764_v51  ;;  %13148 = vmatprep.mubr.msk.f32.mxu1 %vm14379_vm1, %v18913_v18 }
 0xdae   :  { %v7850_v16 = vmul.f32 %v14254_v55, %v17535_v2  ;;  %v7679_v61 = vpop.xlane.xlu1 %7678  ;;  %13235 = vmatprep.subr.mxu1 %v18913_v18  ;;  %v14256_v40 = vpop.eup %14255 }
 0xdaf   :  { %14265 = vrcp.f32 %v7679_v61  ;;  %v7845_v52 = vmul.f32 %v14256_v40, %v17488_v58  ;;  %v7697_v35 = vpop.xlane.xlu0 %7696 }
 0xdb0   :  { %13149 = vmatmul.mubr.msk.f32.gmra.mrb[24].mxu1 %vm2225_vm7, %v7844_v36  ;;  %13169 = vmatmul.mubr.msk.f32.vlgmr.msra.gmra.mrb[22].mxu0 %vm2225_vm7, %v7850_v16  ;;  %14267 = vrcp.f32 %v7664_v56  ;;  %v18915_v36 = vld [vmem:[#allocation58_spill] sm:$0xff] }
 0xdb1   :  { %v14258_v11 = vpop.eup %14257  ;;  %13213 = vmatpush3.xpose.msk.msra.mxu0 %vm2225_vm7, %v5778_v49  ;;  %13151 = vmatprep.mubr.msk.f32.mxu1 %vm14379_vm1, %v18913_v18  ;;  %v5769_v16 = vadd.f32 %v13865_v26, %v18915_v36 }
 0xdb2   :  { %v7851_v2 = vmul.f32 %v14258_v11, %v17546_v24  ;;  %v7682_v19 = vpop.xlane.xlu1 %7681  ;;  %13171 = vmatprep.mubr.msk.f32.mxu0 %vm14379_vm1, %v18913_v18  ;;  %13258 = vmatprep.subr.mxu0 %v18913_v18  ;;  %v14260_v23 = vpop.eup %14259 }
 0xdb3   :  { %14269 = vrcp.f32 %v7682_v19  ;;  %v7846_v58 = vmul.f32 %v14260_v23, %v17501_v10  ;;  %v7700_v25 = vpop.xlane.xlu0 %7699 }
 0xdb4   :  { %13152 = vmatmul.mubr.msk.f32.gmra.mrb[26].mxu1 %vm2225_vm7, %v7845_v52  ;;  %13172 = vmatmul.mubr.msk.f32.gmra.mrb[24].mxu0 %vm2225_vm7, %v7851_v2  ;;  %14271 = vrcp.f32 %v7667_v31  ;;  %v5779_v52 = vcombine.high %v5769_v16, %v5769_v16 }
 0xdb5   :  { %v14262_v7 = vpop.eup %14261  ;;  %13154 = vmatprep.mubr.msk.f32.mxu1 %vm14379_vm1, %v18913_v18  ;;  %13174 = vmatprep.mubr.msk.f32.mxu0 %vm14379_vm1, %v18913_v18 }
 0xdb6   :  { %v7852_v24 = vmul.f32 %v14262_v7, %v17557_v30  ;;  %v7685_v56 = vpop.xlane.xlu1 %7684  ;;  %v14264_v15 = vpop.eup %14263 }
 0xdb7   :  { %14273 = vrcp.f32 %v7685_v56  ;;  %v7847_v10 = vmul.f32 %v14264_v15, %v17514_v1  ;;  %v18916_v15 = vld [vmem:[#allocation15_spill] sm:$0xff] }
 0xdb8   :  { %13155 = vmatmul.mubr.msk.f32.gmra.mrb[28].mxu1 %vm2225_vm7, %v7846_v58  ;;  %13175 = vmatmul.mubr.msk.f32.gmra.mrb[26].mxu0 %vm2225_vm7, %v7852_v24  ;;  %14275 = vrcp.f32 %v7691_v37 }
 0xdb9   :  { %v14266_v59 = vpop.eup %14265  ;;  %13157 = vmatprep.mubr.msk.f32.mxu1 %vm14379_vm1, %v18913_v18  ;;  %13177 = vmatprep.mubr.msk.f32.mxu0 %vm14379_vm1, %v18913_v18 }
 0xdba   :  { %v7853_v30 = vmul.f32 %v14266_v59, %v17568_v0  ;;  %v7688_v31 = vpop.xlane.xlu1 %7687  ;;  %v14268_v42 = vpop.eup %14267 }
 0xdbb   :  { %14277 = vrcp.f32 %v7688_v31  ;;  %v7848_v34 = vmul.f32 %v14268_v42, %v17525_v13  ;;  %v7703_v0 = vpop.xlane.xlu0 %7702  ;;  %v18917_v31 = vld [vmem:[#allocation25_spill] sm:$0xff] }
 0xdbc   :  { %13158 = vmatmul.mubr.msk.f32.gmra.mrb[30].mxu1 %vm2225_vm7, %v7847_v10  ;;  %13178 = vmatmul.mubr.msk.f32.gmra.mrb[28].mxu0 %vm2225_vm7, %v7853_v30  ;;  %14279 = vrcp.f32 %v7694_v28 }
 0xdbd   :  { %v14270_v27 = vpop.eup %14269  ;;  %13160 = vmatprep.mubr.msk.f32.mxu1 %vm14379_vm1, %v18913_v18  ;;  %13180 = vmatprep.mubr.msk.f32.mxu0 %vm14379_vm1, %v18913_v18 }
 0xdbe   :  { %v7854_v1 = vmul.f32 %v14270_v27, %v17579_v21  ;;  %v7712_v37 = vpop.xlane.xlu1 %7711  ;;  %v14272_v47 = vpop.eup %14271 }
 0xdbf   :  { %14281 = vrcp.f32 %v7712_v37  ;;  %v7849_v13 = vmul.f32 %v14272_v47, %v17538_v62  ;;  %v7706_v44 = vpop.xlane.xlu0 %7705  ;;  %v18918_v37 = vld [vmem:[#allocation16_spill] sm:$0xff] }
 0xdc0   :  { %13161 = vmatmul.mubr.msk.f32.gmra.mrb[32].mxu1 %vm2225_vm7, %v7848_v34  ;;  %13181 = vmatmul.mubr.msk.f32.gmra.mrb[30].mxu0 %vm2225_vm7, %v7854_v1  ;;  %14283 = vrcp.f32 %v7697_v35 }
 0xdc1   :  { %v14274_v8 = vpop.eup %14273  ;;  %13163 = vmatprep.mubr.msk.f32.mxu1 %vm14379_vm1, %v18913_v18  ;;  %13183 = vmatprep.mubr.msk.f32.mxu0 %vm14379_vm1, %v18913_v18 }
 0xdc2   :  { %v7855_v21 = vmul.f32 %v14274_v8, %v17589_v32  ;;  %v7715_v20 = vpop.xlane.xlu1 %7714  ;;  %v14276_v54 = vpop.eup %14275 }
 0xdc3   :  { %14285 = vrcp.f32 %v7715_v20  ;;  %v7857_v62 = vmul.f32 %v14276_v54, %v17549_v29  ;;  %v7709_v40 = vpop.xlane.xlu0 %7708 }
 0xdc4   :  { %13164 = vmatmul.mubr.msk.f32.gmra.mrb[34].mxu1 %vm2225_vm7, %v7849_v13  ;;  %13184 = vmatmul.mubr.msk.f32.gmra.mrb[32].mxu0 %vm2225_vm7, %v7855_v21  ;;  %14287 = vrcp.f32 %v7700_v25 }
 0xdc5   :  { %v14278_v51 = vpop.eup %14277  ;;  %13186 = vmatprep.mubr.msk.f32.mxu0 %vm14379_vm1, %v18913_v18  ;;  %13191 = vmatprep.mubr.msk.f32.mxu1 %vm14379_vm1, %v18913_v18 }
 0xdc6   :  { %v7856_v32 = vmul.f32 %v14278_v51, %v17599_v6  ;;  %v7718_v28 = vpop.xlane.xlu1 %7717  ;;  %v14280_v55 = vpop.eup %14279  ;;  %v11254_v51 = vld [vmem:[%s18560_s3 + $0xe0] sm:$0xf] }
 0xdc7   :  { %14289 = vrcp.f32 %v7718_v28  ;;  %v7858_v29 = vmul.f32 %v14280_v55, %v17560_v12  ;;  %v7733_v23 = vpop.xlane.xlu0 %7732  ;;  %v11255_v55 = vld [vmem:[%s18560_s3 + $0xe4] sm:$0xf] }
 0xdc8   :  { %13187 = vmatmul.mubr.msk.f32.gmra.mrb[34].mxu0 %vm2225_vm7, %v7856_v32  ;;  %13192 = vmatmul.mubr.msk.f32.vlgmr.msra.gmra.mrb[36].mxu1 %vm2225_vm7, %v7857_v62  ;;  %14291 = vrcp.f32 %v7703_v0 }
 0xdc9   :  { %v14282_v61 = vpop.eup %14281  ;;  %13236 = vmatpush3.xpose.msk.msra.mxu1 %vm2225_vm7, %v5769_v16  ;;  %13194 = vmatprep.mubr.msk.f32.mxu1 %vm14379_vm1, %v18913_v18 }
 0xdca   :  { %v7864_v6 = vmul.f32 %v14282_v61, %v17609_v63  ;;  %v7721_v49 = vpop.xlane.xlu1 %7720  ;;  %13214 = vmatprep.mubr.msk.f32.mxu0 %vm14379_vm1, %v18913_v18  ;;  %13281 = vmatprep.subr.mxu1 %v18913_v18  ;;  %v14284_v11 = vpop.eup %14283 }
 0xdcb   :  { %14293 = vrcp.f32 %v7721_v49  ;;  %v7859_v12 = vmul.f32 %v14284_v11, %v17571_v17  ;;  %v18921_v49 = vld [vmem:[#allocation26_spill] sm:$0xff] }
 0xdcc   :  { %13195 = vmatmul.mubr.msk.f32.gmra.mrb[38].mxu1 %vm2225_vm7, %v7858_v29  ;;  %13215 = vmatmul.mubr.msk.f32.vlgmr.msra.gmra.mrb[36].mxu0 %vm2225_vm7, %v7864_v6  ;;  %14295 = vrcp.f32 %v7706_v44  ;;  %v18919_v29 = vld [vmem:[#allocation32_spill] sm:$0xff]  ;;  %v18920_v6 = vld [vmem:[#allocation17_spill] sm:$0xff] }
 0xdcd   :  { %v14286_v2 = vpop.eup %14285  ;;  %13259 = vmatpush3.xpose.msk.msra.mxu0 %vm2225_vm7, %v5779_v52  ;;  %13197 = vmatprep.mubr.msk.f32.mxu1 %vm14379_vm1, %v18913_v18 }
 0xdce   :  { %v7865_v63 = vmul.f32 %v14286_v2, %v17618_v41  ;;  %v7724_v35 = vpop.xlane.xlu1 %7723  ;;  %13217 = vmatprep.mubr.msk.f32.mxu0 %vm14379_vm1, %v18913_v18  ;;  %13304 = vmatprep.subr.mxu0 %v18913_v18  ;;  %v14288_v19 = vpop.eup %14287 }
 0xdcf   :  { %14297 = vrcp.f32 %v7724_v35  ;;  %v7860_v17 = vmul.f32 %v14288_v19, %v17582_v9  ;;  %v7736_v9 = vpop.xlane.xlu0 %7735 }
 0xdd0   :  { %13198 = vmatmul.mubr.msk.f32.gmra.mrb[40].mxu1 %vm2225_vm7, %v7859_v12  ;;  %13218 = vmatmul.mubr.msk.f32.gmra.mrb[38].mxu0 %vm2225_vm7, %v7865_v63  ;;  %14299 = vrcp.f32 %v7709_v40 }
 0xdd1   :  { %v14290_v7 = vpop.eup %14289  ;;  %13200 = vmatprep.mubr.msk.f32.mxu1 %vm14379_vm1, %v18913_v18  ;;  %13220 = vmatprep.mubr.msk.f32.mxu0 %vm14379_vm1, %v18913_v18 }
 0xdd2   :  { %v7866_v41 = vmul.f32 %v14290_v7, %v17628_v5  ;;  %v7727_v58 = vpop.xlane.xlu1 %7726  ;;  %v14292_v24 = vpop.eup %14291 }
 0xdd3   :  { %14301 = vrcp.f32 %v7727_v58  ;;  %v7861_v25 = vmul.f32 %v14292_v24, %v18916_v15 }
 0xdd4   :  { %13201 = vmatmul.mubr.msk.f32.gmra.mrb[42].mxu1 %vm2225_vm7, %v7860_v17  ;;  %13221 = vmatmul.mubr.msk.f32.gmra.mrb[40].mxu0 %vm2225_vm7, %v7866_v41  ;;  %14303 = vrcp.f32 %v7733_v23 }
 0xdd5   :  { %v14294_v56 = vpop.eup %14293  ;;  %13203 = vmatprep.mubr.msk.f32.mxu1 %vm14379_vm1, %v18913_v18  ;;  %13223 = vmatprep.mubr.msk.f32.mxu0 %vm14379_vm1, %v18913_v18 }
 0xdd6   :  { %v7867_v5 = vmul.f32 %v14294_v56, %v17637_v3  ;;  %v7730_v59 = vpop.xlane.xlu1 %7729  ;;  %v14296_v10 = vpop.eup %14295 }
 0xdd7   :  { %14305 = vrcp.f32 %v7730_v59  ;;  %v7862_v42 = vmul.f32 %v14296_v10, %v18917_v31  ;;  %v7739_v3 = vpop.xlane.xlu0 %7738 }
 0xdd8   :  { %13204 = vmatmul.mubr.msk.f32.gmra.mrb[44].mxu1 %vm2225_vm7, %v7861_v25  ;;  %13224 = vmatmul.mubr.msk.f32.gmra.mrb[42].mxu0 %vm2225_vm7, %v7867_v5  ;;  %14307 = vrcp.f32 %v7736_v9 }
 0xdd9   :  { %v14298_v30 = vpop.eup %14297  ;;  %13206 = vmatprep.mubr.msk.f32.mxu1 %vm14379_vm1, %v18913_v18  ;;  %13226 = vmatprep.mubr.msk.f32.mxu0 %vm14379_vm1, %v18913_v18 }
 0xdda   :  { %v7868_v27 = vmul.f32 %v14298_v30, %v17643_v53  ;;  %v7754_v34 = vpop.xlane.xlu1 %7753  ;;  %v14300_v1 = vpop.eup %14299 }
 0xddb   :  { %14309 = vrcp.f32 %v7754_v34  ;;  %v7863_v47 = vmul.f32 %v14300_v1, %v18918_v37  ;;  %v7742_v8 = vpop.xlane.xlu0 %7741 }
 0xddc   :  { %13207 = vmatmul.mubr.msk.f32.gmra.mrb[46].mxu1 %vm2225_vm7, %v7862_v42  ;;  %13227 = vmatmul.mubr.msk.f32.gmra.mrb[44].mxu0 %vm2225_vm7, %v7868_v27  ;;  %14311 = vrcp.f32 %v7739_v3 }
 0xddd   :  { %v14302_v0 = vpop.eup %14301  ;;  %13209 = vmatprep.mubr.msk.f32.mxu1 %vm14379_vm1, %v18913_v18  ;;  %13229 = vmatprep.mubr.msk.f32.mxu0 %vm14379_vm1, %v18913_v18 }
 0xdde   :  { %v7869_v53 = vmul.f32 %v14302_v0, %v17652_v4  ;;  %v7757_v13 = vpop.xlane.xlu1 %7756  ;;  %v14304_v21 = vpop.eup %14303 }
 0xddf   :  { %14313 = vrcp.f32 %v7757_v13  ;;  %v7871_v54 = vmul.f32 %v14304_v21, %v17621_v22 }
 0xde0   :  { %13210 = vmatmul.mubr.msk.f32.gmra.mrb[48].mxu1 %vm2225_vm7, %v7863_v47  ;;  %13230 = vmatmul.mubr.msk.f32.gmra.mrb[46].mxu0 %vm2225_vm7, %v7869_v53  ;;  %14315 = vrcp.f32 %v7742_v8 }
 0xde1   :  { %v14306_v20 = vpop.eup %14305  ;;  %13232 = vmatprep.mubr.msk.f32.mxu0 %vm14379_vm1, %v18913_v18  ;;  %13237 = vmatprep.mubr.msk.f32.mxu1 %vm14379_vm1, %v18913_v18 }
 0xde2   :  { %v7870_v4 = vmul.f32 %v14306_v20, %v17657_v48  ;;  %v7760_v26 = vpop.xlane.xlu1 %7759  ;;  %v14308_v44 = vpop.eup %14307 }
 0xde3   :  { %14317 = vrcp.f32 %v7760_v26  ;;  %v7872_v22 = vmul.f32 %v14308_v44, %v17630_v46 }
 0xde4   :  { %13233 = vmatmul.mubr.msk.f32.gmra.mrb[48].mxu0 %vm2225_vm7, %v7870_v4  ;;  %13238 = vmatmul.mubr.msk.f32.vlgmr.msra.gmra.mrb[50].mxu1 %vm2225_vm7, %v7871_v54 }
 0xde5   :  { %v14310_v62 = vpop.eup %14309  ;;  %13240 = vmatprep.mubr.msk.f32.mxu1 %vm14379_vm1, %v18913_v18  ;;  %13260 = vmatprep.mubr.msk.f32.mxu0 %vm14379_vm1, %v18913_v18 }
 0xde6   :  { %v7878_v48 = vmul.f32 %v14310_v62, %v17665_v39  ;;  %v7763_v32 = vpop.xlane.xlu1 %7762  ;;  %13282 = vmatpush3.msk.msra.mxu1 %vm981_vm5, %v11254_v51  ;;  %v14312_v28 = vpop.eup %14311 }
 0xde7   :  { %14319 = vrcp.f32 %v7763_v32  ;;  %13327 = vmatprep.subr.mxu1 %v18913_v18  ;;  %v7873_v46 = vmul.f32 %v14312_v28, %v17645_v60  ;;  %v11258_v32 = vld [vmem:[%s18560_s3 + $0xf0] sm:$0xf] }
 0xde8   :  { %13241 = vmatmul.mubr.msk.f32.gmra.mrb[52].mxu1 %vm2225_vm7, %v7872_v22  ;;  %13261 = vmatmul.mubr.msk.f32.vlgmr.msra.gmra.mrb[50].mxu0 %vm2225_vm7, %v7878_v48 }
 0xde9   :  { %v14314_v36 = vpop.eup %14313  ;;  %13243 = vmatprep.mubr.msk.f32.mxu1 %vm14379_vm1, %v18913_v18  ;;  %13263 = vmatprep.mubr.msk.f32.mxu0 %vm14379_vm1, %v18913_v18 }
 0xdea   :  { %v7879_v39 = vmul.f32 %v14314_v36, %v17669_v38  ;;  %13305 = vmatpush3.msk.msra.mxu0 %vm981_vm5, %v11255_v55  ;;  %v14316_v16 = vpop.eup %14315 }
 0xdeb   :  { %13350 = vmatprep.subr.mxu0 %v18913_v18  ;;  %v7874_v60 = vmul.f32 %v14316_v16, %v18919_v29 }
 0xdec   :  { %13244 = vmatmul.mubr.msk.f32.gmra.mrb[54].mxu1 %vm2225_vm7, %v7873_v46  ;;  %13264 = vmatmul.mubr.msk.f32.gmra.mrb[52].mxu0 %vm2225_vm7, %v7879_v39  ;;  %v11259_v39 = vld [vmem:[%s18560_s3 + $0xf4] sm:$0xf] }
 0xded   :  { %v14318_v61 = vpop.eup %14317  ;;  %13246 = vmatprep.mubr.msk.f32.mxu1 %vm14379_vm1, %v18913_v18  ;;  %13266 = vmatprep.mubr.msk.f32.mxu0 %vm14379_vm1, %v18913_v18 }
 0xdee   :  { %v7880_v38 = vmul.f32 %v14318_v61, %v18920_v6 }
 0xdf0   :  { %13247 = vmatmul.mubr.msk.f32.gmra.mrb[56].mxu1 %vm2225_vm7, %v7874_v60  ;;  %13267 = vmatmul.mubr.msk.f32.gmra.mrb[54].mxu0 %vm2225_vm7, %v7880_v38 }
 0xdf1   :  { %v14320_v40 = vpop.eup %14319  ;;  %13269 = vmatprep.mubr.msk.f32.mxu0 %vm14379_vm1, %v18913_v18  ;;  %13249 = vmatprep.mubr.msk.f32.mxu1 %vm14379_vm1, %v18913_v18 }
 0xdf2   :  { %v7881_v11 = vmul.f32 %v14320_v40, %v18921_v49 }
 0xdf4   :  { %13270 = vmatmul.mubr.msk.f32.gmra.mrb[56].mxu0 %vm2225_vm7, %v7881_v11 }
 0xdf5   :  { %13272 = vmatprep.mubr.msk.f32.mxu0 %vm14379_vm1, %v18913_v18 }
 0xe0e   :  { %v7745_v52 = vpop.xlane.xlu0 %7744 }
 0xe0f   :  { %14321 = vrcp.f32 %v7745_v52 }
 0xe18   :  { %v7766_v2 = vpop.xlane.xlu1 %7765 }
 0xe19   :  { %v14322_v12 = vpop.eup %14321  ;;  %14323 = vrcp.f32 %v7766_v2 }
 0xe1a   :  { %v7875_v63 = vmul.f32 %v14322_v12, %v17700_v43 }
 0xe1c   :  { %13250 = vmatmul.mubr.msk.f32.gmra.mrb[58].mxu1 %vm2225_vm7, %v7875_v63  ;;  %v7748_v35 = vpop.xlane.xlu0 %7747 }
 0xe1d   :  { %14325 = vrcp.f32 %v7748_v35  ;;  %13252 = vmatprep.mubr.msk.f32.mxu1 %vm14379_vm1, %v18913_v18 }
 0xe21   :  { %v7769_v19 = vpop.xlane.xlu1 %7768 }
 0xe22   :  { %14327 = vrcp.f32 %v7769_v19 }
 0xe23   :  { %v14324_v23 = vpop.eup %14323 }
 0xe24   :  { %v7882_v7 = vmul.f32 %v14324_v23, %v17720_v50 }
 0xe25   :  { %v7751_v17 = vpop.xlane.xlu0 %7750 }
 0xe26   :  { %14329 = vrcp.f32 %v7751_v17  ;;  %13273 = vmatmul.mubr.msk.f32.gmra.mrb[58].mxu0 %vm2225_vm7, %v7882_v7 }
 0xe27   :  { %v14326_v41 = vpop.eup %14325  ;;  %13275 = vmatprep.mubr.msk.f32.mxu0 %vm14379_vm1, %v18913_v18 }
 0xe28   :  { %v7876_v43 = vmul.f32 %v14326_v41, %v17728_v33 }
 0xe29   :  { %v7772_v58 = vpop.xlane.xlu1 %7771 }
 0xe2a   :  { %14331 = vrcp.f32 %v7772_v58  ;;  %13253 = vmatmul.mubr.msk.f32.gmra.mrb[60].mxu1 %vm2225_vm7, %v7876_v43 }
 0xe2b   :  { %13255 = vmatprep.mubr.msk.f32.mxu1 %vm14379_vm1, %v18913_v18 }
 0xe2c   :  { %v14328_v24 = vpop.eup %14327 }
 0xe2d   :  { %v7883_v50 = vmul.f32 %v14328_v24, %v17736_v14  ;;  %v11256_v14 = vld [vmem:[%s18560_s3 + $0xe8] sm:$0xf] }
 0xe2f   :  { %13276 = vmatmul.mubr.msk.f32.gmra.mrb[60].mxu0 %vm2225_vm7, %v7883_v50 }
 0xe30   :  { %v14330_v56 = vpop.eup %14329  ;;  %13278 = vmatprep.mubr.msk.f32.mxu0 %vm14379_vm1, %v18913_v18 }
 0xe31   :  { %v7877_v15 = vmul.f32 %v14330_v56, %v17744_v45  ;;  %v11257_v45 = vld [vmem:[%s18560_s3 + $0xec] sm:$0xf] }
 0xe33   :  { %13256 = vmatmul.mubr.msk.f32.gmra.mrb[62].mxu1 %vm2225_vm7, %v7877_v15  ;;  %v11260_v15 = vld [vmem:[%s18560_s3 + $0xf8] sm:$0xf] }
 0xe34   :  { %v14332_v33 = vpop.eup %14331  ;;  %13283 = vmatprep.mubr.msk.f32.mxu1 %vm14379_vm1, %v18913_v18 }
 0xe35   :  { %v7884_v25 = vmul.f32 %v14332_v33, %v17752_v57 }
 0xe37   :  { %13279 = vmatmul.mubr.msk.f32.gmra.mrb[62].mxu0 %vm2225_vm7, %v7884_v25 }
 0xe38   :  { %13306 = vmatprep.mubr.msk.f32.mxu0 %vm14379_vm1, %v18913_v18 }
 0xe4d   :  { %v7974_v9 = vpop.f32.mrb[8].mxu1 }
 0xe4e   :  { %v13101_v5 = vpop.f32.mrb[9].mxu1  ;;  %13284 = vmatmul.mubr.msk.f32.vlgmr.msra.gmra.mrb[64].mxu1 %vm959_vm6, %v7974_v9 }
 0xe4f   :  { %v8097_v59 = vpop.f32.mrb[8].mxu0  ;;  %13286 = vmatprep.mubr.msk.f32.mxu1 %vm14379_vm1, %v18913_v18  ;;  %13328 = vmatpush3.msk.msra.mxu1 %vm981_vm5, %v11256_v14  ;;  %v11261_v5 = vld [vmem:[%s18560_s3 + $0xfc] sm:$0xf] }
 0xe50   :  { %v13124_v57 = vpop.f32.mrb[9].mxu0  ;;  %13307 = vmatmul.mubr.msk.f32.vlgmr.msra.gmra.mrb[64].mxu0 %vm959_vm6, %v8097_v59  ;;  %13373 = vmatprep.subr.mxu1 %v18913_v18 }
 0xe51   :  { %13309 = vmatprep.mubr.msk.f32.mxu0 %vm14379_vm1, %v18913_v18  ;;  %13351 = vmatpush3.msk.msra.mxu0 %vm981_vm5, %v11257_v45  ;;  %v18922_v45 = vmov 0.0|0.0  }
 0xe52   :  { %13396 = vmatprep.subr.mxu0 %v18913_v18 }
 0xe53   :  { %v7979_v10 = vpop.f32.mrb[10].mxu1 }
 0xe54   :  { %v13104_v30 = vpop.f32.mrb[11].mxu1  ;;  %13287 = vmatmul.mubr.msk.f32.gmra.mrb[66].mxu1 %vm959_vm6, %v7979_v10 }
 0xe55   :  { %13289 = vmatprep.mubr.msk.f32.mxu1 %vm14379_vm1, %v18913_v18 }
 0xe57   :  { %v8102_v31 = vpop.f32.mrb[10].mxu0 }
 0xe58   :  { %v7984_v42 = vpop.f32.mrb[12].mxu1  ;;  %v13127_v27 = vpop.f32.mrb[11].mxu0  ;;  %13310 = vmatmul.mubr.msk.f32.gmra.mrb[66].mxu0 %vm959_vm6, %v8102_v31 }
 0xe59   :  { %v13107_v3 = vpop.f32.mrb[13].mxu1  ;;  %13290 = vmatmul.mubr.msk.f32.gmra.mrb[68].mxu1 %vm959_vm6, %v7984_v42  ;;  %13312 = vmatprep.mubr.msk.f32.mxu0 %vm14379_vm1, %v18913_v18 }
 0xe5a   :  { %13292 = vmatprep.mubr.msk.f32.mxu1 %vm14379_vm1, %v18913_v18 }
 0xe5b   :  { %v8107_v34 = vpop.f32.mrb[12].mxu0 }
 0xe5c   :  { %v13130_v1 = vpop.f32.mrb[13].mxu0  ;;  %13313 = vmatmul.mubr.msk.f32.gmra.mrb[68].mxu0 %vm959_vm6, %v8107_v34 }
 0xe5d   :  { %13315 = vmatprep.mubr.msk.f32.mxu0 %vm14379_vm1, %v18913_v18 }
 0xe60   :  { %v7989_v0 = vpop.f32.mrb[14].mxu1 }
 0xe61   :  { %v13110_v37 = vpop.f32.mrb[15].mxu1  ;;  %13293 = vmatmul.mubr.msk.f32.gmra.mrb[70].mxu1 %vm959_vm6, %v7989_v0 }
 0xe62   :  { %13295 = vmatprep.mubr.msk.f32.mxu1 %vm14379_vm1, %v18913_v18 }
 0xe64   :  { %v8112_v47 = vpop.f32.mrb[14].mxu0 }
 0xe65   :  { %v13133_v53 = vpop.f32.mrb[15].mxu0  ;;  %13316 = vmatmul.mubr.msk.f32.gmra.mrb[70].mxu0 %vm959_vm6, %v8112_v47 }
 0xe66   :  { %13318 = vmatprep.mubr.msk.f32.mxu0 %vm14379_vm1, %v18913_v18 }
 0xe69   :  { %v7994_v8 = vpop.f32.mrb[16].mxu1 }
 0xe6a   :  { %v13113_v13 = vpop.f32.mrb[17].mxu1  ;;  %13296 = vmatmul.mubr.msk.f32.gmra.mrb[72].mxu1 %vm959_vm6, %v7994_v8 }
 0xe6b   :  { %13298 = vmatprep.mubr.msk.f32.mxu1 %vm14379_vm1, %v18913_v18 }
 0xe6d   :  { %v8117_v21 = vpop.f32.mrb[16].mxu0 }
 0xe6e   :  { %v13136_v20 = vpop.f32.mrb[17].mxu0  ;;  %13319 = vmatmul.mubr.msk.f32.gmra.mrb[72].mxu0 %vm959_vm6, %v8117_v21 }
 0xe6f   :  { %13321 = vmatprep.mubr.msk.f32.mxu0 %vm14379_vm1, %v18913_v18 }
 0xe71   :  { %v7999_v54 = vpop.f32.mrb[18].mxu1 }
 0xe72   :  { %v13116_v4 = vpop.f32.mrb[19].mxu1  ;;  %13299 = vmatmul.mubr.msk.f32.gmra.mrb[74].mxu1 %vm959_vm6, %v7999_v54 }
 0xe73   :  { %13301 = vmatprep.mubr.msk.f32.mxu1 %vm14379_vm1, %v18913_v18  ;;  %v8122_v26 = vpop.f32.mrb[18].mxu0 }
 0xe74   :  { %v13139_v44 = vpop.f32.mrb[19].mxu0  ;;  %13322 = vmatmul.mubr.msk.f32.gmra.mrb[74].mxu0 %vm959_vm6, %v8122_v26 }
 0xe75   :  { %13324 = vmatprep.mubr.msk.f32.mxu0 %vm14379_vm1, %v18913_v18 }
 0xe77   :  { %v8004_v51 = vpop.f32.mrb[20].mxu1 }
 0xe78   :  { %v13119_v62 = vpop.f32.mrb[21].mxu1  ;;  %13302 = vmatmul.mubr.msk.f32.gmra.mrb[76].mxu1 %vm959_vm6, %v8004_v51 }
 0xe79   :  { %13329 = vmatprep.mubr.msk.f32.mxu1 %vm14379_vm1, %v18913_v18 }
 0xe7b   :  { %v8127_v22 = vpop.f32.mrb[20].mxu0 }
 0xe7c   :  { %v13142_v48 = vpop.f32.mrb[21].mxu0  ;;  %13325 = vmatmul.mubr.msk.f32.gmra.mrb[76].mxu0 %vm959_vm6, %v8127_v22 }
 0xe7d   :  { %13352 = vmatprep.mubr.msk.f32.mxu0 %vm14379_vm1, %v18913_v18 }
 0xe7f   :  { %v8220_v28 = vpop.f32.mrb[22].mxu1 }
 0xe80   :  { %v13147_v55 = vpop.f32.mrb[23].mxu1  ;;  %13330 = vmatmul.mubr.msk.f32.vlgmr.msra.gmra.mrb[78].mxu1 %vm959_vm6, %v8220_v28 }
 0xe81   :  { %13332 = vmatprep.mubr.msk.f32.mxu1 %vm14379_vm1, %v18913_v18  ;;  %13374 = vmatpush3.msk.msra.mxu1 %vm981_vm5, %v11258_v32 }
 0xe82   :  { %13419 = vmatprep.subr.mxu1 %v18913_v18 }
 0xe83   :  { %v8225_v36 = vpop.f32.mrb[24].mxu1  ;;  %v8343_v46 = vpop.f32.mrb[22].mxu0 }
 0xe84   :  { %v13150_v16 = vpop.f32.mrb[25].mxu1  ;;  %v13170_v61 = vpop.f32.mrb[23].mxu0  ;;  %13333 = vmatmul.mubr.msk.f32.gmra.mrb[80].mxu1 %vm959_vm6, %v8225_v36  ;;  %13353 = vmatmul.mubr.msk.f32.vlgmr.msra.gmra.mrb[78].mxu0 %vm959_vm6, %v8343_v46 }
 0xe85   :  { %13335 = vmatprep.mubr.msk.f32.mxu1 %vm14379_vm1, %v18913_v18  ;;  %13355 = vmatprep.mubr.msk.f32.mxu0 %vm14379_vm1, %v18913_v18 }
 0xe86   :  { %13397 = vmatpush3.msk.msra.mxu0 %vm981_vm5, %v11259_v39 }
 0xe87   :  { %v8230_v29 = vpop.f32.mrb[26].mxu1  ;;  %v8348_v60 = vpop.f32.mrb[24].mxu0  ;;  %13442 = vmatprep.subr.mxu0 %v18913_v18 }
 0xe88   :  { %v13153_v6 = vpop.f32.mrb[27].mxu1  ;;  %v13173_v38 = vpop.f32.mrb[25].mxu0  ;;  %13336 = vmatmul.mubr.msk.f32.gmra.mrb[82].mxu1 %vm959_vm6, %v8230_v29  ;;  %13356 = vmatmul.mubr.msk.f32.gmra.mrb[80].mxu0 %vm959_vm6, %v8348_v60 }
 0xe89   :  { %13338 = vmatprep.mubr.msk.f32.mxu1 %vm14379_vm1, %v18913_v18  ;;  %13358 = vmatprep.mubr.msk.f32.mxu0 %vm14379_vm1, %v18913_v18 }
 0xe8b   :  { %v8235_v40 = vpop.f32.mrb[28].mxu1  ;;  %v8353_v49 = vpop.f32.mrb[26].mxu0 }
 0xe8c   :  { %v13156_v11 = vpop.f32.mrb[29].mxu1  ;;  %v13176_v52 = vpop.f32.mrb[27].mxu0  ;;  %13339 = vmatmul.mubr.msk.f32.gmra.mrb[84].mxu1 %vm959_vm6, %v8235_v40  ;;  %13359 = vmatmul.mubr.msk.f32.gmra.mrb[82].mxu0 %vm959_vm6, %v8353_v49 }
 0xe8d   :  { %13341 = vmatprep.mubr.msk.f32.mxu1 %vm14379_vm1, %v18913_v18  ;;  %13361 = vmatprep.mubr.msk.f32.mxu0 %vm14379_vm1, %v18913_v18 }
 0xe8f   :  { %v8240_v2 = vpop.f32.mrb[30].mxu1  ;;  %v8358_v12 = vpop.f32.mrb[28].mxu0 }
 0xe90   :  { %v13159_v63 = vpop.f32.mrb[31].mxu1  ;;  %v13179_v35 = vpop.f32.mrb[29].mxu0  ;;  %13342 = vmatmul.mubr.msk.f32.gmra.mrb[86].mxu1 %vm959_vm6, %v8240_v2  ;;  %13362 = vmatmul.mubr.msk.f32.gmra.mrb[84].mxu0 %vm959_vm6, %v8358_v12 }
 0xe91   :  { %13344 = vmatprep.mubr.msk.f32.mxu1 %vm14379_vm1, %v18913_v18  ;;  %13364 = vmatprep.mubr.msk.f32.mxu0 %vm14379_vm1, %v18913_v18 }
 0xe93   :  { %v8245_v19 = vpop.f32.mrb[32].mxu1  ;;  %v8363_v23 = vpop.f32.mrb[30].mxu0 }
 0xe94   :  { %v13162_v7 = vpop.f32.mrb[33].mxu1  ;;  %v13182_v17 = vpop.f32.mrb[31].mxu0  ;;  %13345 = vmatmul.mubr.msk.f32.gmra.mrb[88].mxu1 %vm959_vm6, %v8245_v19  ;;  %13365 = vmatmul.mubr.msk.f32.gmra.mrb[86].mxu0 %vm959_vm6, %v8363_v23 }
 0xe95   :  { %13347 = vmatprep.mubr.msk.f32.mxu1 %vm14379_vm1, %v18913_v18  ;;  %13367 = vmatprep.mubr.msk.f32.mxu0 %vm14379_vm1, %v18913_v18 }
 0xe97   :  { %v8250_v41 = vpop.f32.mrb[34].mxu1  ;;  %v8368_v43 = vpop.f32.mrb[32].mxu0 }
 0xe98   :  { %v13165_v58 = vpop.f32.mrb[35].mxu1  ;;  %v13185_v24 = vpop.f32.mrb[33].mxu0  ;;  %13348 = vmatmul.mubr.msk.f32.gmra.mrb[90].mxu1 %vm959_vm6, %v8250_v41  ;;  %13368 = vmatmul.mubr.msk.f32.gmra.mrb[88].mxu0 %vm959_vm6, %v8368_v43 }
 0xe99   :  { %13370 = vmatprep.mubr.msk.f32.mxu0 %vm14379_vm1, %v18913_v18  ;;  %13375 = vmatprep.mubr.msk.f32.mxu1 %vm14379_vm1, %v18913_v18  ;;  %v9996_v58 = vld [vmem:[%s18559_s2 + $0x28] sm:$0xff]  ;;  %v9997_v24 = vld [vmem:[%s18559_s2 + $0x30] sm:$0xff] }
 0xe9b   :  { %v8373_v50 = vpop.f32.mrb[34].mxu0  ;;  %v8466_v56 = vpop.f32.mrb[36].mxu1 }
 0xe9c   :  { %v13188_v33 = vpop.f32.mrb[35].mxu0  ;;  %v13193_v25 = vpop.f32.mrb[37].mxu1  ;;  %13371 = vmatmul.mubr.msk.f32.gmra.mrb[90].mxu0 %vm959_vm6, %v8373_v50  ;;  %13376 = vmatmul.mubr.msk.f32.vlgmr.msra.gmra.mrb[92].mxu1 %vm959_vm6, %v8466_v56  ;;  %v13753_v50 = vpack.c.bf16 %v9997_v24, %v9996_v58  ;;  %v9998_v56 = vld [vmem:[%s18559_s2 + $0x38] sm:$0xff] }
 0xe9d   :  { %13378 = vmatprep.mubr.msk.f32.mxu1 %vm14379_vm1, %v18913_v18  ;;  %13398 = vmatprep.mubr.msk.f32.mxu0 %vm14379_vm1, %v18913_v18 }
 0xe9e   :  { %13420 = vmatpush3.msk.msra.mxu1 %vm981_vm5, %v11260_v15  ;;  %v9999_v15 = vld [vmem:[%s18559_s2 + $0x40] sm:$0xff] }
 0xe9f   :  { %v8471_v14 = vpop.f32.mrb[38].mxu1  ;;  %v8589_v9 = vpop.f32.mrb[36].mxu0  ;;  %13752 = vmatprep.subr.bf16.mxu1 %v18922_v45  ;;  %v13756_v33 = vpack.c.bf16 %v9999_v15, %v9998_v56 }
 0xea0   :  { %v13196_v59 = vpop.f32.mrb[39].mxu1  ;;  %v13216_v57 = vpop.f32.mrb[37].mxu0  ;;  %13379 = vmatmul.mubr.msk.f32.gmra.mrb[94].mxu1 %vm959_vm6, %v8471_v14  ;;  %13399 = vmatmul.mubr.msk.f32.vlgmr.msra.gmra.mrb[92].mxu0 %vm959_vm6, %v8589_v9 }
 0xea1   :  { %13381 = vmatprep.mubr.msk.f32.mxu1 %vm14379_vm1, %v18913_v18  ;;  %13401 = vmatprep.mubr.msk.f32.mxu0 %vm14379_vm1, %v18913_v18 }
 0xea2   :  { %13443 = vmatpush3.msk.msra.mxu0 %vm981_vm5, %v11261_v5 }
 0xea3   :  { %v8476_v10 = vpop.f32.mrb[40].mxu1  ;;  %v8594_v30 = vpop.f32.mrb[38].mxu0  ;;  %13758 = vmatprep.subr.bf16.mxu0 %v18922_v45 }
 0xea4   :  { %v13199_v31 = vpop.f32.mrb[41].mxu1  ;;  %v13219_v42 = vpop.f32.mrb[39].mxu0  ;;  %13382 = vmatmul.mubr.msk.f32.gmra.mrb[96].mxu1 %vm959_vm6, %v8476_v10  ;;  %13402 = vmatmul.mubr.msk.f32.gmra.mrb[94].mxu0 %vm959_vm6, %v8594_v30 }
 0xea5   :  { %13384 = vmatprep.mubr.msk.f32.mxu1 %vm14379_vm1, %v18913_v18  ;;  %13404 = vmatprep.mubr.msk.f32.mxu0 %vm14379_vm1, %v18913_v18 }
 0xea7   :  { %v8481_v27 = vpop.f32.mrb[42].mxu1  ;;  %v8599_v3 = vpop.f32.mrb[40].mxu0 }
 0xea8   :  { %v13202_v34 = vpop.f32.mrb[43].mxu1  ;;  %v13222_v1 = vpop.f32.mrb[41].mxu0  ;;  %13385 = vmatmul.mubr.msk.f32.gmra.mrb[98].mxu1 %vm959_vm6, %v8481_v27  ;;  %13405 = vmatmul.mubr.msk.f32.gmra.mrb[96].mxu0 %vm959_vm6, %v8599_v3 }
 0xea9   :  { %13387 = vmatprep.mubr.msk.f32.mxu1 %vm14379_vm1, %v18913_v18  ;;  %13407 = vmatprep.mubr.msk.f32.mxu0 %vm14379_vm1, %v18913_v18 }
 0xeab   :  { %v8486_v0 = vpop.f32.mrb[44].mxu1  ;;  %v8604_v37 = vpop.f32.mrb[42].mxu0 }
 0xeac   :  { %v13205_v47 = vpop.f32.mrb[45].mxu1  ;;  %v13225_v53 = vpop.f32.mrb[43].mxu0  ;;  %13388 = vmatmul.mubr.msk.f32.gmra.mrb[100].mxu1 %vm959_vm6, %v8486_v0  ;;  %13408 = vmatmul.mubr.msk.f32.gmra.mrb[98].mxu0 %vm959_vm6, %v8604_v37 }
 0xead   :  { %13390 = vmatprep.mubr.msk.f32.mxu1 %vm14379_vm1, %v18913_v18  ;;  %13410 = vmatprep.mubr.msk.f32.mxu0 %vm14379_vm1, %v18913_v18 }
 0xeaf   :  { %v8491_v8 = vpop.f32.mrb[46].mxu1  ;;  %v8609_v13 = vpop.f32.mrb[44].mxu0 }
 0xeb0   :  { %v13208_v21 = vpop.f32.mrb[47].mxu1  ;;  %v13228_v20 = vpop.f32.mrb[45].mxu0  ;;  %13391 = vmatmul.mubr.msk.f32.gmra.mrb[102].mxu1 %vm959_vm6, %v8491_v8  ;;  %13411 = vmatmul.mubr.msk.f32.gmra.mrb[100].mxu0 %vm959_vm6, %v8609_v13 }
 0xeb1   :  { %13393 = vmatprep.mubr.msk.f32.mxu1 %vm14379_vm1, %v18913_v18  ;;  %13413 = vmatprep.mubr.msk.f32.mxu0 %vm14379_vm1, %v18913_v18 }
 0xeb3   :  { %v8496_v54 = vpop.f32.mrb[48].mxu1  ;;  %v8614_v4 = vpop.f32.mrb[46].mxu0 }
 0xeb4   :  { %v13211_v26 = vpop.f32.mrb[49].mxu1  ;;  %v13231_v44 = vpop.f32.mrb[47].mxu0  ;;  %13394 = vmatmul.mubr.msk.f32.gmra.mrb[104].mxu1 %vm959_vm6, %v8496_v54  ;;  %13414 = vmatmul.mubr.msk.f32.gmra.mrb[102].mxu0 %vm959_vm6, %v8614_v4 }
 0xeb5   :  { %13416 = vmatprep.mubr.msk.f32.mxu0 %vm14379_vm1, %v18913_v18  ;;  %13421 = vmatprep.mubr.msk.f32.mxu1 %vm14379_vm1, %v18913_v18 }
 0xeb7   :  { %v8619_v51 = vpop.f32.mrb[48].mxu0  ;;  %v8712_v62 = vpop.f32.mrb[50].mxu1 }
 0xeb8   :  { %v13234_v22 = vpop.f32.mrb[49].mxu0  ;;  %v13239_v48 = vpop.f32.mrb[51].mxu1  ;;  %13417 = vmatmul.mubr.msk.f32.gmra.mrb[104].mxu0 %vm959_vm6, %v8619_v51  ;;  %13422 = vmatmul.mubr.msk.f32.vlgmr.msra.gmra.mrb[106].mxu1 %vm959_vm6, %v8712_v62 }
 0xeb9   :  { %13424 = vmatprep.mubr.msk.f32.mxu1 %vm14379_vm1, %v18913_v18  ;;  %13444 = vmatprep.mubr.msk.f32.mxu0 %vm14379_vm1, %v18913_v18 }
 0xeba   :  { %13754 = vmatpush3.bf16.msra.mxu1 %v13753_v50 }
 0xebb   :  { %v8717_v32 = vpop.f32.mrb[52].mxu1  ;;  %v8835_v28 = vpop.f32.mrb[50].mxu0  ;;  %13755 = vmatprep.subr.bf16.mxu1 %v18922_v45 }
 0xebc   :  { %v13242_v55 = vpop.f32.mrb[53].mxu1  ;;  %v13262_v36 = vpop.f32.mrb[51].mxu0  ;;  %13425 = vmatmul.mubr.msk.f32.gmra.mrb[108].mxu1 %vm959_vm6, %v8717_v32  ;;  %13445 = vmatmul.mubr.msk.f32.vlgmr.msra.gmra.mrb[106].mxu0 %vm959_vm6, %v8835_v28 }
 0xebd   :  { %13427 = vmatprep.mubr.msk.f32.mxu1 %vm14379_vm1, %v18913_v18  ;;  %13447 = vmatprep.mubr.msk.f32.mxu0 %vm14379_vm1, %v18913_v18 }
 0xebe   :  { %13757 = vmatpush3.bf16.msra.mxu1 %v13756_v33 }
 0xebf   :  { %v8722_v46 = vpop.f32.mrb[54].mxu1  ;;  %v8840_v39 = vpop.f32.mrb[52].mxu0  ;;  %13770 = vmatprep.subr.bf16.mxu1 %v18922_v45 }
 0xec0   :  { %v13245_v16 = vpop.f32.mrb[55].mxu1  ;;  %v13265_v61 = vpop.f32.mrb[53].mxu0  ;;  %13428 = vmatmul.mubr.msk.f32.gmra.mrb[110].mxu1 %vm959_vm6, %v8722_v46  ;;  %13448 = vmatmul.mubr.msk.f32.gmra.mrb[108].mxu0 %vm959_vm6, %v8840_v39 }
 0xec1   :  { %13430 = vmatprep.mubr.msk.f32.mxu1 %vm14379_vm1, %v18913_v18  ;;  %13450 = vmatprep.mubr.msk.f32.mxu0 %vm14379_vm1, %v18913_v18 }
 0xec3   :  { %v8727_v29 = vpop.f32.mrb[56].mxu1  ;;  %v8845_v60 = vpop.f32.mrb[54].mxu0 }
 0xec4   :  { %v13248_v6 = vpop.f32.mrb[57].mxu1  ;;  %v13268_v38 = vpop.f32.mrb[55].mxu0  ;;  %13431 = vmatmul.mubr.msk.f32.gmra.mrb[112].mxu1 %vm959_vm6, %v8727_v29  ;;  %13451 = vmatmul.mubr.msk.f32.gmra.mrb[110].mxu0 %vm959_vm6, %v8845_v60 }
 0xec5   :  { %13453 = vmatprep.mubr.msk.f32.mxu0 %vm14379_vm1, %v18913_v18  ;;  %13433 = vmatprep.mubr.msk.f32.mxu1 %vm14379_vm1, %v18913_v18 }
 0xec7   :  { %v8850_v40 = vpop.f32.mrb[56].mxu0 }
 0xec8   :  { %v13271_v49 = vpop.f32.mrb[57].mxu0  ;;  %13454 = vmatmul.mubr.msk.f32.gmra.mrb[112].mxu0 %vm959_vm6, %v8850_v40 }
 0xec9   :  { %13456 = vmatprep.mubr.msk.f32.mxu0 %vm14379_vm1, %v18913_v18 }
 0xeef   :  { %v8732_v11 = vpop.f32.mrb[58].mxu1 }
 0xef0   :  { %v13251_v52 = vpop.f32.mrb[59].mxu1  ;;  %13434 = vmatmul.mubr.msk.f32.gmra.mrb[114].mxu1 %vm959_vm6, %v8732_v11 }
 0xef1   :  { %13436 = vmatprep.mubr.msk.f32.mxu1 %vm14379_vm1, %v18913_v18 }
 0xef9   :  { %v8855_v2 = vpop.f32.mrb[58].mxu0 }
 0xefa   :  { %v13274_v12 = vpop.f32.mrb[59].mxu0  ;;  %13457 = vmatmul.mubr.msk.f32.gmra.mrb[114].mxu0 %vm959_vm6, %v8855_v2 }
 0xefb   :  { %13459 = vmatprep.mubr.msk.f32.mxu0 %vm14379_vm1, %v18913_v18 }
 0xefd   :  { %v8737_v63 = vpop.f32.mrb[60].mxu1 }
 0xefe   :  { %v13254_v35 = vpop.f32.mrb[61].mxu1  ;;  %13437 = vmatmul.mubr.msk.f32.gmra.mrb[116].mxu1 %vm959_vm6, %v8737_v63 }
 0xeff   :  { %13439 = vmatprep.mubr.msk.f32.mxu1 %vm14379_vm1, %v18913_v18 }
 0xf02   :  { %v8860_v19 = vpop.f32.mrb[60].mxu0 }
 0xf03   :  { %v13277_v23 = vpop.f32.mrb[61].mxu0  ;;  %13460 = vmatmul.mubr.msk.f32.gmra.mrb[116].mxu0 %vm959_vm6, %v8860_v19 }
 0xf04   :  { %13462 = vmatprep.mubr.msk.f32.mxu0 %vm14379_vm1, %v18913_v18 }
 0xf06   :  { %v8742_v7 = vpop.f32.mrb[62].mxu1 }
 0xf07   :  { %v13257_v17 = vpop.f32.mrb[63].mxu1  ;;  %13440 = vmatmul.mubr.msk.f32.gmra.mrb[118].mxu1 %vm959_vm6, %v8742_v7 }
 0xf08   :  { %13473 = vmatprep.mubr.msk.f32.mxu1 %vm14379_vm1, %v18913_v18 }
 0xf0a   :  { %v8865_v41 = vpop.f32.mrb[62].mxu0 }
 0xf0b   :  { %v13280_v43 = vpop.f32.mrb[63].mxu0  ;;  %13463 = vmatmul.mubr.msk.f32.gmra.mrb[118].mxu0 %vm959_vm6, %v8865_v41 }
 0xf0c   :  { %13510 = vmatprep.mubr.msk.f32.mxu0 %vm14379_vm1, %v18913_v18 }
 0xf21   :  { %v8959_v25 = vpop.f32.mrb[64].mxu1 }
 0xf22   :  { %v13285_v14 = vpop.f32.mrb[65].mxu1  ;;  %v9861_v5 = vsel %vm31_vm0, %v8959_v25, 0.0 }
 0xf23   :  { %v9083_v9 = vpop.f32.mrb[64].mxu0 }
 0xf24   :  { %v9862_v59 = vsel %vm31_vm0, %v9083_v9, 0.0  ;;  %v13308_v57 = vpop.f32.mrb[65].mxu0 }
 0xf25   :  { %v9863_v10 = vadd.f32 %v9862_v59, %v9861_v5 }
 0xf27   :  { %v8964_v30 = vpop.f32.mrb[66].mxu1 }
 0xf28   :  { %v13288_v31 = vpop.f32.mrb[67].mxu1  ;;  %v9876_v27 = vsel %vm31_vm0, %v8964_v30, 0.0 }
 0xf2b   :  { %v9088_v42 = vpop.f32.mrb[66].mxu0 }
 0xf2c   :  { %v8969_v3 = vpop.f32.mrb[68].mxu1  ;;  %v9877_v34 = vsel %vm31_vm0, %v9088_v42, 0.0  ;;  %v13311_v1 = vpop.f32.mrb[67].mxu0 }
 0xf2d   :  { %v9878_v0 = vadd.f32 %v9877_v34, %v9876_v27  ;;  %v13291_v37 = vpop.f32.mrb[69].mxu1  ;;  %v9891_v53 = vsel %vm31_vm0, %v8969_v3, 0.0 }
 0xf2f   :  { %v9093_v47 = vpop.f32.mrb[68].mxu0 }
 0xf30   :  { %v9892_v8 = vsel %vm31_vm0, %v9093_v47, 0.0  ;;  %v13314_v13 = vpop.f32.mrb[69].mxu0 }
 0xf31   :  { %v9893_v21 = vadd.f32 %v9892_v8, %v9891_v53 }
 0xf34   :  { %v8974_v20 = vpop.f32.mrb[70].mxu1 }
 0xf35   :  { %v13294_v54 = vpop.f32.mrb[71].mxu1  ;;  %v9906_v26 = vsel %vm31_vm0, %v8974_v20, 0.0 }
 0xf38   :  { %v9098_v4 = vpop.f32.mrb[70].mxu0 }
 0xf39   :  { %v9907_v44 = vsel %vm31_vm0, %v9098_v4, 0.0  ;;  %v13317_v51 = vpop.f32.mrb[71].mxu0 }
 0xf3a   :  { %v9908_v62 = vadd.f32 %v9907_v44, %v9906_v26 }
 0xf3d   :  { %v8979_v22 = vpop.f32.mrb[72].mxu1 }
 0xf3e   :  { %v13297_v48 = vpop.f32.mrb[73].mxu1  ;;  %v9921_v28 = vsel %vm31_vm0, %v8979_v22, 0.0 }
 0xf41   :  { %v9103_v32 = vpop.f32.mrb[72].mxu0 }
 0xf42   :  { %v9922_v55 = vsel %vm31_vm0, %v9103_v32, 0.0  ;;  %v13320_v36 = vpop.f32.mrb[73].mxu0 }
 0xf43   :  { %v9923_v46 = vadd.f32 %v9922_v55, %v9921_v28 }
 0xf45   :  { %v8984_v39 = vpop.f32.mrb[74].mxu1 }
 0xf46   :  { %v13300_v16 = vpop.f32.mrb[75].mxu1  ;;  %v9936_v29 = vsel %vm31_vm0, %v8984_v39, 0.0 }
 0xf47   :  { %v9108_v61 = vpop.f32.mrb[74].mxu0 }
 0xf48   :  { %v9937_v60 = vsel %vm31_vm0, %v9108_v61, 0.0  ;;  %v13323_v6 = vpop.f32.mrb[75].mxu0 }
 0xf49   :  { %v9938_v38 = vadd.f32 %v9937_v60, %v9936_v29 }
 0xf4b   :  { %v8989_v40 = vpop.f32.mrb[76].mxu1 }
 0xf4c   :  { %v13303_v49 = vpop.f32.mrb[77].mxu1  ;;  %v9951_v52 = vsel %vm31_vm0, %v8989_v40, 0.0 }
 0xf4f   :  { %v9113_v11 = vpop.f32.mrb[76].mxu0 }
 0xf50   :  { %v9952_v2 = vsel %vm31_vm0, %v9113_v11, 0.0  ;;  %v13326_v12 = vpop.f32.mrb[77].mxu0 }
 0xf51   :  { %v9953_v63 = vadd.f32 %v9952_v2, %v9951_v52 }
 0xf53   :  { %v9207_v35 = vpop.f32.mrb[78].mxu1 }
 0xf54   :  { %v9864_v19 = vsel %vm31_vm0, %v9207_v35, 0.0  ;;  %v13331_v23 = vpop.f32.mrb[79].mxu1 }
 0xf55   :  { %v9865_v7 = vadd.f32 %v9864_v19, %v9863_v10 }
 0xf57   :  { %v9212_v17 = vpop.f32.mrb[80].mxu1  ;;  %v9331_v41 = vpop.f32.mrb[78].mxu0 }
 0xf58   :  { %v9879_v43 = vsel %vm31_vm0, %v9212_v17, 0.0  ;;  %v9866_v58 = vsel %vm31_vm0, %v9331_v41, 0.0  ;;  %v13334_v24 = vpop.f32.mrb[81].mxu1  ;;  %v13354_v50 = vpop.f32.mrb[79].mxu0 }
 0xf59   :  { %v9880_v56 = vadd.f32 %v9879_v43, %v9878_v0  ;;  %v9867_v15 = vadd.f32 %v9866_v58, %v9865_v7 }
 0xf5b   :  { %v9217_v33 = vpop.f32.mrb[82].mxu1  ;;  %v9336_v25 = vpop.f32.mrb[80].mxu0 }
 0xf5c   :  { %v9894_v14 = vsel %vm31_vm0, %v9217_v33, 0.0  ;;  %v9881_v9 = vsel %vm31_vm0, %v9336_v25, 0.0  ;;  %v13337_v5 = vpop.f32.mrb[83].mxu1  ;;  %v13357_v59 = vpop.f32.mrb[81].mxu0 }
 0xf5d   :  { %v9895_v57 = vadd.f32 %v9894_v14, %v9893_v21  ;;  %v9882_v10 = vadd.f32 %v9881_v9, %v9880_v56 }
 0xf5f   :  { %v9222_v30 = vpop.f32.mrb[84].mxu1  ;;  %v9341_v31 = vpop.f32.mrb[82].mxu0 }
 0xf60   :  { %v9909_v42 = vsel %vm31_vm0, %v9222_v30, 0.0  ;;  %v9896_v27 = vsel %vm31_vm0, %v9341_v31, 0.0  ;;  %v13340_v3 = vpop.f32.mrb[85].mxu1  ;;  %v13360_v34 = vpop.f32.mrb[83].mxu0 }
 0xf61   :  { %v9910_v1 = vadd.f32 %v9909_v42, %v9908_v62  ;;  %v9897_v0 = vadd.f32 %v9896_v27, %v9895_v57 }
 0xf63   :  { %v9227_v37 = vpop.f32.mrb[86].mxu1  ;;  %v9346_v47 = vpop.f32.mrb[84].mxu0 }
 0xf64   :  { %v9924_v53 = vsel %vm31_vm0, %v9227_v37, 0.0  ;;  %v9911_v8 = vsel %vm31_vm0, %v9346_v47, 0.0  ;;  %v13343_v13 = vpop.f32.mrb[87].mxu1  ;;  %v13363_v20 = vpop.f32.mrb[85].mxu0 }
 0xf65   :  { %v9925_v21 = vadd.f32 %v9924_v53, %v9923_v46  ;;  %v9912_v54 = vadd.f32 %v9911_v8, %v9910_v1 }
 0xf67   :  { %v9232_v4 = vpop.f32.mrb[88].mxu1  ;;  %v9351_v26 = vpop.f32.mrb[86].mxu0 }
 0xf68   :  { %v9939_v44 = vsel %vm31_vm0, %v9232_v4, 0.0  ;;  %v9926_v51 = vsel %vm31_vm0, %v9351_v26, 0.0  ;;  %v13346_v22 = vpop.f32.mrb[89].mxu1  ;;  %v13366_v48 = vpop.f32.mrb[87].mxu0 }
 0xf69   :  { %v9940_v62 = vadd.f32 %v9939_v44, %v9938_v38  ;;  %v9927_v32 = vadd.f32 %v9926_v51, %v9925_v21 }
 0xf6b   :  { %v9237_v28 = vpop.f32.mrb[90].mxu1  ;;  %v9356_v55 = vpop.f32.mrb[88].mxu0 }
 0xf6c   :  { %v9954_v36 = vsel %vm31_vm0, %v9237_v28, 0.0  ;;  %v9941_v39 = vsel %vm31_vm0, %v9356_v55, 0.0  ;;  %v13349_v16 = vpop.f32.mrb[91].mxu1  ;;  %v13369_v61 = vpop.f32.mrb[89].mxu0 }
 0xf6d   :  { %v9955_v46 = vadd.f32 %v9954_v36, %v9953_v63  ;;  %v9942_v29 = vadd.f32 %v9941_v39, %v9940_v62 }
 0xf6f   :  { %v9361_v60 = vpop.f32.mrb[90].mxu0  ;;  %v9455_v6 = vpop.f32.mrb[92].mxu1 }
 0xf70   :  { %v9956_v40 = vsel %vm31_vm0, %v9361_v60, 0.0  ;;  %v9868_v49 = vsel %vm31_vm0, %v9455_v6, 0.0  ;;  %v13372_v11 = vpop.f32.mrb[91].mxu0  ;;  %v13377_v52 = vpop.f32.mrb[93].mxu1 }
 0xf71   :  { %v9957_v38 = vadd.f32 %v9956_v40, %v9955_v46  ;;  %v9869_v2 = vadd.f32 %v9868_v49, %v9867_v15  ;;  %v18233_v40 = vld [vmem:[%s18558_s1 + $0x70] sm:$0xff] }
 0xf73   :  { %v9460_v12 = vpop.f32.mrb[94].mxu1  ;;  %v9579_v35 = vpop.f32.mrb[92].mxu0 }
 0xf74   :  { %v9883_v19 = vsel %vm31_vm0, %v9460_v12, 0.0  ;;  %v9870_v23 = vsel %vm31_vm0, %v9579_v35, 0.0  ;;  %v13380_v7 = vpop.f32.mrb[95].mxu1  ;;  %v13400_v17 = vpop.f32.mrb[93].mxu0 }
 0xf75   :  { %v9884_v63 = vadd.f32 %v9883_v19, %v9882_v10  ;;  %v9871_v41 = vadd.f32 %v9870_v23, %v9869_v2  ;;  %v18923_v23 = vld [vmem:[#allocation71_spill] sm:$0xff] }
 0xf76   :  { %v18924_v7 = vsub.s32 0, %v18923_v23 }
 0xf77   :  { %v9465_v43 = vpop.f32.mrb[96].mxu1  ;;  %v9584_v58 = vpop.f32.mrb[94].mxu0 }
 0xf78   :  { %v9898_v24 = vsel %vm31_vm0, %v9465_v43, 0.0  ;;  %v9885_v50 = vsel %vm31_vm0, %v9584_v58, 0.0  ;;  %v13383_v56 = vpop.f32.mrb[97].mxu1  ;;  %v13403_v33 = vpop.f32.mrb[95].mxu0  ;;  %v18240_v17 = vrot.slane %v18233_v40, %v18924_v7  ;;  %v18926_v43 = vsub.s32 1, %v18923_v23 }
 0xf79   :  { %v9899_v25 = vadd.f32 %v9898_v24, %v9897_v0  ;;  %v9886_v15 = vadd.f32 %v9885_v50, %v9884_v63  ;;  %v18925_v63 = vld [vmem:[#allocation64_spill] sm:$0xff] }
 0xf7a   :  { %v18246_v58 = vrot.slane %v18233_v40, %v18926_v43 }
 0xf7b   :  { %v9470_v14 = vpop.f32.mrb[98].mxu1  ;;  %v9589_v9 = vpop.f32.mrb[96].mxu0 }
 0xf7c   :  { %v9913_v5 = vsel %vm31_vm0, %v9470_v14, 0.0  ;;  %v9900_v59 = vsel %vm31_vm0, %v9589_v9, 0.0  ;;  %v13386_v57 = vpop.f32.mrb[99].mxu1  ;;  %v13406_v30 = vpop.f32.mrb[97].mxu0 }
 0xf7d   :  { %v9914_v10 = vadd.f32 %v9913_v5, %v9912_v54  ;;  %v9901_v31 = vadd.f32 %v9900_v59, %v9899_v25  ;;  %v18927_v57 = vld [vmem:[#allocation73_spill] sm:$0xff] }
 0xf7f   :  { %v9475_v42 = vpop.f32.mrb[100].mxu1  ;;  %v9594_v27 = vpop.f32.mrb[98].mxu0 }
 0xf80   :  { %v9928_v3 = vsel %vm31_vm0, %v9475_v42, 0.0  ;;  %v9915_v34 = vsel %vm31_vm0, %v9594_v27, 0.0  ;;  %v13389_v1 = vpop.f32.mrb[101].mxu1  ;;  %v13409_v37 = vpop.f32.mrb[99].mxu0 }
 0xf81   :  { %v9929_v0 = vadd.f32 %v9928_v3, %v9927_v32  ;;  %v9916_v47 = vadd.f32 %v9915_v34, %v9914_v10 }
 0xf83   :  { %v9480_v53 = vpop.f32.mrb[102].mxu1  ;;  %v9599_v8 = vpop.f32.mrb[100].mxu0 }
 0xf84   :  { %v9943_v13 = vsel %vm31_vm0, %v9480_v53, 0.0  ;;  %v9930_v20 = vsel %vm31_vm0, %v9599_v8, 0.0  ;;  %v13392_v21 = vpop.f32.mrb[103].mxu1  ;;  %v13412_v4 = vpop.f32.mrb[101].mxu0  ;;  %v18928_v8 = vld [vmem:[#allocation68_spill] sm:$0xff] }
 0xf85   :  { %v9944_v54 = vadd.f32 %v9943_v13, %v9942_v29  ;;  %v18220_v26 = vadd.f32 %v9930_v20, %v9929_v0 }
 0xf87   :  { %v9485_v44 = vpop.f32.mrb[104].mxu1  ;;  %v9604_v51 = vpop.f32.mrb[102].mxu0 }
 0xf88   :  { %v9958_v22 = vsel %vm31_vm0, %v9485_v44, 0.0  ;;  %v9945_v48 = vsel %vm31_vm0, %v9604_v51, 0.0  ;;  %v13395_v62 = vpop.f32.mrb[105].mxu1  ;;  %v13415_v32 = vpop.f32.mrb[103].mxu0  ;;  %v18929_v51 = vld [vmem:[#allocation72_spill] sm:$0xff] }
 0xf89   :  { %v9959_v28 = vadd.f32 %v9958_v22, %v9957_v38  ;;  %v18224_v55 = vadd.f32 %v9945_v48, %v9944_v54 }
 0xf8b   :  { %v9609_v36 = vpop.f32.mrb[104].mxu0  ;;  %v9703_v39 = vpop.f32.mrb[106].mxu1 }
 0xf8c   :  { %v9960_v16 = vsel %vm31_vm0, %v9609_v36, 0.0  ;;  %v9872_v61 = vsel %vm31_vm0, %v9703_v39, 0.0  ;;  %v13418_v46 = vpop.f32.mrb[105].mxu0  ;;  %v13423_v29 = vpop.f32.mrb[107].mxu1 }
 0xf8d   :  { %v18228_v60 = vadd.f32 %v9960_v16, %v9959_v28  ;;  %v9873_v6 = vadd.f32 %v9872_v61, %v9871_v41 }
 0xf8f   :  { %v9708_v49 = vpop.f32.mrb[108].mxu1  ;;  %v9827_v11 = vpop.f32.mrb[106].mxu0 }
 0xf90   :  { %v9887_v52 = vsel %vm31_vm0, %v9708_v49, 0.0  ;;  %v9874_v38 = vsel %vm31_vm0, %v9827_v11, 0.0  ;;  %v13426_v2 = vpop.f32.mrb[109].mxu1  ;;  %v13446_v12 = vpop.f32.mrb[107].mxu0 }
 0xf91   :  { %v9888_v35 = vadd.f32 %v9887_v52, %v9886_v15  ;;  %v9875_v19 = vadd.f32 %v9874_v38, %v9873_v6  ;;  %v18930_v6 = vld [vmem:[#allocation76_spill] sm:$0xff] }
 0xf93   :  { %v9967_v41 = vadd.f32 %v9875_v19, %v18925_v63  ;;  %v9713_v24 = vpop.f32.mrb[110].mxu1  ;;  %v9832_v50 = vpop.f32.mrb[108].mxu0 }
 0xf94   :  { %v9902_v56 = vsel %vm31_vm0, %v9713_v24, 0.0  ;;  %v9889_v33 = vsel %vm31_vm0, %v9832_v50, 0.0  ;;  %v13429_v25 = vpop.f32.mrb[111].mxu1  ;;  %v13449_v15 = vpop.f32.mrb[109].mxu0 }
 0xf95   :  { %v9978_v14 = vmul.f32 %v18240_v17, %v9967_v41  ;;  %v9903_v9 = vadd.f32 %v9902_v56, %v9901_v31  ;;  %v9890_v5 = vadd.f32 %v9889_v33, %v9888_v35  ;;  %v18931_v41 = vld [vmem:[#allocation79_spill] sm:$0xff] }
 0xf97   :  { %v18252_v59 = vadd.f32 %v18246_v58, %v9978_v14  ;;  %v9968_v30 = vadd.f32 %v9890_v5, %v18927_v57  ;;  %v9718_v10 = vpop.f32.mrb[112].mxu1  ;;  %v9837_v42 = vpop.f32.mrb[110].mxu0  ;;  %v18932_v57 = vld [vmem:[#allocation22_spill] sm:$0xff] }
 0xf98   :  { %v9917_v27 = vsel %vm31_vm0, %v9718_v10, 0.0  ;;  %v9904_v3 = vsel %vm31_vm0, %v9837_v42, 0.0  ;;  %v13432_v34 = vpop.f32.mrb[113].mxu1  ;;  %v13452_v1 = vpop.f32.mrb[111].mxu0  ;;  %v10189_v42 = vld [vmem:[%s18558_s1 + $0xb8] sm:$0xff] }
 0xf99   :  { %v9979_v37 = vmul.f32 %v18240_v17, %v9968_v30  ;;  %v9918_v0 = vadd.f32 %v9917_v27, %v9916_v47  ;;  %v9905_v53 = vadd.f32 %v9904_v3, %v9903_v9  ;;  %13474 = vmatmul.mubr.msk.f32.vlgmr.msra.gmra.mrb[120].mxu1 %vm31_vm0, %v18252_v59  ;;  %v10190_v27 = vld [vmem:[%s18558_s1 + $0xc0] sm:$0xff]  ;;  %v10193_v1 = vld [vmem:[%s18558_s1 + $0xd8] sm:$0xff] }
 0xf9a   :  { %13476 = vmatprep.mubr.msk.f32.mxu1 %vm14379_vm1, %v18913_v18  ;;  %v13759_v3 = vpack.c.bf16 %v10190_v27, %v10189_v42 }
 0xf9b   :  { %v18263_v31 = vadd.f32 %v18246_v58, %v9979_v37  ;;  %v9969_v13 = vadd.f32 %v9905_v53, %v18928_v8  ;;  %v9842_v20 = vpop.f32.mrb[112].mxu0  ;;  %v10194_v37 = vld [vmem:[%s18558_s1 + $0xe0] sm:$0xff]  ;;  %v10195_v53 = vld [vmem:[%s18558_s1 + $0xe8] sm:$0xff]  ;;  %v10196_v8 = vld [vmem:[%s18558_s1 + $0xf0] sm:$0xff] }
 0xf9c   :  { %v9919_v21 = vsel %vm31_vm0, %v9842_v20, 0.0  ;;  %v13455_v4 = vpop.f32.mrb[113].mxu0  ;;  %13760 = vmatpush3.bf16.msra.mxu0 %v13759_v3  ;;  %v10347_v20 = vld [vmem:[%s18564_s7] sm:$0xff] }
 0xf9d   :  { %v9980_v54 = vmul.f32 %v18240_v17, %v9969_v13  ;;  %v9920_v44 = vadd.f32 %v9919_v21, %v9918_v0  ;;  %13477 = vmatmul.mubr.msk.f32.gmra.mrb[122].mxu1 %vm31_vm0, %v18263_v31  ;;  %13761 = vmatprep.subr.bf16.mxu0 %v18922_v45  ;;  %v13765_v0 = vpack.c.bf16 %v10194_v37, %v10193_v1  ;;  %v10348_v21 = vld [vmem:[%s18564_s7 + $0x8] sm:$0xff] }
 0xf9e   :  { %13479 = vmatprep.mubr.msk.f32.mxu1 %vm14379_vm1, %v18913_v18  ;;  %v13768_v13 = vpack.c.bf16 %v10196_v8, %v10195_v53  ;;  %v13771_v4 = vpack.c.bf16 %v10348_v21, %v10347_v20 }
 0xf9f   :  { %v18273_v47 = vadd.f32 %v18246_v58, %v9980_v54  ;;  %v9970_v22 = vadd.f32 %v9920_v44, %v18929_v51  ;;  %v18362_v54 = vld [vmem:[%s18559_s2 + $0x48] ss:$0 sm:$0xff] }
 0xfa0   :  { %13772 = vmatpush3.bf16.msra.mxu1 %v13771_v4 }
 0xfa1   :  { %v9981_v48 = vmul.f32 %v18240_v17, %v9970_v22  ;;  %13480 = vmatmul.mubr.msk.f32.gmra.mrb[124].mxu1 %vm31_vm0, %v18273_v47  ;;  %13773 = vmatprep.subr.bf16.mxu1 %v18922_v45 }
 0xfa2   :  { %13482 = vmatprep.mubr.msk.f32.mxu1 %vm14379_vm1, %v18913_v18 }
 0xfa3   :  { %v18282_v62 = vadd.f32 %v18246_v58, %v9981_v48 }
 0xfa5   :  { %13483 = vmatmul.mubr.msk.f32.gmra.mrb[126].mxu1 %vm31_vm0, %v18282_v62 }
 0xfa6   :  { %13485 = vmatprep.mubr.msk.f32.mxu1 %vm14379_vm1, %v18913_v18 }
 0xfc3   :  { %v9723_v32 = vpop.f32.mrb[114].mxu1 }
 0xfc4   :  { %v9932_v28 = vsel %vm31_vm0, %v9723_v32, 0.0  ;;  %v13435_v36 = vpop.f32.mrb[115].mxu1 }
 0xfc5   :  { %v9933_v39 = vadd.f32 %v9932_v28, %v18220_v26 }
 0xfcd   :  { %v9847_v16 = vpop.f32.mrb[114].mxu0 }
 0xfce   :  { %v9934_v61 = vsel %vm31_vm0, %v9847_v16, 0.0  ;;  %v13458_v46 = vpop.f32.mrb[115].mxu0 }
 0xfcf   :  { %v9935_v29 = vadd.f32 %v9934_v61, %v9933_v39 }
 0xfd1   :  { %v9971_v49 = vadd.f32 %v9935_v29, %v18930_v6  ;;  %v9728_v11 = vpop.f32.mrb[116].mxu1 }
 0xfd2   :  { %v9947_v52 = vsel %vm31_vm0, %v9728_v11, 0.0  ;;  %v13438_v38 = vpop.f32.mrb[117].mxu1 }
 0xfd3   :  { %v9982_v2 = vmul.f32 %v18240_v17, %v9971_v49  ;;  %v9948_v12 = vadd.f32 %v9947_v52, %v18224_v55 }
 0xfd5   :  { %v18296_v35 = vadd.f32 %v18246_v58, %v9982_v2 }
 0xfd6   :  { %v9852_v19 = vpop.f32.mrb[116].mxu0 }
 0xfd7   :  { %v9949_v26 = vsel %vm31_vm0, %v9852_v19, 0.0  ;;  %v13461_v7 = vpop.f32.mrb[117].mxu0  ;;  %13486 = vmatmul.mubr.msk.f32.gmra.mrb[128].mxu1 %vm31_vm0, %v18296_v35 }
 0xfd8   :  { %v9950_v63 = vadd.f32 %v9949_v26, %v9948_v12  ;;  %13488 = vmatprep.mubr.msk.f32.mxu1 %vm14379_vm1, %v18913_v18 }
 0xfda   :  { %v9972_v43 = vadd.f32 %v9950_v63, %v18931_v41  ;;  %v9733_v24 = vpop.f32.mrb[118].mxu1 }
 0xfdb   :  { %v9962_v50 = vsel %vm31_vm0, %v9733_v24, 0.0  ;;  %v13441_v55 = vpop.f32.mrb[119].mxu1 }
 0xfdc   :  { %v9983_v56 = vmul.f32 %v18240_v17, %v9972_v43  ;;  %v9963_v33 = vadd.f32 %v9962_v50, %v18228_v60 }
 0xfde   :  { %v18308_v25 = vadd.f32 %v18246_v58, %v9983_v56  ;;  %v9857_v15 = vpop.f32.mrb[118].mxu0 }
 0xfdf   :  { %v9964_v14 = vsel %vm31_vm0, %v9857_v15, 0.0  ;;  %v13464_v9 = vpop.f32.mrb[119].mxu0 }
 0xfe0   :  { %v9965_v5 = vadd.f32 %v9964_v14, %v9963_v33  ;;  %13489 = vmatmul.mubr.msk.f32.gmra.mrb[130].mxu1 %vm31_vm0, %v18308_v25 }
 0xfe1   :  { %13491 = vmatprep.mubr.msk.f32.mxu1 %vm14379_vm1, %v18913_v18 }
 0xfe2   :  { %v9973_v30 = vadd.f32 %v9965_v5, %v18932_v57 }
 0xfe4   :  { %v9984_v10 = vmul.f32 %v18240_v17, %v9973_v30  ;;  %v10191_v17 = vld [vmem:[%s18558_s1 + $0xc8] sm:$0xff] }
 0xfe6   :  { %v18318_v60 = vadd.f32 %v18246_v58, %v9984_v10  ;;  %v10192_v58 = vld [vmem:[%s18558_s1 + $0xd0] sm:$0xff]  ;;  %s14354_s1 = scalar_lea.vmem %s10914_s10, 128 }
 0xfe7   :  { %v13762_v34 = vpack.c.bf16 %v10192_v58, %v10191_v17  ;;  %p14355_p0 = scmp.ne.s32.totalorder %s10914_s10, %s14354_s1  ;;  %p14360_p2 = scmp.lt.s32.totalorder %s14354_s1, %s14354_s1 }
 0xfe8   :  { %13492 = vmatmul.mubr.msk.f32.gmra.mrb[132].mxu1 %vm31_vm0, %v18318_v60 }
 0xfe9   :  { %13539 = vmatprep.mubr.msk.f32.mxu1 %vm14379_vm1, %v18913_v18  ;;  %13763 = vmatpush3.bf16.msra.mxu0 %v13762_v34  ;;  %p14361_p3 = por %p14360_p2, %p14359_p1 }
 0xfea   :  { %13764 = vmatprep.subr.bf16.mxu0 %v18922_v45 }
 0xfeb   :  { %p14362_p4 = pnand %p14361_p3, %p14355_p0 }
 0xfed   :  { %13766 = vmatpush3.bf16.msra.mxu0 %v13765_v0 }
 0xfee   :  { %13767 = vmatprep.subr.bf16.mxu0 %v18922_v45 }
 0xff1   :  { %13769 = vmatpush3.bf16.msra.mxu0 %v13768_v13 }
 0xff2   :  { %13788 = vmatprep.subr.bf16.mxu0 %v18922_v45 }
0x106c   :  { %v10092_v44 = vpop.f32.mrb[120].mxu1 }
0x106d   :  { %v10093_v51 = vadd.f32 %v18362_v54, %v10092_v44  ;;  %v13475_v22 = vpop.f32.mrb[121].mxu1 }
0x106f   :  { %v10133_v48 = vmul.f32 0.044715, %v10093_v51  ;;  %v10126_v5 = vmul.f32 0.5, %v10093_v51 }
0x1070   :  { %v10097_v32 = vpop.f32.mrb[122].mxu1 }
0x1071   :  { %v10140_v28 = vmul.f32 %v10133_v48, %v10093_v51  ;;  %v10098_v36 = vadd.f32 %v18362_v54, %v10097_v32  ;;  %v13478_v39 = vpop.f32.mrb[123].mxu1 }
0x1073   :  { %v10147_v16 = vmul.f32 %v10140_v28, %v10093_v51  ;;  %v10134_v61 = vmul.f32 0.044715, %v10098_v36  ;;  %v10127_v42 = vmul.f32 0.5, %v10098_v36 }
0x1074   :  { %v10102_v46 = vpop.f32.mrb[124].mxu1 }
0x1075   :  { %v10154_v29 = vadd.f32 %v10147_v16, %v10093_v51  ;;  %v10141_v6 = vmul.f32 %v10134_v61, %v10098_v36  ;;  %v10103_v49 = vadd.f32 %v18362_v54, %v10102_v46  ;;  %v13481_v11 = vpop.f32.mrb[125].mxu1 }
0x1077   :  { %v10161_v52 = vmul.f32 0.7978846, %v10154_v29  ;;  %v10148_v38 = vmul.f32 %v10141_v6, %v10098_v36  ;;  %v10135_v2 = vmul.f32 0.044715, %v10103_v49  ;;  %v10128_v58 = vmul.f32 0.5, %v10103_v49 }
0x1078   :  { %v10107_v12 = vpop.f32.mrb[126].mxu1 }
0x1079   :  { %14333 = vtanh.f32 %v10161_v52  ;;  %v10155_v19 = vadd.f32 %v10148_v38, %v10098_v36  ;;  %v10142_v26 = vmul.f32 %v10135_v2, %v10103_v49  ;;  %v10108_v7 = vadd.f32 %v18362_v54, %v10107_v12  ;;  %v13484_v63 = vpop.f32.mrb[127].mxu1 }
0x107b   :  { %v10162_v41 = vmul.f32 0.7978846, %v10155_v19  ;;  %v10149_v43 = vmul.f32 %v10142_v26, %v10103_v49  ;;  %v10136_v24 = vmul.f32 0.044715, %v10108_v7  ;;  %v10129_v0 = vmul.f32 0.5, %v10108_v7 }
0x107d   :  { %14335 = vtanh.f32 %v10162_v41  ;;  %v10156_v50 = vadd.f32 %v10149_v43, %v10103_v49  ;;  %v10143_v55 = vmul.f32 %v10136_v24, %v10108_v7 }
0x107f   :  { %v10163_v56 = vmul.f32 0.7978846, %v10156_v50  ;;  %v10150_v33 = vmul.f32 %v10143_v55, %v10108_v7 }
0x1081   :  { %14337 = vtanh.f32 %v10163_v56  ;;  %v10157_v15 = vadd.f32 %v10150_v33, %v10108_v7 }
0x1083   :  { %v14334_v14 = vpop.eup %14333  ;;  %v10164_v9 = vmul.f32 0.7978846, %v10157_v15 }
0x1084   :  { %v10175_v57 = vadd.f32 1.0, %v14334_v14  ;;  %v10349_v14 = vld [vmem:[%s18564_s7 + $0x10] sm:$0xff] }
0x1085   :  { %14339 = vtanh.f32 %v10164_v9  ;;  %v10350_v9 = vld [vmem:[%s18564_s7 + $0x18] sm:$0xff] }
0x1086   :  { %v10182_v30 = vmul.f32 %v10175_v57, %v10126_v5  ;;  %v13774_v5 = vpack.c.bf16 %v10350_v9, %v10349_v14  ;;  %v10359_v57 = vld [vmem:[%s18564_s7 + $0x60] sm:$0xff] }
0x1087   :  { %v14336_v10 = vpop.eup %14335  ;;  %v10371_v9 = vld [vmem:[%s18564_s7 + $0xc0] sm:$0xff] }
0x1088   :  { %v10176_v27 = vadd.f32 1.0, %v14336_v10  ;;  %13511 = vmatmul.mubr.msk.f32.vlgmr.msra.gmra.mrb[120].mxu0 %vm5154_vm8, %v10182_v30  ;;  %13775 = vmatpush3.bf16.msra.mxu1 %v13774_v5  ;;  %v10360_v30 = vld [vmem:[%s18564_s7 + $0x68] sm:$0xff] }
0x1089   :  { %13513 = vmatprep.mubr.msk.f32.mxu0 %vm14379_vm1, %v18913_v18  ;;  %13776 = vmatprep.subr.bf16.mxu1 %v18922_v45  ;;  %v13789_v10 = vpack.c.bf16 %v10360_v30, %v10359_v57  ;;  %v10372_v5 = vld [vmem:[%s18564_s7 + $0xc8] sm:$0xff] }
0x108a   :  { %v10183_v3 = vmul.f32 %v10176_v27, %v10127_v42  ;;  %v10361_v42 = vld [vmem:[%s18564_s7 + $0x70] sm:$0xff]  ;;  %v10362_v27 = vld [vmem:[%s18564_s7 + $0x78] sm:$0xff]  ;;  %v13807_v30 = vpack.c.bf16 %v10372_v5, %v10371_v9 }
0x108b   :  { %v14338_v17 = vpop.eup %14337  ;;  %13790 = vmatpush3.bf16.msra.mxu0 %v13789_v10 }
0x108c   :  { %v10177_v34 = vadd.f32 1.0, %v14338_v17  ;;  %13514 = vmatmul.mubr.msk.f32.gmra.mrb[122].mxu0 %vm5154_vm8, %v10183_v3  ;;  %13791 = vmatprep.subr.bf16.mxu0 %v18922_v45  ;;  %v13792_v3 = vpack.c.bf16 %v10362_v27, %v10361_v42  ;;  %v18933_v17 = vsub.s32 2, %v18923_v23  ;;  %v10373_v42 = vld [vmem:[%s18564_s7 + $0xd0] sm:$0xff] }
0x108d   :  { %13516 = vmatprep.mubr.msk.f32.mxu0 %vm14379_vm1, %v18913_v18 }
0x108e   :  { %v10184_v1 = vmul.f32 %v10177_v34, %v10128_v58  ;;  %v18416_v58 = vrot.slane %v18233_v40, %v18933_v17 }
0x108f   :  { %v14340_v37 = vpop.eup %14339  ;;  %13793 = vmatpush3.bf16.msra.mxu0 %v13792_v3 }
0x1090   :  { %v10178_v53 = vadd.f32 1.0, %v14340_v37  ;;  %13517 = vmatmul.mubr.msk.f32.gmra.mrb[124].mxu0 %vm5154_vm8, %v10184_v1  ;;  %13800 = vmatprep.subr.bf16.mxu0 %v18922_v45  ;;  %v18934_v37 = vsub.s32 3, %v18923_v23 }
0x1091   :  { %13519 = vmatprep.mubr.msk.f32.mxu0 %vm14379_vm1, %v18913_v18 }
0x1092   :  { %v10185_v8 = vmul.f32 %v10178_v53, %v10129_v0  ;;  %v18422_v0 = vrot.slane %v18233_v40, %v18934_v37  ;;  %v10353_v40 = vld [vmem:[%s18564_s7 + $0x30] sm:$0xff] }
0x1094   :  { %13520 = vmatmul.mubr.msk.f32.gmra.mrb[126].mxu0 %vm5154_vm8, %v10185_v8  ;;  %v10351_v8 = vld [vmem:[%s18564_s7 + $0x20] sm:$0xff] }
0x1095   :  { %13522 = vmatprep.mubr.msk.f32.mxu0 %vm14379_vm1, %v18913_v18 }
0x10aa   :  { %v10112_v13 = vpop.f32.mrb[128].mxu1 }
0x10ab   :  { %v10113_v20 = vadd.f32 %v18362_v54, %v10112_v13  ;;  %v13487_v21 = vpop.f32.mrb[129].mxu1  ;;  %v10352_v13 = vld [vmem:[%s18564_s7 + $0x28] sm:$0xff] }
0x10ad   :  { %v10137_v4 = vmul.f32 0.044715, %v10113_v20  ;;  %v10130_v19 = vmul.f32 0.5, %v10113_v20 }
0x10af   :  { %v10144_v44 = vmul.f32 %v10137_v4, %v10113_v20  ;;  %v13777_v4 = vpack.c.bf16 %v10352_v13, %v10351_v8 }
0x10b1   :  { %v10151_v51 = vmul.f32 %v10144_v44, %v10113_v20 }
0x10b3   :  { %v10117_v22 = vpop.f32.mrb[130].mxu1  ;;  %v10158_v48 = vadd.f32 %v10151_v51, %v10113_v20  ;;  %v10354_v51 = vld [vmem:[%s18564_s7 + $0x38] sm:$0xff] }
0x10b4   :  { %v10118_v32 = vadd.f32 %v18362_v54, %v10117_v22  ;;  %v13490_v28 = vpop.f32.mrb[131].mxu1 }
0x10b5   :  { %v10165_v36 = vmul.f32 0.7978846, %v10158_v48  ;;  %v13780_v48 = vpack.c.bf16 %v10354_v51, %v10353_v40  ;;  %v10355_v28 = vld [vmem:[%s18564_s7 + $0x40] sm:$0xff] }
0x10b6   :  { %v10138_v39 = vmul.f32 0.044715, %v10118_v32 }
0x10b7   :  { %14341 = vtanh.f32 %v10165_v36  ;;  %v10356_v36 = vld [vmem:[%s18564_s7 + $0x48] sm:$0xff] }
0x10b8   :  { %v10145_v16 = vmul.f32 %v10138_v39, %v10118_v32 }
0x10ba   :  { %v10152_v61 = vmul.f32 %v10145_v16, %v10118_v32  ;;  %v13783_v16 = vpack.c.bf16 %v10356_v36, %v10355_v28 }
0x10bb   :  { %v10122_v46 = vpop.f32.mrb[132].mxu1 }
0x10bc   :  { %v10159_v29 = vadd.f32 %v10152_v61, %v10118_v32  ;;  %v10123_v6 = vadd.f32 %v18362_v54, %v10122_v46  ;;  %v13493_v49 = vpop.f32.mrb[133].mxu1  ;;  %v10131_v54 = vmul.f32 0.5, %v10118_v32  ;;  %v10357_v61 = vld [vmem:[%s18564_s7 + $0x50] sm:$0xff] }
0x10be   :  { %v10166_v11 = vmul.f32 0.7978846, %v10159_v29  ;;  %v10139_v52 = vmul.f32 0.044715, %v10123_v6  ;;  %v10132_v56 = vmul.f32 0.5, %v10123_v6 }
0x10c0   :  { %14343 = vtanh.f32 %v10166_v11  ;;  %v10146_v38 = vmul.f32 %v10139_v52, %v10123_v6  ;;  %v10358_v11 = vld [vmem:[%s18564_s7 + $0x58] sm:$0xff]  ;;  %v10367_v52 = vld [vmem:[%s18564_s7 + $0xa0] sm:$0xff] }
0x10c1   :  { %v14342_v2 = vpop.eup %14341 }
0x10c2   :  { %v10153_v12 = vmul.f32 %v10146_v38, %v10123_v6  ;;  %v10179_v26 = vadd.f32 1.0, %v14342_v2  ;;  %v10368_v38 = vld [vmem:[%s18564_s7 + $0xa8] sm:$0xff] }
0x10c4   :  { %v10160_v7 = vadd.f32 %v10153_v12, %v10123_v6  ;;  %v10186_v63 = vmul.f32 %v10179_v26, %v10130_v19  ;;  %v10363_v26 = vld [vmem:[%s18564_s7 + $0x80] sm:$0xff] }
0x10c6   :  { %v10167_v41 = vmul.f32 0.7978846, %v10160_v7  ;;  %13523 = vmatmul.mubr.msk.f32.gmra.mrb[128].mxu0 %vm5154_vm8, %v10186_v63  ;;  %v10364_v7 = vld [vmem:[%s18564_s7 + $0x88] sm:$0xff]  ;;  %v10369_v63 = vld [vmem:[%s18564_s7 + $0xb0] sm:$0xff] }
0x10c7   :  { %13525 = vmatprep.mubr.msk.f32.mxu0 %vm14379_vm1, %v18913_v18 }
0x10c8   :  { %14345 = vtanh.f32 %v10167_v41  ;;  %v10370_v41 = vld [vmem:[%s18564_s7 + $0xb8] sm:$0xff] }
0x10ca   :  { %v14344_v43 = vpop.eup %14343 }
0x10cb   :  { %v10180_v24 = vadd.f32 1.0, %v14344_v43  ;;  %v13795_v43 = vpack.c.bf16 %v10364_v7, %v10363_v26  ;;  %v18936_v26 = vld [vmem:[#allocation5_spill] sm:$0xff] }
0x10cd   :  { %v10187_v50 = vmul.f32 %v10180_v24, %v10131_v54  ;;  %v10365_v24 = vld [vmem:[%s18564_s7 + $0x90] sm:$0xff] }
0x10cf   :  { %13526 = vmatmul.mubr.msk.f32.gmra.mrb[130].mxu0 %vm5154_vm8, %v10187_v50  ;;  %v10366_v50 = vld [vmem:[%s18564_s7 + $0x98] sm:$0xff] }
0x10d0   :  { %13528 = vmatprep.mubr.msk.f32.mxu0 %vm14379_vm1, %v18913_v18 }
0x10d2   :  { %v14346_v55 = vpop.eup %14345 }
0x10d3   :  { %v10181_v33 = vadd.f32 1.0, %v14346_v55  ;;  %v13804_v55 = vpack.c.bf16 %v10370_v41, %v10369_v63 }
0x10d5   :  { %v10188_v15 = vmul.f32 %v10181_v33, %v10132_v56  ;;  %v13798_v56 = vpack.c.bf16 %v10366_v50, %v10365_v24 }
0x10d7   :  { %13529 = vmatmul.mubr.msk.f32.gmra.mrb[132].mxu0 %vm5154_vm8, %v10188_v15 }
0x10d8   :  { %13572 = vmatprep.mubr.msk.f32.mxu0 %vm14379_vm1, %v18913_v18 }
0x115b   :  { %v10284_v34 = vpop.f32.mrb[120].mxu0 }
0x115c   :  { %v10318_v1 = vadd.f32 %v10284_v34, %v18252_v59  ;;  %v13512_v53 = vpop.f32.mrb[121].mxu0 }
0x115e   :  { %v10329_v20 = vmul.f32 %v18416_v58, %v10318_v1 }
0x115f   :  { %v10289_v21 = vpop.f32.mrb[122].mxu0 }
0x1160   :  { %v10340_v59 = vadd.f32 %v18422_v0, %v10329_v20  ;;  %v10319_v23 = vadd.f32 %v10289_v21, %v18263_v31  ;;  %v13515_v44 = vpop.f32.mrb[123].mxu0 }
0x1162   :  { %13540 = vmatmul.mubr.msk.f32.vlgmr.msra.gmra.mrb[134].mxu1 %vm31_vm0, %v10340_v59  ;;  %v10330_v32 = vmul.f32 %v18416_v58, %v10319_v23 }
0x1163   :  { %13778 = vmatpush3.bf16.msra.mxu1 %v13777_v4  ;;  %v10294_v22 = vpop.f32.mrb[124].mxu0  ;;  %13550 = vmatprep.mubr.msk.f32.mxu1 %vm14379_vm1, %v18913_v18 }
0x1164   :  { %v13518_v31 = vpop.f32.mrb[125].mxu0  ;;  %13779 = vmatprep.subr.bf16.mxu1 %v18922_v45  ;;  %v10341_v46 = vadd.f32 %v18422_v0, %v10330_v32  ;;  %v10320_v29 = vadd.f32 %v10294_v22, %v18273_v47  ;;  %v13786_v47 = vpack.c.bf16 %v10358_v11, %v10357_v61  ;;  %v10900_v11 = vld [vmem:[%s18564_s7 + $0xe0] sm:$0xff] }
0x1166   :  { %v10331_v12 = vmul.f32 %v18416_v58, %v10320_v29 }
0x1167   :  { %13781 = vmatpush3.bf16.msra.mxu1 %v13780_v48  ;;  %v10299_v39 = vpop.f32.mrb[126].mxu0 }
0x1168   :  { %v10321_v6 = vadd.f32 %v10299_v39, %v18282_v62  ;;  %v13521_v49 = vpop.f32.mrb[127].mxu0  ;;  %13782 = vmatprep.subr.bf16.mxu1 %v18922_v45  ;;  %v13801_v62 = vpack.c.bf16 %v10368_v38, %v10367_v52  ;;  %v10342_v54 = vadd.f32 %v18422_v0, %v10331_v12  ;;  %v18935_v12 = vld [vmem:[#allocation6_spill] sm:$0xff] }
0x116a   :  { %v10332_v2 = vmul.f32 %v18416_v58, %v10321_v6  ;;  %13551 = vmatmul.mubr.msk.f32.vlgmr.msra.gmra.mrb[136].mxu1 %vm31_vm0, %v10341_v46 }
0x116b   :  { %13784 = vmatpush3.bf16.msra.mxu1 %v13783_v16  ;;  %13561 = vmatprep.mubr.msk.f32.mxu1 %vm14379_vm1, %v18913_v18 }
0x116c   :  { %v10343_v19 = vadd.f32 %v18422_v0, %v10332_v2  ;;  %13785 = vmatprep.subr.bf16.mxu1 %v18922_v45  ;;  %v10901_v2 = vld [vmem:[%s18564_s7 + $0xe8] sm:$0xff] }
0x116e   :  { %13573 = vmatmul.mubr.msk.f32.vlgmr.msra.gmra.mrb[134].mxu0 %vm31_vm0, %v10343_v19 }
0x116f   :  { %13787 = vmatpush3.bf16.msra.mxu1 %v13786_v47  ;;  %13802 = vmatpush3.bf16.msra.mxu0 %v13801_v62 }
0x1170   :  { %13794 = vmatprep.subr.bf16.mxu1 %v18922_v45  ;;  %13803 = vmatprep.subr.bf16.mxu0 %v18922_v45 }
0x1171   :  { %13594 = vmatprep.mubr.msk.f32.mxu0 %vm14379_vm1, %v18913_v18 }
0x1172   :  { %13562 = vmatmul.mubr.msk.f32.vlgmr.msra.gmra.mrb[138].mxu1 %vm31_vm0, %v10342_v54 }
0x1173   :  { %13796 = vmatpush3.bf16.msra.mxu1 %v13795_v43  ;;  %13583 = vmatprep.mubr.msk.f32.mxu1 %vm14379_vm1, %v18913_v18 }
0x1174   :  { %13797 = vmatprep.subr.bf16.mxu1 %v18922_v45  ;;  %13805 = vmatpush3.bf16.msra.mxu0 %v13804_v55 }
0x1177   :  { %13799 = vmatpush3.bf16.msra.mxu1 %v13798_v56 }
0x1178   :  { %13806 = vmatprep.subr.bf16.mxu1 %v18922_v45 }
0x1199   :  { %v10304_v33 = vpop.f32.mrb[128].mxu0 }
0x119a   :  { %v10322_v15 = vadd.f32 %v10304_v33, %v18296_v35  ;;  %v13524_v14 = vpop.f32.mrb[129].mxu0  ;;  %v10374_v35 = vld [vmem:[%s18564_s7 + $0xd8] sm:$0xff] }
0x119b   :  { %v13810_v3 = vpack.c.bf16 %v10374_v35, %v10373_v42 }
0x119c   :  { %v10333_v57 = vmul.f32 %v18416_v58, %v10322_v15 }
0x119e   :  { %v10344_v10 = vadd.f32 %v18422_v0, %v10333_v57 }
0x11a0   :  { %13584 = vmatmul.mubr.msk.f32.vlgmr.msra.gmra.mrb[140].mxu1 %vm31_vm0, %v10344_v10 }
0x11a1   :  { %13808 = vmatpush3.bf16.msra.mxu1 %v13807_v30  ;;  %13605 = vmatprep.mubr.msk.f32.mxu1 %vm14379_vm1, %v18913_v18 }
0x11a2   :  { %v10309_v27 = vpop.f32.mrb[130].mxu0  ;;  %13809 = vmatprep.subr.bf16.mxu1 %v18922_v45 }
0x11a3   :  { %v10323_v17 = vadd.f32 %v10309_v27, %v18308_v25  ;;  %v13527_v34 = vpop.f32.mrb[131].mxu0 }
0x11a5   :  { %v10334_v1 = vmul.f32 %v18416_v58, %v10323_v17  ;;  %13811 = vmatpush3.bf16.msra.mxu1 %v13810_v3 }
0x11a7   :  { %v10345_v37 = vadd.f32 %v18422_v0, %v10334_v1 }
0x11a9   :  { %13595 = vmatmul.mubr.msk.f32.vlgmr.msra.gmra.mrb[136].mxu0 %vm31_vm0, %v10345_v37 }
0x11aa   :  { %v10314_v53 = vpop.f32.mrb[132].mxu0 }
0x11ab   :  { %v10324_v8 = vadd.f32 %v10314_v53, %v18318_v60  ;;  %v13530_v13 = vpop.f32.mrb[133].mxu0 }
0x11ad   :  { %v10335_v20 = vmul.f32 %v18416_v58, %v10324_v8 }
0x11af   :  { %v10346_v18 = vadd.f32 %v18422_v0, %v10335_v20 }
0x11b1   :  { %13606 = vmatmul.mubr.msk.f32.vlgmr.msra.gmra.mrb[142].mxu1 %vm31_vm0, %v10346_v18 }
0x1235   :  { %v10444_v25 = vpop.f32.mrb[134].mxu1 }
0x1236   :  { %v13541_v21 = vpop.f32.mrb[135].mxu1  ;;  %v10887_v4 = vsel %vm10886_vm9, %v10444_v25, 0.0 }
0x123d   :  { %v10517_v45 = vpop.f32.mrb[136].mxu1 }
0x123e   :  { %v10888_v59 = vsel %vm10886_vm9, %v10517_v45, 0.0  ;;  %v13552_v23 = vpop.f32.mrb[137].mxu1 }
0x123f   :  { %v10889_v44 = vadd.f32 %v10888_v59, %v10887_v4 }
0x1241   :  { %v10663_v40 = vpop.f32.mrb[134].mxu0 }
0x1242   :  { %v13574_v51 = vpop.f32.mrb[135].mxu0  ;;  %v10892_v0 = vsel %vm10886_vm9, %v10663_v40, 0.0 }
0x1245   :  { %v10590_v60 = vpop.f32.mrb[138].mxu1 }
0x1246   :  { %v10890_v22 = vsel %vm10886_vm9, %v10590_v60, 0.0  ;;  %v13563_v58 = vpop.f32.mrb[139].mxu1 }
0x1247   :  { %v10891_v48 = vadd.f32 %v10890_v22, %v10889_v44 }
0x1249   :  { %v10893_v32 = vadd.f32 %v10892_v0, %v10891_v48 }
0x1273   :  { %v10736_v31 = vpop.f32.mrb[140].mxu1 }
0x1274   :  { %v10894_v28 = vsel %vm10886_vm9, %v10736_v31, 0.0  ;;  %v13585_v36 = vpop.f32.mrb[141].mxu1 }
0x1275   :  { %v10895_v39 = vadd.f32 %v10894_v28, %v10893_v32 }
0x127c   :  { %v10809_v16 = vpop.f32.mrb[136].mxu0 }
0x127d   :  { %v10896_v61 = vsel %vm10886_vm9, %v10809_v16, 0.0  ;;  %v13596_v46 = vpop.f32.mrb[137].mxu0 }
0x127e   :  { %v10897_v29 = vadd.f32 %v10896_v61, %v10895_v39 }
0x1284   :  { %v10882_v6 = vpop.f32.mrb[142].mxu1 }
0x1285   :  { %v10898_v49 = vsel %vm10886_vm9, %v10882_v6, 0.0  ;;  %v13607_v52 = vpop.f32.mrb[143].mxu1 }
0x1286   :  { %v10899_v38 = vadd.f32 %v10898_v49, %v10897_v29 }
0x1288   :  { %v10902_v47 = vsub.f32 %v10899_v38, %v10900_v11 }
0x128a   :  { %v10903_v62 = vmul.f32 %v10902_v47, %v10901_v2 }
0x128c   :  { %v10904_v19 = vmul.f32 %v10903_v62, %v18935_v12 }
0x128e   :  { %v10905_v7 = vadd.f32 %v10904_v19, %v18936_v26 }
0x1290   :  { %10906 = vst.msk [vmem:[#allocation2] sm:$0xff] %vm10886_vm9, %v10905_v7 }
0x1291   :  { %14365 = shalt.err (!%p14362_p4)
}
0x1292   :  { %s14366_s6 = scalar_lea.hbm %s18565_s8, 128 }
0x1293   :  { %p14367_p5 = scmp.ne.s32.totalorder %s18565_s8, %s14366_s6  ;;  %p14370_p6 = scmp.lt.u32.totalorder %s14366_s6, %s18565_s8 }
0x1295   :  { %p14372_p7 = pnand %p14370_p6, %p14367_p5 }
0x1297   :  { %14375 = shalt.err (!%p14372_p7)
}
0x1298   :  { %10916 = dma.vmem_to_hbm [thread:$0]  %s10914_s10, 128, %s18565_s8, [#allocation3]  }
0x1299   :  { %14376 = dma.done.wait [#allocation3], 128  }
0x129a   :  { %14377 = vsyncadd [#allocation3], 4294967168 }
0x129b   :  { %10920 = vsyncpa [#allocation3], 1 }

</bundles_post_ra>
